<compile_context>
chip_gen: v7x
topology: tpu7x:2x2x1
jax: 0.10.0
libtpu: 0.0.40
codegen_flags: <defaults>
</compile_context>

<pallas_src>
import functools

import jax
import jax.numpy as jnp
import numpy as np
from jax.experimental import pallas as pl
from jax.experimental.pallas import tpu as pltpu

EPS = 1e-5

# Interior of the padded VMEM scratches starts at this sublane (W) offset so
# the interior store is tile-aligned for bf16 ((16, 128) native tiles); the
# 1-pixel halo lives at columns PAD_OFF-1 and PAD_OFF+W.
PAD_OFF = 16


def _vmem_limit_bytes():
    """Raise the scoped-VMEM limit (defaults: 16 MiB v5e / 32 MiB v6e+) while
    staying under the physical capacity of the current chip (64 MiB on v7x)."""
    try:
        cap = pltpu.get_tpu_info().vmem_capacity_bytes
        return int(min(100 * 1024 * 1024, cap * 3 // 4))
    except Exception:
        return None  # fall back to the compiler default


def _fill_padded(pref, val, H, W):
    """Zero the 1-px halo strips of `pref` and write `val` into the interior.

    Only thin border strips are zeroed (not the whole scratch), and the
    interior store starts at a sublane-aligned offset.  Borders are re-zeroed
    each grid step so correctness does not depend on which core sees
    program_id == 0 under "parallel" (megacore) sharding.
    """
    WP = pref.shape[1]
    C = pref.shape[2]
    zrow = jnp.zeros((1, WP, C), pref.dtype)
    zcol = jnp.zeros((H + 2, 1, C), pref.dtype)
    pref[0:1, :, :] = zrow                              # top halo row
    pref[H + 1:H + 2, :, :] = zrow                      # bottom halo row
    pref[:, PAD_OFF - 1:PAD_OFF, :] = zcol              # left halo column
    pref[:, PAD_OFF + W:PAD_OFF + W + 1, :] = zcol      # right halo column
    pref[1:H + 1, PAD_OFF:PAD_OFF + W, :] = val.astype(pref.dtype)


def _conv3x3_bn_relu(pref, w_ref, s_ref, t_ref, H, W):
    """3x3 'same' conv + folded BN + ReLU, reading from a zero-padded bf16
    VMEM scratch.

    Builds an im2col tile (H*W, 9*Cin) in bf16 and issues a single MXU matmul
    with K = 9*Cin (fills the 256-deep MXU contraction far better than 9
    K=Cin matmuls, removes the per-tap result pops + VPU adds).  Accumulation
    is f32; the folded BN scale/shift epilogue runs in f32.
    """
    Cin = pref.shape[-1]
    cols = []
    for dy in range(3):
        for dx in range(3):
            win = pref[dy:dy + H, PAD_OFF - 1 + dx:PAD_OFF - 1 + dx + W, :]
            cols.append(win.reshape(H * W, Cin))
    patches = jnp.concatenate(cols, axis=-1)              # (H*W, 9*Cin) bf16
    acc = jnp.dot(patches, w_ref[...],                    # one K = 9*Cin matmul
                  preferred_element_type=jnp.float32)     # f32 accumulate
    y = acc * s_ref[...] + t_ref[...]                     # folded BN, f32
    return jnp.maximum(y, 0.0)                            # (H*W, Cout) f32


def doubleconv_kernel(x_ref, w1_ref, s1_ref, t1_ref, w2_ref, s2_ref, t2_ref,
                      o_ref, px_ref, py_ref, *, H, W):
    # x_ref block: (1, H, W, Cin) bf16.  Zero-padding is done here in VMEM
    # (no padded HBM copy in the wrapper).
    _fill_padded(px_ref, x_ref[0], H, W)

    # conv1 + BN1 + ReLU  (f32 result, then bf16 into the padded scratch)
    y1 = _conv3x3_bn_relu(px_ref, w1_ref, s1_ref, t1_ref, H, W)   # (H*W, Cmid)
    cmid = y1.shape[-1]
    _fill_padded(py_ref, y1.reshape(H, W, cmid), H, W)

    # conv2 + BN2 + ReLU
    y2 = _conv3x3_bn_relu(py_ref, w2_ref, s2_ref, t2_ref, H, W)   # (H*W, Cout)
    o_ref[0] = y2.reshape(H, W, -1).astype(o_ref.dtype)


def double_conv(x, w1, s1, t1, w2, s2, t2):
    """DoubleConv forward.

    x  : (B, H, W, Cin) NHWC activations (bf16 recommended).
    w1 : (9*Cin,  Cmid) bf16 im2col-ordered weights (row = (ky*3+kx)*Cin + ci).
    w2 : (9*Cmid, Cout) bf16 im2col-ordered weights.
    s*/t*: (1, C) f32 folded BatchNorm scale / shift (conv bias folded in).
    Returns (B, H, W, Cout) in x.dtype.  The wrapper does no HBM transposes
    and no HBM padding; everything happens inside the kernel.
    """
    B, H, W, Cin = x.shape
    Cmid = w1.shape[-1]
    Cout = w2.shape[-1]
    assert w1.shape[0] == 9 * Cin and w2.shape[0] == 9 * Cmid

    WP = PAD_OFF + W + 1       # scratch width: halo cols at PAD_OFF-1, PAD_OFF+W
    kernel = functools.partial(doubleconv_kernel, H=H, W=W)

    return pl.pallas_call(
        kernel,
        out_shape=jax.ShapeDtypeStruct((B, H, W, Cout), x.dtype),
        grid_spec=pltpu.PrefetchScalarGridSpec(
            num_scalar_prefetch=0,
            grid=(B,),
            in_specs=[
                pl.BlockSpec((1, H, W, Cin), lambda b: (b, 0, 0, 0)),
                # Constant index_map -> blocks fetched once, stay resident
                # (no per-step re-DMA of weights / scale / shift).
                pl.BlockSpec((9 * Cin, Cmid), lambda b: (0, 0)),
                pl.BlockSpec((1, Cmid), lambda b: (0, 0)),
                pl.BlockSpec((1, Cmid), lambda b: (0, 0)),
                pl.BlockSpec((9 * Cmid, Cout), lambda b: (0, 0)),
                pl.BlockSpec((1, Cout), lambda b: (0, 0)),
                pl.BlockSpec((1, Cout), lambda b: (0, 0)),
            ],
            out_specs=pl.BlockSpec((1, H, W, Cout), lambda b: (b, 0, 0, 0)),
            scratch_shapes=[
                pltpu.VMEM((H + 2, WP, Cin), jnp.bfloat16),    # padded input
                pltpu.VMEM((H + 2, WP, Cmid), jnp.bfloat16),   # padded conv1 out
            ],
        ),
        compiler_params=pltpu.CompilerParams(
            dimension_semantics=("parallel",),        # batch images independent
            vmem_limit_bytes=_vmem_limit_bytes()),
    )(x, w1, s1, t1, w2, s2, t2)


def _fold_params(w_oihw, b, gamma, beta, mean, var):
    """Fold conv bias + eval-mode BatchNorm into per-channel scale/shift and
    convert the torch-layout weight (Cout, Cin, 3, 3) into the im2col layout
    (9*Cin, Cout), stored in bf16 for the MXU."""
    s = gamma / jnp.sqrt(var + EPS)
    t = (b - mean) * s + beta
    co, ci = w_oihw.shape[0], w_oihw.shape[1]
    w_k = jnp.transpose(w_oihw, (2, 3, 1, 0)).reshape(9 * ci, co)
    return (w_k.astype(jnp.bfloat16),
            s.reshape(1, -1).astype(jnp.float32),
            t.reshape(1, -1).astype(jnp.float32))


def _reference(x_bf16, p1, p2):
    """XLA f32 reference with the same bf16 rounding points as the kernel
    (bf16 inputs, bf16 weights, bf16 intermediate activation; f32 accumulate
    and f32 BN epilogue)."""
    def block(x, w, b, g, be, m, v):
        w = w.astype(jnp.bfloat16).astype(jnp.float32)
        y = jax.lax.conv_general_dilated(
            x, w, window_strides=(1, 1), padding=((1, 1), (1, 1)),
            dimension_numbers=("NHWC", "OIHW", "NHWC"))
        s = g / jnp.sqrt(v + EPS)
        t = (b - m) * s + be
        return jnp.maximum(y * s + t, 0.0)

    x = x_bf16.astype(jnp.float32)
    y1 = block(x, *p1).astype(jnp.bfloat16).astype(jnp.float32)
    return block(y1, *p2)


if __name__ == "__main__":
    # UNet `inc` block of VelocityPrediction: DoubleConv(4, 64), small spatial.
    B, Cin, Cout, H, W = 2, 4, 64, 16, 16
    key = jax.random.PRNGKey(0)
    ks = jax.random.split(key, 13)

    x = jax.random.normal(ks[0], (B, H, W, Cin), jnp.float32)   # NHWC

    # layer 1 params (torch shapes)
    w1 = jax.random.normal(ks[1], (Cout, Cin, 3, 3), jnp.float32) * 0.1
    b1 = jax.random.normal(ks[2], (Cout,), jnp.float32) * 0.1
    g1 = 1.0 + 0.1 * jax.random.normal(ks[3], (Cout,), jnp.float32)
    be1 = 0.1 * jax.random.normal(ks[4], (Cout,), jnp.float32)
    m1 = 0.1 * jax.random.normal(ks[5], (Cout,), jnp.float32)
    v1 = jax.random.uniform(ks[6], (Cout,), jnp.float32, 0.5, 1.5)

    # layer 2 params
    w2 = jax.random.normal(ks[7], (Cout, Cout, 3, 3), jnp.float32) * 0.1
    b2 = jax.random.normal(ks[8], (Cout,), jnp.float32) * 0.1
    g2 = 1.0 + 0.1 * jax.random.normal(ks[9], (Cout,), jnp.float32)
    be2 = 0.1 * jax.random.normal(ks[10], (Cout,), jnp.float32)
    m2 = 0.1 * jax.random.normal(ks[11], (Cout,), jnp.float32)
    v2 = jax.random.uniform(ks[12], (Cout,), jnp.float32, 0.5, 1.5)

    wk1, s1, t1 = _fold_params(w1, b1, g1, be1, m1, v1)
    wk2, s2, t2 = _fold_params(w2, b2, g2, be2, m2, v2)

    # Activations are kept in bf16 NHWC end-to-end (no wrapper transposes/pad).
    x_bf16 = x.astype(jnp.bfloat16)
    out = double_conv(x_bf16, wk1, s1, t1, wk2, s2, t2)
    out = jax.block_until_ready(out)

    ref = _reference(x_bf16,
                     (w1, b1, g1, be1, m1, v1),
                     (w2, b2, g2, be2, m2, v2))
    np.testing.assert_allclose(np.asarray(out.astype(jnp.float32)),
                               np.asarray(ref), rtol=3e-2, atol=3e-2)

    print("KERNEL_OK")
</pallas_src>

<mosaic_0001>
module attributes {stable_mosaic.version = 11 : i64} {
  func.func @doubleconv_kernel(%arg0: i32, %arg1: memref<1x16x16x4xbf16, #tpu.memory_space<vmem>>, %arg2: memref<36x64xbf16, #tpu.memory_space<vmem>>, %arg3: memref<1x64xf32, #tpu.memory_space<vmem>>, %arg4: memref<1x64xf32, #tpu.memory_space<vmem>>, %arg5: memref<576x64xbf16, #tpu.memory_space<vmem>>, %arg6: memref<1x64xf32, #tpu.memory_space<vmem>>, %arg7: memref<1x64xf32, #tpu.memory_space<vmem>>, %arg8: memref<1x16x16x64xbf16, #tpu.memory_space<vmem>>, %arg9: memref<18x33x4xbf16, #tpu.memory_space<vmem>>, %arg10: memref<18x33x64xbf16, #tpu.memory_space<vmem>>) attributes {dimension_semantics = [#tpu.dimension_semantics<parallel>], iteration_bounds = array<i64: 2>, scalar_prefetch = 0 : i64, scratch_operands = 2 : i64, tpu.core_type = #tpu.core_type<tc>, window_params = [{transform_indices = @transform_0, window_bounds = array<i64: 1, 16, 16, 4>}, {pipeline_mode = #tpu.pipeline_mode<synchronous>, transform_indices = @transform_1, window_bounds = array<i64: 36, 64>}, {pipeline_mode = #tpu.pipeline_mode<synchronous>, transform_indices = @transform_2, window_bounds = array<i64: 1, 64>}, {pipeline_mode = #tpu.pipeline_mode<synchronous>, transform_indices = @transform_3, window_bounds = array<i64: 1, 64>}, {pipeline_mode = #tpu.pipeline_mode<synchronous>, transform_indices = @transform_4, window_bounds = array<i64: 576, 64>}, {pipeline_mode = #tpu.pipeline_mode<synchronous>, transform_indices = @transform_5, window_bounds = array<i64: 1, 64>}, {pipeline_mode = #tpu.pipeline_mode<synchronous>, transform_indices = @transform_6, window_bounds = array<i64: 1, 64>}, {transform_indices = @transform_7, window_bounds = array<i64: 1, 16, 16, 64>}]} {
    %c0 = arith.constant 0 : index
    %c0_0 = arith.constant 0 : index
    %c0_1 = arith.constant 0 : index
    %c0_2 = arith.constant 0 : index
    %0 = vector.load %arg1[%c0, %c0_0, %c0_1, %c0_2] : memref<1x16x16x4xbf16, #tpu.memory_space<vmem>>, vector<1x16x16x4xbf16>
    %1 = vector.shape_cast %0 : vector<1x16x16x4xbf16> to vector<16x16x4xbf16>
    %cst = arith.constant 0.000000e+00 : bf16
    %2 = vector.broadcast %cst : bf16 to vector<1x33x4xbf16>
    %cst_3 = arith.constant 0.000000e+00 : bf16
    %3 = vector.broadcast %cst_3 : bf16 to vector<18x1x4xbf16>
    %c0_4 = arith.constant 0 : index
    %c0_5 = arith.constant 0 : index
    %c0_6 = arith.constant 0 : index
    %4 = vector.load %arg9[%c0_4, %c0_5, %c0_6] : memref<18x33x4xbf16, #tpu.memory_space<vmem>>, vector<1x33x4xbf16>
    tpu.vector_store %arg9[%c0_4, %c0_5, %c0_6], %2 {strides = array<i32>} : memref<18x33x4xbf16, #tpu.memory_space<vmem>>, vector<1x33x4xbf16>,
    %c17 = arith.constant 17 : index
    %c0_7 = arith.constant 0 : index
    %c0_8 = arith.constant 0 : index
    %5 = vector.load %arg9[%c17, %c0_7, %c0_8] : memref<18x33x4xbf16, #tpu.memory_space<vmem>>, vector<1x33x4xbf16>
    tpu.vector_store %arg9[%c17, %c0_7, %c0_8], %2 {strides = array<i32>} : memref<18x33x4xbf16, #tpu.memory_space<vmem>>, vector<1x33x4xbf16>,
    %c0_9 = arith.constant 0 : index
    %c15 = arith.constant 15 : index
    %c0_10 = arith.constant 0 : index
    %6 = vector.load %arg9[%c0_9, %c15, %c0_10] : memref<18x33x4xbf16, #tpu.memory_space<vmem>>, vector<18x1x4xbf16>
    tpu.vector_store %arg9[%c0_9, %c15, %c0_10], %3 {strides = array<i32>} : memref<18x33x4xbf16, #tpu.memory_space<vmem>>, vector<18x1x4xbf16>,
    %c0_11 = arith.constant 0 : index
    %c32 = arith.constant 32 : index
    %c0_12 = arith.constant 0 : index
    %7 = vector.load %arg9[%c0_11, %c32, %c0_12] : memref<18x33x4xbf16, #tpu.memory_space<vmem>>, vector<18x1x4xbf16>
    tpu.vector_store %arg9[%c0_11, %c32, %c0_12], %3 {strides = array<i32>} : memref<18x33x4xbf16, #tpu.memory_space<vmem>>, vector<18x1x4xbf16>,
    %c1 = arith.constant 1 : index
    %c16 = arith.constant 16 : index
    %c0_13 = arith.constant 0 : index
    %8 = vector.load %arg9[%c1, %c16, %c0_13] : memref<18x33x4xbf16, #tpu.memory_space<vmem>>, vector<16x16x4xbf16>
    tpu.vector_store %arg9[%c1, %c16, %c0_13], %1 {strides = array<i32>} : memref<18x33x4xbf16, #tpu.memory_space<vmem>>, vector<16x16x4xbf16>,
    %c0_14 = arith.constant 0 : index
    %c15_15 = arith.constant 15 : index
    %c0_16 = arith.constant 0 : index
    %9 = vector.load %arg9[%c0_14, %c15_15, %c0_16] : memref<18x33x4xbf16, #tpu.memory_space<vmem>>, vector<16x16x4xbf16>
    %10 = vector.shape_cast %9 : vector<16x16x4xbf16> to vector<256x4xbf16>
    %c0_17 = arith.constant 0 : index
    %c16_18 = arith.constant 16 : index
    %c0_19 = arith.constant 0 : index
    %11 = vector.load %arg9[%c0_17, %c16_18, %c0_19] : memref<18x33x4xbf16, #tpu.memory_space<vmem>>, vector<16x16x4xbf16>
    %12 = vector.shape_cast %11 : vector<16x16x4xbf16> to vector<256x4xbf16>
    %c0_20 = arith.constant 0 : index
    %c17_21 = arith.constant 17 : index
    %c0_22 = arith.constant 0 : index
    %13 = vector.load %arg9[%c0_20, %c17_21, %c0_22] : memref<18x33x4xbf16, #tpu.memory_space<vmem>>, vector<16x16x4xbf16>
    %14 = vector.shape_cast %13 : vector<16x16x4xbf16> to vector<256x4xbf16>
    %c1_23 = arith.constant 1 : index
    %c15_24 = arith.constant 15 : index
    %c0_25 = arith.constant 0 : index
    %15 = vector.load %arg9[%c1_23, %c15_24, %c0_25] : memref<18x33x4xbf16, #tpu.memory_space<vmem>>, vector<16x16x4xbf16>
    %16 = vector.shape_cast %15 : vector<16x16x4xbf16> to vector<256x4xbf16>
    %c1_26 = arith.constant 1 : index
    %c16_27 = arith.constant 16 : index
    %c0_28 = arith.constant 0 : index
    %17 = vector.load %arg9[%c1_26, %c16_27, %c0_28] : memref<18x33x4xbf16, #tpu.memory_space<vmem>>, vector<16x16x4xbf16>
    %18 = vector.shape_cast %17 : vector<16x16x4xbf16> to vector<256x4xbf16>
    %c1_29 = arith.constant 1 : index
    %c17_30 = arith.constant 17 : index
    %c0_31 = arith.constant 0 : index
    %19 = vector.load %arg9[%c1_29, %c17_30, %c0_31] : memref<18x33x4xbf16, #tpu.memory_space<vmem>>, vector<16x16x4xbf16>
    %20 = vector.shape_cast %19 : vector<16x16x4xbf16> to vector<256x4xbf16>
    %c2 = arith.constant 2 : index
    %c15_32 = arith.constant 15 : index
    %c0_33 = arith.constant 0 : index
    %21 = vector.load %arg9[%c2, %c15_32, %c0_33] : memref<18x33x4xbf16, #tpu.memory_space<vmem>>, vector<16x16x4xbf16>
    %22 = vector.shape_cast %21 : vector<16x16x4xbf16> to vector<256x4xbf16>
    %c2_34 = arith.constant 2 : index
    %c16_35 = arith.constant 16 : index
    %c0_36 = arith.constant 0 : index
    %23 = vector.load %arg9[%c2_34, %c16_35, %c0_36] : memref<18x33x4xbf16, #tpu.memory_space<vmem>>, vector<16x16x4xbf16>
    %24 = vector.shape_cast %23 : vector<16x16x4xbf16> to vector<256x4xbf16>
    %c2_37 = arith.constant 2 : index
    %c17_38 = arith.constant 17 : index
    %c0_39 = arith.constant 0 : index
    %25 = vector.load %arg9[%c2_37, %c17_38, %c0_39] : memref<18x33x4xbf16, #tpu.memory_space<vmem>>, vector<16x16x4xbf16>
    %26 = vector.shape_cast %25 : vector<16x16x4xbf16> to vector<256x4xbf16>
    %27 = tpu.concatenate %10, %12, %14, %16, %18, %20, %22, %24, %26 in 1 : vector<256x4xbf16>, vector<256x4xbf16>, vector<256x4xbf16>, vector<256x4xbf16>, vector<256x4xbf16>, vector<256x4xbf16>, vector<256x4xbf16>, vector<256x4xbf16>, vector<256x4xbf16> -> vector<256x36xbf16>
    %c0_40 = arith.constant 0 : index
    %c0_41 = arith.constant 0 : index
    %28 = vector.load %arg2[%c0_40, %c0_41] : memref<36x64xbf16, #tpu.memory_space<vmem>>, vector<36x64xbf16>
    %cst_42 = arith.constant dense<0.000000e+00> : vector<256x64xf32>
    %29 = tpu.matmul %27, %28, %cst_42 {dimension_numbers = #tpu.dot_dimension_numbers<[1], [0], [0], [1], [0, 0, 1, 1], [], []>} : vector<256x36xbf16>, vector<36x64xbf16>, vector<256x64xf32> -> vector<256x64xf32>
    %c0_43 = arith.constant 0 : index
    %c0_44 = arith.constant 0 : index
    %30 = vector.load %arg3[%c0_43, %c0_44] : memref<1x64xf32, #tpu.memory_space<vmem>>, vector<1x64xf32>
    %31 = vector.broadcast %30 : vector<1x64xf32> to vector<256x64xf32>
    %32 = arith.mulf %29, %31 : vector<256x64xf32>
    %c0_45 = arith.constant 0 : index
    %c0_46 = arith.constant 0 : index
    %33 = vector.load %arg4[%c0_45, %c0_46] : memref<1x64xf32, #tpu.memory_space<vmem>>, vector<1x64xf32>
    %34 = vector.broadcast %33 : vector<1x64xf32> to vector<256x64xf32>
    %35 = arith.addf %32, %34 : vector<256x64xf32>
    %cst_47 = arith.constant 0.000000e+00 : f32
    %36 = vector.broadcast %cst_47 : f32 to vector<256x64xf32>
    %37 = arith.maximumf %35, %36 : vector<256x64xf32>
    %38 = vector.shape_cast %37 : vector<256x64xf32> to vector<16x16x64xf32>
    %cst_48 = arith.constant 0.000000e+00 : bf16
    %39 = vector.broadcast %cst_48 : bf16 to vector<1x33x64xbf16>
    %cst_49 = arith.constant 0.000000e+00 : bf16
    %40 = vector.broadcast %cst_49 : bf16 to vector<18x1x64xbf16>
    %c0_50 = arith.constant 0 : index
    %c0_51 = arith.constant 0 : index
    %c0_52 = arith.constant 0 : index
    %41 = vector.load %arg10[%c0_50, %c0_51, %c0_52] : memref<18x33x64xbf16, #tpu.memory_space<vmem>>, vector<1x33x64xbf16>
    tpu.vector_store %arg10[%c0_50, %c0_51, %c0_52], %39 {strides = array<i32>} : memref<18x33x64xbf16, #tpu.memory_space<vmem>>, vector<1x33x64xbf16>,
    %c17_53 = arith.constant 17 : index
    %c0_54 = arith.constant 0 : index
    %c0_55 = arith.constant 0 : index
    %42 = vector.load %arg10[%c17_53, %c0_54, %c0_55] : memref<18x33x64xbf16, #tpu.memory_space<vmem>>, vector<1x33x64xbf16>
    tpu.vector_store %arg10[%c17_53, %c0_54, %c0_55], %39 {strides = array<i32>} : memref<18x33x64xbf16, #tpu.memory_space<vmem>>, vector<1x33x64xbf16>,
    %c0_56 = arith.constant 0 : index
    %c15_57 = arith.constant 15 : index
    %c0_58 = arith.constant 0 : index
    %43 = vector.load %arg10[%c0_56, %c15_57, %c0_58] : memref<18x33x64xbf16, #tpu.memory_space<vmem>>, vector<18x1x64xbf16>
    tpu.vector_store %arg10[%c0_56, %c15_57, %c0_58], %40 {strides = array<i32>} : memref<18x33x64xbf16, #tpu.memory_space<vmem>>, vector<18x1x64xbf16>,
    %c0_59 = arith.constant 0 : index
    %c32_60 = arith.constant 32 : index
    %c0_61 = arith.constant 0 : index
    %44 = vector.load %arg10[%c0_59, %c32_60, %c0_61] : memref<18x33x64xbf16, #tpu.memory_space<vmem>>, vector<18x1x64xbf16>
    tpu.vector_store %arg10[%c0_59, %c32_60, %c0_61], %40 {strides = array<i32>} : memref<18x33x64xbf16, #tpu.memory_space<vmem>>, vector<18x1x64xbf16>,
    %45 = arith.truncf %38 : vector<16x16x64xf32> to vector<16x16x64xbf16>
    %c1_62 = arith.constant 1 : index
    %c16_63 = arith.constant 16 : index
    %c0_64 = arith.constant 0 : index
    %46 = vector.load %arg10[%c1_62, %c16_63, %c0_64] : memref<18x33x64xbf16, #tpu.memory_space<vmem>>, vector<16x16x64xbf16>
    tpu.vector_store %arg10[%c1_62, %c16_63, %c0_64], %45 {strides = array<i32>} : memref<18x33x64xbf16, #tpu.memory_space<vmem>>, vector<16x16x64xbf16>,
    %c0_65 = arith.constant 0 : index
    %c15_66 = arith.constant 15 : index
    %c0_67 = arith.constant 0 : index
    %47 = vector.load %arg10[%c0_65, %c15_66, %c0_67] : memref<18x33x64xbf16, #tpu.memory_space<vmem>>, vector<16x16x64xbf16>
    %48 = vector.shape_cast %47 : vector<16x16x64xbf16> to vector<256x64xbf16>
    %c0_68 = arith.constant 0 : index
    %c16_69 = arith.constant 16 : index
    %c0_70 = arith.constant 0 : index
    %49 = vector.load %arg10[%c0_68, %c16_69, %c0_70] : memref<18x33x64xbf16, #tpu.memory_space<vmem>>, vector<16x16x64xbf16>
    %50 = vector.shape_cast %49 : vector<16x16x64xbf16> to vector<256x64xbf16>
    %c0_71 = arith.constant 0 : index
    %c17_72 = arith.constant 17 : index
    %c0_73 = arith.constant 0 : index
    %51 = vector.load %arg10[%c0_71, %c17_72, %c0_73] : memref<18x33x64xbf16, #tpu.memory_space<vmem>>, vector<16x16x64xbf16>
    %52 = vector.shape_cast %51 : vector<16x16x64xbf16> to vector<256x64xbf16>
    %c1_74 = arith.constant 1 : index
    %c15_75 = arith.constant 15 : index
    %c0_76 = arith.constant 0 : index
    %53 = vector.load %arg10[%c1_74, %c15_75, %c0_76] : memref<18x33x64xbf16, #tpu.memory_space<vmem>>, vector<16x16x64xbf16>
    %54 = vector.shape_cast %53 : vector<16x16x64xbf16> to vector<256x64xbf16>
    %c1_77 = arith.constant 1 : index
    %c16_78 = arith.constant 16 : index
    %c0_79 = arith.constant 0 : index
    %55 = vector.load %arg10[%c1_77, %c16_78, %c0_79] : memref<18x33x64xbf16, #tpu.memory_space<vmem>>, vector<16x16x64xbf16>
    %56 = vector.shape_cast %55 : vector<16x16x64xbf16> to vector<256x64xbf16>
    %c1_80 = arith.constant 1 : index
    %c17_81 = arith.constant 17 : index
    %c0_82 = arith.constant 0 : index
    %57 = vector.load %arg10[%c1_80, %c17_81, %c0_82] : memref<18x33x64xbf16, #tpu.memory_space<vmem>>, vector<16x16x64xbf16>
    %58 = vector.shape_cast %57 : vector<16x16x64xbf16> to vector<256x64xbf16>
    %c2_83 = arith.constant 2 : index
    %c15_84 = arith.constant 15 : index
    %c0_85 = arith.constant 0 : index
    %59 = vector.load %arg10[%c2_83, %c15_84, %c0_85] : memref<18x33x64xbf16, #tpu.memory_space<vmem>>, vector<16x16x64xbf16>
    %60 = vector.shape_cast %59 : vector<16x16x64xbf16> to vector<256x64xbf16>
    %c2_86 = arith.constant 2 : index
    %c16_87 = arith.constant 16 : index
    %c0_88 = arith.constant 0 : index
    %61 = vector.load %arg10[%c2_86, %c16_87, %c0_88] : memref<18x33x64xbf16, #tpu.memory_space<vmem>>, vector<16x16x64xbf16>
    %62 = vector.shape_cast %61 : vector<16x16x64xbf16> to vector<256x64xbf16>
    %c2_89 = arith.constant 2 : index
    %c17_90 = arith.constant 17 : index
    %c0_91 = arith.constant 0 : index
    %63 = vector.load %arg10[%c2_89, %c17_90, %c0_91] : memref<18x33x64xbf16, #tpu.memory_space<vmem>>, vector<16x16x64xbf16>
    %64 = vector.shape_cast %63 : vector<16x16x64xbf16> to vector<256x64xbf16>
    %65 = tpu.concatenate %48, %50, %52, %54, %56, %58, %60, %62, %64 in 1 : vector<256x64xbf16>, vector<256x64xbf16>, vector<256x64xbf16>, vector<256x64xbf16>, vector<256x64xbf16>, vector<256x64xbf16>, vector<256x64xbf16>, vector<256x64xbf16>, vector<256x64xbf16> -> vector<256x576xbf16>
    %c0_92 = arith.constant 0 : index
    %c0_93 = arith.constant 0 : index
    %66 = vector.load %arg5[%c0_92, %c0_93] : memref<576x64xbf16, #tpu.memory_space<vmem>>, vector<576x64xbf16>
    %cst_94 = arith.constant dense<0.000000e+00> : vector<256x64xf32>
    %67 = tpu.matmul %65, %66, %cst_94 {dimension_numbers = #tpu.dot_dimension_numbers<[1], [0], [0], [1], [0, 0, 1, 1], [], []>} : vector<256x576xbf16>, vector<576x64xbf16>, vector<256x64xf32> -> vector<256x64xf32>
    %c0_95 = arith.constant 0 : index
    %c0_96 = arith.constant 0 : index
    %68 = vector.load %arg6[%c0_95, %c0_96] : memref<1x64xf32, #tpu.memory_space<vmem>>, vector<1x64xf32>
    %69 = vector.broadcast %68 : vector<1x64xf32> to vector<256x64xf32>
    %70 = arith.mulf %67, %69 : vector<256x64xf32>
    %c0_97 = arith.constant 0 : index
    %c0_98 = arith.constant 0 : index
    %71 = vector.load %arg7[%c0_97, %c0_98] : memref<1x64xf32, #tpu.memory_space<vmem>>, vector<1x64xf32>
    %72 = vector.broadcast %71 : vector<1x64xf32> to vector<256x64xf32>
    %73 = arith.addf %70, %72 : vector<256x64xf32>
    %cst_99 = arith.constant 0.000000e+00 : f32
    %74 = vector.broadcast %cst_99 : f32 to vector<256x64xf32>
    %75 = arith.maximumf %73, %74 : vector<256x64xf32>
    %76 = vector.shape_cast %75 : vector<256x64xf32> to vector<16x16x64xf32>
    %77 = arith.truncf %76 : vector<16x16x64xf32> to vector<16x16x64xbf16>
    %c0_100 = arith.constant 0 : index
    %c0_101 = arith.constant 0 : index
    %c0_102 = arith.constant 0 : index
    %c0_103 = arith.constant 0 : index
    %78 = vector.load %arg8[%c0_100, %c0_101, %c0_102, %c0_103] : memref<1x16x16x64xbf16, #tpu.memory_space<vmem>>, vector<1x16x16x64xbf16>
    %79 = vector.shape_cast %78 : vector<1x16x16x64xbf16> to vector<16x16x64xbf16>
    %80 = vector.shape_cast %77 : vector<16x16x64xbf16> to vector<1x16x16x64xbf16>
    tpu.vector_store %arg8[%c0_100, %c0_101, %c0_102, %c0_103], %80 {strides = array<i32>} : memref<1x16x16x64xbf16, #tpu.memory_space<vmem>>, vector<1x16x16x64xbf16>,
    return
  }
  func.func @transform_0(%arg0: i32) -> (i32, i32, i32, i32) {
    %c0_i32 = arith.constant 0 : i32
    %c0_i32_0 = arith.constant 0 : i32
    %c0_i32_1 = arith.constant 0 : i32
    %c0_i32_2 = arith.constant 0 : i32
    return %arg0, %c0_i32, %c0_i32_0, %c0_i32_1 : i32, i32, i32, i32
  }
  func.func @transform_1(%arg0: i32) -> (i32, i32) {
    %c0_i32 = arith.constant 0 : i32
    %c0_i32_0 = arith.constant 0 : i32
    %c0_i32_1 = arith.constant 0 : i32
    return %c0_i32, %c0_i32_0 : i32, i32
  }
  func.func @transform_2(%arg0: i32) -> (i32, i32) {
    %c0_i32 = arith.constant 0 : i32
    %c0_i32_0 = arith.constant 0 : i32
    %c0_i32_1 = arith.constant 0 : i32
    return %c0_i32, %c0_i32_0 : i32, i32
  }
  func.func @transform_3(%arg0: i32) -> (i32, i32) {
    %c0_i32 = arith.constant 0 : i32
    %c0_i32_0 = arith.constant 0 : i32
    %c0_i32_1 = arith.constant 0 : i32
    return %c0_i32, %c0_i32_0 : i32, i32
  }
  func.func @transform_4(%arg0: i32) -> (i32, i32) {
    %c0_i32 = arith.constant 0 : i32
    %c0_i32_0 = arith.constant 0 : i32
    %c0_i32_1 = arith.constant 0 : i32
    return %c0_i32, %c0_i32_0 : i32, i32
  }
  func.func @transform_5(%arg0: i32) -> (i32, i32) {
    %c0_i32 = arith.constant 0 : i32
    %c0_i32_0 = arith.constant 0 : i32
    %c0_i32_1 = arith.constant 0 : i32
    return %c0_i32, %c0_i32_0 : i32, i32
  }
  func.func @transform_6(%arg0: i32) -> (i32, i32) {
    %c0_i32 = arith.constant 0 : i32
    %c0_i32_0 = arith.constant 0 : i32
    %c0_i32_1 = arith.constant 0 : i32
    return %c0_i32, %c0_i32_0 : i32, i32
  }
  func.func @transform_7(%arg0: i32) -> (i32, i32, i32, i32) {
    %c0_i32 = arith.constant 0 : i32
    %c0_i32_0 = arith.constant 0 : i32
    %c0_i32_1 = arith.constant 0 : i32
    %c0_i32_2 = arith.constant 0 : i32
    return %arg0, %c0_i32, %c0_i32_0, %c0_i32_1 : i32, i32, i32, i32
  }
}

</mosaic_0001>

<bundles_post_ra>
// kernel: tpu_custom_call.1
= control target key start
LH: loop header
LB: loop body
LE: loop exit
PB: predicated region body
PF: predicated region fallthrough
CT: control target
= control target key end

     0   :  { %12 = vsyncpa [#allocation5], 0  ;;  %s14725_s0 = inlined_call_operand.vmem [shape: bf16[2,16,16,4], index: 0, kind: input, shape index: {}]   ;;  %s14726_s1 = inlined_call_operand.vmem [shape: bf16[36,64], index: 1, kind: input, shape index: {}]   ;;  %s14727_s2 = inlined_call_operand.vmem [shape: f32[1,64], index: 2, kind: input, shape index: {}]   ;;  %s14728_s3 = inlined_call_operand.vmem [shape: f32[1,64], index: 3, kind: input, shape index: {}]   ;;  %s14729_s4 = inlined_call_operand.vmem [shape: bf16[576,64], index: 4, kind: input, shape index: {}]   ;;  %s14730_s5 = inlined_call_operand.vmem [shape: f32[1,64], index: 5, kind: input, shape index: {}]   ;;  %s14731_s6 = inlined_call_operand.vmem [shape: f32[1,64], index: 6, kind: input, shape index: {}]   ;;  %s14732_s7 = inlined_call_operand.hbm [shape: bf16[2,16,16,64], index: 7, kind: output, shape index: {}]  }
   0x1   :  { %14 = vsyncpa [#allocation5 + $0x1], 0  ;;  %s9335_s24 = smov 0   ;;  %s9337_s25 = smov 0  }
   0x2   :  { %s9339_s26 = smov 0   ;;  %s9341_s27 = smov 0  }
   0x3 LB: > { %s9356_s28 = sadd.s32 4294967295, %s9282_s27   ;;  %s8079_s29 = sadd.s32 4294967294, %s9282_s27   ;;  %s9282_s27 = sphi %s9341_s27, %s15456_s27   ;;  %s9278_s26 = sphi %s9339_s26, %s15455_s26   ;;  %s9274_s25 = sphi %s9337_s25, %s15454_s25   ;;  %s9270_s24 = sphi %s9335_s24, %s15453_s24  }
   0x4   : > { %s9360_s30 = sadd.s32 1, %s9282_s27   ;;  %s179_s8 = sadd.s32 1, %s9278_s26 }
   0x5   : > { %s176_s9 = ssub.s32 %s9282_s27, %s9360_s30  ;;  %p189_p0 = scmp.ne.s32.totalorder %s9278_s26, %s9274_s25 }
   0x6   : > { %p177_p1 = scmp.eq.s32.totalorder %s176_s9, 0  ;;  %p190_p2 = scmp.eq.s32.totalorder %s9356_s28, 1 }
   0x7   : > { %p195_p3 = scmp.ne.s32.totalorder %s9274_s25, %s9270_s24  ;;  %p196_p4 = scmp.eq.s32.totalorder %s8079_s29, 1 }
   0x8   : > { %s9371_s10 = scalar_select %p177_p1, %s9278_s26, %s179_s8  }
   0x9   : > { %p9373_p5 = por %p190_p2, %p189_p0  ;;  %p9377_p6 = por %p196_p4, %p195_p3 }
   0xa   : > { %p8082_p7 = scmp.ge.s32.totalorder %s9282_s27, 1  ;;  %p240_p8 = scmp.lt.s32.totalorder %s9282_s27, 3 }
   0xc   : > { %p241_p9 = pnand %p8082_p7, %p240_p8 }
   0xe   : > { %244 = sbr.rel (%p241_p9) target bundleno = 1218 (0x4c2), region = 48 }
  0x15   : > { %vm310_vm0 = vcmask 27648   ;;  %vm14743_vm1 = vcmask 519168   ;;  %p272_p10 = scmp.lt.s32.totalorder %s9356_s28, 1  ;;  %vm329_vm2 = vcmask 27651   ;;  %v9284_v0 = vmov 0   ;;  %s9285_s18 = smov 4  }
  0x16   : > { %313 = vst.msk [vmem:[#allocation2 + $0x8] sm:$0xf] %vm310_vm0, %v9284_v0  ;;  %314 = vst.msk [vmem:[#allocation2 + $0xc] sm:$0xf] %vm310_vm0, %v9284_v0  ;;  %vm330_vm3 = vsmask.f32 7950 }
  0x17   : > { %312 = vst.msk [vmem:[#allocation2 + $0x4] sm:$0xf] %vm310_vm0, %v9284_v0  ;;  %323 = vst.msk [vmem:[#allocation2 + $0x158] sm:$0xf] %vm310_vm0, %v9284_v0  ;;  %s273_s13 = scalar_select %p272_p10, %s9356_s28, 1  ;;  %vm315_vm6 = vcmask 24576  }
  0x18   : > { %324 = vst.msk [vmem:[#allocation2 + $0x15c] sm:$0xf] %vm310_vm0, %v9284_v0  ;;  %325 = vst.msk [vmem:[#allocation2 + $0x160] sm:$0xf] %vm310_vm0, %v9284_v0  ;;  %vm316_vm4 = vsmask.f32 256 }
  0x19   : > { %3793 = vst.msk [vmem:[#allocation3 + $0x4] sm:$0xf] %vm14743_vm1, %v9284_v0  ;;  %3794 = vst.msk [vmem:[#allocation3 + $0x8] sm:$0xf] %vm14743_vm1, %v9284_v0  ;;  %v338_v2 = vld [vmem:[#allocation2 + $0x2c] sm:$0x8] }
  0x1a   : > { %3795 = vst.msk [vmem:[#allocation3 + $0xc] sm:$0xf] %vm14743_vm1, %v9284_v0  ;;  %3803 = vst.msk [vmem:[#allocation3 + $0x158] sm:$0xf] %vm14743_vm1, %v9284_v0  ;;  %v341_v4 = vld [vmem:[#allocation2 + $0x40] sm:$0x8] }
  0x1b   : > { %3804 = vst.msk [vmem:[#allocation3 + $0x15c] sm:$0xf] %vm14743_vm1, %v9284_v0  ;;  %3805 = vst.msk [vmem:[#allocation3 + $0x160] sm:$0xf] %vm14743_vm1, %v9284_v0  ;;  %s8614_s14 = sshll.u32 %s273_s13, 7  ;;  %s9286_s19 = smov 16  }
  0x1c   : > { %vm9401_vm5 = vmand %vm329_vm2, %vm330_vm3  ;;  %v335_v6 = vld [vmem:[#allocation2 + $0x18] sm:$0x8]  ;;  %s9412_s17 = scalar_lea.vmem %s14725_s0, %s8614_s14  ;;  %v389_v9 = vld [vmem:[#allocation2 + $0x24] sm:$0x1]  ;;  %vm521_vm8 = vsmask.f32 4368 }
  0x1d   : > { %v339_v3 = vsel %vm9401_vm5, 0, %v338_v2  ;;  %v342_v5 = vsel %vm9401_vm5, 0, %v341_v4  ;;  %v336_v7 = vsel %vm9401_vm5, 0, %v335_v6  ;;  %vm9417_vm7 = vmand %vm315_vm6, %vm316_vm4  ;;  %v280_v10 = vld [vmem:[%s9412_s17 + $0x8] sm:$0xf]  ;;  %s9287_s20 = smov 28  }
  0x1e   : > { %340 = vst [vmem:[#allocation2 + $0x2c] sm:$0x8] %v339_v3  ;;  %343 = vst [vmem:[#allocation2 + $0x40] sm:$0x8] %v342_v5  ;;  %v281_v11 = vld [vmem:[%s9412_s17 + $0xc] sm:$0xf] }
  0x1f   : > { %v278_v12 = vld [vmem:[%s9412_s17] sm:$0xf]  ;;  %337 = vst [vmem:[#allocation2 + $0x18] sm:$0x8] %v336_v7  ;;  %443 = vst.msk [vmem:[#allocation2 + $0x30] sm:$0xf] %vm310_vm0, %v280_v10 }
  0x20   : > { %444 = vst.msk [vmem:[#allocation2 + $0x34] sm:$0xf] %vm310_vm0, %v281_v11  ;;  %v279_v13 = vld [vmem:[%s9412_s17 + $0x4] sm:$0xf]  ;;  %441 = vst.msk [vmem:[#allocation2 + $0x1c] sm:$0xf] %vm310_vm0, %v278_v12 }
  0x21   : > { %v282_v14 = vld [vmem:[%s9412_s17 + $0x10] sm:$0xf]  ;;  %v283_v15 = vld [vmem:[%s9412_s17 + $0x14] sm:$0xf]  ;;  %v474_v16 = vld [vmem:[#allocation2 + $0x8] sm:$0xf] }
  0x22   : > { %v475_v17 = vld [vmem:[#allocation2 + $0xc] sm:$0xf]  ;;  %442 = vst.msk [vmem:[#allocation2 + $0x20] sm:$0xf] %vm310_vm0, %v279_v13  ;;  %445 = vst.msk [vmem:[#allocation2 + $0x44] sm:$0xf] %vm310_vm0, %v282_v14 }
  0x23   : > { %446 = vst.msk [vmem:[#allocation2 + $0x48] sm:$0xf] %vm310_vm0, %v283_v15  ;;  %v390_v18 = vsel %vm9417_vm7, 0, %v389_v9  ;;  %v538_v19 = vshrl.u32 %v475_v17, 16  ;;  %v541_v20 = vshll.u32 %v475_v17, 16  ;;  %v8150_v21 = vcombine.low %v474_v16, %v475_v17  ;;  %vm9518_vm9 = vmor %vm316_vm4, %vm521_vm8  ;;  %s9288_s21 = smov 12  }
  0x24   : > { %v529_v22 = vshrl.u32 %v474_v16, 16  ;;  %391 = vst [vmem:[#allocation2 + $0x24] sm:$0x1] %v390_v18  ;;  %v392_v23 = vld [vmem:[#allocation2 + $0x38] sm:$0x1]  ;;  %v532_v24 = vshll.u32 %v474_v16, 16 }
  0x25   : > { %v393_v25 = vsel %vm9417_vm7, 0, %v392_v23  ;;  %v318_v26 = vld [vmem:[#allocation2 + $0x10] sm:$0x1]  ;;  %v540_v27 = vrot.slane %v538_v19, 7  ;;  %v9437_v28 = vrot.slane %v541_v20, 5  ;;  %v9439_v29 = vrot.slane %v538_v19, 4  ;;  %2527 = vrot.lane.b32.xlu0 %v8150_v21, %s9285_s18 }
  0x26   : > { %v9442_v30 = vrot.slane %v529_v22, 7  ;;  %v9444_v31 = vld [vmem:[#allocation2 + $0x2c] sm:$0x8]  ;;  %394 = vst [vmem:[#allocation2 + $0x38] sm:$0x1] %v393_v25  ;;  %v9446_v32 = vrot.slane %v529_v22, 4 }
  0x27   : > { %v9448_v33 = vrot.slane %v532_v24, 5  ;;  %v9450_v34 = vld [vmem:[#allocation2 + $0x40] sm:$0x8]  ;;  %v319_v35 = vsel %vm9417_vm7, 0, %v318_v26  ;;  %v9454_v36 = vor.u32 %v541_v20, %v540_v27  ;;  %v1189_v38 = vshrl.u32 %v9444_v31, 16  ;;  %s9289_s22 = smov 24  }
  0x28   : > { %v9457_v37 = vor.u32 %v532_v24, %v9442_v30  ;;  %v1830_v39 = vshrl.u32 %v9450_v34, 16  ;;  %320 = vst [vmem:[#allocation2 + $0x10] sm:$0x1] %v319_v35  ;;  %v1122_v40 = vld [vmem:[#allocation2 + $0x30] sm:$0xf]  ;;  %v901_v44 = vor.u32 %v9439_v29, %v9437_v28  ;;  %s9290_s23 = smov 8  }
  0x29   : > { %v1123_v41 = vld [vmem:[#allocation2 + $0x34] sm:$0xf]  ;;  %v477_v42 = vld [vmem:[#allocation2 + $0x1c] sm:$0xf]  ;;  %v896_v43 = vor.u32 %v9448_v33, %v9446_v32  ;;  %v1194_v48 = vshrl.u32 %v1122_v40, 16  ;;  %v1197_v50 = vshll.u32 %v1122_v40, 16 }
  0x2a   : > { %v1203_v45 = vshrl.u32 %v1123_v41, 16  ;;  %v1206_v46 = vshll.u32 %v1123_v41, 16  ;;  %v8199_v47 = vcombine.low %v1122_v40, %v1123_v41  ;;  %v9465_v49 = vld [vmem:[#allocation2 + $0x20] sm:$0xf]  ;;  %v9470_v54 = vld [vmem:[#allocation2 + $0x44] sm:$0xf] }
  0x2b   : > { %v560_v51 = vshrl.u32 %v9465_v49, 16  ;;  %v563_v52 = vshll.u32 %v9465_v49, 16  ;;  %v8151_v53 = vcombine.low %v477_v42, %v9465_v49  ;;  %v1196_v58 = vrot.slane %v1194_v48, 7  ;;  %v9477_v59 = vld [vmem:[#allocation2 + $0x48] sm:$0xf]  ;;  %s9291_s29 = smov 20  }
  0x2c   : > { %v1205_v55 = vrot.slane %v1203_v45, 7  ;;  %v9472_v56 = vrot.slane %v1206_v46, 5  ;;  %v9474_v57 = vrot.slane %v1203_v45, 4  ;;  %2801 = vrot.lane.b32.xlu1 %v8199_v47, %s9286_s19  ;;  %v9479_v60 = vrot.slane %v1194_v48, 4  ;;  %v1119_v10 = vld [vmem:[#allocation2 + $0x1c] sm:$0xf] }
  0x2d   : > { %v9481_v61 = vrot.slane %v1197_v50, 5  ;;  %v562_v62 = vrot.slane %v560_v51, 7  ;;  %v9483_v63 = vrot.slane %v560_v51, 4  ;;  %2529 = vrot.lane.b32.xlu0 %v8151_v53, %s9285_s18  ;;  %v1199_v2 = vor.u32 %v1197_v50, %v1196_v58  ;;  %v9500_v15 = vld [vmem:[#allocation2 + $0x20] sm:$0xf]  ;;  %s9292_s8 = smov 32  }
  0x2e   : > { %v1208_v0 = vor.u32 %v1206_v46, %v1205_v55  ;;  %v551_v3 = vshrl.u32 %v477_v42, 16  ;;  %v554_v4 = vshll.u32 %v477_v42, 16  ;;  %v1835_v6 = vshrl.u32 %v9470_v54, 16  ;;  %v1760_v24 = vld [vmem:[#allocation2 + $0x30] sm:$0xf]  ;;  %s8679_s13 = sshll.u32 %s9356_s28, 11 }
  0x2f   : > { %v9488_v5 = vor.u32 %v563_v52, %v562_v62  ;;  %v1838_v7 = vshll.u32 %v9470_v54, 16  ;;  %v1844_v9 = vshrl.u32 %v9477_v59, 16  ;;  %v1847_v14 = vshll.u32 %v9477_v59, 16  ;;  %v9522_v41 = vld [vmem:[#allocation2 + $0x34] sm:$0xf]  ;;  %s14671_s9 = scalar_lea.hbm %s14732_s7, %s8679_s13 }
  0x30   : > { %v9493_v11 = vrot.slane %v551_v3, 7  ;;  %v9495_v12 = vrot.slane %v551_v3, 4  ;;  %v9497_v13 = vrot.slane %v554_v4, 5  ;;  %v1837_v16 = vrot.slane %v1835_v6, 7 }
  0x31   : > { %v1846_v17 = vrot.slane %v1844_v9, 7  ;;  %v9502_v18 = vrot.slane %v1835_v6, 4  ;;  %v9504_v19 = vrot.slane %v1838_v7, 5  ;;  %v9509_v21 = vrot.slane %v1844_v9, 4  ;;  %v1118_v6 = vld [vmem:[#allocation2 + $0x18] sm:$0x8] }
  0x32   : > { %v9507_v20 = vor.u32 %v554_v4, %v9493_v11  ;;  %v8247_v22 = vcombine.low %v9470_v54, %v9477_v59  ;;  %v1172_v23 = vshrl.u32 %v1119_v10, 16  ;;  %v1175_v25 = vshll.u32 %v1119_v10, 16 }
  0x33   : > { %v1181_v26 = vshrl.u32 %v9500_v15, 16  ;;  %v1184_v27 = vshll.u32 %v9500_v15, 16  ;;  %v8198_v35 = vcombine.low %v1119_v10, %v9500_v15  ;;  %vm891_vm10 = vsmask.f32 3328 }
  0x34   : > { %vm892_vm11 = vsmask.f32 7440  ;;  %3073 = vrot.lane.b32.xlu1 %v8247_v22, %s9287_s20  ;;  %v1174_v42 = vrot.slane %v1172_v23, 7  ;;  %v9525_v45 = vrot.slane %v1172_v23, 4  ;;  %v8103_v46 = vrot.slane %v1189_v38, 11 }
  0x35   : > { %v1201_v47 = vrot.slane %v1196_v58, 4  ;;  %v1183_v48 = vrot.slane %v1181_v26, 7  ;;  %v9529_v50 = vrot.slane %v1175_v25, 5  ;;  %v9531_v51 = vrot.slane %v1181_v26, 4  ;;  %2799 = vrot.lane.b32.xlu0 %v8198_v35, %s9286_s19  ;;  %vm9580_vm12 = vmor %vm891_vm10, %vm892_vm11 }
  0x36   : > { %v1813_v53 = vshrl.u32 %v1760_v24, 16  ;;  %v1200_v54 = vsel %vm9518_vm9, %v8103_v46, %v1199_v2  ;;  %v1816_v62 = vshll.u32 %v1760_v24, 16  ;;  %v1822_v3 = vshrl.u32 %v9522_v41, 16 }
  0x37   : > { %v1209_v55 = vsel %vm9518_vm9, %v1201_v47, %v1208_v0  ;;  %v1825_v58 = vshll.u32 %v9522_v41, 16  ;;  %v8246_v2 = vcombine.low %v1760_v24, %v9522_v41  ;;  %v1759_v0 = vld [vmem:[#allocation2 + $0x2c] sm:$0x8]  ;;  %v8119_v23 = vrot.slane %v1830_v39, 11 }
  0x38   : > { %v8183_v31 = vcombine.low %v1200_v54, %v1209_v55  ;;  %v1815_v38 = vrot.slane %v1813_v53, 7  ;;  %v9540_v4 = vrot.slane %v1813_v53, 4  ;;  %v1824_v9 = vrot.slane %v1822_v3, 7  ;;  %v284_v55 = vld [vmem:[%s9412_s17 + $0x18] sm:$0xf] }
  0x39   : > { %v9542_v10 = vrot.slane %v1816_v62, 5  ;;  %v9544_v22 = vrot.slane %v1822_v3, 4  ;;  %v1840_v26 = vor.u32 %v1838_v7, %v1837_v16  ;;  %v1842_v35 = vrot.slane %v1837_v16, 4  ;;  %3071 = vrot.lane.b32.xlu0 %v8246_v2, %s9287_s20  ;;  %v285_v3 = vld [vmem:[%s9412_s17 + $0x1c] sm:$0xf] }
  0x3a   : > { %2689 = vrot.lane.b32.xlu1 %v8183_v31, %s9288_s21  ;;  %v1849_v46 = vor.u32 %v1847_v14, %v1846_v17  ;;  %v1167_v47 = vshrl.u32 %v1118_v6, 16  ;;  %v1177_v53 = vor.u32 %v1175_v25, %v1174_v42  ;;  %v1179_v54 = vrot.slane %v1174_v42, 4  ;;  %v876_v17 = vld [vmem:[#allocation2 + $0x24] sm:$0x1]  ;;  %447 = vst.msk [vmem:[#allocation2 + $0x58] sm:$0xf] %vm310_vm0, %v284_v55 }
  0x3b   : > { %v1186_v24 = vor.u32 %v1184_v27, %v1183_v48  ;;  %v1841_v34 = vsel %vm9518_vm9, %v8119_v23, %v1840_v26  ;;  %v1808_v7 = vshrl.u32 %v1759_v0, 16  ;;  %v1818_v16 = vor.u32 %v1816_v62, %v1815_v38  ;;  %448 = vst.msk [vmem:[#allocation2 + $0x5c] sm:$0xf] %vm310_vm0, %v285_v3  ;;  %v286_v6 = vld [vmem:[%s9412_s17 + $0x20] sm:$0xf] }
  0x3c   : > { %v1850_v39 = vsel %vm9518_vm9, %v1842_v35, %v1849_v46  ;;  %v8102_v42 = vrot.slane %v1167_v47, 11  ;;  %v1820_v31 = vrot.slane %v1815_v38, 4  ;;  %v287_v2 = vld [vmem:[%s9412_s17 + $0x24] sm:$0xf]  ;;  %v1827_v0 = vor.u32 %v1825_v58, %v1824_v9  ;;  %449 = vst.msk [vmem:[#allocation2 + $0x6c] sm:$0xf] %vm310_vm0, %v286_v6 }
  0x3d   : > { %v8231_v25 = vcombine.low %v1841_v34, %v1850_v39  ;;  %v1187_v48 = vsel %vm9518_vm9, %v1179_v54, %v1186_v24  ;;  %v8118_v23 = vrot.slane %v1808_v7, 11  ;;  %v910_v62 = vor.u32 %v9497_v13, %v9495_v12  ;;  %v1518_v35 = vld [vmem:[#allocation2 + $0x24] sm:$0x1]  ;;  %450 = vst.msk [vmem:[#allocation2 + $0x70] sm:$0xf] %vm310_vm0, %v287_v2 }
  0x3e   : > { %v912_v26 = vrot.slane %v563_v52, 5  ;;  %v1178_v38 = vsel %vm9518_vm9, %v8102_v42, %v1177_v53  ;;  %v918_v12 = vshll.u32 %v876_v17, 16  ;;  %v1536_v49 = vor.u32 %v9529_v50, %v9525_v45  ;;  %v288_v13 = vld [vmem:[%s9412_s17 + $0x28] sm:$0xf]  ;;  %v289_v46 = vld [vmem:[%s9412_s17 + $0x2c] sm:$0xf] }
  0x3f   : > { %2961 = vrot.lane.b32.xlu1 %v8231_v25, %s9289_s22  ;;  %v1538_v52 = vrot.slane %v1184_v27, 5  ;;  %v8182_v47 = vcombine.low %v1178_v38, %v1187_v48  ;;  %v1819_v53 = vsel %vm9518_vm9, %v8118_v23, %v1818_v16  ;;  %v1828_v54 = vsel %vm9518_vm9, %v1820_v31, %v1827_v0  ;;  %v1519_v55 = vld [vmem:[#allocation2 + $0x38] sm:$0x1]  ;;  %451 = vst.msk [vmem:[#allocation2 + $0x80] sm:$0xf] %vm310_vm0, %v288_v13 }
  0x40   : > { %v911_v24 = vrot.slane %v910_v62, 4  ;;  %452 = vst.msk [vmem:[#allocation2 + $0x84] sm:$0xf] %vm310_vm0, %v289_v46  ;;  %v8230_v45 = vcombine.low %v1819_v53, %v1828_v54  ;;  %v915_v15 = vor.u32 %v9483_v63, %v912_v26  ;;  %v920_v50 = vrot.slane %v918_v12, 5  ;;  %v290_v3 = vld [vmem:[%s9412_s17 + $0x30] sm:$0xf] }
  0x41   : > { %v1537_v27 = vrot.slane %v1536_v49, 4  ;;  %v291_v34 = vld [vmem:[%s9412_s17 + $0x34] sm:$0xf]  ;;  %2687 = vrot.lane.b32.xlu0 %v8182_v47, %s9288_s21  ;;  %v1541_v7 = vor.u32 %v9531_v51, %v1538_v52  ;;  %v1544_v16 = vshll.u32 %v1518_v35, 16  ;;  %v1550_v17 = vor.u32 %v9481_v61, %v9479_v60  ;;  %453 = vst.msk [vmem:[#allocation2 + $0x94] sm:$0xf] %vm310_vm0, %v290_v3 }
  0x42   : > { %v913_v39 = vsel %vm9580_vm12, %v911_v24, %v912_v26  ;;  %454 = vst.msk [vmem:[#allocation2 + $0x98] sm:$0xf] %vm310_vm0, %v291_v34  ;;  %v916_v63 = vrot.slane %v915_v15, 4  ;;  %v1555_v42 = vor.u32 %v9474_v57, %v9472_v56  ;;  %v1558_v48 = vshll.u32 %v1519_v55, 16  ;;  %v2159_v51 = vld [vmem:[#allocation2 + $0x38] sm:$0x1] }
  0x43   : > { %v1539_v25 = vsel %vm9580_vm12, %v1537_v27, %v1538_v52  ;;  %v1542_v31 = vrot.slane %v1541_v7, 4  ;;  %v1546_v6 = vrot.slane %v1544_v16, 5  ;;  %v1551_v2 = vrot.slane %v1550_v17, 4  ;;  %v386_v26 = vld [vmem:[#allocation2 + $0x10] sm:$0x1] }
  0x44   : > { %v2177_v23 = vor.u32 %v9542_v10, %v9540_v4  ;;  %v921_v60 = vsel %vm9580_vm12, %v916_v63, %v920_v50  ;;  %v1556_v61 = vrot.slane %v1555_v42, 4  ;;  %v1560_v0 = vrot.slane %v1558_v48, 5  ;;  %v480_v10 = vld [vmem:[#allocation2 + $0x30] sm:$0xf]  ;;  %v481_v52 = vld [vmem:[#allocation2 + $0x34] sm:$0xf] }
  0x45   : > { %v2179_v62 = vrot.slane %v1825_v58, 5  ;;  %2959 = vrot.lane.b32.xlu0 %v8230_v45, %s9289_s22  ;;  %v8167_v57 = vcombine.low %v913_v39, %v921_v60  ;;  %v1547_v35 = vsel %vm9580_vm12, %v1542_v31, %v1546_v6  ;;  %v1553_v38 = vsel %vm9580_vm12, %v1551_v2, %v9472_v56  ;;  %v395_v45 = vld [vmem:[#allocation2 + $0x4c] sm:$0x1]  ;;  %v877_v27 = vld [vmem:[#allocation2 + $0x38] sm:$0x1] }
  0x46   : > { %v2178_v4 = vrot.slane %v2177_v23, 4  ;;  %v8214_v12 = vcombine.low %v1539_v25, %v1547_v35  ;;  %v1561_v49 = vsel %vm9580_vm12, %v1556_v61, %v1560_v0  ;;  %v2185_v58 = vshll.u32 %v2159_v51, 16  ;;  %v9651_v16 = vld [vmem:[#allocation2 + $0x44] sm:$0xf]  ;;  %v9664_v48 = vld [vmem:[#allocation2 + $0x48] sm:$0xf] }
  0x47   : > { %v2182_v41 = vor.u32 %v9544_v22, %v2179_v62  ;;  %2609 = vrot.lane.b32.xlu1 %v8167_v57, %s9290_s23  ;;  %v8215_v13 = vcombine.low %v1553_v38, %v1561_v49  ;;  %v387_v56 = vsel %vm9417_vm7, 0, %v386_v26  ;;  %v9634_v47 = vrot.slane %v896_v43, 4 }
  0x48   : > { %v2180_v46 = vsel %vm9580_vm12, %v2178_v4, %v2179_v62  ;;  %v2187_v54 = vrot.slane %v2185_v58, 5  ;;  %388 = vst [vmem:[#allocation2 + $0x10] sm:$0x1] %v387_v56  ;;  %v9639_v22 = vrot.slane %v901_v44, 4  ;;  %v573_v24 = vshrl.u32 %v480_v10, 16 }
  0x49   : > { %v2183_v53 = vrot.slane %v2182_v41, 4  ;;  %2879 = vrot.lane.b32.xlu0 %v8214_v12, %s9291_s29  ;;  %v899_v55 = vsel %vm9580_vm12, %v9634_v47, %v9437_v28  ;;  %v576_v32 = vshll.u32 %v480_v10, 16  ;;  %v582_v33 = vshrl.u32 %v481_v52, 16  ;;  %v9686_v41 = vld [vmem:[#allocation2 + $0x44] sm:$0xf] }
  0x4a   : > { %v585_v43 = vshll.u32 %v481_v52, 16  ;;  %v9648_v50 = vrot.slane %v573_v24, 7  ;;  %v922_v29 = vrot.slane %v573_v24, 4  ;;  %v8152_v44 = vcombine.low %v480_v10, %v481_v52  ;;  %v9691_v56 = vld [vmem:[#allocation2 + $0x48] sm:$0xf] }
  0x4b   : > { %v2188_v15 = vsel %vm9580_vm12, %v2183_v53, %v2187_v54  ;;  %2881 = vrot.lane.b32.xlu1 %v8215_v13, %s9291_s29  ;;  %v584_v34 = vrot.slane %v582_v33, 7  ;;  %v923_v39 = vrot.slane %v576_v32, 5  ;;  %v928_v7 = vrot.slane %v582_v33, 4  ;;  %v292_v33 = vld [vmem:[%s9412_s17 + $0x38] sm:$0xf] }
  0x4c   : > { %v8262_v3 = vcombine.low %v2180_v46, %v2188_v15  ;;  %v9654_v17 = vor.u32 %v576_v32, %v9648_v50  ;;  %v396_v63 = vsel %vm9417_vm7, 0, %v395_v45  ;;  %v2191_v25 = vor.u32 %v9504_v19, %v9502_v18  ;;  %455 = vst.msk [vmem:[#allocation2 + $0xa8] sm:$0xf] %vm310_vm0, %v292_v33 }
  0x4d   : > { %v9662_v42 = vrot.slane %v1847_v14, 5  ;;  %v9667_v31 = vor.u32 %v585_v43, %v584_v34  ;;  %397 = vst [vmem:[#allocation2 + $0x4c] sm:$0x1] %v396_v63  ;;  %v924_v6 = vor.u32 %v923_v39, %v922_v29  ;;  %v926_v2 = vrot.slane %v585_v43, 5 }
  0x4e   : > { %3151 = vrot.lane.b32.xlu0 %v8262_v3, %s9292_s8  ;;  %v932_v51 = vshll.u32 %v877_v27, 16  ;;  %v9669_v23 = vrot.slane %v2191_v25, 4  ;;  %v595_v59 = vshrl.u32 %v9651_v16, 16  ;;  %v598_v14 = vshll.u32 %v9651_v16, 16 }
  0x4f   : > { %v2196_v18 = vor.u32 %v9509_v21, %v9662_v42  ;;  %v875_v19 = vld [vmem:[#allocation2 + $0x10] sm:$0x1]  ;;  %v925_v60 = vrot.slane %v924_v6, 4  ;;  %v929_v61 = vor.u32 %v928_v7, %v926_v2  ;;  %v604_v62 = vshrl.u32 %v9664_v48, 16  ;;  %v1124_v21 = vld [vmem:[#allocation2 + $0x40] sm:$0x8] }
  0x50   : > { %v934_v0 = vrot.slane %v932_v51, 5  ;;  %v904_v26 = vshll.u32 %v875_v19, 16  ;;  %v2194_v57 = vsel %vm9580_vm12, %v9669_v23, %v9662_v42  ;;  %v9680_v38 = vrot.slane %v595_v59, 7  ;;  %v293_v6 = vld [vmem:[%s9412_s17 + $0x3c] sm:$0xf] }
  0x51   : > { %v2197_v35 = vrot.slane %v2196_v18, 4  ;;  %v927_v4 = vsel %vm9580_vm12, %v925_v60, %v926_v2  ;;  %v930_v10 = vrot.slane %v929_v61, 4  ;;  %v606_v12 = vrot.slane %v604_v62, 7  ;;  %456 = vst.msk [vmem:[#allocation2 + $0xac] sm:$0xf] %vm310_vm0, %v293_v6 }
  0x52   : > { %2531 = vrot.lane.b32.xlu0 %v8152_v44, %s9285_s18  ;;  %v607_v49 = vshll.u32 %v9664_v48, 16  ;;  %v906_v58 = vrot.slane %v904_v26, 5  ;;  %v9689_v52 = vor.u32 %v598_v14, %v9680_v38  ;;  %v936_v13 = vrot.slane %v595_v59, 4  ;;  %v9719_v19 = vld [vmem:[#allocation2 + $0x58] sm:$0xf] }
  0x53   : > { %v937_v46 = vrot.slane %v598_v14, 5  ;;  %v935_v53 = vsel %vm9580_vm12, %v930_v10, %v934_v0  ;;  %v942_v24 = vrot.slane %v604_v62, 4  ;;  %v8153_v32 = vcombine.low %v9651_v16, %v9664_v48  ;;  %v9723_v26 = vld [vmem:[#allocation2 + $0x5c] sm:$0xf] }
  0x54   : > { %v9695_v54 = vor.u32 %v607_v49, %v606_v12  ;;  %v907_v43 = vsel %vm9580_vm12, %v9639_v22, %v906_v58  ;;  %v2160_v45 = vld [vmem:[#allocation2 + $0x4c] sm:$0x1]  ;;  %v8168_v15 = vcombine.low %v927_v4, %v935_v53  ;;  %v1211_v29 = vshrl.u32 %v1124_v21, 16  ;;  %v294_v21 = vld [vmem:[%s9412_s17 + $0x40] sm:$0xf] }
  0x55   : > { %v1216_v44 = vshrl.u32 %v9686_v41, 16  ;;  %v878_v27 = vld [vmem:[#allocation2 + $0x4c] sm:$0x1]  ;;  %v8166_v3 = vcombine.low %v899_v55, %v907_v43  ;;  %v2199_v34 = vshll.u32 %v2160_v45, 16  ;;  %v1219_v39 = vshll.u32 %v9686_v41, 16 }
  0x56   : > { %v1225_v22 = vshrl.u32 %v9691_v56, 16  ;;  %2611 = vrot.lane.b32.xlu0 %v8168_v15, %s9290_s23  ;;  %v8104_v7 = vrot.slane %v1211_v29, 11  ;;  %v1228_v25 = vshll.u32 %v9691_v56, 16  ;;  %v938_v42 = vor.u32 %v937_v46, %v936_v13  ;;  %v344_v55 = vld [vmem:[#allocation2 + $0x54] sm:$0x8] }
  0x57   : > { %v1218_v63 = vrot.slane %v1216_v44, 7  ;;  %2607 = vrot.lane.b32.xlu1 %v8166_v3, %s9290_s23  ;;  %v2201_v2 = vrot.slane %v2199_v34, 5  ;;  %v940_v28 = vrot.slane %v607_v49, 5  ;;  %v946_v47 = vshll.u32 %v878_v27, 16  ;;  %457 = vst.msk [vmem:[#allocation2 + $0xbc] sm:$0xf] %vm310_vm0, %v294_v21 }
  0x58   : > { %v1227_v51 = vrot.slane %v1225_v22, 7  ;;  %v939_v59 = vrot.slane %v938_v42, 4  ;;  %v8200_v14 = vcombine.low %v9686_v41, %v9691_v56  ;;  %v345_v49 = vsel %vm9401_vm5, 0, %v344_v55  ;;  %v295_v41 = vld [vmem:[%s9412_s17 + $0x44] sm:$0xf] }
  0x59   : > { %v1221_v23 = vor.u32 %v1219_v39, %v1218_v63  ;;  %v1223_v18 = vrot.slane %v1218_v63, 4  ;;  %v2202_v60 = vsel %vm9580_vm12, %v2197_v35, %v2201_v2  ;;  %v943_v0 = vor.u32 %v942_v24, %v940_v28  ;;  %346 = vst [vmem:[#allocation2 + $0x54] sm:$0x8] %v345_v49  ;;  %v1520_v46 = vld [vmem:[#allocation2 + $0x4c] sm:$0x1] }
  0x5a   : > { %v1230_v61 = vor.u32 %v1228_v25, %v1227_v51  ;;  %v948_v62 = vrot.slane %v946_v47, 5  ;;  %v8263_v4 = vcombine.low %v2194_v57, %v2202_v60  ;;  %v941_v12 = vsel %vm9580_vm12, %v939_v59, %v940_v28  ;;  %458 = vst.msk [vmem:[#allocation2 + $0xc0] sm:$0xf] %vm310_vm0, %v295_v41  ;;  %v9744_v27 = vld [vmem:[#allocation2 + $0x58] sm:$0xf] }
  0x5b   : > { %v1222_v10 = vsel %vm9518_vm9, %v8104_v7, %v1221_v23  ;;  %v944_v58 = vrot.slane %v943_v0, 4  ;;  %v1238_v13 = vshrl.u32 %v9719_v19, 16  ;;  %v1241_v57 = vshll.u32 %v9719_v19, 16  ;;  %v9747_v42 = vld [vmem:[#allocation2 + $0x5c] sm:$0xf] }
  0x5c   : > { %v1231_v35 = vsel %vm9518_vm9, %v1223_v18, %v1230_v61  ;;  %3153 = vrot.lane.b32.xlu1 %v8263_v4, %s9292_s8  ;;  %v1247_v53 = vshrl.u32 %v9723_v26, 16  ;;  %v1250_v24 = vshll.u32 %v9723_v26, 16  ;;  %v1562_v33 = vrot.slane %v1216_v44, 4  ;;  %v398_v59 = vld [vmem:[#allocation2 + $0x60] sm:$0x1] }
  0x5d   : > { %v8184_v56 = vcombine.low %v1222_v10, %v1231_v35  ;;  %v949_v43 = vsel %vm9580_vm12, %v944_v58, %v948_v62  ;;  %v1240_v45 = vrot.slane %v1238_v13, 7  ;;  %v1563_v15 = vrot.slane %v1219_v39, 5  ;;  %v347_v58 = vld [vmem:[#allocation2 + $0x68] sm:$0x8] }
  0x5e   : > { %v1566_v29 = vrot.slane %v1228_v25, 5  ;;  %v8169_v3 = vcombine.low %v941_v12, %v949_v43  ;;  %v1249_v34 = vrot.slane %v1247_v53, 7  ;;  %v1568_v7 = vrot.slane %v1225_v22, 4 }
  0x5f   : > { %2691 = vrot.lane.b32.xlu0 %v8184_v56, %s9288_s21  ;;  %v1572_v63 = vshll.u32 %v1520_v46, 16  ;;  %v1243_v6 = vor.u32 %v1241_v57, %v1240_v45  ;;  %v1245_v2 = vrot.slane %v1240_v45, 4  ;;  %v1564_v51 = vor.u32 %v1563_v15, %v1562_v33  ;;  %v9774_v45 = vld [vmem:[#allocation2 + $0x6c] sm:$0xf]  ;;  %v9776_v15 = vld [vmem:[#allocation2 + $0x70] sm:$0xf] }
  0x60   : > { %v8201_v44 = vcombine.low %v9719_v19, %v9723_v26  ;;  %2533 = vrot.lane.b32.xlu1 %v8153_v32, %s9285_s18  ;;  %v1252_v39 = vor.u32 %v1250_v24, %v1249_v34  ;;  %v1569_v25 = vor.u32 %v1568_v7, %v1566_v29  ;;  %v1857_v47 = vshrl.u32 %v9744_v27, 16  ;;  %v1127_v60 = vld [vmem:[#allocation2 + $0x54] sm:$0x8] }
  0x61   : > { %v1574_v28 = vrot.slane %v1572_v63, 5  ;;  %v1565_v22 = vrot.slane %v1564_v51, 4  ;;  %v1860_v55 = vshll.u32 %v9744_v27, 16  ;;  %v1866_v23 = vshrl.u32 %v9747_v42, 16  ;;  %v1765_v32 = vld [vmem:[#allocation2 + $0x54] sm:$0x8] }
  0x62   : > { %v1869_v18 = vshll.u32 %v9747_v42, 16  ;;  %v1253_v16 = vsel %vm9518_vm9, %v1245_v2, %v1252_v39  ;;  %v1570_v48 = vrot.slane %v1569_v25, 4  ;;  %v1859_v61 = vrot.slane %v1857_v47, 7 }
  0x63   : > { %2803 = vrot.lane.b32.xlu0 %v8200_v14, %s9286_s19  ;;  %v8248_v0 = vcombine.low %v9744_v27, %v9747_v42  ;;  %v1233_v62 = vshrl.u32 %v1127_v60, 16  ;;  %v1567_v21 = vsel %vm9580_vm12, %v1565_v22, %v1566_v29  ;;  %v1852_v4 = vshrl.u32 %v1765_v32, 16  ;;  %v9105_v14 = vld [vmem:[%s14726_s1] sm:$0xff]  }
  0x64   : > { %v1868_v10 = vrot.slane %v1866_v23, 7  ;;  %2613 = vrot.lane.b32.xlu1 %v8169_v3, %s9290_s23  ;;  %v1575_v12 = vsel %vm9580_vm12, %v1570_v48, %v1574_v28  ;;  %v1862_v49 = vor.u32 %v1860_v55, %v1859_v61  ;;  %v1864_v41 = vrot.slane %v1859_v61, 4  ;;  %8943 = vmatprep.subr.bf16.mxu0 %v9105_v14 }
  0x65   : > { %v399_v35 = vsel %vm9417_vm7, 0, %v398_v59  ;;  %v8105_v46 = vrot.slane %v1233_v62, 11  ;;  %v8216_v56 = vcombine.low %v1567_v21, %v1575_v12  ;;  %v8120_v33 = vrot.slane %v1852_v4, 11  ;;  %8944 = vmatpush3.bf16.msra.mxu0 %v9105_v14 }
  0x66   : > { %v1871_v43 = vor.u32 %v1869_v18, %v1868_v10  ;;  %400 = vst [vmem:[#allocation2 + $0x60] sm:$0x1] %v399_v35  ;;  %v1576_v29 = vrot.slane %v1238_v13, 4  ;;  %v1577_v3 = vrot.slane %v1241_v57, 5  ;;  %v9778_v34 = vrot.slane %v1250_v24, 5 }
  0x67   : > { %v1582_v7 = vrot.slane %v1247_v53, 4  ;;  %v1244_v63 = vsel %vm9518_vm9, %v8105_v46, %v1243_v6  ;;  %2883 = vrot.lane.b32.xlu0 %v8216_v56, %s9291_s29  ;;  %v1863_v2 = vsel %vm9518_vm9, %v8120_v33, %v1862_v49  ;;  %v348_v39 = vsel %vm9401_vm5, 0, %v347_v58  ;;  %v296_v13 = vld [vmem:[%s9412_s17 + $0x48] sm:$0xf]  ;;  %v297_v57 = vld [vmem:[%s9412_s17 + $0x4c] sm:$0xf] }
  0x68   : > { %v1872_v51 = vsel %vm9518_vm9, %v1864_v41, %v1871_v43  ;;  %v8185_v24 = vcombine.low %v1244_v63, %v1253_v16  ;;  %v1578_v53 = vor.u32 %v1577_v3, %v1576_v29  ;;  %349 = vst [vmem:[#allocation2 + $0x68] sm:$0x8] %v348_v39  ;;  %v9792_v6 = vld [vmem:[#allocation2 + $0x58] sm:$0xf]  ;;  %459 = vst.msk [vmem:[#allocation2 + $0xd0] sm:$0xf] %vm310_vm0, %v296_v13 }
  0x69   : > { %v8232_v25 = vcombine.low %v1863_v2, %v1872_v51  ;;  %v1583_v28 = vor.u32 %v1582_v7, %v9778_v34  ;;  %460 = vst.msk [vmem:[#allocation2 + $0xd4] sm:$0xf] %vm310_vm0, %v297_v57  ;;  %v1879_v22 = vshrl.u32 %v9774_v45, 16  ;;  %v1882_v59 = vshll.u32 %v9774_v45, 16  ;;  %v9107_v16 = vld [vmem:[%s14726_s1 + $0x8] sm:$0xff]  }
  0x6a   : > { %v1888_v60 = vshrl.u32 %v9776_v15, 16  ;;  %v1891_v48 = vshll.u32 %v9776_v15, 16  ;;  %2693 = vrot.lane.b32.xlu1 %v8185_v24, %s9288_s21  ;;  %v1579_v32 = vrot.slane %v1578_v53, 4  ;;  %v2203_v62 = vrot.slane %v1857_v47, 4  ;;  %v9809_v49 = vld [vmem:[#allocation2 + $0x5c] sm:$0xf]  ;;  %8945 = vmatprep.subr.bf16.mxu0 %v9107_v16 }
  0x6b   : > { %v1584_v61 = vrot.slane %v1583_v28, 4  ;;  %v2204_v21 = vrot.slane %v1860_v55, 5  ;;  %2963 = vrot.lane.b32.xlu0 %v8232_v25, %s9289_s22  ;;  %v1881_v4 = vrot.slane %v1879_v22, 7  ;;  %v2207_v14 = vrot.slane %v1869_v18, 5  ;;  %8946 = vmatpush3.bf16.msra.mxu0 %v9107_v16  ;;  %v401_v24 = vld [vmem:[#allocation2 + $0x74] sm:$0x1] }
  0x6c   : > { %v1890_v10 = vrot.slane %v1888_v60, 7  ;;  %v2209_v12 = vrot.slane %v1866_v23, 4  ;;  %v1581_v35 = vsel %vm9580_vm12, %v1579_v32, %v9778_v34  ;;  %v8249_v58 = vcombine.low %v9774_v45, %v9776_v15  ;;  %v9845_v32 = vld [vmem:[#allocation2 + $0x6c] sm:$0xf] }
  0x6d   : > { %v1521_v41 = vld [vmem:[#allocation2 + $0x60] sm:$0x1]  ;;  %v2205_v55 = vor.u32 %v2204_v21, %v2203_v62  ;;  %v617_v46 = vshrl.u32 %v9792_v6, 16  ;;  %v1884_v23 = vor.u32 %v1882_v59, %v1881_v4  ;;  %v1886_v18 = vrot.slane %v1881_v4, 4 }
  0x6e   : > { %v2161_v47 = vld [vmem:[#allocation2 + $0x60] sm:$0x1]  ;;  %v1586_v56 = vshll.u32 %v1521_v41, 16  ;;  %v1893_v33 = vor.u32 %v1891_v48, %v1890_v10  ;;  %2805 = vrot.lane.b32.xlu1 %v8201_v44, %s9286_s19  ;;  %v2210_v29 = vor.u32 %v2209_v12, %v2207_v14  ;;  %v620_v51 = vshll.u32 %v9792_v6, 16 }
  0x6f   : > { %v2206_v43 = vrot.slane %v2205_v55, 4  ;;  %v2213_v3 = vshll.u32 %v2161_v47, 16  ;;  %v9825_v34 = vrot.slane %v617_v46, 7  ;;  %3075 = vrot.lane.b32.xlu0 %v8248_v0, %s9287_s20  ;;  %v1768_v63 = vld [vmem:[#allocation2 + $0x68] sm:$0x8]  ;;  %v626_v19 = vshrl.u32 %v9809_v49, 16 }
  0x70   : > { %v1588_v7 = vrot.slane %v1586_v56, 5  ;;  %v1894_v2 = vsel %vm9518_vm9, %v1886_v18, %v1893_v33  ;;  %v1874_v26 = vshrl.u32 %v1768_v63, 16  ;;  %v2211_v39 = vrot.slane %v2210_v29, 4  ;;  %v879_v10 = vld [vmem:[#allocation2 + $0x60] sm:$0x1] }
  0x71   : > { %v2208_v44 = vsel %vm9580_vm12, %v2206_v43, %v2207_v14  ;;  %v2215_v13 = vrot.slane %v2213_v3, 5  ;;  %v9840_v27 = vor.u32 %v620_v51, %v9825_v34  ;;  %v628_v42 = vrot.slane %v626_v19, 7  ;;  %v298_v14 = vld [vmem:[%s9412_s17 + $0x50] sm:$0xf]  ;;  %v1130_v63 = vld [vmem:[#allocation2 + $0x68] sm:$0x8] }
  0x72   : > { %v1589_v57 = vsel %vm9580_vm12, %v1584_v61, %v1588_v7  ;;  %v629_v0 = vshll.u32 %v9809_v49, 16  ;;  %v8121_v53 = vrot.slane %v1874_v26, 11  ;;  %v950_v16 = vrot.slane %v617_v46, 4  ;;  %v9859_v55 = vld [vmem:[#allocation2 + $0x70] sm:$0xf] }
  0x73   : > { %v8217_v25 = vcombine.low %v1581_v35, %v1589_v57  ;;  %v2216_v28 = vsel %vm9580_vm12, %v2211_v39, %v2215_v13  ;;  %v951_v61 = vrot.slane %v620_v51, 5  ;;  %v956_v4 = vrot.slane %v626_v19, 4  ;;  %v299_v46 = vld [vmem:[%s9412_s17 + $0x54] sm:$0xf]  ;;  %461 = vst.msk [vmem:[#allocation2 + $0xe4] sm:$0xf] %vm310_vm0, %v298_v14 }
  0x74   : > { %v8264_v62 = vcombine.low %v2208_v44, %v2216_v28  ;;  %v9847_v21 = vor.u32 %v629_v0, %v628_v42  ;;  %v1885_v12 = vsel %vm9518_vm9, %v8121_v53, %v1884_v23  ;;  %v8154_v41 = vcombine.low %v9792_v6, %v9809_v49  ;;  %462 = vst.msk [vmem:[#allocation2 + $0xe8] sm:$0xf] %vm310_vm0, %v299_v46  ;;  %v9882_v26 = vld [vmem:[#allocation2 + $0x70] sm:$0xf] }
  0x75   : > { %2885 = vrot.lane.b32.xlu1 %v8217_v25, %s9291_s29  ;;  %v402_v35 = vsel %vm9417_vm7, 0, %v401_v24  ;;  %v2217_v47 = vrot.slane %v1879_v22, 4  ;;  %v8233_v56 = vcombine.low %v1885_v12, %v1894_v2  ;;  %v2218_v23 = vrot.slane %v1882_v59, 5 }
  0x76   : > { %3155 = vrot.lane.b32.xlu0 %v8264_v62, %s9292_s8  ;;  %403 = vst [vmem:[#allocation2 + $0x74] sm:$0x1] %v402_v35  ;;  %v9868_v6 = vrot.slane %v1891_v48, 5  ;;  %v2223_v49 = vrot.slane %v1888_v60, 4  ;;  %v952_v22 = vor.u32 %v951_v61, %v950_v16  ;;  %v954_v18 = vrot.slane %v629_v0, 5 }
  0x77   : > { %v960_v33 = vshll.u32 %v879_v10, 16  ;;  %v639_v43 = vshrl.u32 %v9845_v32, 16  ;;  %v2219_v29 = vor.u32 %v2218_v23, %v2217_v47  ;;  %v642_v7 = vshll.u32 %v9845_v32, 16  ;;  %v9877_v48 = vld [vmem:[#allocation2 + $0x6c] sm:$0xf] }
  0x78   : > { %v2224_v3 = vor.u32 %v2223_v49, %v9868_v6  ;;  %v648_v59 = vshrl.u32 %v9859_v55, 16  ;;  %v953_v60 = vrot.slane %v952_v22, 4  ;;  %v957_v2 = vor.u32 %v956_v4, %v954_v18 }
  0x79   : > { %2965 = vrot.lane.b32.xlu1 %v8233_v56, %s9289_s22  ;;  %v962_v51 = vrot.slane %v960_v33, 5  ;;  %v9880_v19 = vrot.slane %v639_v43, 7  ;;  %v2220_v44 = vrot.slane %v2219_v29, 4  ;;  %v651_v57 = vshll.u32 %v9859_v55, 16 }
  0x7a   : > { %2535 = vrot.lane.b32.xlu0 %v8154_v41, %s9285_s18  ;;  %v2225_v39 = vrot.slane %v2224_v3, 4  ;;  %v650_v13 = vrot.slane %v648_v59, 7  ;;  %v955_v42 = vsel %vm9580_vm12, %v953_v60, %v954_v18  ;;  %v958_v0 = vrot.slane %v957_v2, 4  ;;  %v9909_v18 = vld [vmem:[#allocation2 + $0x80] sm:$0xf] }
  0x7b   : > { %14884 = vst [vmem:[#allocation7_spill] sm:$0xff] %v9880_v19  ;;  %v9889_v24 = vor.u32 %v642_v7, %v9880_v19  ;;  %v964_v25 = vrot.slane %v639_v43, 4  ;;  %v2222_v53 = vsel %vm9580_vm12, %v2220_v44, %v9868_v6  ;;  %v965_v16 = vrot.slane %v642_v7, 5  ;;  %v350_v6 = vld [vmem:[#allocation2 + $0x7c] sm:$0x8] }
  0x7c   : > { %v9894_v28 = vor.u32 %v651_v57, %v650_v13  ;;  %v970_v62 = vrot.slane %v648_v59, 4  ;;  %v963_v4 = vsel %vm9580_vm12, %v958_v0, %v962_v51  ;;  %v8155_v10 = vcombine.low %v9845_v32, %v9859_v55  ;;  %v9913_v7 = vld [vmem:[#allocation2 + $0x84] sm:$0xf]  ;;  %v10360_v19 = vld [vmem:[#allocation2 + $0xd0] sm:$0xf] }
  0x7d   : > { %14885 = vst [vmem:[#allocation8_spill] sm:$0xff] %v9889_v24  ;;  %3077 = vrot.lane.b32.xlu1 %v8249_v58, %s9287_s20  ;;  %v2162_v61 = vld [vmem:[#allocation2 + $0x74] sm:$0x1]  ;;  %v1255_v14 = vshrl.u32 %v1130_v63, 16  ;;  %v1260_v12 = vshrl.u32 %v9877_v48, 16  ;;  %v8170_v47 = vcombine.low %v955_v42, %v963_v4  ;;  %v1263_v46 = vshll.u32 %v9877_v48, 16 }
  0x7e   : > { %14886 = vst [vmem:[#allocation9_spill] sm:$0xff] %v9894_v28  ;;  %v880_v41 = vld [vmem:[#allocation2 + $0x74] sm:$0x1]  ;;  %v2227_v35 = vshll.u32 %v2162_v61, 16  ;;  %v1269_v56 = vshrl.u32 %v9882_v26, 16  ;;  %v1272_v15 = vshll.u32 %v9882_v26, 16  ;;  %v966_v58 = vor.u32 %v965_v16, %v964_v25 }
  0x7f   : > { %v8106_v23 = vrot.slane %v1255_v14, 11  ;;  %v1262_v45 = vrot.slane %v1260_v12, 7  ;;  %2615 = vrot.lane.b32.xlu0 %v8170_v47, %s9290_s23  ;;  %v968_v55 = vrot.slane %v651_v57, 5  ;;  %v974_v22 = vshll.u32 %v880_v41, 16  ;;  %v1522_v51 = vld [vmem:[#allocation2 + $0x74] sm:$0x1] }
  0x80   : > { %v2229_v49 = vrot.slane %v2227_v35, 5  ;;  %v1271_v32 = vrot.slane %v1269_v56, 7  ;;  %v967_v29 = vrot.slane %v966_v58, 4  ;;  %v8202_v3 = vcombine.low %v9877_v48, %v9882_v26  ;;  %v9927_v25 = vld [vmem:[#allocation2 + $0x80] sm:$0xf] }
  0x81   : > { %v1265_v33 = vor.u32 %v1263_v46, %v1262_v45  ;;  %v1267_v43 = vrot.slane %v1262_v45, 4  ;;  %v971_v60 = vor.u32 %v970_v62, %v968_v55  ;;  %v976_v2 = vrot.slane %v974_v22, 5  ;;  %v300_v4 = vld [vmem:[%s9412_s17 + $0x58] sm:$0xf]  ;;  %v362_v28 = vld [vmem:[#allocation2 + $0xcc] sm:$0x8] }
  0x82   : > { %v2230_v59 = vsel %vm9580_vm12, %v2225_v39, %v2229_v49  ;;  %v1274_v63 = vor.u32 %v1272_v15, %v1271_v32  ;;  %v969_v57 = vsel %vm9580_vm12, %v967_v29, %v968_v55  ;;  %v351_v48 = vsel %vm9401_vm5, 0, %v350_v6  ;;  %463 = vst.msk [vmem:[#allocation2 + $0xf8] sm:$0xf] %vm310_vm0, %v300_v4  ;;  %v9938_v32 = vld [vmem:[#allocation2 + $0x84] sm:$0xf] }
  0x83   : > { %v8265_v44 = vcombine.low %v2222_v53, %v2230_v59  ;;  %v1266_v13 = vsel %vm9518_vm9, %v8106_v23, %v1265_v33  ;;  %v972_v39 = vrot.slane %v971_v60, 4  ;;  %352 = vst [vmem:[#allocation2 + $0x7c] sm:$0x8] %v351_v48  ;;  %v1282_v42 = vshrl.u32 %v9909_v18, 16  ;;  %v301_v23 = vld [vmem:[%s9412_s17 + $0x5c] sm:$0xf] }
  0x84   : > { %v1275_v26 = vsel %vm9518_vm9, %v1267_v43, %v1274_v63  ;;  %v1285_v0 = vshll.u32 %v9909_v18, 16  ;;  %v1291_v16 = vshrl.u32 %v9913_v7, 16  ;;  %v1294_v62 = vshll.u32 %v9913_v7, 16  ;;  %464 = vst.msk [vmem:[#allocation2 + $0xfc] sm:$0xf] %vm310_vm0, %v301_v23 }
  0x85   : > { %3157 = vrot.lane.b32.xlu1 %v8265_v44, %s9292_s8  ;;  %v8186_v53 = vcombine.low %v1266_v13, %v1275_v26  ;;  %v1590_v61 = vrot.slane %v1260_v12, 4  ;;  %v977_v14 = vsel %vm9580_vm12, %v972_v39, %v976_v2  ;;  %v1284_v41 = vrot.slane %v1282_v42, 7  ;;  %v404_v59 = vld [vmem:[#allocation2 + $0x88] sm:$0x1]  ;;  %v353_v26 = vld [vmem:[#allocation2 + $0x90] sm:$0x8] }
  0x86   : > { %v1591_v35 = vrot.slane %v1263_v46, 5  ;;  %v1594_v47 = vrot.slane %v1272_v15, 5  ;;  %v8171_v45 = vcombine.low %v969_v57, %v977_v14  ;;  %v1293_v58 = vrot.slane %v1291_v16, 7  ;;  %v9960_v23 = vld [vmem:[#allocation2 + $0x94] sm:$0xf] }
  0x87   : > { %2695 = vrot.lane.b32.xlu0 %v8186_v53, %s9288_s21  ;;  %v1596_v6 = vrot.slane %v1269_v56, 4  ;;  %v1600_v49 = vshll.u32 %v1522_v51, 16  ;;  %v1287_v12 = vor.u32 %v1285_v0, %v1284_v41  ;;  %v1289_v55 = vrot.slane %v1284_v41, 4 }
  0x88   : > { %v1592_v22 = vor.u32 %v1591_v35, %v1590_v61  ;;  %v8203_v46 = vcombine.low %v9909_v18, %v9913_v7  ;;  %v1296_v15 = vor.u32 %v1294_v62, %v1293_v58  ;;  %v1901_v29 = vshrl.u32 %v9927_v25, 16  ;;  %v9962_v58 = vld [vmem:[#allocation2 + $0x98] sm:$0xf] }
  0x89   : > { %2537 = vrot.lane.b32.xlu1 %v8155_v10, %s9285_s18  ;;  %v1597_v33 = vor.u32 %v1596_v6, %v1594_v47  ;;  %v1602_v43 = vrot.slane %v1600_v49, 5  ;;  %v1904_v63 = vshll.u32 %v9927_v25, 16  ;;  %v1910_v60 = vshrl.u32 %v9938_v32, 16 }
  0x8a   : > { %v1593_v56 = vrot.slane %v1592_v22, 4  ;;  %v1913_v2 = vshll.u32 %v9938_v32, 16  ;;  %v1133_v51 = vld [vmem:[#allocation2 + $0x7c] sm:$0x8]  ;;  %v1297_v44 = vsel %vm9518_vm9, %v1289_v55, %v1296_v15  ;;  %v1903_v57 = vrot.slane %v1901_v29, 7 }
  0x8b   : > { %2807 = vrot.lane.b32.xlu0 %v8202_v3, %s9286_s19  ;;  %v1598_v10 = vrot.slane %v1597_v33, 4  ;;  %v1771_v13 = vld [vmem:[#allocation2 + $0x7c] sm:$0x8]  ;;  %v8250_v48 = vcombine.low %v9927_v25, %v9938_v32  ;;  %v1277_v39 = vshrl.u32 %v1133_v51, 16  ;;  %v1912_v4 = vrot.slane %v1910_v60, 7 }
  0x8c   : > { %v1595_v53 = vsel %vm9580_vm12, %v1593_v56, %v1594_v47  ;;  %v1896_v61 = vshrl.u32 %v1771_v13, 16  ;;  %v1906_v14 = vor.u32 %v1904_v63, %v1903_v57  ;;  %v1908_v41 = vrot.slane %v1903_v57, 4 }
  0x8d   : > { %2617 = vrot.lane.b32.xlu1 %v8171_v45, %s9290_s23  ;;  %v1603_v3 = vsel %vm9580_vm12, %v1598_v10, %v1602_v43  ;;  %v405_v35 = vsel %vm9417_vm7, 0, %v404_v59  ;;  %v8107_v6 = vrot.slane %v1277_v39, 11  ;;  %v1915_v47 = vor.u32 %v1913_v2, %v1912_v4  ;;  %v9977_v39 = vld [vmem:[#allocation2 + $0x80] sm:$0xf]  ;;  %v9980_v4 = vld [vmem:[#allocation2 + $0x84] sm:$0xf] }
  0x8e   : > { %v8218_v49 = vcombine.low %v1595_v53, %v1603_v3  ;;  %v8122_v55 = vrot.slane %v1896_v61, 11  ;;  %406 = vst [vmem:[#allocation2 + $0x88] sm:$0x1] %v405_v35  ;;  %v1604_v22 = vrot.slane %v1282_v42, 4  ;;  %v1605_v15 = vrot.slane %v1285_v0, 5 }
  0x8f   : > { %v1608_v45 = vrot.slane %v1294_v62, 5  ;;  %v1610_v33 = vrot.slane %v1291_v16, 4  ;;  %v1288_v43 = vsel %vm9518_vm9, %v8107_v6, %v1287_v12  ;;  %v1916_v56 = vsel %vm9518_vm9, %v1908_v41, %v1915_v47 }
  0x90   : > { %2887 = vrot.lane.b32.xlu0 %v8218_v49, %s9291_s29  ;;  %v1907_v59 = vsel %vm9518_vm9, %v8122_v55, %v1906_v14  ;;  %v354_v51 = vsel %vm9401_vm5, 0, %v353_v26  ;;  %v8187_v10 = vcombine.low %v1288_v43, %v1297_v44  ;;  %v1606_v42 = vor.u32 %v1605_v15, %v1604_v22 }
  0x91   : > { %v8234_v13 = vcombine.low %v1907_v59, %v1916_v56  ;;  %v1611_v0 = vor.u32 %v1610_v33, %v1608_v45  ;;  %355 = vst [vmem:[#allocation2 + $0x90] sm:$0x8] %v354_v51  ;;  %v1923_v16 = vshrl.u32 %v9960_v23, 16  ;;  %v1926_v62 = vshll.u32 %v9960_v23, 16 }
  0x92   : > { %v1932_v12 = vshrl.u32 %v9962_v58, 16  ;;  %v1935_v57 = vshll.u32 %v9962_v58, 16  ;;  %2697 = vrot.lane.b32.xlu1 %v8187_v10, %s9288_s21  ;;  %v1607_v53 = vrot.slane %v1606_v42, 4  ;;  %v2231_v26 = vrot.slane %v1901_v29, 4 }
  0x93   : > { %v1612_v61 = vrot.slane %v1611_v0, 4  ;;  %v2232_v44 = vrot.slane %v1904_v63, 5  ;;  %v1925_v3 = vrot.slane %v1923_v16, 7  ;;  %v2235_v41 = vrot.slane %v1913_v2, 5 }
  0x94   : > { %2967 = vrot.lane.b32.xlu0 %v8234_v13, %s9289_s22  ;;  %v1934_v14 = vrot.slane %v1932_v12, 7  ;;  %v2237_v35 = vrot.slane %v1910_v60, 4  ;;  %v1609_v49 = vsel %vm9580_vm12, %v1607_v53, %v1608_v45  ;;  %v8251_v29 = vcombine.low %v9960_v23, %v9962_v58  ;;  %v356_v23 = vld [vmem:[#allocation2 + $0xa4] sm:$0x8] }
  0x95   : > { %v1523_v6 = vld [vmem:[#allocation2 + $0x88] sm:$0x1]  ;;  %v2233_v47 = vor.u32 %v2232_v44, %v2231_v26  ;;  %v661_v63 = vshrl.u32 %v9977_v39, 16  ;;  %v1928_v15 = vor.u32 %v1926_v62, %v1925_v3  ;;  %v1930_v33 = vrot.slane %v1925_v3, 4  ;;  %v407_v26 = vld [vmem:[#allocation2 + $0x9c] sm:$0x1] }
  0x96   : > { %v2163_v55 = vld [vmem:[#allocation2 + $0x88] sm:$0x1]  ;;  %v1614_v22 = vshll.u32 %v1523_v6, 16  ;;  %v1937_v2 = vor.u32 %v1935_v57, %v1934_v14  ;;  %2809 = vrot.lane.b32.xlu1 %v8203_v46, %s9286_s19  ;;  %v2238_v45 = vor.u32 %v2237_v35, %v2235_v41  ;;  %v664_v13 = vshll.u32 %v9977_v39, 16  ;;  %v10018_v44 = vld [vmem:[#allocation2 + $0x94] sm:$0xf] }
  0x97   : > { %v2234_v60 = vrot.slane %v2233_v47, 4  ;;  %v2241_v43 = vshll.u32 %v2163_v55, 16  ;;  %v10000_v59 = vrot.slane %v661_v63, 7  ;;  %v670_v18 = vshrl.u32 %v9980_v4, 16  ;;  %v302_v6 = vld [vmem:[%s9412_s17 + $0x60] sm:$0xf] }
  0x98   : > { %v1616_v56 = vrot.slane %v1614_v22, 5  ;;  %3079 = vrot.lane.b32.xlu0 %v8250_v48, %s9287_s20  ;;  %v1774_v51 = vld [vmem:[#allocation2 + $0x90] sm:$0x8]  ;;  %v1938_v10 = vsel %vm9518_vm9, %v1930_v33, %v1937_v2  ;;  %v2239_v42 = vrot.slane %v2238_v45, 4  ;;  %v673_v53 = vshll.u32 %v9980_v4, 16 }
  0x99   : > { %14887 = vst [vmem:[#allocation10_spill] sm:$0xff] %v10000_v59  ;;  %v1918_v7 = vshrl.u32 %v1774_v51, 16  ;;  %v2236_v46 = vsel %vm9580_vm12, %v2234_v60, %v2235_v41  ;;  %v2243_v0 = vrot.slane %v2241_v43, 5  ;;  %v10015_v32 = vor.u32 %v664_v13, %v10000_v59  ;;  %v303_v55 = vld [vmem:[%s9412_s17 + $0x64] sm:$0xf]  ;;  %v10026_v60 = vpop.permute.xlu0 %2527 }
  0x9a   : > { %v1617_v25 = vsel %vm9580_vm12, %v1612_v61, %v1616_v56  ;;  %v672_v48 = vrot.slane %v670_v18, 7  ;;  %v978_v41 = vrot.slane %v661_v63, 4  ;;  %v979_v61 = vrot.slane %v664_v13, 5  ;;  %v881_v2 = vld [vmem:[#allocation2 + $0x88] sm:$0x1] }
  0x9b   : > { %14888 = vst [vmem:[#allocation11_spill] sm:$0xff] %v10015_v32  ;;  %v8219_v3 = vcombine.low %v1609_v49, %v1617_v25  ;;  %v8123_v14 = vrot.slane %v1918_v7, 11  ;;  %v2244_v35 = vsel %vm9580_vm12, %v2239_v42, %v2243_v0  ;;  %v984_v33 = vrot.slane %v670_v18, 4  ;;  %465 = vst.msk [vmem:[#allocation2 + $0x10c] sm:$0xf] %vm310_vm0, %v302_v6 }
  0x9c   : > { %v8266_v47 = vcombine.low %v2236_v46, %v2244_v35  ;;  %v10024_v22 = vor.u32 %v673_v53, %v672_v48  ;;  %466 = vst.msk [vmem:[#allocation2 + $0x110] sm:$0xf] %vm310_vm0, %v303_v55  ;;  %v8156_v63 = vcombine.low %v9977_v39, %v9980_v4  ;;  %v408_v45 = vsel %vm9417_vm7, 0, %v407_v26  ;;  %v10039_v56 = vld [vmem:[#allocation2 + $0x98] sm:$0xf] }
  0x9d   : > { %2889 = vrot.lane.b32.xlu1 %v8219_v3, %s9291_s29  ;;  %v1929_v49 = vsel %vm9518_vm9, %v8123_v14, %v1928_v15  ;;  %v2245_v43 = vrot.slane %v1923_v16, 4  ;;  %409 = vst [vmem:[#allocation2 + $0x9c] sm:$0x1] %v408_v45  ;;  %v2246_v13 = vrot.slane %v1926_v62, 5  ;;  %v10046_v15 = vrot.slane %v1935_v57, 5 }
  0x9e   : > { %14889 = vst [vmem:[#allocation12_spill] sm:$0xff] %v10024_v22  ;;  %v8235_v51 = vcombine.low %v1929_v49, %v1938_v10  ;;  %3159 = vrot.lane.b32.xlu0 %v8266_v47, %s9292_s8  ;;  %v2251_v39 = vrot.slane %v1932_v12, 4  ;;  %v980_v4 = vor.u32 %v979_v61, %v978_v41  ;;  %v982_v18 = vrot.slane %v673_v53, 5  ;;  %v1136_v62 = vld [vmem:[#allocation2 + $0x90] sm:$0x8]  ;;  %v10085_v58 = vpop.permute.xlu1 %2801 }
  0x9f   : > { %v988_v7 = vshll.u32 %v881_v2, 16  ;;  %v683_v16 = vshrl.u32 %v10018_v44, 16  ;;  %v2247_v46 = vor.u32 %v2246_v13, %v2245_v43  ;;  %v686_v42 = vshll.u32 %v10018_v44, 16  ;;  %v10054_v25 = vld [vmem:[#allocation2 + $0x94] sm:$0xf]  ;;  %v10062_v41 = vpop.permute.xlu0 %2529 }
  0xa0   : > { %v2252_v10 = vor.u32 %v2251_v39, %v10046_v15  ;;  %v692_v0 = vshrl.u32 %v10039_v56, 16  ;;  %v981_v57 = vrot.slane %v980_v4, 4  ;;  %v985_v48 = vor.u32 %v984_v33, %v982_v18  ;;  %v10069_v33 = vld [vmem:[#allocation2 + $0x98] sm:$0xf]  ;;  %v10284_v22 = vld [vmem:[#allocation2 + $0xc0] sm:$0xf] }
  0xa1   : > { %2969 = vrot.lane.b32.xlu1 %v8235_v51, %s9289_s22  ;;  %v990_v12 = vrot.slane %v988_v7, 5  ;;  %v10057_v26 = vrot.slane %v683_v16, 7  ;;  %v2248_v3 = vrot.slane %v2247_v46, 4  ;;  %v695_v35 = vshll.u32 %v10039_v56, 16 }
  0xa2   : > { %2539 = vrot.lane.b32.xlu0 %v8156_v63, %s9285_s18  ;;  %v694_v14 = vrot.slane %v692_v0, 7  ;;  %v983_v6 = vsel %vm9580_vm12, %v981_v57, %v982_v18  ;;  %v986_v55 = vrot.slane %v985_v48, 4  ;;  %v992_v61 = vrot.slane %v683_v16, 4  ;;  %v10088_v57 = vld [vmem:[#allocation2 + $0xa8] sm:$0xf] }
  0xa3   : > { %14890 = vst [vmem:[#allocation13_spill] sm:$0xff] %v10057_v26  ;;  %v10067_v47 = vor.u32 %v686_v42, %v10057_v26  ;;  %v2253_v2 = vrot.slane %v2252_v10, 4  ;;  %v993_v63 = vrot.slane %v686_v42, 5  ;;  %v998_v45 = vrot.slane %v692_v0, 4 }
  0xa4   : > { %v10071_v49 = vor.u32 %v695_v35, %v694_v14  ;;  %v2164_v43 = vld [vmem:[#allocation2 + $0x9c] sm:$0x1]  ;;  %v2250_v51 = vsel %vm9580_vm12, %v2248_v3, %v10046_v15  ;;  %v991_v13 = vsel %vm9580_vm12, %v986_v55, %v990_v12  ;;  %v1299_v39 = vshrl.u32 %v1136_v62, 16  ;;  %v10091_v14 = vld [vmem:[#allocation2 + $0xac] sm:$0xf] }
  0xa5   : > { %14891 = vst [vmem:[#allocation14_spill] sm:$0xff] %v10067_v47  ;;  %3081 = vrot.lane.b32.xlu1 %v8251_v29, %s9287_s20  ;;  %v1304_v4 = vshrl.u32 %v10054_v25, 16  ;;  %v882_v18 = vld [vmem:[#allocation2 + $0x9c] sm:$0x1]  ;;  %v2255_v7 = vshll.u32 %v2164_v43, 16  ;;  %v8172_v16 = vcombine.low %v983_v6, %v991_v13  ;;  %v1307_v46 = vshll.u32 %v10054_v25, 16 }
  0xa6   : > { %14892 = vst [vmem:[#allocation15_spill] sm:$0xff] %v10071_v49  ;;  %v1313_v10 = vshrl.u32 %v10069_v33, 16  ;;  %v8108_v29 = vrot.slane %v1299_v39, 11  ;;  %v1316_v15 = vshll.u32 %v10069_v33, 16  ;;  %v994_v0 = vor.u32 %v993_v63, %v992_v61 }
  0xa7   : > { %v1306_v42 = vrot.slane %v1304_v4, 7  ;;  %v2257_v62 = vrot.slane %v2255_v7, 5  ;;  %2619 = vrot.lane.b32.xlu0 %v8172_v16, %s9290_s23  ;;  %v996_v12 = vrot.slane %v695_v35, 5  ;;  %v1002_v3 = vshll.u32 %v882_v18, 16  ;;  %v10093_v6 = vpop.permute.xlu0 %2799 }
  0xa8   : > { %v1315_v48 = vrot.slane %v1313_v10, 7  ;;  %v8157_v55 = vcombine.low %v10018_v44, %v10039_v56  ;;  %v995_v39 = vrot.slane %v994_v0, 4  ;;  %v357_v47 = vsel %vm9401_vm5, 0, %v356_v23 }
  0xa9   : > { %v1309_v43 = vor.u32 %v1307_v46, %v1306_v42  ;;  %v1311_v13 = vrot.slane %v1306_v42, 4  ;;  %v2258_v61 = vsel %vm9580_vm12, %v2253_v2, %v2257_v62  ;;  %v999_v7 = vor.u32 %v998_v45, %v996_v12  ;;  %358 = vst [vmem:[#allocation2 + $0xa4] sm:$0x8] %v357_v47  ;;  %v1524_v42 = vld [vmem:[#allocation2 + $0x9c] sm:$0x1] }
  0xaa   : > { %v1318_v63 = vor.u32 %v1316_v15, %v1315_v48  ;;  %v1004_v53 = vrot.slane %v1002_v3, 5  ;;  %v8267_v16 = vcombine.low %v2250_v51, %v2258_v61  ;;  %v997_v18 = vsel %vm9580_vm12, %v995_v39, %v996_v12  ;;  %v10109_v51 = vpop.permute.xlu1 %3073  ;;  %v332_v48 = vld [vmem:[#allocation2 + $0x4] sm:$0x8]  ;;  %v10114_v12 = vld [vmem:[#allocation2 + $0xa8] sm:$0xf] }
  0xab   : > { %v1310_v35 = vsel %vm9518_vm9, %v8108_v29, %v1309_v43  ;;  %v1000_v56 = vrot.slane %v999_v7, 4  ;;  %v1326_v2 = vshrl.u32 %v10088_v57, 16  ;;  %v1329_v45 = vshll.u32 %v10088_v57, 16  ;;  %v10120_v39 = vpop.permute.xlu0 %3071 }
  0xac   : > { %v1319_v44 = vsel %vm9518_vm9, %v1311_v13, %v1318_v63  ;;  %3161 = vrot.lane.b32.xlu1 %v8267_v16, %s9292_s8  ;;  %v1335_v0 = vshrl.u32 %v10091_v14, 16  ;;  %v1338_v62 = vshll.u32 %v10091_v14, 16  ;;  %v1618_v23 = vrot.slane %v1304_v4, 4 }
  0xad   : > { %v8188_v29 = vcombine.low %v1310_v35, %v1319_v44  ;;  %v1005_v47 = vsel %vm9580_vm12, %v1000_v56, %v1004_v53  ;;  %v1328_v3 = vrot.slane %v1326_v2, 7  ;;  %v1619_v43 = vrot.slane %v1307_v46, 5  ;;  %v10127_v44 = vld [vmem:[#allocation2 + $0xac] sm:$0xf]  ;;  %v410_v56 = vld [vmem:[#allocation2 + $0xb0] sm:$0x1] }
  0xae   : > { %v1622_v13 = vrot.slane %v1316_v15, 5  ;;  %v8204_v61 = vcombine.low %v10054_v25, %v10069_v33  ;;  %v1337_v4 = vrot.slane %v1335_v0, 7  ;;  %v1624_v63 = vrot.slane %v1313_v10, 4 }
  0xaf   : > { %2699 = vrot.lane.b32.xlu0 %v8188_v29, %s9288_s21  ;;  %v1628_v7 = vshll.u32 %v1524_v42, 16  ;;  %v8173_v16 = vcombine.low %v997_v18, %v1005_v47  ;;  %v1333_v35 = vrot.slane %v1328_v3, 4  ;;  %v1620_v53 = vor.u32 %v1619_v43, %v1618_v23  ;;  %v10144_v23 = vpop.permute.xlu1 %2689 }
  0xb0   : > { %2541 = vrot.lane.b32.xlu1 %v8157_v55, %s9285_s18  ;;  %v1331_v46 = vor.u32 %v1329_v45, %v1328_v3  ;;  %v1340_v15 = vor.u32 %v1338_v62, %v1337_v4  ;;  %v1625_v25 = vor.u32 %v1624_v63, %v1622_v13  ;;  %v333_v10 = vsel %vm9401_vm5, 0, %v332_v48  ;;  %v1139_v47 = vld [vmem:[#allocation2 + $0xa4] sm:$0x8]  ;;  %v359_v48 = vld [vmem:[#allocation2 + $0xb8] sm:$0x8] }
  0xb1   : > { %v1630_v33 = vrot.slane %v1628_v7, 5  ;;  %v1621_v29 = vrot.slane %v1620_v53, 4  ;;  %v14893_v18 = vrot.slane %v9442_v30, 4  ;;  %v14733_v55 = vshrl.u32 %v10114_v12, 16  ;;  %334 = vst [vmem:[#allocation2 + $0x4] sm:$0x8] %v333_v10 }
  0xb2   : > { %v1341_v3 = vsel %vm9518_vm9, %v1333_v35, %v1340_v15  ;;  %v1626_v43 = vrot.slane %v1625_v25, 4  ;;  %v1777_v30 = vld [vmem:[#allocation2 + $0xa4] sm:$0x8]  ;;  %v1321_v4 = vshrl.u32 %v1139_v47, 16  ;;  %v476_v53 = vld [vmem:[#allocation2 + $0x18] sm:$0x8] }
  0xb3   : > { %v10141_v42 = vsel %vm9518_vm9, %v14893_v18, %v9454_v36  ;;  %2811 = vrot.lane.b32.xlu0 %v8204_v61, %s9286_s19  ;;  %v1948_v36 = vshll.u32 %v10114_v12, 16  ;;  %v1623_v63 = vsel %vm9580_vm12, %v1621_v29, %v1622_v13  ;;  %v1940_v7 = vshrl.u32 %v1777_v30, 16  ;;  %v10156_v35 = vpop.permute.xlu0 %2687  ;;  %v304_v29 = vld [vmem:[%s9412_s17 + $0x68] sm:$0xf] }
  0xb4   : > { %v1947_v61 = vrot.slane %v14733_v55, 7  ;;  %2621 = vrot.lane.b32.xlu1 %v8173_v16, %s9290_s23  ;;  %v1631_v15 = vsel %vm9580_vm12, %v1626_v43, %v1630_v33  ;;  %v14734_v25 = vshrl.u32 %v10127_v44, 16  ;;  %v411_v13 = vsel %vm9417_vm7, 0, %v410_v56  ;;  %v305_v16 = vld [vmem:[%s9412_s17 + $0x6c] sm:$0xf] }
  0xb5   : > { %v8109_v18 = vrot.slane %v1321_v4, 11  ;;  %v8220_v47 = vcombine.low %v1623_v63, %v1631_v15  ;;  %v8124_v30 = vrot.slane %v1940_v7, 11  ;;  %412 = vst [vmem:[#allocation2 + $0xb0] sm:$0x1] %v411_v13  ;;  %467 = vst.msk [vmem:[#allocation2 + $0x120] sm:$0xf] %vm310_vm0, %v304_v29  ;;  %v10188_v15 = vpop.permute.xlu1 %2961 }
  0xb6   : > { %v1950_v55 = vor.u32 %v1948_v36, %v1947_v61  ;;  %v1952_v33 = vrot.slane %v1947_v61, 4  ;;  %v1956_v43 = vrot.slane %v14734_v25, 7  ;;  %v1632_v10 = vrot.slane %v1326_v2, 4  ;;  %v10176_v4 = vld [vmem:[#allocation2 + $0xbc] sm:$0xf] }
  0xb7   : > { %v1633_v56 = vrot.slane %v1329_v45, 5  ;;  %468 = vst.msk [vmem:[#allocation2 + $0x124] sm:$0xf] %vm310_vm0, %v305_v16  ;;  %v1332_v63 = vsel %vm9518_vm9, %v8109_v18, %v1331_v46  ;;  %2891 = vrot.lane.b32.xlu0 %v8220_v47, %s9291_s29  ;;  %v1636_v61 = vrot.slane %v1338_v62, 5  ;;  %v1638_v2 = vrot.slane %v1335_v0, 4  ;;  %v10190_v45 = vpop.permute.xlu0 %2959 }
  0xb8   : > { %v1951_v7 = vsel %vm9518_vm9, %v8124_v30, %v1950_v55  ;;  %v8189_v13 = vcombine.low %v1332_v63, %v1341_v3  ;;  %vm3183_vm13 = vcmask 31744   ;;  %v14894_v29 = vshll.u32 %v10127_v44, 16  ;;  %v10194_v16 = vld [vmem:[#allocation2 + $0xc0] sm:$0xf]  ;;  %v473_v55 = vld [vmem:[#allocation2 + $0x4] sm:$0x8] }
  0xb9   : > { %v1634_v18 = vor.u32 %v1633_v56, %v1632_v10  ;;  %v546_v47 = vshrl.u32 %v476_v53, 16  ;;  %v1639_v30 = vor.u32 %v1638_v2, %v1636_v61  ;;  %v558_v62 = vrot.slane %v9493_v11, 4 }
  0xba   : > { %v1959_v46 = vor.u32 %v14894_v29, %v1956_v43  ;;  %v360_v0 = vsel %vm9401_vm5, 0, %v359_v48  ;;  %v14737_v25 = vshrl.u32 %v10176_v4, 16  ;;  %2701 = vrot.lane.b32.xlu1 %v8189_v13, %s9288_s21  ;;  %v524_v3 = vshrl.u32 %v473_v55, 16 }
  0xbb   : > { %v1635_v43 = vrot.slane %v1634_v18, 4  ;;  %v8087_v10 = vrot.slane %v546_v47, 11  ;;  %361 = vst [vmem:[#allocation2 + $0xb8] sm:$0x8] %v360_v0  ;;  %v566_v56 = vsel %vm9518_vm9, %v558_v62, %v9488_v5  ;;  %v8252_v11 = vcombine.low %v10114_v12, %v10127_v44  ;;  %v10210_v2 = vpop.permute.xlu0 %2879  ;;  %v10218_v0 = vpop.permute.xlu1 %2609 }
  0xbc   : > { %v1960_v63 = vsel %vm9518_vm9, %v1952_v33, %v1959_v46  ;;  %v1969_v48 = vrot.slane %v14737_v25, 7  ;;  %v8086_v13 = vrot.slane %v524_v3, 11  ;;  %v1525_v29 = vld [vmem:[#allocation2 + $0xb0] sm:$0x1]  ;;  %v1640_v55 = vrot.slane %v1639_v30, 4 }
  0xbd   : > { %v8236_v53 = vcombine.low %v1951_v7, %v1960_v63  ;;  %v557_v33 = vsel %vm9518_vm9, %v8087_v10, %v9507_v20  ;;  %v14736_v7 = vshll.u32 %v10176_v4, 16  ;;  %v1642_v5 = vshll.u32 %v1525_v29, 16  ;;  %v2165_v62 = vld [vmem:[#allocation2 + $0xb0] sm:$0x1] }
  0xbe   : > { %v8135_v46 = vcombine.low %v557_v33, %v566_v56  ;;  %v1974_v18 = vrot.slane %v1969_v48, 4  ;;  %v14735_v47 = vshrl.u32 %v10194_v16, 16  ;;  %v14895_v30 = vcombine.low %v10088_v57, %v10091_v14  ;;  %v883_v32 = vld [vmem:[#allocation2 + $0xb0] sm:$0x1] }
  0xbf   : > { %2971 = vrot.lane.b32.xlu0 %v8236_v53, %s9289_s22  ;;  %v535_v20 = vsel %vm9518_vm9, %v8086_v13, %v9457_v37  ;;  %v1637_v3 = vsel %vm9580_vm12, %v1635_v43, %v1636_v61  ;;  %v1979_v63 = vshll.u32 %v10194_v16, 16  ;;  %v14896_v10 = vshrl.u32 %v10114_v12, 16 }
  0xc0   : > { %2813 = vrot.lane.b32.xlu1 %v14895_v30, %s9286_s19  ;;  %v10233_v56 = vcombine.low %v535_v20, %v10141_v42  ;;  %v1644_v29 = vrot.slane %v1642_v5, 5  ;;  %v1972_v57 = vor.u32 %v14736_v7, %v1969_v48  ;;  %v1978_v14 = vrot.slane %v14735_v47, 7  ;;  %v10239_v33 = vpop.permute.xlu0 %3151  ;;  %v10247_v20 = vld [vmem:[#allocation2 + $0xa8] sm:$0xf]  ;;  %v10264_v7 = vpop.permute.xlu1 %2881 }
  0xc1   : > { %v2259_v53 = vrot.slane %v14896_v10, 4  ;;  %v2260_v37 = vrot.slane %v1948_v36, 5  ;;  %v14897_v61 = vshll.u32 %v10127_v44, 16  ;;  %v14898_v13 = vshrl.u32 %v10127_v44, 16 }
  0xc2   : > { %v2269_v42 = vshll.u32 %v2165_v62, 16  ;;  %v1645_v48 = vsel %vm9580_vm12, %v1640_v55, %v1644_v29  ;;  %v10253_v5 = vsel %vm3183_vm13, %v8135_v46, %v10062_v41  ;;  %v1780_v12 = vld [vmem:[#allocation2 + $0xb8] sm:$0x8]  ;;  %v1981_v36 = vor.u32 %v1979_v63, %v1978_v14 }
  0xc3   : > { %v2263_v43 = vrot.slane %v14897_v61, 5  ;;  %v2265_v30 = vrot.slane %v14898_v13, 4  ;;  %3083 = vrot.lane.b32.xlu0 %v8252_v11, %s9287_s20  ;;  %v8253_v10 = vcombine.low %v10176_v4, %v10194_v16  ;;  %v10258_v61 = vld [vmem:[#allocation2 + $0xac] sm:$0xf]  ;;  %v8221_v44 = vcombine.low %v1637_v3, %v1645_v48  ;;  %v413_v11 = vld [vmem:[#allocation2 + $0xc4] sm:$0x1] }
  0xc4   : > { %v1962_v62 = vshrl.u32 %v1780_v12, 16  ;;  %v2261_v13 = vor.u32 %v2260_v37, %v2259_v53  ;;  %v1982_v55 = vsel %vm9518_vm9, %v1974_v18, %v1981_v36  ;;  %v2271_v29 = vrot.slane %v2269_v42, 5  ;;  %v10268_v53 = vpop.permute.xlu0 %2531  ;;  %v10273_v48 = vld [vmem:[#allocation2 + $0xbc] sm:$0xf] }
  0xc5   : > { %v2266_v47 = vor.u32 %v2265_v30, %v2263_v43  ;;  %v705_v41 = vshrl.u32 %v10247_v20, 16  ;;  %v708_v46 = vshll.u32 %v10247_v20, 16  ;;  %2893 = vrot.lane.b32.xlu1 %v8221_v44, %s9291_s29  ;;  %v714_v3 = vshrl.u32 %v10258_v61, 16 }
  0xc6   : > { %v8125_v14 = vrot.slane %v1962_v62, 11  ;;  %v2262_v25 = vrot.slane %v2261_v13, 4  ;;  %v717_v18 = vshll.u32 %v10258_v61, 16  ;;  %vm3232_vm14 = vcmask 64512  }
  0xc7   : > { %v2267_v49 = vrot.slane %v2266_v47, 4  ;;  %v10270_v37 = vrot.slane %v705_v41, 7  ;;  %v1006_v30 = vrot.slane %v705_v41, 4  ;;  %v1007_v42 = vrot.slane %v708_v46, 5 }
  0xc8   : > { %v1973_v12 = vsel %vm9518_vm9, %v8125_v14, %v1972_v57  ;;  %v2264_v47 = vsel %vm9580_vm12, %v2262_v25, %v2263_v43  ;;  %v716_v44 = vrot.slane %v714_v3, 7  ;;  %v1012_v41 = vrot.slane %v714_v3, 4 }
  0xc9   : > { %14899 = vst [vmem:[#allocation16_spill] sm:$0xff] %v10270_v37  ;;  %v2272_v36 = vsel %vm9580_vm12, %v2267_v49, %v2271_v29  ;;  %v8237_v62 = vcombine.low %v1973_v12, %v1982_v55  ;;  %v10282_v26 = vor.u32 %v708_v46, %v10270_v37  ;;  %v8158_v57 = vcombine.low %v10247_v20, %v10258_v61  ;;  %v306_v55 = vld [vmem:[%s9412_s17 + $0x70] sm:$0xf]  ;;  %v307_v29 = vld [vmem:[%s9412_s17 + $0x74] sm:$0xf] }
  0xca   : > { %v8268_v13 = vcombine.low %v2264_v47, %v2272_v36  ;;  %v10286_v59 = vor.u32 %v717_v18, %v716_v44  ;;  %v414_v25 = vsel %vm9417_vm7, 0, %v413_v11  ;;  %v14902_v49 = vshrl.u32 %v10176_v4, 16  ;;  %v10304_v11 = vpop.permute.xlu1 %2607  ;;  %469 = vst.msk [vmem:[#allocation2 + $0x134] sm:$0xf] %vm310_vm0, %v306_v55  ;;  %470 = vst.msk [vmem:[#allocation2 + $0x138] sm:$0xf] %vm310_vm0, %v307_v29 }
  0xcb   : > { %14900 = vst [vmem:[#allocation17_spill] sm:$0xff] %v10282_v26  ;;  %2973 = vrot.lane.b32.xlu1 %v8237_v62, %s9289_s22  ;;  %415 = vst [vmem:[#allocation2 + $0xc4] sm:$0x1] %v414_v25  ;;  %v14903_v46 = vshll.u32 %v10176_v4, 16  ;;  %v10300_v3 = vrot.slane %v1979_v63, 5  ;;  %v14904_v20 = vshrl.u32 %v10194_v16, 16  ;;  %v1008_v12 = vor.u32 %v1007_v42, %v1006_v30  ;;  %v10310_v4 = vpop.permute.xlu0 %2611 }
  0xcc   : > { %14901 = vst [vmem:[#allocation18_spill] sm:$0xff] %v10286_v59  ;;  %v2273_v43 = vrot.slane %v14902_v49, 4  ;;  %3163 = vrot.lane.b32.xlu0 %v8268_v13, %s9292_s8  ;;  %v1010_v47 = vrot.slane %v717_v18, 5  ;;  %v1016_v36 = vshll.u32 %v883_v32, 16  ;;  %v727_v44 = vshrl.u32 %v10273_v48, 16 }
  0xcd   : > { %v2274_v14 = vrot.slane %v14903_v46, 5  ;;  %v2279_v61 = vrot.slane %v14904_v20, 4  ;;  %v730_v62 = vshll.u32 %v10273_v48, 16  ;;  %v1009_v16 = vrot.slane %v1008_v12, 4  ;;  %v1142_v49 = vld [vmem:[#allocation2 + $0xb8] sm:$0x8] }
  0xce   : > { %v736_v30 = vshrl.u32 %v10284_v22, 16  ;;  %v10317_v42 = vsel %vm3183_vm13, %v10233_v56, %v10026_v60  ;;  %v1013_v25 = vor.u32 %v1012_v41, %v1010_v47  ;;  %v1018_v18 = vrot.slane %v1016_v36, 5  ;;  %v10329_v41 = vld [vmem:[#allocation2 + $0xbc] sm:$0xf] }
  0xcf   : > { %v2275_v63 = vor.u32 %v2274_v14, %v2273_v43  ;;  %v2280_v13 = vor.u32 %v2279_v61, %v10300_v3  ;;  %v10319_v32 = vrot.slane %v727_v44, 7  ;;  %3085 = vrot.lane.b32.xlu1 %v8253_v10, %s9287_s20  ;;  %v739_v46 = vshll.u32 %v10284_v22, 16  ;;  %v10331_v61 = vpop.permute.xlu1 %3153 }
  0xd0   : > { %2543 = vrot.lane.b32.xlu0 %v8158_v57, %s9285_s18  ;;  %v738_v29 = vrot.slane %v736_v30, 7  ;;  %v1011_v14 = vsel %vm9580_vm12, %v1009_v16, %v1010_v47  ;;  %v1014_v20 = vrot.slane %v1013_v25, 4  ;;  %v1020_v56 = vrot.slane %v727_v44, 4 }
  0xd1   : > { %14905 = vst [vmem:[#allocation19_spill] sm:$0xff] %v10319_v32  ;;  %v2276_v43 = vrot.slane %v2275_v63, 4  ;;  %v2281_v55 = vrot.slane %v2280_v13, 4  ;;  %v10327_v60 = vor.u32 %v730_v62, %v10319_v32  ;;  %v1021_v12 = vrot.slane %v730_v62, 5  ;;  %v10338_v63 = vld [vmem:[#allocation2 + $0xc0] sm:$0xf]  ;;  %v10342_v16 = vpop.permute.xlu0 %2691 }
  0xd2   : > { %v10336_v57 = vor.u32 %v739_v46, %v738_v29  ;;  %v1026_v36 = vrot.slane %v736_v30, 4  ;;  %v2166_v47 = vld [vmem:[#allocation2 + $0xc4] sm:$0x1]  ;;  %v1019_v13 = vsel %vm9580_vm12, %v1014_v20, %v1018_v18  ;;  %vm3265_vm15 = vcmask 97280  }
  0xd3   : > { %14906 = vst [vmem:[#allocation20_spill] sm:$0xff] %v10327_v60  ;;  %v2278_v10 = vsel %vm9580_vm12, %v2276_v43, %v10300_v3  ;;  %v1343_v44 = vshrl.u32 %v1142_v49, 16  ;;  %v2283_v25 = vshll.u32 %v2166_v47, 16  ;;  %v8174_v60 = vcombine.low %v1011_v14, %v1019_v13  ;;  %v884_v30 = vld [vmem:[#allocation2 + $0xc4] sm:$0x1]  ;;  %v10352_v49 = vpop.permute.xlu1 %2533 }
  0xd4   : > { %14907 = vst [vmem:[#allocation21_spill] sm:$0xff] %v10336_v57  ;;  %v3236_v3 = vsel %vm3232_vm14, %v10253_v5, %v10218_v0  ;;  %v1348_v62 = vshrl.u32 %v10329_v41, 16  ;;  %v1351_v18 = vshll.u32 %v10329_v41, 16  ;;  %v1357_v20 = vshrl.u32 %v10338_v63, 16 }
  0xd5   : > { %v3269_v43 = vsel %vm3265_vm15, %v3236_v3, %v10144_v23  ;;  %v8110_v29 = vrot.slane %v1343_v44, 11  ;;  %v2285_v57 = vrot.slane %v2283_v25, 5  ;;  %2623 = vrot.lane.b32.xlu0 %v8174_v60, %s9290_s23  ;;  %v1360_v47 = vshll.u32 %v10338_v63, 16  ;;  %v10356_v26 = vpop.permute.xlu0 %2803 }
  0xd6   : > { %v1350_v14 = vrot.slane %v1348_v62, 7  ;;  %v1022_v0 = vor.u32 %v1021_v12, %v1020_v56  ;;  %v1359_v5 = vrot.slane %v1357_v20, 7  ;;  %v1024_v13 = vrot.slane %v739_v46, 5 }
  0xd7   : > { %v1030_v32 = vshll.u32 %v884_v30, 16  ;;  %vm3298_vm2 = vcmask 130048   ;;  %v2286_v23 = vsel %vm9580_vm12, %v2281_v55, %v2285_v57  ;;  %v10362_v56 = vpop.permute.xlu1 %2613  ;;  %v8159_v46 = vcombine.low %v10273_v48, %v10284_v22  ;;  %v10370_v57 = vld [vmem:[#allocation2 + $0xd4] sm:$0xf] }
  0xd8   : > { %v1353_v44 = vor.u32 %v1351_v18, %v1350_v14  ;;  %v1355_v3 = vrot.slane %v1350_v14, 4  ;;  %v1023_v59 = vrot.slane %v1022_v0, 4  ;;  %v8269_v37 = vcombine.low %v2278_v10, %v2286_v23  ;;  %v1526_v0 = vld [vmem:[#allocation2 + $0xc4] sm:$0x1] }
  0xd9   : > { %v1362_v25 = vor.u32 %v1360_v47, %v1359_v5  ;;  %v1027_v24 = vor.u32 %v1026_v36, %v1024_v13  ;;  %v1032_v60 = vrot.slane %v1030_v32, 5  ;;  %vm3331_vm6 = vcmask 162816  }
  0xda   : > { %v1354_v12 = vsel %vm9518_vm9, %v8110_v29, %v1353_v44  ;;  %v1025_v55 = vsel %vm9580_vm12, %v1023_v59, %v1024_v13  ;;  %3165 = vrot.lane.b32.xlu1 %v8269_v37, %s9292_s8  ;;  %vm3364_vm8 = vcmask 195584   ;;  %v3302_v36 = vsel %vm3298_vm2, %v3269_v43, %v10085_v58  ;;  %v10382_v29 = vpop.permute.xlu0 %2883  ;;  %v479_v44 = vld [vmem:[#allocation2 + $0x2c] sm:$0x8]  ;;  %v14926_v1 = vld [vmem:[#allocation20_spill] sm:$0xff] }
  0xdb   : > { %v1363_v32 = vsel %vm9518_vm9, %v1355_v3, %v1362_v25  ;;  %v1028_v10 = vrot.slane %v1027_v24, 4  ;;  %v8206_v48 = vcombine.low %v10329_v41, %v10338_v63  ;;  %v363_v59 = vsel %vm9401_vm5, 0, %v362_v28 }
  0xdc   : > { %v8190_v22 = vcombine.low %v1354_v12, %v1363_v32  ;;  %v1370_v30 = vshrl.u32 %v10360_v19, 16  ;;  %v3335_v24 = vsel %vm3331_vm6, %v3302_v36, %v10264_v7  ;;  %364 = vst [vmem:[#allocation2 + $0xcc] sm:$0x8] %v363_v59  ;;  %v1373_v58 = vshll.u32 %v10360_v19, 16  ;;  %v10402_v3 = vpop.permute.xlu1 %2693 }
  0xdd   : > { %v1033_v37 = vsel %vm9580_vm12, %v1028_v10, %v1032_v60  ;;  %v1379_v43 = vshrl.u32 %v10370_v57, 16  ;;  %v1382_v63 = vshll.u32 %v10370_v57, 16  ;;  %v3234_v14 = vsel %vm3232_vm14, %v10317_v42, %v10304_v11 }
  0xde   : > { %2703 = vrot.lane.b32.xlu0 %v8190_v22, %s9288_s21  ;;  %v8175_v41 = vcombine.low %v1025_v55, %v1033_v37  ;;  %v1372_v28 = vrot.slane %v1370_v30, 7  ;;  %2545 = vrot.lane.b32.xlu1 %v8159_v46, %s9285_s18  ;;  %v3267_v5 = vsel %vm3265_vm15, %v3234_v14, %v10156_v35  ;;  %v1646_v13 = vrot.slane %v1348_v62, 4  ;;  %v10406_v11 = vpop.permute.xlu0 %2963  ;;  %v10422_v22 = vld [vmem:[#allocation2 + $0xd0] sm:$0xf] }
  0xdf   : > { %v1381_v7 = vrot.slane %v1379_v43, 7  ;;  %v1647_v23 = vrot.slane %v1351_v18, 5  ;;  %v3368_v25 = vsel %vm3364_vm8, %v3335_v24, %v10188_v15  ;;  %v1650_v12 = vrot.slane %v1360_v47, 5  ;;  %v9109_v47 = vld [vmem:[%s14726_s1 + $0x10] ss:$0 sps:$4 sm:$0x33]  }
  0xe0   : > { %v1377_v60 = vrot.slane %v1372_v28, 4  ;;  %v1652_v55 = vrot.slane %v1357_v20, 4  ;;  %v1656_v32 = vshll.u32 %v1526_v0, 16  ;;  %v1375_v35 = vor.u32 %v1373_v58, %v1372_v28 }
  0xe1   : > { %v1384_v42 = vor.u32 %v1382_v63, %v1381_v7  ;;  %v1648_v46 = vor.u32 %v1647_v23, %v1646_v13  ;;  %v10415_v62 = vsel %vm3298_vm2, %v3267_v5, %v10093_v6  ;;  %v568_v15 = vshrl.u32 %v479_v44, 16  ;;  %v308_v5 = vld [vmem:[%s9412_s17 + $0x78] sm:$0xf]  ;;  %v309_v13 = vld [vmem:[%s9412_s17 + $0x7c] sm:$0xf]  ;;  %s9293_s17 = smov 64  }
  0xe2   : > { %2815 = vrot.lane.b32.xlu0 %v8206_v48, %s9286_s19  ;;  %v580_v18 = vrot.slane %v9648_v50, 4  ;;  %2625 = vrot.lane.b32.xlu1 %v8175_v41, %s9290_s23  ;;  %v1653_v10 = vor.u32 %v1652_v55, %v1650_v12  ;;  %v1658_v36 = vrot.slane %v1656_v32, 5  ;;  %vm3397_vm10 = vcmask 228352   ;;  %v10424_v48 = vpop.permute.xlu1 %2805  ;;  %v10431_v41 = vpop.permute.xlu0 %3075  ;;  %471 = vst.msk [vmem:[#allocation2 + $0x148] sm:$0xf] %vm310_vm0, %v308_v5 }
  0xe3   : > { %v1649_v20 = vrot.slane %v1648_v46, 4  ;;  %v1145_v6 = vld [vmem:[#allocation2 + $0xcc] sm:$0x8]  ;;  %v8207_v50 = vcombine.low %v10360_v19, %v10370_v57  ;;  %v8088_v59 = vrot.slane %v568_v15, 11  ;;  %vm3430_vm11 = vcmask 261120  }
  0xe4   : > { %v588_v37 = vsel %vm9518_vm9, %v580_v18, %v9667_v31  ;;  %v1783_v24 = vld [vmem:[#allocation2 + $0xcc] sm:$0x8]  ;;  %v1365_v28 = vshrl.u32 %v1145_v6, 16  ;;  %v1385_v14 = vsel %vm9518_vm9, %v1377_v60, %v1384_v42  ;;  %v1654_v7 = vrot.slane %v1653_v10, 4  ;;  %v10442_v31 = vld [vmem:[#allocation2 + $0xd4] sm:$0xf] }
  0xe5   : > { %v1651_v0 = vsel %vm9580_vm12, %v1649_v20, %v1650_v12  ;;  %v579_v23 = vsel %vm9518_vm9, %v8088_v59, %v9654_v17  ;;  %vm3516_vm1 = vcmask 1041408   ;;  %v1984_v44 = vshrl.u32 %v1783_v24, 16  ;;  %472 = vst.msk [vmem:[#allocation2 + $0x14c] sm:$0xf] %vm310_vm0, %v309_v13  ;;  %v416_v32 = vld [vmem:[#allocation2 + $0xd8] sm:$0x1] }
  0xe6   : > { %v1989_v46 = vshrl.u32 %v10422_v22, 16  ;;  %v8111_v60 = vrot.slane %v1365_v28, 11  ;;  %v1659_v12 = vsel %vm9580_vm12, %v1654_v7, %v1658_v36  ;;  %v8136_v42 = vcombine.low %v579_v23, %v588_v37  ;;  %9029 = vmatprep.subr.msk.bf16.mxu0 %vm3516_vm1, %v9109_v47  ;;  %v482_v5 = vld [vmem:[#allocation2 + $0x40] sm:$0x8] }
  0xe7   : > { %v3518_v55 = vsel %vm3516_vm1, %v9109_v47, 0  ;;  %v8222_v15 = vcombine.low %v1651_v0, %v1659_v12  ;;  %v8126_v17 = vrot.slane %v1984_v44, 11  ;;  %v1992_v20 = vshll.u32 %v10422_v22, 16  ;;  %v10458_v47 = vpop.permute.xlu1 %2885 }
  0xe8   : > { %8948 = vmatpush3.bf16.msra.mxu0 %v3518_v55  ;;  %v1991_v18 = vrot.slane %v1989_v46, 7  ;;  %v1376_v10 = vsel %vm9518_vm9, %v8111_v60, %v1375_v35  ;;  %v3401_v6 = vsel %vm3397_vm10, %v3368_v25, %v10109_v51  ;;  %v1998_v36 = vshrl.u32 %v10442_v31, 16  ;;  %v10465_v35 = vpop.permute.xlu0 %3155 }
  0xe9   : > { %v2001_v59 = vshll.u32 %v10442_v31, 16  ;;  %v8191_v37 = vcombine.low %v1376_v10, %v1385_v14  ;;  %2895 = vrot.lane.b32.xlu0 %v8222_v15, %s9291_s29  ;;  %v417_v0 = vsel %vm9417_vm7, 0, %v416_v32  ;;  %v1660_v25 = vrot.slane %v1370_v30, 4  ;;  %v365_v32 = vld [vmem:[#allocation2 + $0xe0] sm:$0x8] }
  0xea   : > { %v1994_v24 = vor.u32 %v1992_v20, %v1991_v18  ;;  %v1996_v28 = vrot.slane %v1991_v18, 4  ;;  %v2000_v51 = vrot.slane %v1998_v36, 7  ;;  %418 = vst [vmem:[#allocation2 + $0xd8] sm:$0x1] %v417_v0  ;;  %v1661_v14 = vrot.slane %v1373_v58, 5 }
  0xeb   : > { %v10475_v7 = vrot.slane %v1382_v63, 5  ;;  %2705 = vrot.lane.b32.xlu1 %v8191_v37, %s9288_s21  ;;  %v3192_v13 = vsel %vm3183_vm13, %v8136_v42, %v10268_v53  ;;  %v1666_v44 = vrot.slane %v1379_v43, 4  ;;  %v3333_v30 = vsel %vm3331_vm6, %v10415_v62, %v10210_v2  ;;  %v10489_v12 = vpop.permute.xlu1 %2965  ;;  %v10495_v15 = vld [vmem:[#allocation2 + $0xe4] sm:$0xf]  ;;  %v10505_v18 = vld [vmem:[#allocation2 + $0xe8] sm:$0xf] }
  0xec   : > { %v1995_v23 = vsel %vm9518_vm9, %v8126_v17, %v1994_v24  ;;  %v2003_v58 = vor.u32 %v2001_v59, %v2000_v51  ;;  %v1662_v60 = vor.u32 %v1661_v14, %v1660_v25  ;;  %v3366_v63 = vsel %vm3364_vm8, %v3333_v30, %v10190_v45 }
  0xed   : > { %vm3483_vm0 = vcmask 293888   ;;  %v1667_v53 = vor.u32 %v1666_v44, %v10475_v7  ;;  %v3399_v42 = vsel %vm3397_vm10, %v3366_v63, %v10120_v39  ;;  %v590_v55 = vshrl.u32 %v482_v5, 16  ;;  %v10507_v39 = vpop.permute.xlu0 %2535 }
  0xee   : > { %v602_v43 = vrot.slane %v9680_v38, 4  ;;  %v3434_v2 = vsel %vm3430_vm11, %v3401_v6, %v10331_v61  ;;  %v2004_v45 = vsel %vm9518_vm9, %v1996_v28, %v2003_v58  ;;  %v3238_v62 = vsel %vm3232_vm14, %v3192_v13, %v10310_v4 }
  0xef   : > { %v3432_v17 = vsel %vm3430_vm11, %v3399_v42, %v10239_v33  ;;  %2817 = vrot.lane.b32.xlu1 %v8207_v50, %s9286_s19  ;;  %v8238_v38 = vcombine.low %v1995_v23, %v2004_v45  ;;  %v1663_v61 = vrot.slane %v1662_v60, 4  ;;  %v8089_v10 = vrot.slane %v590_v55, 11  ;;  %v10532_v5 = vpop.permute.xlu1 %3077 }
  0xf0   : > { %8949 = vmatprep.mubr.msk.bf16.mxu0 %vm3483_vm0, %v3432_v17  ;;  %v610_v4 = vsel %vm9518_vm9, %v602_v43, %v9695_v54  ;;  %v1668_v6 = vrot.slane %v1667_v53, 4  ;;  %v8254_v33 = vcombine.low %v10422_v22, %v10442_v31  ;;  %v366_v37 = vsel %vm9401_vm5, 0, %v365_v32  ;;  %v505_v43 = vld [vmem:[#allocation2 + $0xd4] sm:$0xf] }
  0xf1   : > { %8950 = vmatmul.mubr.msk.bf16.vlgmr.msra.gmra.mrb[0].mxu0 %vm3483_vm0, %v3434_v2  ;;  %v2011_v19 = vshrl.u32 %v10495_v15, 16  ;;  %2975 = vrot.lane.b32.xlu0 %v8238_v38, %s9289_s22  ;;  %v1527_v57 = vld [vmem:[#allocation2 + $0xd8] sm:$0x1]  ;;  %v601_v50 = vsel %vm9518_vm9, %v8089_v10, %v9689_v52  ;;  %367 = vst [vmem:[#allocation2 + $0xe0] sm:$0x8] %v366_v37  ;;  %v2014_v54 = vshll.u32 %v10495_v15, 16  ;;  %v1665_v58 = vsel %vm9580_vm12, %v1663_v61, %v10475_v7  ;;  %v10545_v53 = vpop.permute.xlu0 %2615 }
  0xf2   : > { %v2020_v24 = vshrl.u32 %v10505_v18, 16  ;;  %v2023_v28 = vshll.u32 %v10505_v18, 16  ;;  %v1670_v0 = vshll.u32 %v1527_v57, 16  ;;  %v8137_v51 = vcombine.low %v601_v50, %v610_v4  ;;  %v2167_v23 = vld [vmem:[#allocation2 + $0xd8] sm:$0x1] }
  0xf3   : > { %v2013_v25 = vrot.slane %v2011_v19, 7  ;;  %v2287_v14 = vrot.slane %v1989_v46, 4  ;;  %v2288_v52 = vrot.slane %v1992_v20, 5  ;;  %v2291_v44 = vrot.slane %v2001_v59, 5  ;;  %v419_v57 = vld [vmem:[#allocation2 + $0xec] sm:$0x1] }
  0xf4   : > { %v2022_v13 = vrot.slane %v2020_v24, 7  ;;  %v2293_v30 = vrot.slane %v1998_v36, 4  ;;  %v1672_v60 = vrot.slane %v1670_v0, 5  ;;  %v3271_v46 = vsel %vm3265_vm15, %v3238_v62, %v10342_v16  ;;  %v504_v36 = vld [vmem:[#allocation2 + $0xd0] sm:$0xf] }
  0xf5   : > { %v2018_v63 = vrot.slane %v2013_v25, 4  ;;  %v3195_v42 = vsel %vm3183_vm13, %v8137_v51, %v10352_v49  ;;  %3087 = vrot.lane.b32.xlu0 %v8254_v33, %s9287_s20  ;;  %v2289_v20 = vor.u32 %v2288_v52, %v2287_v14  ;;  %v2016_v7 = vor.u32 %v2014_v54, %v2013_v25 }
  0xf6   : > { %v2025_v22 = vor.u32 %v2023_v28, %v2022_v13  ;;  %v2294_v31 = vor.u32 %v2293_v30, %v2291_v44  ;;  %v1673_v59 = vsel %vm9580_vm12, %v1668_v6, %v1672_v60  ;;  %v3240_v16 = vsel %vm3232_vm14, %v3195_v42, %v10362_v56  ;;  %v885_v42 = vld [vmem:[#allocation2 + $0xd8] sm:$0x1] }
  0xf7   : > { %v2297_v55 = vshll.u32 %v2167_v23, 16  ;;  %v8223_v32 = vcombine.low %v1665_v58, %v1673_v59  ;;  %v2290_v2 = vrot.slane %v2289_v20, 4  ;;  %v8255_v45 = vcombine.low %v10495_v15, %v10505_v18  ;;  %v10560_v4 = vpop.permute.xlu1 %3157 }
  0xf8   : > { %v2295_v49 = vrot.slane %v2294_v31, 4  ;;  %v1786_v62 = vld [vmem:[#allocation2 + $0xe0] sm:$0x8]  ;;  %v2026_v17 = vsel %vm9518_vm9, %v2018_v63, %v2025_v22  ;;  %v749_v61 = vshrl.u32 %v504_v36, 16  ;;  %v752_v10 = vshll.u32 %v504_v36, 16 }
  0xf9   : > { %v2299_v38 = vrot.slane %v2297_v55, 5  ;;  %2897 = vrot.lane.b32.xlu1 %v8223_v32, %s9291_s29  ;;  %v2006_v56 = vshrl.u32 %v1786_v62, 16  ;;  %v2292_v6 = vsel %vm9580_vm12, %v2290_v2, %v2291_v44  ;;  %v758_v33 = vshrl.u32 %v505_v43, 16  ;;  %v10569_v14 = vpop.permute.xlu0 %2695 }
  0xfa   : > { %v761_v37 = vshll.u32 %v505_v43, 16  ;;  %v10567_v0 = vrot.slane %v749_v61, 7  ;;  %v1034_v51 = vrot.slane %v749_v61, 4  ;;  %v1035_v25 = vrot.slane %v752_v10, 5 }
  0xfb   : > { %v2300_v50 = vsel %vm9580_vm12, %v2295_v49, %v2299_v38  ;;  %v8127_v13 = vrot.slane %v2006_v56, 11  ;;  %v760_v52 = vrot.slane %v758_v33, 7  ;;  %v1040_v30 = vrot.slane %v758_v33, 4  ;;  %v10576_v22 = vpop.permute.xlu1 %2537 }
  0xfc   : > { %v8270_v23 = vcombine.low %v2292_v6, %v2300_v50  ;;  %v10572_v58 = vor.u32 %v752_v10, %v10567_v0  ;;  %v8160_v44 = vcombine.low %v504_v36, %v505_v43  ;;  %v420_v60 = vsel %vm9417_vm7, 0, %v419_v57  ;;  %v10587_v36 = vld [vmem:[#allocation2 + $0xe4] sm:$0xf]  ;;  %v10589_v43 = vld [vmem:[#allocation2 + $0xe8] sm:$0xf] }
  0xfd   : > { %v2301_v63 = vrot.slane %v2011_v19, 4  ;;  %v2017_v20 = vsel %vm9518_vm9, %v8127_v13, %v2016_v7  ;;  %v10581_v31 = vor.u32 %v761_v37, %v760_v52  ;;  %421 = vst [vmem:[#allocation2 + $0xec] sm:$0x1] %v420_v60  ;;  %v2302_v59 = vrot.slane %v2014_v54, 5  ;;  %v10597_v49 = vpop.permute.xlu0 %2807  ;;  %v10616_v52 = vld [vmem:[#allocation2 + $0xe4] sm:$0xf] }
  0xfe   : > { %3167 = vrot.lane.b32.xlu0 %v8270_v23, %s9292_s8  ;;  %v10585_v55 = vrot.slane %v2023_v28, 5  ;;  %v8239_v19 = vcombine.low %v2017_v20, %v2026_v17  ;;  %v3304_v32 = vsel %vm3298_vm2, %v3271_v46, %v10356_v26  ;;  %v3273_v7 = vsel %vm3265_vm15, %v3240_v16, %v10402_v3  ;;  %v1148_v23 = vld [vmem:[#allocation2 + $0xe0] sm:$0x8] }
  0xff   : > { %v2307_v2 = vrot.slane %v2020_v24, 4  ;;  %v2303_v62 = vor.u32 %v2302_v59, %v2301_v63  ;;  %v1036_v54 = vor.u32 %v1035_v25, %v1034_v51  ;;  %v1038_v28 = vrot.slane %v761_v37, 5  ;;  %v10604_v3 = vpop.permute.xlu1 %2617 }
 0x100   : > { %v1044_v38 = vshll.u32 %v885_v42, 16  ;;  %2977 = vrot.lane.b32.xlu1 %v8239_v19, %s9289_s22  ;;  %v771_v17 = vshrl.u32 %v10587_v36, 16  ;;  %v774_v26 = vshll.u32 %v10587_v36, 16  ;;  %v780_v46 = vshrl.u32 %v10589_v43, 16  ;;  %v10629_v42 = vld [vmem:[#allocation2 + $0xe8] sm:$0xf] }
 0x101   : > { %v2308_v61 = vor.u32 %v2307_v2, %v10585_v55  ;;  %v2304_v24 = vrot.slane %v2303_v62, 4  ;;  %v1037_v16 = vrot.slane %v1036_v54, 4  ;;  %v1041_v10 = vor.u32 %v1040_v30, %v1038_v28 }
 0x102   : > { %2547 = vrot.lane.b32.xlu0 %v8160_v44, %s9285_s18  ;;  %v1046_v56 = vrot.slane %v1044_v38, 5  ;;  %v3337_v6 = vsel %vm3331_vm6, %v3304_v32, %v10382_v29  ;;  %v10609_v33 = vrot.slane %v771_v17, 7  ;;  %v782_v37 = vrot.slane %v780_v46, 7  ;;  %v10618_v30 = vpop.permute.xlu0 %2887 }
 0x103   : > { %v783_v57 = vshll.u32 %v10589_v43, 16  ;;  %v2309_v50 = vrot.slane %v2308_v61, 4  ;;  %v3306_v51 = vsel %vm3298_vm2, %v3273_v7, %v10424_v48  ;;  %v1039_v25 = vsel %vm9580_vm12, %v1037_v16, %v1038_v28 }
 0x104   : > { %v1042_v13 = vrot.slane %v1041_v10, 4  ;;  %3089 = vrot.lane.b32.xlu1 %v8255_v45, %s9287_s20  ;;  %v2168_v29 = vld [vmem:[#allocation2 + $0xec] sm:$0x1]  ;;  %v10625_v44 = vor.u32 %v774_v26, %v10609_v33  ;;  %v1048_v48 = vrot.slane %v771_v17, 4  ;;  %v1049_v63 = vrot.slane %v774_v26, 5  ;;  %v10639_v62 = vpop.permute.xlu1 %2697 }
 0x105   : > { %v10627_v60 = vor.u32 %v783_v57, %v782_v37  ;;  %v2306_v20 = vsel %vm9580_vm12, %v2304_v24, %v10585_v55  ;;  %v2311_v59 = vshll.u32 %v2168_v29, 16  ;;  %v1054_v15 = vrot.slane %v780_v46, 4  ;;  %v886_v2 = vld [vmem:[#allocation2 + $0xec] sm:$0x1]  ;;  %v10651_v29 = vld [vmem:[#allocation2 + $0xf8] sm:$0xf] }
 0x106   : > { %v1047_v19 = vsel %vm9580_vm12, %v1042_v13, %v1046_v56  ;;  %v8161_v45 = vcombine.low %v10587_v36, %v10589_v43  ;;  %v1387_v32 = vshrl.u32 %v1148_v23, 16  ;;  %v1392_v7 = vshrl.u32 %v10616_v52, 16  ;;  %v10644_v61 = vpop.permute.xlu0 %2967  ;;  %v368_v56 = vld [vmem:[#allocation2 + $0xf4] sm:$0x8] }
 0x107   : > { %v8176_v18 = vcombine.low %v1039_v25, %v1047_v19  ;;  %v2313_v54 = vrot.slane %v2311_v59, 5  ;;  %v1395_v28 = vshll.u32 %v10616_v52, 16  ;;  %v1401_v55 = vshrl.u32 %v10629_v42, 16  ;;  %v10657_v19 = vld [vmem:[#allocation2 + $0xfc] sm:$0xf] }
 0x108   : > { %v1404_v38 = vshll.u32 %v10629_v42, 16  ;;  %v8112_v17 = vrot.slane %v1387_v32, 11  ;;  %v1394_v26 = vrot.slane %v1392_v7, 7  ;;  %v1050_v36 = vor.u32 %v1049_v63, %v1048_v48  ;;  %v10653_v59 = vpop.permute.xlu1 %2809 }
 0x109   : > { %2627 = vrot.lane.b32.xlu0 %v8176_v18, %s9290_s23  ;;  %v1052_v43 = vrot.slane %v783_v57, 5  ;;  %v2314_v46 = vsel %vm9580_vm12, %v2309_v50, %v2313_v54  ;;  %v3370_v24 = vsel %vm3364_vm8, %v3337_v6, %v10406_v11  ;;  %v1403_v16 = vrot.slane %v1401_v55, 7 }
 0x10a   : > { %v1058_v10 = vshll.u32 %v886_v2, 16  ;;  %v8271_v37 = vcombine.low %v2306_v20, %v2314_v46  ;;  %v1397_v25 = vor.u32 %v1395_v28, %v1394_v26  ;;  %v1399_v13 = vrot.slane %v1394_v26, 4  ;;  %v10659_v11 = vpop.permute.xlu0 %3079 }
 0x10b   : > { %v1051_v23 = vrot.slane %v1050_v36, 4  ;;  %v3339_v57 = vsel %vm3331_vm6, %v3306_v51, %v10458_v47  ;;  %v1406_v48 = vor.u32 %v1404_v38, %v1403_v16  ;;  %v1055_v63 = vor.u32 %v1054_v15, %v1052_v43  ;;  %v1528_v36 = vld [vmem:[#allocation2 + $0xec] sm:$0x1] }
 0x10c   : > { %v1060_v50 = vrot.slane %v1058_v10, 5  ;;  %3169 = vrot.lane.b32.xlu1 %v8271_v37, %s9292_s8  ;;  %v1398_v6 = vsel %vm9518_vm9, %v8112_v17, %v1397_v25  ;;  %v3403_v18 = vsel %vm3397_vm10, %v3370_v24, %v10431_v41  ;;  %v369_v47 = vsel %vm9401_vm5, 0, %v368_v56  ;;  %v485_v24 = vld [vmem:[#allocation2 + $0x54] sm:$0x8] }
 0x10d   : > { %v1053_v20 = vsel %vm9580_vm12, %v1051_v23, %v1052_v43  ;;  %v1407_v51 = vsel %vm9518_vm9, %v1399_v13, %v1406_v48  ;;  %v1056_v15 = vrot.slane %v1055_v63, 4  ;;  %v8208_v32 = vcombine.low %v10616_v52, %v10629_v42  ;;  %370 = vst [vmem:[#allocation2 + $0xf4] sm:$0x8] %v369_v47 }
 0x10e   : > { %v1414_v2 = vshrl.u32 %v10651_v29, 16  ;;  %v8192_v54 = vcombine.low %v1398_v6, %v1407_v51  ;;  %v1423_v17 = vshrl.u32 %v10657_v19, 16  ;;  %v1426_v26 = vshll.u32 %v10657_v19, 16 }
 0x10f   : > { %v3436_v41 = vsel %vm3430_vm11, %v3403_v18, %v10465_v35  ;;  %v1061_v43 = vsel %vm9580_vm12, %v1056_v15, %v1060_v50  ;;  %v1417_v52 = vshll.u32 %v10651_v29, 16  ;;  %v1674_v42 = vrot.slane %v1392_v7, 4  ;;  %v10689_v37 = vpop.permute.xlu1 %2889 }
 0x110   : > { %v1416_v46 = vrot.slane %v1414_v2, 7  ;;  %8953 = vmatprep.mubr.msk.bf16.mxu0 %vm3483_vm0, %v3436_v41  ;;  %2549 = vrot.lane.b32.xlu1 %v8161_v45, %s9285_s18  ;;  %v8177_v16 = vcombine.low %v1053_v20, %v1061_v43  ;;  %v1425_v35 = vrot.slane %v1423_v17, 7  ;;  %v1675_v10 = vrot.slane %v1395_v28, 5  ;;  %v10693_v48 = vpop.permute.xlu0 %3159 }
 0x111   : > { %2707 = vrot.lane.b32.xlu0 %v8192_v54, %s9288_s21  ;;  %v1678_v56 = vrot.slane %v1404_v38, 5  ;;  %v3372_v25 = vsel %vm3364_vm8, %v3339_v57, %v10489_v12  ;;  %v1680_v7 = vrot.slane %v1401_v55, 4  ;;  %v1684_v23 = vshll.u32 %v1528_v36, 16  ;;  %v10702_v57 = vld [vmem:[#allocation2 + $0xf8] sm:$0xf] }
 0x112   : > { %v1421_v13 = vrot.slane %v1416_v46, 4  ;;  %v1428_v45 = vor.u32 %v1426_v26, %v1425_v35  ;;  %v3405_v63 = vsel %vm3397_vm10, %v3372_v25, %v10532_v5  ;;  %v1676_v50 = vor.u32 %v1675_v10, %v1674_v42  ;;  %v10715_v36 = vld [vmem:[#allocation2 + $0xfc] sm:$0xf] }
 0x113   : > { %v612_v6 = vshrl.u32 %v485_v24, 16  ;;  %v1681_v28 = vor.u32 %v1680_v7, %v1678_v56  ;;  %v1686_v38 = vrot.slane %v1684_v23, 5  ;;  %v624_v20 = vrot.slane %v9825_v34, 4  ;;  %v10710_v34 = vpop.permute.xlu1 %2969 }
 0x114   : > { %v3438_v12 = vsel %vm3430_vm11, %v3405_v63, %v10560_v4  ;;  %2629 = vrot.lane.b32.xlu1 %v8177_v16, %s9290_s23  ;;  %v1151_v55 = vld [vmem:[#allocation2 + $0xf4] sm:$0x8]  ;;  %v1419_v18 = vor.u32 %v1417_v52, %v1416_v46  ;;  %v1429_v5 = vsel %vm9518_vm9, %v1421_v13, %v1428_v45  ;;  %v1677_v47 = vrot.slane %v1676_v50, 4  ;;  %v422_v16 = vld [vmem:[#allocation2 + $0x100] sm:$0x1]  ;;  %v10725_v35 = vpop.permute.xlu0 %2539 }
 0x115   : > { %2819 = vrot.lane.b32.xlu0 %v8208_v32, %s9286_s19  ;;  %v8090_v51 = vrot.slane %v612_v6, 11  ;;  %v1789_v15 = vld [vmem:[#allocation2 + $0xf4] sm:$0x8]  ;;  %v1409_v54 = vshrl.u32 %v1151_v55, 16  ;;  %v1682_v4 = vrot.slane %v1681_v28, 4  ;;  %v632_v41 = vsel %vm9518_vm9, %v624_v20, %v9847_v21  ;;  %8954 = vmatmul.mubr.msk.bf16.gmra.mrb[4].mxu0 %vm3483_vm0, %v3438_v12 }
 0x116   : > { %v2028_v32 = vshrl.u32 %v1789_v15, 16  ;;  %v1679_v43 = vsel %vm9580_vm12, %v1677_v47, %v1678_v56  ;;  %v2033_v42 = vshrl.u32 %v10702_v57, 16  ;;  %v2036_v24 = vshll.u32 %v10702_v57, 16  ;;  %v488_v28 = vld [vmem:[#allocation2 + $0x68] sm:$0x8] }
 0x117   : > { %v623_v46 = vsel %vm9518_vm9, %v8090_v51, %v9840_v27  ;;  %v8113_v21 = vrot.slane %v1409_v54, 11  ;;  %v1687_v10 = vsel %vm9580_vm12, %v1682_v4, %v1686_v38  ;;  %v2042_v23 = vshrl.u32 %v10715_v36, 16  ;;  %v10744_v47 = vld [vmem:[#allocation2 + $0x10c] sm:$0xf]  ;;  %v10746_v51 = vpop.permute.xlu1 %3081 }
 0x118   : > { %v8138_v25 = vcombine.low %v623_v46, %v632_v41  ;;  %v8128_v13 = vrot.slane %v2028_v32, 11  ;;  %v8224_v7 = vcombine.low %v1679_v43, %v1687_v10  ;;  %v2035_v56 = vrot.slane %v2033_v42, 7  ;;  %v14908_v43 = vld [vmem:[#allocation7_spill] sm:$0xff]  ;;  %v14909_v10 = vld [vmem:[#allocation9_spill] sm:$0xff] }
 0x119   : > { %v2045_v27 = vshll.u32 %v10715_v36, 16  ;;  %v1420_v45 = vsel %vm9518_vm9, %v8113_v21, %v1419_v18  ;;  %v8209_v63 = vcombine.low %v10651_v29, %v10657_v19  ;;  %v423_v50 = vsel %vm9417_vm7, 0, %v422_v16  ;;  %v371_v18 = vld [vmem:[#allocation2 + $0x108] sm:$0x8]  ;;  %v10760_v16 = vpop.permute.xlu0 %2619 }
 0x11a   : > { %v1688_v6 = vrot.slane %v1414_v2, 4  ;;  %v8193_v38 = vcombine.low %v1420_v45, %v1429_v5  ;;  %2899 = vrot.lane.b32.xlu0 %v8224_v7, %s9291_s29  ;;  %v2038_v20 = vor.u32 %v2036_v24, %v2035_v56  ;;  %v2040_v12 = vrot.slane %v2035_v56, 4  ;;  %424 = vst [vmem:[#allocation2 + $0x100] sm:$0x1] %v423_v50 }
 0x11b   : > { %v2044_v55 = vrot.slane %v2042_v23, 7  ;;  %v3198_v15 = vsel %vm3183_vm13, %v8138_v25, %v10507_v39  ;;  %v1689_v2 = vrot.slane %v1417_v52, 5  ;;  %v1692_v5 = vrot.slane %v1426_v26, 5  ;;  %v10764_v26 = vld [vmem:[#allocation2 + $0x110] sm:$0xf] }
 0x11c   : > { %v1694_v54 = vrot.slane %v1423_v17, 4  ;;  %2709 = vrot.lane.b32.xlu1 %v8193_v38, %s9288_s21  ;;  %v2039_v4 = vsel %vm9518_vm9, %v8128_v13, %v2038_v20  ;;  %v634_v32 = vshrl.u32 %v488_v28, 16  ;;  %v646_v46 = vrot.slane %v14908_v43, 4 }
 0x11d   : > { %v2047_v41 = vor.u32 %v2045_v27, %v2044_v55  ;;  %v1690_v39 = vor.u32 %v1689_v2, %v1688_v6  ;;  %v372_v52 = vsel %vm9401_vm5, 0, %v371_v18  ;;  %v2055_v19 = vshrl.u32 %v10744_v47, 16  ;;  %v14910_v6 = vld [vmem:[#allocation8_spill] sm:$0xff] }
 0x11e   : > { %v1695_v29 = vor.u32 %v1694_v54, %v1692_v5  ;;  %v8091_v21 = vrot.slane %v634_v32, 11  ;;  %v654_v25 = vsel %vm9518_vm9, %v646_v46, %v14909_v10  ;;  %v8256_v13 = vcombine.low %v10702_v57, %v10715_v36  ;;  %373 = vst [vmem:[#allocation2 + $0x108] sm:$0x8] %v372_v52  ;;  %v510_v10 = vld [vmem:[#allocation2 + $0xf8] sm:$0xf] }
 0x11f   : > { %v2048_v17 = vsel %vm9518_vm9, %v2040_v12, %v2047_v41  ;;  %v1691_v56 = vrot.slane %v1690_v39, 4  ;;  %v3242_v45 = vsel %vm3232_vm14, %v3198_v15, %v10545_v53  ;;  %v2057_v50 = vrot.slane %v2055_v19, 7  ;;  %v10785_v12 = vpop.permute.xlu1 %3161 }
 0x120   : > { %v8240_v7 = vcombine.low %v2039_v4, %v2048_v17  ;;  %2821 = vrot.lane.b32.xlu1 %v8209_v63, %s9286_s19  ;;  %v645_v28 = vsel %vm9518_vm9, %v8091_v21, %v14910_v6  ;;  %v2058_v38 = vshll.u32 %v10744_v47, 16  ;;  %v2064_v20 = vshrl.u32 %v10764_v26, 16 }
 0x121   : > { %v2067_v36 = vshll.u32 %v10764_v26, 16  ;;  %v1529_v53 = vld [vmem:[#allocation2 + $0x100] sm:$0x1]  ;;  %v1693_v55 = vsel %vm9580_vm12, %v1691_v56, %v1692_v5  ;;  %v1696_v18 = vrot.slane %v1695_v29, 4  ;;  %v8139_v63 = vcombine.low %v645_v28, %v654_v25  ;;  %v10800_v43 = vpop.permute.xlu0 %2699 }
 0x122   : > { %2979 = vrot.lane.b32.xlu0 %v8240_v7, %s9289_s22  ;;  %v10792_v15 = vsel %vm3265_vm15, %v3242_v45, %v10569_v14  ;;  %v2169_v2 = vld [vmem:[#allocation2 + $0x100] sm:$0x1]  ;;  %v1698_v54 = vshll.u32 %v1529_v53, 16  ;;  %v2066_v4 = vrot.slane %v2064_v20, 7  ;;  %v2315_v41 = vrot.slane %v2033_v42, 4 }
 0x123   : > { %v2316_v32 = vrot.slane %v2036_v24, 5  ;;  %v2062_v5 = vrot.slane %v2057_v50, 4  ;;  %v2319_v46 = vrot.slane %v2045_v27, 5  ;;  %v2321_v39 = vrot.slane %v2042_v23, 4  ;;  %v10806_v25 = vpop.permute.xlu1 %2541  ;;  %v511_v7 = vld [vmem:[#allocation2 + $0xfc] sm:$0xf] }
 0x124   : > { %v2325_v29 = vshll.u32 %v2169_v2, 16  ;;  %v1700_v52 = vrot.slane %v1698_v54, 5  ;;  %v3201_v14 = vsel %vm3183_vm13, %v8139_v63, %v10576_v22  ;;  %v2069_v17 = vor.u32 %v2067_v36, %v2066_v4 }
 0x125   : > { %v2317_v21 = vor.u32 %v2316_v32, %v2315_v41  ;;  %v1792_v57 = vld [vmem:[#allocation2 + $0x108] sm:$0x8]  ;;  %v2060_v42 = vor.u32 %v2058_v38, %v2057_v50  ;;  %v3244_v24 = vsel %vm3232_vm14, %v3201_v14, %v10604_v3  ;;  %v2322_v23 = vor.u32 %v2321_v39, %v2319_v46  ;;  %v10821_v4 = vpop.permute.xlu0 %2811 }
 0x126   : > { %3091 = vrot.lane.b32.xlu0 %v8256_v13, %s9287_s20  ;;  %v2327_v27 = vrot.slane %v2325_v29, 5  ;;  %v1701_v22 = vsel %vm9580_vm12, %v1696_v18, %v1700_v52  ;;  %v2050_v56 = vshrl.u32 %v1792_v57, 16  ;;  %v8257_v6 = vcombine.low %v10744_v47, %v10764_v26 }
 0x127   : > { %v2318_v45 = vrot.slane %v2317_v21, 4  ;;  %v8225_v28 = vcombine.low %v1693_v55, %v1701_v22  ;;  %v2070_v13 = vsel %vm9518_vm9, %v2062_v5, %v2069_v17  ;;  %v2323_v53 = vrot.slane %v2322_v23, 4  ;;  %v425_v5 = vld [vmem:[#allocation2 + $0x114] sm:$0x1]  ;;  %v10830_v14 = vpop.permute.xlu1 %2621 }
 0x128   : > { %v793_v50 = vshrl.u32 %v510_v10, 16  ;;  %v8129_v63 = vrot.slane %v2050_v56, 11  ;;  %v796_v2 = vshll.u32 %v510_v10, 16  ;;  %v802_v54 = vshrl.u32 %v511_v7, 16 }
 0x129   : > { %v2320_v3 = vsel %vm9580_vm12, %v2318_v45, %v2319_v46  ;;  %2901 = vrot.lane.b32.xlu1 %v8225_v28, %s9291_s29  ;;  %v2328_v18 = vsel %vm9580_vm12, %v2323_v53, %v2327_v27  ;;  %v805_v55 = vshll.u32 %v511_v7, 16  ;;  %v8162_v56 = vcombine.low %v510_v10, %v511_v7  ;;  %v887_v45 = vld [vmem:[#allocation2 + $0x100] sm:$0x1]  ;;  %v10840_v28 = vld [vmem:[#allocation2 + $0x10c] sm:$0xf] }
 0x12a   : > { %v10826_v41 = vrot.slane %v793_v50, 7  ;;  %v1062_v32 = vrot.slane %v793_v50, 4  ;;  %v2061_v39 = vsel %vm9518_vm9, %v8129_v63, %v2060_v42  ;;  %v8272_v29 = vcombine.low %v2320_v3, %v2328_v18  ;;  %v10851_v10 = vld [vmem:[#allocation2 + $0x110] sm:$0xf] }
 0x12b   : > { %v804_v52 = vrot.slane %v802_v54, 7  ;;  %v1063_v46 = vrot.slane %v796_v2, 5  ;;  %v8241_v17 = vcombine.low %v2061_v39, %v2070_v13  ;;  %v1066_v57 = vrot.slane %v805_v55, 5 }
 0x12c   : > { %v10833_v21 = vor.u32 %v796_v2, %v10826_v41  ;;  %v1068_v23 = vrot.slane %v802_v54, 4  ;;  %3171 = vrot.lane.b32.xlu0 %v8272_v29, %s9292_s8  ;;  %v426_v42 = vsel %vm9417_vm7, 0, %v425_v5  ;;  %v2329_v53 = vrot.slane %v2055_v19, 4  ;;  %v10860_v54 = vpop.permute.xlu0 %2891 }
 0x12d   : > { %v10836_v27 = vor.u32 %v805_v55, %v804_v52  ;;  %v1064_v22 = vor.u32 %v1063_v46, %v1062_v32  ;;  %2981 = vrot.lane.b32.xlu1 %v8241_v17, %s9289_s22  ;;  %427 = vst [vmem:[#allocation2 + $0x114] sm:$0x1] %v426_v42  ;;  %v2330_v50 = vrot.slane %v2058_v38, 5  ;;  %v10849_v63 = vrot.slane %v2067_v36, 5 }
 0x12e   : > { %v1069_v13 = vor.u32 %v1068_v23, %v1066_v57  ;;  %v3308_v7 = vsel %vm3298_vm2, %v10792_v15, %v10597_v49  ;;  %v3277_v3 = vsel %vm3265_vm15, %v3244_v24, %v10639_v62  ;;  %v2335_v2 = vrot.slane %v2064_v20, 4  ;;  %v10869_v20 = vpop.permute.xlu1 %2701 }
 0x12f   : > { %v1065_v19 = vrot.slane %v1064_v22, 4  ;;  %v2331_v47 = vor.u32 %v2330_v50, %v2329_v53  ;;  %v1072_v18 = vshll.u32 %v887_v45, 16  ;;  %v815_v36 = vshrl.u32 %v10840_v28, 16  ;;  %v1154_v22 = vld [vmem:[#allocation2 + $0x108] sm:$0x8] }
 0x130   : > { %v1070_v38 = vrot.slane %v1069_v13, 4  ;;  %2551 = vrot.lane.b32.xlu0 %v8162_v56, %s9285_s18  ;;  %v2336_v55 = vor.u32 %v2335_v2, %v10849_v63  ;;  %v818_v62 = vshll.u32 %v10840_v28, 16  ;;  %v824_v26 = vshrl.u32 %v10851_v10, 16  ;;  %v10886_v56 = vld [vmem:[#allocation2 + $0x10c] sm:$0xf] }
 0x131   : > { %v1067_v49 = vsel %vm9580_vm12, %v1065_v19, %v1066_v57  ;;  %3093 = vrot.lane.b32.xlu1 %v8257_v6, %s9287_s20  ;;  %v2332_v15 = vrot.slane %v2331_v47, 4  ;;  %v1074_v24 = vrot.slane %v1072_v18, 5  ;;  %v10872_v32 = vrot.slane %v815_v36, 7  ;;  %v10890_v50 = vld [vmem:[#allocation2 + $0x110] sm:$0xf] }
 0x132   : > { %v827_v5 = vshll.u32 %v10851_v10, 16  ;;  %v3341_v39 = vsel %vm3331_vm6, %v3308_v7, %v10618_v30  ;;  %v826_v29 = vrot.slane %v824_v26, 7  ;;  %v1076_v52 = vrot.slane %v815_v36, 4 }
 0x133   : > { %v1077_v46 = vrot.slane %v818_v62, 5  ;;  %v3310_v17 = vsel %vm3298_vm2, %v3277_v3, %v10653_v59  ;;  %v1075_v57 = vsel %vm9580_vm12, %v1070_v38, %v1074_v24  ;;  %v10882_v6 = vor.u32 %v818_v62, %v10872_v32  ;;  %v10892_v59 = vpop.permute.xlu0 %2971  ;;  %v10903_v62 = vpop.permute.xlu1 %2813 }
 0x134   : > { %v10884_v23 = vrot.slane %v827_v5, 5  ;;  %v2170_v42 = vld [vmem:[#allocation2 + $0x114] sm:$0x1]  ;;  %v8178_v45 = vcombine.low %v1067_v49, %v1075_v57  ;;  %v10888_v30 = vor.u32 %v827_v5, %v826_v29  ;;  %v1082_v53 = vrot.slane %v824_v26, 4  ;;  %v374_v29 = vld [vmem:[#allocation2 + $0x11c] sm:$0x8] }
 0x135   : > { %14911 = vst [vmem:[#allocation7_spill] sm:$0xff] %v10882_v6  ;;  %v1078_v13 = vor.u32 %v1077_v46, %v1076_v52  ;;  %v2334_v7 = vsel %vm9580_vm12, %v2332_v15, %v10849_v63  ;;  %v2337_v3 = vrot.slane %v2336_v55, 4  ;;  %v2339_v2 = vshll.u32 %v2170_v42, 16  ;;  %v888_v47 = vld [vmem:[#allocation2 + $0x114] sm:$0x1] }
 0x136   : > { %14912 = vst [vmem:[#allocation9_spill] sm:$0xff] %v10888_v30  ;;  %v8163_v19 = vcombine.low %v10840_v28, %v10851_v10  ;;  %2631 = vrot.lane.b32.xlu0 %v8178_v45, %s9290_s23  ;;  %v1083_v38 = vor.u32 %v1082_v53, %v10884_v23  ;;  %v1431_v18 = vshrl.u32 %v1154_v22, 16  ;;  %v1436_v36 = vshrl.u32 %v10886_v56, 16  ;;  %v10913_v42 = vld [vmem:[#allocation2 + $0x120] sm:$0xf] }
 0x137   : > { %v1439_v49 = vshll.u32 %v10886_v56, 16  ;;  %v2341_v26 = vrot.slane %v2339_v2, 5  ;;  %v1445_v63 = vshrl.u32 %v10890_v50, 16  ;;  %v1448_v55 = vshll.u32 %v10890_v50, 16  ;;  %v10915_v30 = vld [vmem:[#allocation2 + $0x124] sm:$0xf] }
 0x138   : > { %v1079_v15 = vrot.slane %v1078_v13, 4  ;;  %v3374_v28 = vsel %vm3364_vm8, %v3341_v39, %v10644_v61  ;;  %v8114_v10 = vrot.slane %v1431_v18, 11  ;;  %v1438_v24 = vrot.slane %v1436_v36, 7  ;;  %v10917_v61 = vpop.permute.xlu0 %3083  ;;  %v10934_v18 = vpop.permute.xlu1 %2893  ;;  %v11178_v6 = vld [vmem:[#allocation2 + $0x14c] sm:$0xf] }
 0x139   : > { %v1086_v5 = vshll.u32 %v888_v47, 16  ;;  %v2342_v52 = vsel %vm9580_vm12, %v2337_v3, %v2341_v26  ;;  %v3343_v46 = vsel %vm3331_vm6, %v3310_v17, %v10689_v37  ;;  %v1447_v57 = vrot.slane %v1445_v63, 7 }
 0x13a   : > { %v1084_v22 = vrot.slane %v1083_v38, 4  ;;  %v8273_v45 = vcombine.low %v2334_v7, %v2342_v52  ;;  %v1441_v53 = vor.u32 %v1439_v49, %v1438_v24  ;;  %v1443_v13 = vrot.slane %v1438_v24, 4 }
 0x13b   : > { %v1088_v2 = vrot.slane %v1086_v5, 5  ;;  %v1450_v39 = vor.u32 %v1448_v55, %v1447_v57  ;;  %v1081_v3 = vsel %vm9580_vm12, %v1079_v15, %v10884_v23  ;;  %v3407_v37 = vsel %vm3397_vm10, %v3374_v28, %v10659_v11  ;;  %v491_v5 = vld [vmem:[#allocation2 + $0x7c] sm:$0x8] }
 0x13c   : > { %v375_v17 = vsel %vm9401_vm5, 0, %v374_v29  ;;  %3173 = vrot.lane.b32.xlu1 %v8273_v45, %s9292_s8  ;;  %v1442_v7 = vsel %vm9518_vm9, %v8114_v10, %v1441_v53  ;;  %v3376_v47 = vsel %vm3364_vm8, %v3343_v46, %v10710_v34  ;;  %v8210_v38 = vcombine.low %v10886_v56, %v10890_v50  ;;  %v1530_v10 = vld [vmem:[#allocation2 + $0x114] sm:$0x1] }
 0x13d   : > { %376 = vst [vmem:[#allocation2 + $0x11c] sm:$0x8] %v375_v17  ;;  %v1458_v23 = vshrl.u32 %v10913_v42, 16  ;;  %v1451_v11 = vsel %vm9518_vm9, %v1443_v13, %v1450_v39  ;;  %v1089_v26 = vsel %vm9580_vm12, %v1084_v22, %v1088_v2  ;;  %v1467_v15 = vshrl.u32 %v10915_v30, 16  ;;  %v14913_v17 = vld [vmem:[#allocation10_spill] sm:$0xff] }
 0x13e   : > { %v1470_v28 = vshll.u32 %v10915_v30, 16  ;;  %v8194_v34 = vcombine.low %v1442_v7, %v1451_v11  ;;  %v1461_v50 = vshll.u32 %v10913_v42, 16  ;;  %v3440_v24 = vsel %vm3430_vm11, %v3407_v37, %v10693_v48  ;;  %v10952_v2 = vpop.permute.xlu0 %3163  ;;  %v10961_v7 = vld [vmem:[#allocation2 + $0x120] sm:$0xf] }
 0x13f   : > { %v1460_v56 = vrot.slane %v1458_v23, 7  ;;  %v1469_v29 = vrot.slane %v1467_v15, 7  ;;  %v1702_v52 = vrot.slane %v1436_v36, 4  ;;  %v1703_v46 = vrot.slane %v1439_v49, 5  ;;  %8957 = vmatprep.mubr.msk.bf16.mxu0 %vm3483_vm0, %v3440_v24 }
 0x140   : > { %v1706_v57 = vrot.slane %v1448_v55, 5  ;;  %2553 = vrot.lane.b32.xlu1 %v8163_v19, %s9285_s18  ;;  %2711 = vrot.lane.b32.xlu0 %v8194_v34, %s9288_s21  ;;  %v8179_v22 = vcombine.low %v1081_v3, %v1089_v26  ;;  %v1708_v53 = vrot.slane %v1445_v63, 4  ;;  %v1712_v13 = vshll.u32 %v1530_v10, 16  ;;  %v10963_v63 = vpop.permute.xlu1 %2973 }
 0x141   : > { %v1465_v45 = vrot.slane %v1460_v56, 4  ;;  %v1472_v48 = vor.u32 %v1470_v28, %v1469_v29  ;;  %v3409_v36 = vsel %vm3397_vm10, %v3376_v47, %v10746_v51  ;;  %v1704_v49 = vor.u32 %v1703_v46, %v1702_v52  ;;  %v10975_v52 = vld [vmem:[#allocation2 + $0x124] sm:$0xf] }
 0x142   : > { %v656_v55 = vshrl.u32 %v491_v5, 16  ;;  %v1709_v39 = vor.u32 %v1708_v53, %v1706_v57  ;;  %v1714_v37 = vrot.slane %v1712_v13, 5  ;;  %v668_v19 = vrot.slane %v14913_v17, 4  ;;  %v14914_v5 = vld [vmem:[#allocation12_spill] sm:$0xff]  ;;  %v428_v13 = vld [vmem:[#allocation2 + $0x128] sm:$0x1] }
 0x143   : > { %v3442_v3 = vsel %vm3430_vm11, %v3409_v36, %v10785_v12  ;;  %v1463_v26 = vor.u32 %v1461_v50, %v1460_v56  ;;  %v1473_v51 = vsel %vm9518_vm9, %v1465_v45, %v1472_v48  ;;  %v1705_v47 = vrot.slane %v1704_v49, 4  ;;  %v14915_v45 = vld [vmem:[#allocation11_spill] sm:$0xff] }
 0x144   : > { %v1157_v11 = vld [vmem:[#allocation2 + $0x11c] sm:$0x8]  ;;  %v8092_v10 = vrot.slane %v656_v55, 11  ;;  %8958 = vmatmul.mubr.msk.bf16.gmra.mrb[8].mxu0 %vm3483_vm0, %v3442_v3  ;;  %2633 = vrot.lane.b32.xlu1 %v8179_v22, %s9290_s23  ;;  %v1710_v24 = vrot.slane %v1709_v39, 4  ;;  %v676_v29 = vsel %vm9518_vm9, %v668_v19, %v14914_v5  ;;  %v2077_v22 = vshrl.u32 %v10961_v7, 16  ;;  %v10986_v39 = vpop.permute.xlu0 %2543 }
 0x145   : > { %v1795_v34 = vld [vmem:[#allocation2 + $0x11c] sm:$0x8]  ;;  %2823 = vrot.lane.b32.xlu0 %v8210_v38, %s9286_s19  ;;  %v1453_v12 = vshrl.u32 %v1157_v11, 16  ;;  %v1707_v46 = vsel %vm9580_vm12, %v1705_v47, %v1706_v57  ;;  %v2080_v38 = vshll.u32 %v10961_v7, 16  ;;  %v2086_v19 = vshrl.u32 %v10975_v52, 16 }
 0x146   : > { %v2072_v56 = vshrl.u32 %v1795_v34, 16  ;;  %v667_v53 = vsel %vm9518_vm9, %v8092_v10, %v14915_v45  ;;  %v1715_v36 = vsel %vm9580_vm12, %v1710_v24, %v1714_v37  ;;  %v2079_v57 = vrot.slane %v2077_v22, 7  ;;  %v494_v34 = vld [vmem:[#allocation2 + $0x90] sm:$0x8] }
 0x147   : > { %v8115_v48 = vrot.slane %v1453_v12, 11  ;;  %v8140_v49 = vcombine.low %v667_v53, %v676_v29  ;;  %v8226_v17 = vcombine.low %v1707_v46, %v1715_v36  ;;  %v2089_v3 = vshll.u32 %v10975_v52, 16  ;;  %v11000_v12 = vpop.permute.xlu1 %3085  ;;  %v11005_v46 = vld [vmem:[#allocation2 + $0x134] sm:$0xf] }
 0x148   : > { %v8130_v55 = vrot.slane %v2072_v56, 11  ;;  %v8211_v47 = vcombine.low %v10913_v42, %v10915_v30  ;;  %v429_v37 = vsel %vm9417_vm7, 0, %v428_v13  ;;  %v1716_v10 = vrot.slane %v1458_v23, 4  ;;  %v377_v56 = vld [vmem:[#allocation2 + $0x130] sm:$0x8]  ;;  %v11024_v30 = vpop.permute.xlu0 %2623 }
 0x149   : > { %v1464_v11 = vsel %vm9518_vm9, %v8115_v48, %v1463_v26  ;;  %2903 = vrot.lane.b32.xlu0 %v8226_v17, %s9291_s29  ;;  %v2082_v5 = vor.u32 %v2080_v38, %v2079_v57  ;;  %v2084_v29 = vrot.slane %v2079_v57, 4  ;;  %v2088_v26 = vrot.slane %v2086_v19, 7  ;;  %430 = vst [vmem:[#allocation2 + $0x128] sm:$0x1] %v429_v37  ;;  %v14916_v17 = vld [vmem:[#allocation13_spill] sm:$0xff] }
 0x14a   : > { %v8195_v24 = vcombine.low %v1464_v11, %v1473_v51  ;;  %v3204_v45 = vsel %vm3183_vm13, %v8140_v49, %v10725_v35  ;;  %v1717_v23 = vrot.slane %v1461_v50, 5  ;;  %v1720_v51 = vrot.slane %v1470_v28, 5  ;;  %v11021_v50 = vld [vmem:[#allocation2 + $0x138] sm:$0xf] }
 0x14b   : > { %v1722_v53 = vrot.slane %v1467_v15, 4  ;;  %v2083_v13 = vsel %vm9518_vm9, %v8130_v55, %v2082_v5  ;;  %v2091_v48 = vor.u32 %v2089_v3, %v2088_v26  ;;  %v678_v36 = vshrl.u32 %v494_v34, 16  ;;  %v14917_v55 = vld [vmem:[#allocation15_spill] sm:$0xff] }
 0x14c   : > { %2713 = vrot.lane.b32.xlu1 %v8195_v24, %s9288_s21  ;;  %v690_v57 = vrot.slane %v14916_v17, 4  ;;  %v1718_v11 = vor.u32 %v1717_v23, %v1716_v10  ;;  %v378_v42 = vsel %vm9401_vm5, 0, %v377_v56  ;;  %v2099_v28 = vshrl.u32 %v11005_v46, 16  ;;  %v11037_v56 = vpop.permute.xlu1 %3165 }
 0x14d   : > { %v1723_v35 = vor.u32 %v1722_v53, %v1720_v51  ;;  %v2092_v15 = vsel %vm9518_vm9, %v2084_v29, %v2091_v48  ;;  %v8093_v49 = vrot.slane %v678_v36, 11  ;;  %v8258_v10 = vcombine.low %v10961_v7, %v10975_v52  ;;  %379 = vst [vmem:[#allocation2 + $0x130] sm:$0x8] %v378_v42  ;;  %v14918_v29 = vld [vmem:[#allocation14_spill] sm:$0xff] }
 0x14e   : > { %v698_v37 = vsel %vm9518_vm9, %v690_v57, %v14917_v55  ;;  %v8242_v34 = vcombine.low %v2083_v13, %v2092_v15  ;;  %v1719_v24 = vrot.slane %v1718_v11, 4  ;;  %v3246_v5 = vsel %vm3232_vm14, %v3204_v45, %v10760_v16 }
 0x14f   : > { %v2101_v26 = vrot.slane %v2099_v28, 7  ;;  %v689_v23 = vsel %vm9518_vm9, %v8093_v49, %v14918_v29  ;;  %v2102_v53 = vshll.u32 %v11005_v46, 16  ;;  %v2108_v52 = vshrl.u32 %v11021_v50, 16  ;;  %v11063_v29 = vld [vmem:[#allocation2 + $0x120] sm:$0xf] }
 0x150   : > { %2825 = vrot.lane.b32.xlu1 %v8211_v47, %s9286_s19  ;;  %v2111_v13 = vshll.u32 %v11021_v50, 16  ;;  %2983 = vrot.lane.b32.xlu0 %v8242_v34, %s9289_s22  ;;  %v1531_v16 = vld [vmem:[#allocation2 + $0x128] sm:$0x1]  ;;  %v1721_v45 = vsel %vm9580_vm12, %v1719_v24, %v1720_v51  ;;  %v1724_v48 = vrot.slane %v1723_v35, 4  ;;  %v8141_v36 = vcombine.low %v689_v23, %v698_v37  ;;  %v11057_v35 = vpop.permute.xlu0 %2703  ;;  %v11068_v23 = vld [vmem:[#allocation2 + $0x124] sm:$0xf] }
 0x151   : > { %v3279_v47 = vsel %vm3265_vm15, %v3246_v5, %v10800_v43  ;;  %v2171_v17 = vld [vmem:[#allocation2 + $0x128] sm:$0x1]  ;;  %v1726_v57 = vshll.u32 %v1531_v16, 16  ;;  %v2110_v11 = vrot.slane %v2108_v52, 7  ;;  %v2343_v42 = vrot.slane %v2077_v22, 4  ;;  %14919 = vst [vmem:[#allocation8_spill] sm:$0xff] %v11068_v23  ;;  %v11070_v16 = vpop.permute.xlu1 %2545 }
 0x152   : > { %v2344_v15 = vrot.slane %v2080_v38, 5  ;;  %v2106_v49 = vrot.slane %v2101_v26, 4  ;;  %v2347_v55 = vrot.slane %v2089_v3, 5  ;;  %v2349_v34 = vrot.slane %v2086_v19, 4 }
 0x153   : > { %v2353_v51 = vshll.u32 %v2171_v17, 16  ;;  %v1728_v37 = vrot.slane %v1726_v57, 5  ;;  %v3207_v43 = vsel %vm3183_vm13, %v8141_v36, %v10806_v25  ;;  %v2113_v24 = vor.u32 %v2111_v13, %v2110_v11 }
 0x154   : > { %v2345_v5 = vor.u32 %v2344_v15, %v2343_v42  ;;  %3095 = vrot.lane.b32.xlu0 %v8258_v10, %s9287_s20  ;;  %v1798_v7 = vld [vmem:[#allocation2 + $0x130] sm:$0x8]  ;;  %v2104_v22 = vor.u32 %v2102_v53, %v2101_v26  ;;  %v3248_v38 = vsel %vm3232_vm14, %v3207_v43, %v10830_v14  ;;  %v2350_v19 = vor.u32 %v2349_v34, %v2347_v55 }
 0x155   : > { %v2355_v3 = vrot.slane %v2353_v51, 5  ;;  %v1729_v25 = vsel %vm9580_vm12, %v1724_v48, %v1728_v37  ;;  %v2094_v36 = vshrl.u32 %v1798_v7, 16  ;;  %v8259_v57 = vcombine.low %v11005_v46, %v11021_v50  ;;  %v431_v51 = vld [vmem:[#allocation2 + $0x13c] sm:$0x1] }
 0x156   : > { %v2346_v17 = vrot.slane %v2345_v5, 4  ;;  %v8227_v10 = vcombine.low %v1721_v45, %v1729_v25  ;;  %v2114_v26 = vsel %vm9518_vm9, %v2106_v49, %v2113_v24  ;;  %v2351_v11 = vrot.slane %v2350_v19, 4  ;;  %v11091_v24 = vpop.permute.xlu0 %2815  ;;  %v11099_v25 = vld [vmem:[#allocation2 + $0x134] sm:$0xf] }
 0x157   : > { %v14750_v14 = vshrl.u32 %v11063_v29, 16  ;;  %v8131_v42 = vrot.slane %v2094_v36, 11  ;;  %v14749_v34 = vshll.u32 %v11063_v29, 16  ;;  %v14748_v48 = vshrl.u32 %v11068_v23, 16 }
 0x158   : > { %v2348_v15 = vsel %vm9580_vm12, %v2346_v17, %v2347_v55  ;;  %2905 = vrot.lane.b32.xlu1 %v8227_v10, %s9291_s29  ;;  %v2356_v45 = vsel %vm9580_vm12, %v2351_v11, %v2355_v3  ;;  %v3312_v49 = vsel %vm3298_vm2, %v3279_v47, %v10821_v4  ;;  %v14745_v37 = vshll.u32 %v11068_v23, 16  ;;  %v889_v3 = vld [vmem:[#allocation2 + $0x128] sm:$0x1]  ;;  %v11105_v10 = vld [vmem:[#allocation2 + $0x138] sm:$0xf] }
 0x159   : > { %v1090_v43 = vrot.slane %v14750_v14, 4  ;;  %v2105_v55 = vsel %vm9518_vm9, %v8131_v42, %v2104_v22  ;;  %v8274_v5 = vcombine.low %v2348_v15, %v2356_v45  ;;  %v1091_v7 = vrot.slane %v14749_v34, 5  ;;  %v11107_v22 = vpop.permute.xlu1 %2625 }
 0x15a   : > { %v1096_v19 = vrot.slane %v14748_v48, 4  ;;  %v8243_v4 = vcombine.low %v2105_v55, %v2114_v26  ;;  %v432_v47 = vsel %vm9417_vm7, 0, %v431_v51  ;;  %v2357_v36 = vrot.slane %v2099_v28, 4 }
 0x15b   : > { %v2358_v17 = vrot.slane %v2102_v53, 5  ;;  %3175 = vrot.lane.b32.xlu0 %v8274_v5, %s9292_s8  ;;  %v3281_v11 = vsel %vm3265_vm15, %v3248_v38, %v10869_v20  ;;  %v8164_v42 = vcombine.low %v11063_v29, %v11068_v23  ;;  %433 = vst [vmem:[#allocation2 + $0x13c] sm:$0x1] %v432_v47  ;;  %v11116_v26 = vrot.slane %v2111_v13, 5  ;;  %v1160_v47 = vld [vmem:[#allocation2 + $0x130] sm:$0x8] }
 0x15c   : > { %v2363_v46 = vrot.slane %v2108_v52, 4  ;;  %2985 = vrot.lane.b32.xlu1 %v8243_v4, %s9289_s22  ;;  %v1092_v53 = vor.u32 %v1091_v7, %v1090_v43  ;;  %v1094_v15 = vrot.slane %v14745_v37, 5  ;;  %v1100_v51 = vshll.u32 %v889_v3, 16  ;;  %v11127_v4 = vpop.permute.xlu0 %2895 }
 0x15d   : > { %v2359_v28 = vor.u32 %v2358_v17, %v2357_v36  ;;  %v14747_v38 = vshrl.u32 %v11099_v25, 16  ;;  %v14744_v45 = vshll.u32 %v11099_v25, 16  ;;  %v14746_v13 = vshrl.u32 %v11105_v10, 16  ;;  %v11135_v17 = vld [vmem:[#allocation2 + $0x134] sm:$0xf] }
 0x15e   : > { %v2364_v20 = vor.u32 %v2363_v46, %v11116_v26  ;;  %v1093_v5 = vrot.slane %v1092_v53, 4  ;;  %v1097_v50 = vor.u32 %v1096_v19, %v1094_v15  ;;  %v1102_v52 = vrot.slane %v1100_v51, 5  ;;  %v11137_v46 = vld [vmem:[#allocation2 + $0x138] sm:$0xf] }
 0x15f   : > { %v2360_v55 = vrot.slane %v2359_v28, 4  ;;  %2555 = vrot.lane.b32.xlu0 %v8164_v42, %s9285_s18  ;;  %v3345_v7 = vsel %vm3331_vm6, %v3312_v49, %v10860_v54  ;;  %v3314_v3 = vsel %vm3298_vm2, %v3281_v11, %v10903_v62  ;;  %v14751_v36 = vshll.u32 %v11105_v10, 16  ;;  %v11146_v49 = vpop.permute.xlu1 %2705 }
 0x160   : > { %v2365_v43 = vrot.slane %v2364_v20, 4  ;;  %3097 = vrot.lane.b32.xlu1 %v8259_v57, %s9287_s20  ;;  %v1095_v19 = vsel %vm9580_vm12, %v1093_v5, %v1094_v15  ;;  %v1098_v28 = vrot.slane %v1097_v50, 4  ;;  %v1104_v42 = vrot.slane %v14747_v38, 4 }
 0x161   : > { %v1105_v54 = vrot.slane %v14744_v45, 5  ;;  %v2362_v62 = vsel %vm9580_vm12, %v2360_v55, %v11116_v26  ;;  %v1110_v11 = vrot.slane %v14746_v13, 4  ;;  %v1475_v53 = vshrl.u32 %v1160_v47, 16 }
 0x162   : > { %v2172_v15 = vld [vmem:[#allocation2 + $0x13c] sm:$0x1]  ;;  %v1103_v51 = vsel %vm9580_vm12, %v1098_v28, %v1102_v52  ;;  %v1480_v20 = vshrl.u32 %v11135_v17, 16  ;;  %v1483_v5 = vshll.u32 %v11135_v17, 16  ;;  %v1489_v50 = vshrl.u32 %v11137_v46, 16 }
 0x163   : > { %v2367_v45 = vshll.u32 %v2172_v15, 16  ;;  %v8180_v37 = vcombine.low %v1095_v19, %v1103_v51  ;;  %v8116_v26 = vrot.slane %v1475_v53, 11  ;;  %v1492_v55 = vshll.u32 %v11137_v46, 16  ;;  %v890_v13 = vld [vmem:[#allocation2 + $0x13c] sm:$0x1]  ;;  %v11163_v14 = vpop.permute.xlu0 %2975  ;;  %v11174_v23 = vpop.permute.xlu1 %2817 }
 0x164   : > { %v1482_v38 = vrot.slane %v1480_v20, 7  ;;  %v1491_v48 = vrot.slane %v1489_v50, 7  ;;  %v1106_v34 = vor.u32 %v1105_v54, %v1104_v42  ;;  %v1108_v47 = vrot.slane %v14751_v36, 5  ;;  %v380_v54 = vld [vmem:[#allocation2 + $0x144] sm:$0x8] }
 0x165   : > { %v2369_v52 = vrot.slane %v2367_v45, 5  ;;  %2635 = vrot.lane.b32.xlu0 %v8180_v37, %s9290_s23  ;;  %v3378_v28 = vsel %vm3364_vm8, %v3345_v7, %v10892_v59  ;;  %v3347_v19 = vsel %vm3331_vm6, %v3314_v3, %v10934_v18  ;;  %v1114_v53 = vshll.u32 %v890_v13, 16  ;;  %v11172_v36 = vld [vmem:[#allocation2 + $0x148] sm:$0xf] }
 0x166   : > { %v1485_v15 = vor.u32 %v1483_v5, %v1482_v38  ;;  %v1487_v51 = vrot.slane %v1482_v38, 4  ;;  %v1494_v57 = vor.u32 %v1492_v55, %v1491_v48  ;;  %v3411_v42 = vsel %vm3397_vm10, %v3378_v28, %v10917_v61 }
 0x167   : > { %v2370_v37 = vsel %vm9580_vm12, %v2365_v43, %v2369_v52  ;;  %v1107_v45 = vrot.slane %v1106_v34, 4  ;;  %v1111_v59 = vor.u32 %v1110_v11, %v1108_v47  ;;  %v1116_v7 = vrot.slane %v1114_v53, 5  ;;  %v11196_v52 = vpop.permute.xlu0 %3087  ;;  %v497_v53 = vld [vmem:[#allocation2 + $0xa4] sm:$0x8] }
 0x168   : > { %v8275_v18 = vcombine.low %v2362_v62, %v2370_v37  ;;  %v1486_v48 = vsel %vm9518_vm9, %v8116_v26, %v1485_v15  ;;  %v1495_v61 = vsel %vm9518_vm9, %v1487_v51, %v1494_v57  ;;  %v3380_v38 = vsel %vm3364_vm8, %v3347_v19, %v10963_v63  ;;  %v1532_v26 = vld [vmem:[#allocation2 + $0x13c] sm:$0x1] }
 0x169   : > { %v8196_v13 = vcombine.low %v1486_v48, %v1495_v61  ;;  %v1112_v3 = vrot.slane %v1111_v59, 4  ;;  %v381_v43 = vsel %vm9401_vm5, 0, %v380_v54  ;;  %v1502_v34 = vshrl.u32 %v11172_v36, 16 }
 0x16a   : > { %3177 = vrot.lane.b32.xlu1 %v8275_v18, %s9292_s8  ;;  %v8212_v62 = vcombine.low %v11135_v17, %v11137_v46  ;;  %382 = vst [vmem:[#allocation2 + $0x144] sm:$0x8] %v381_v43  ;;  %v1511_v11 = vshrl.u32 %v11178_v6, 16  ;;  %v1514_v57 = vshll.u32 %v11178_v6, 16  ;;  %v3444_v63 = vsel %vm3430_vm11, %v3411_v42, %v10952_v2 }
 0x16b   : > { %2715 = vrot.lane.b32.xlu0 %v8196_v13, %s9288_s21  ;;  %v1109_v28 = vsel %vm9580_vm12, %v1107_v45, %v1108_v47  ;;  %v1117_v19 = vsel %vm9580_vm12, %v1112_v3, %v1116_v7  ;;  %v1504_v17 = vrot.slane %v1502_v34, 7  ;;  %v1730_v46 = vrot.slane %v1480_v20, 4  ;;  %8961 = vmatprep.mubr.msk.bf16.mxu0 %vm3483_vm0, %v3444_v63  ;;  %v11209_v54 = vpop.permute.xlu1 %2897  ;;  %v11213_v7 = vld [vmem:[#allocation2 + $0x148] sm:$0xf] }
 0x16c   : > { %v1505_v2 = vshll.u32 %v11172_v36, 16  ;;  %v1513_v15 = vrot.slane %v1511_v11, 7  ;;  %v1731_v51 = vrot.slane %v1483_v5, 5  ;;  %v1734_v42 = vrot.slane %v1492_v55, 5 }
 0x16d   : > { %v1509_v47 = vrot.slane %v1504_v17, 4  ;;  %v3413_v37 = vsel %vm3397_vm10, %v3380_v38, %v11000_v12  ;;  %v1736_v45 = vrot.slane %v1489_v50, 4  ;;  %v1740_v59 = vshll.u32 %v1532_v26, 16  ;;  %v14921_v12 = vld [vmem:[#allocation16_spill] sm:$0xff]  ;;  %v11225_v26 = vld [vmem:[#allocation2 + $0x14c] sm:$0xf] }
 0x16e   : > { %v14920_v20 = vcombine.low %v11099_v25, %v11105_v10  ;;  %v8181_v18 = vcombine.low %v1109_v28, %v1117_v19  ;;  %v1516_v5 = vor.u32 %v1514_v57, %v1513_v15  ;;  %v1732_v55 = vor.u32 %v1731_v51, %v1730_v46  ;;  %v14922_v15 = vld [vmem:[#allocation18_spill] sm:$0xff] }
 0x16f   : > { %v700_v48 = vshrl.u32 %v497_v53, 16  ;;  %2827 = vrot.lane.b32.xlu0 %v8212_v62, %s9286_s19  ;;  %v1737_v61 = vor.u32 %v1736_v45, %v1734_v42  ;;  %v1742_v13 = vrot.slane %v1740_v59, 5  ;;  %v712_v50 = vrot.slane %v14921_v12, 4  ;;  %v14923_v59 = vld [vmem:[#allocation17_spill] sm:$0xff]  ;;  %v434_v12 = vld [vmem:[#allocation2 + $0x150] sm:$0x1] }
 0x170   : > { %2557 = vrot.lane.b32.xlu1 %v14920_v20, %s9285_s18  ;;  %v3446_v38 = vsel %vm3430_vm11, %v3413_v37, %v11037_v56  ;;  %v1507_v3 = vor.u32 %v1505_v2, %v1504_v17  ;;  %v1733_v43 = vrot.slane %v1732_v55, 4  ;;  %v2121_v28 = vshrl.u32 %v11213_v7, 16  ;;  %v11229_v19 = vpop.permute.xlu0 %3167 }
 0x171   : > { %v8094_v63 = vrot.slane %v700_v48, 11  ;;  %8962 = vmatmul.mubr.msk.bf16.gmra.mrb[12].mxu0 %vm3483_vm0, %v3446_v38  ;;  %v1163_v46 = vld [vmem:[#allocation2 + $0x144] sm:$0x8]  ;;  %v1517_v62 = vsel %vm9518_vm9, %v1509_v47, %v1516_v5  ;;  %v1738_v53 = vrot.slane %v1737_v61, 4  ;;  %v720_v56 = vsel %vm9518_vm9, %v712_v50, %v14922_v15 }
 0x172   : > { %v1801_v17 = vld [vmem:[#allocation2 + $0x144] sm:$0x8]  ;;  %v2124_v51 = vshll.u32 %v11213_v7, 16  ;;  %v1497_v37 = vshrl.u32 %v1163_v46, 16  ;;  %v1735_v45 = vsel %vm9580_vm12, %v1733_v43, %v1734_v42  ;;  %v11243_v47 = vpop.permute.xlu1 %2977  ;;  %v2123_v61 = vrot.slane %v2121_v28, 7 }
 0x173   : > { %v711_v20 = vsel %vm9518_vm9, %v8094_v63, %v14923_v59  ;;  %v2116_v55 = vshrl.u32 %v1801_v17, 16  ;;  %v1743_v5 = vsel %vm9580_vm12, %v1738_v53, %v1742_v13  ;;  %v2133_v43 = vshll.u32 %v11225_v26, 16  ;;  %v500_v53 = vld [vmem:[#allocation2 + $0xb8] sm:$0x8] }
 0x174   : > { %2637 = vrot.lane.b32.xlu1 %v8181_v18, %s9290_s23  ;;  %v8142_v48 = vcombine.low %v711_v20, %v720_v56  ;;  %v14754_v18 = vshrl.u32 %v11225_v26, 16  ;;  %v8117_v50 = vrot.slane %v1497_v37, 11  ;;  %v8228_v38 = vcombine.low %v1735_v45, %v1743_v5  ;;  %v383_v56 = vld [vmem:[#allocation2 + $0x158] sm:$0x8]  ;;  %v11264_v20 = vld [vmem:[#allocation2 + $0x15c] sm:$0xf] }
 0x175   : > { %v8132_v42 = vrot.slane %v2116_v55, 11  ;;  %v8213_v63 = vcombine.low %v11172_v36, %v11178_v6  ;;  %v2126_v46 = vor.u32 %v2124_v51, %v2123_v61  ;;  %v2128_v15 = vrot.slane %v2123_v61, 4  ;;  %v11266_v55 = vpop.permute.xlu0 %2547 }
 0x176   : > { %v2132_v13 = vrot.slane %v14754_v18, 7  ;;  %v1508_v17 = vsel %vm9518_vm9, %v8117_v50, %v1507_v3  ;;  %2907 = vrot.lane.b32.xlu0 %v8228_v38, %s9291_s29  ;;  %v435_v37 = vsel %vm9417_vm7, 0, %v434_v12  ;;  %v1744_v45 = vrot.slane %v1502_v34, 4  ;;  %v11278_v50 = vld [vmem:[#allocation2 + $0x160] sm:$0xf] }
 0x177   : > { %v1745_v59 = vrot.slane %v1505_v2, 5  ;;  %v8197_v5 = vcombine.low %v1508_v17, %v1517_v62  ;;  %v2127_v61 = vsel %vm9518_vm9, %v8132_v42, %v2126_v46  ;;  %436 = vst [vmem:[#allocation2 + $0x150] sm:$0x1] %v435_v37  ;;  %v11272_v3 = vrot.slane %v1514_v57, 5  ;;  %v11280_v62 = vpop.permute.xlu1 %3089  ;;  %v14924_v42 = vld [vmem:[#allocation19_spill] sm:$0xff] }
 0x178   : > { %v2135_v18 = vor.u32 %v2133_v43, %v2132_v13  ;;  %v3210_v12 = vsel %vm3183_vm13, %v8142_v48, %v10986_v39  ;;  %v1750_v34 = vrot.slane %v1511_v11, 4  ;;  %v722_v2 = vshrl.u32 %v500_v53, 16  ;;  %v14925_v53 = vld [vmem:[#allocation21_spill] sm:$0xff] }
 0x179   : > { %v1746_v36 = vor.u32 %v1745_v59, %v1744_v45  ;;  %2717 = vrot.lane.b32.xlu1 %v8197_v5, %s9288_s21  ;;  %v734_v57 = vrot.slane %v14924_v42, 4  ;;  %v384_v46 = vsel %vm9401_vm5, 0, %v383_v56  ;;  %v2143_v39 = vshrl.u32 %v11264_v20, 16  ;;  %s269_s21 = sand.u32 1, %s9274_s25  }
 0x17a   : > { %v2136_v38 = vsel %vm9518_vm9, %v2128_v15, %v2135_v18  ;;  %v1751_v11 = vor.u32 %v1750_v34, %v11272_v3  ;;  %v8095_v13 = vrot.slane %v722_v2, 11  ;;  %385 = vst [vmem:[#allocation2 + $0x158] sm:$0x8] %v384_v46  ;;  %v2146_v18 = vshll.u32 %v11264_v20, 16  ;;  %s14681_s28 = scalar_lea.sflag [#allocation5], %s269_s21 }
 0x17b   : > { %v8244_v48 = vcombine.low %v2127_v61, %v2136_v38  ;;  %v1747_v6 = vrot.slane %v1746_v36, 4  ;;  %v742_v17 = vsel %vm9518_vm9, %v734_v57, %v14925_v53  ;;  %v2145_v37 = vrot.slane %v2143_v39, 7  ;;  %v11302_v5 = vpop.permute.xlu0 %2627 }
 0x17c   : > { %v2152_v15 = vshrl.u32 %v11278_v50, 16  ;;  %v733_v56 = vsel %vm9518_vm9, %v8095_v13, %v14926_v1  ;;  %v8260_v45 = vcombine.low %v11213_v7, %v11225_v26  ;;  %v2155_v59 = vshll.u32 %v11278_v50, 16  ;;  %v326_v7 = vld [vmem:[#allocation2 + $0x164] sm:$0x1] }
 0x17d   : > { %2987 = vrot.lane.b32.xlu0 %v8244_v48, %s9289_s22  ;;  %2829 = vrot.lane.b32.xlu1 %v8213_v63, %s9286_s19  ;;  %v1752_v61 = vrot.slane %v1751_v11, 4  ;;  %v8143_v36 = vcombine.low %v733_v56, %v742_v17  ;;  %v2150_v34 = vrot.slane %v2145_v37, 4  ;;  %v1749_v42 = vsel %vm9580_vm12, %v1747_v6, %v11272_v3 }
 0x17e   : > { %v2154_v2 = vrot.slane %v2152_v15, 7  ;;  %v1533_v38 = vld [vmem:[#allocation2 + $0x150] sm:$0x1]  ;;  %v3250_v57 = vsel %vm3232_vm14, %v3210_v12, %v11024_v30  ;;  %v2371_v48 = vrot.slane %v2121_v28, 4  ;;  %v2372_v63 = vrot.slane %v2124_v51, 5  ;;  %v11316_v11 = vpop.permute.xlu1 %3169 }
 0x17f   : > { %v2173_v46 = vld [vmem:[#allocation2 + $0x150] sm:$0x1]  ;;  %v1754_v13 = vshll.u32 %v1533_v38, 16  ;;  %v2148_v53 = vor.u32 %v2146_v18, %v2145_v37  ;;  %v2375_v1 = vrot.slane %v2133_v43, 5  ;;  %v3213_v3 = vsel %vm3183_vm13, %v8143_v36, %v11070_v16 }
 0x180   : > { %v2157_v17 = vor.u32 %v2155_v59, %v2154_v2  ;;  %v2373_v30 = vor.u32 %v2372_v63, %v2371_v48  ;;  %v14927_v12 = vshrl.u32 %v11225_v26, 16  ;;  %v2381_v6 = vshll.u32 %v2173_v46, 16 }
 0x181   : > { %3099 = vrot.lane.b32.xlu0 %v8260_v45, %s9287_s20  ;;  %v1756_v51 = vrot.slane %v1754_v13, 5  ;;  %v1804_v56 = vld [vmem:[#allocation2 + $0x158] sm:$0x8]  ;;  %v3283_v2 = vsel %vm3265_vm15, %v3250_v57, %v11057_v35  ;;  %v3252_v43 = vsel %vm3232_vm14, %v3213_v3, %v11107_v22  ;;  %v327_v46 = vsel %vm9417_vm7, 0, %v326_v7 }
 0x182   : > { %v2377_v28 = vrot.slane %v14927_v12, 4  ;;  %v2158_v37 = vsel %vm9518_vm9, %v2150_v34, %v2157_v17  ;;  %v2138_v16 = vshrl.u32 %v1804_v56, 16  ;;  %v2374_v36 = vrot.slane %v2373_v30, 4  ;;  %328 = vst [vmem:[#allocation2 + $0x164] sm:$0x1] %v327_v46  ;;  %v11343_v17 = vpop.permute.xlu1 %2549 }
 0x183   : > { %v2383_v38 = vrot.slane %v2381_v6, 5  ;;  %v11331_v48 = vpop.permute.xlu0 %2707  ;;  %v1757_v26 = vsel %vm9580_vm12, %v1752_v61, %v1756_v51  ;;  %v11337_v63 = vrot.slane %v2143_v39, 4  ;;  %v11339_v34 = vrot.slane %v2146_v18, 5  ;;  %v503_v18 = vld [vmem:[#allocation2 + $0xcc] sm:$0x8] }
 0x184   : > { %v2378_v45 = vor.u32 %v2377_v28, %v2375_v1  ;;  %v8229_v35 = vcombine.low %v1749_v42, %v1757_v26  ;;  %v8133_v57 = vrot.slane %v2138_v16, 11  ;;  %v2376_v22 = vsel %vm9580_vm12, %v2374_v36, %v2375_v1  ;;  %v506_v6 = vld [vmem:[#allocation2 + $0xe0] sm:$0x8] }
 0x185   : > { %v8261_v3 = vcombine.low %v11264_v20, %v11278_v50  ;;  %v3316_v61 = vsel %vm3298_vm2, %v3283_v2, %v11091_v24  ;;  %v3285_v39 = vsel %vm3265_vm15, %v3252_v43, %v11146_v49  ;;  %v2387_v30 = vor.u32 %v11339_v34, %v11337_v63 }
 0x186   : > { %v2379_v13 = vrot.slane %v2378_v45, 4  ;;  %2909 = vrot.lane.b32.xlu1 %v8229_v35, %s9291_s29  ;;  %v2149_v42 = vsel %vm9518_vm9, %v8133_v57, %v2148_v53  ;;  %v3349_v20 = vsel %vm3331_vm6, %v3316_v61, %v11127_v4  ;;  %v3318_v49 = vsel %vm3298_vm2, %v3285_v39, %v11174_v23  ;;  %s8083_s29 = sshll.u32 %s269_s21, 7 }
 0x187   : > { %v8245_v12 = vcombine.low %v2149_v42, %v2158_v37  ;;  %v3382_v28 = vsel %vm3364_vm8, %v3349_v20, %v11163_v14  ;;  %v11364_v7 = vpop.permute.xlu0 %2819  ;;  %v3351_v53 = vsel %vm3331_vm6, %v3318_v49, %v11209_v54  ;;  %v744_v56 = vshrl.u32 %v503_v18, 16  ;;  %v509_v37 = vld [vmem:[#allocation2 + $0xf4] sm:$0x8]  ;;  %v14930_v18 = vld [vmem:[#allocation9_spill] sm:$0xff] }
 0x188   : > { %v2384_v1 = vsel %vm9580_vm12, %v2379_v13, %v2383_v38  ;;  %v3415_v51 = vsel %vm3397_vm10, %v3382_v28, %v11196_v52  ;;  %v756_v4 = vrot.slane %v10567_v0, 4  ;;  %v11374_v23 = vrot.slane %v2155_v59, 5  ;;  %v512_v52 = vld [vmem:[#allocation2 + $0x108] sm:$0x8]  ;;  %v11389_v59 = vpop.permute.xlu1 %2629 }
 0x189   : > { %v8276_v24 = vcombine.low %v2376_v22, %v2384_v1  ;;  %v2391_v14 = vrot.slane %v2152_v15, 4  ;;  %v3384_v2 = vsel %vm3364_vm8, %v3351_v53, %v11243_v47  ;;  %v3448_v54 = vsel %vm3430_vm11, %v3415_v51, %v11229_v19  ;;  %v515_v47 = vld [vmem:[#allocation2 + $0x11c] sm:$0x8]  ;;  %v437_v16 = vld [vmem:[#allocation2 + $0x164] sm:$0x1] }
 0x18a   : > { %2989 = vrot.lane.b32.xlu1 %v8245_v12, %s9289_s22  ;;  %v3417_v0 = vsel %vm3397_vm10, %v3384_v2, %v11280_v62  ;;  %8965 = vmatprep.mubr.msk.bf16.mxu0 %vm3483_vm0, %v3448_v54  ;;  %v8096_v43 = vrot.slane %v744_v56, 11  ;;  %v764_v50 = vsel %vm9518_vm9, %v756_v4, %v10581_v31  ;;  %v766_v15 = vshrl.u32 %v506_v6, 16  ;;  %v518_v1 = vld [vmem:[#allocation2 + $0x130] sm:$0x8]  ;;  %v14932_v53 = vld [vmem:[#allocation8_spill] sm:$0xff] }
 0x18b   : > { %3179 = vrot.lane.b32.xlu0 %v8276_v24, %s9292_s8  ;;  %v3450_v19 = vsel %vm3430_vm11, %v3417_v0, %v11316_v11  ;;  %v778_v36 = vrot.slane %v10609_v33, 4  ;;  %v788_v45 = vshrl.u32 %v509_v37, 16  ;;  %v800_v62 = vrot.slane %v10826_v41, 4 }
 0x18c   : > { %v438_v38 = vsel %vm9417_vm7, 0, %v437_v16  ;;  %v755_v31 = vsel %vm9518_vm9, %v8096_v43, %v10572_v58  ;;  %8966 = vmatmul.mubr.msk.bf16.gmra.mrb[16].mxu0 %vm3483_vm0, %v3450_v19  ;;  %v8097_v26 = vrot.slane %v766_v15, 11  ;;  %v810_v46 = vshrl.u32 %v512_v52, 16  ;;  %v11404_v11 = vpop.permute.xlu0 %2899 }
 0x18d   : > { %439 = vst [vmem:[#allocation2 + $0x164] sm:$0x1] %v438_v38  ;;  %v8144_v63 = vcombine.low %v755_v31, %v764_v50  ;;  %v786_v33 = vsel %vm9518_vm9, %v778_v36, %v10627_v60  ;;  %v8098_v41 = vrot.slane %v788_v45, 11  ;;  %v808_v8 = vsel %vm9518_vm9, %v800_v62, %v10836_v27  ;;  %v3814_v38 = vld [vmem:[#allocation3 + $0x18] sm:$0x8] }
 0x18e   : > { %3101 = vrot.lane.b32.xlu1 %v8261_v3, %s9287_s20  ;;  %v777_v58 = vsel %vm9518_vm9, %v8097_v26, %v10625_v44  ;;  %v8099_v34 = vrot.slane %v810_v46, 11  ;;  %v822_v35 = vrot.slane %v10872_v32, 4  ;;  %v832_v57 = vshrl.u32 %v515_v47, 16  ;;  %v11422_v3 = vpop.permute.xlu1 %2709  ;;  %v14929_v44 = vld [vmem:[#allocation7_spill] sm:$0xff]  ;;  %s9294_s20 = smov [#allocation4]  }
 0x18f   : > { %v11414_v22 = vcombine.low %v777_v58, %v786_v33  ;;  %v799_v60 = vsel %vm9518_vm9, %v8098_v41, %v10833_v21  ;;  %v14928_v13 = vshrl.u32 %v11063_v29, 16  ;;  %v2392_v27 = vor.u32 %v2391_v14, %v11374_v23  ;;  %v3817_v31 = vld [vmem:[#allocation3 + $0x2c] sm:$0x8]  ;;  %s9224_s22 = sshll.u32 %s9294_s20, 4  ;;  %s9225_s22 = int_to_ptr.vmem [resolvable:$false] %s9224_s22 }
 0x190   : > { %v11424_v39 = vcombine.low %v799_v60, %v808_v8  ;;  %v821_v32 = vsel %vm9518_vm9, %v8099_v34, %v14929_v44  ;;  %v830_v42 = vsel %vm9518_vm9, %v822_v35, %v14930_v18  ;;  %v8100_v21 = vrot.slane %v832_v57, 11  ;;  %v3820_v8 = vld [vmem:[#allocation3 + $0x40] sm:$0x8]  ;;  %v11470_v35 = vld [vmem:[#allocation3 + $0x8] sm:$0xf]  ;;  %s9226_s23 = scalar_lea.vmem %s9225_s22, 4096 }
 0x191   : > { %v839_v61 = vrot.slane %v14928_v13, 7  ;;  %v11432_v20 = vcombine.low %v821_v32, %v830_v42  ;;  %v2388_v12 = vrot.slane %v2387_v30, 4  ;;  %v14931_v24 = vshll.u32 %v11063_v29, 16  ;;  %v11472_v57 = vld [vmem:[#allocation3 + $0xc] sm:$0xf] }
 0x192   : > { %vm3809_vm1 = vcmask 519171   ;;  %v14933_v51 = vshrl.u32 %v14932_v53, 16  ;;  %v854_v4 = vshrl.u32 %v518_v1, 16  ;;  %v2393_v14 = vrot.slane %v2392_v27, 4  ;;  %v2822_v19 = vpop.permute.xlu1 %2821  ;;  %v3868_v13 = vld [vmem:[#allocation3 + $0x24] sm:$0x1] }
 0x193   : > { %v842_v49 = vor.u32 %v14931_v24, %v839_v61  ;;  %v844_v6 = vrot.slane %v839_v61, 4  ;;  %v3216_v2 = vsel %vm3183_vm13, %v8144_v63, %v11266_v55  ;;  %v14934_v30 = vshrl.u32 %v11099_v25, 16  ;;  %vm11449_vm5 = vmand %vm3809_vm1, %vm330_vm3  ;;  %v3871_v61 = vld [vmem:[#allocation3 + $0x38] sm:$0x1] }
 0x194   : > { %v2980_v28 = vpop.permute.xlu0 %2979  ;;  %v848_v56 = vrot.slane %v14933_v51, 7  ;;  %v2174_v37 = vld [vmem:[#allocation2 + $0x164] sm:$0x1]  ;;  %v14935_v0 = vshll.u32 %v14932_v53, 16  ;;  %v8101_v50 = vrot.slane %v854_v4, 11  ;;  %v14936_v15 = vshrl.u32 %v11105_v10, 16 }
 0x195   : > { %v843_v54 = vsel %vm9518_vm9, %v8100_v21, %v842_v49  ;;  %v861_v52 = vrot.slane %v14934_v30, 7  ;;  %v2395_v29 = vshll.u32 %v2174_v37, 16  ;;  %v14937_v16 = vmov 0 }
 0x196   : > { %v851_v43 = vor.u32 %v14935_v0, %v848_v56  ;;  %v870_v47 = vrot.slane %v14936_v15, 7  ;;  %v14938_v16 = vsel %vm11449_vm5, 4294967295, %v14937_v16  ;;  %v2390_v55 = vsel %vm9580_vm12, %v2388_v12, %v11374_v23 }
 0x197   : > { %14939 = vst [vmem:[#allocation10_spill] sm:$0xff] %v14938_v16  ;;  %v14940_v36 = vshll.u32 %v11099_v25, 16  ;;  %v866_v62 = vrot.slane %v861_v52, 4  ;;  %v2397_v26 = vrot.slane %v2395_v29, 5  ;;  %v3254_v46 = vsel %vm3232_vm14, %v3216_v2, %v11302_v5 }
 0x198   : > { %v852_v63 = vsel %vm9518_vm9, %v844_v6, %v851_v43  ;;  %v14941_v33 = vshll.u32 %v11105_v10, 16  ;;  %v3287_v23 = vsel %vm3265_vm15, %v3254_v46, %v11331_v48  ;;  %v3092_v58 = vpop.permute.xlu0 %3091  ;;  %v3815_v60 = vsel %vm11449_vm5, 0, %v3814_v38 }
 0x199   : > { %v864_v45 = vor.u32 %v14940_v36, %v861_v52  ;;  %v11466_v25 = vcombine.low %v843_v54, %v852_v63  ;;  %v2398_v5 = vsel %vm9580_vm12, %v2393_v14, %v2397_v26  ;;  %v3818_v48 = vsel %vm11449_vm5, 0, %v3817_v31  ;;  %3816 = vst [vmem:[#allocation3 + $0x18] sm:$0x8] %v3815_v60  ;;  %v11537_v26 = vld [vmem:[%s14727_s2] ss:$0 sm:$0xff] }
 0x19a   : > { %v873_v41 = vor.u32 %v14941_v33, %v870_v47  ;;  %v8277_v27 = vcombine.low %v2390_v55, %v2398_v5  ;;  %3819 = vst [vmem:[#allocation3 + $0x2c] sm:$0x8] %v3818_v48  ;;  %v3821_v32 = vsel %vm11449_vm5, 0, %v3820_v8  ;;  %vm3796_vm3 = vcmask 516096  }
 0x19b   : > { %v865_v34 = vsel %vm9518_vm9, %v8101_v50, %v864_v45  ;;  %v3320_v18 = vsel %vm3298_vm2, %v3287_v23, %v11364_v7  ;;  %3822 = vst [vmem:[#allocation3 + $0x40] sm:$0x8] %v3821_v32  ;;  %vm11489_vm7 = vmand %vm3796_vm3, %vm316_vm4  ;;  %v14942_v42 = vmov 0  ;;  %v2902_v21 = vpop.permute.xlu1 %2901  ;;  %v8395_v12 = vcombine.low %v11470_v35, %v11472_v57 }
 0x19c   : > { %v874_v10 = vsel %vm9518_vm9, %v866_v62, %v873_v41  ;;  %v14943_v42 = vsel %vm11489_vm7, 4294967295, %v14942_v42  ;;  %3181 = vrot.lane.b32.xlu1 %v8277_v27, %s9292_s8  ;;  %v3353_v1 = vsel %vm3331_vm6, %v3320_v18, %v11404_v11  ;;  %v3869_v24 = vsel %vm11489_vm7, 0, %v3868_v13  ;;  %v3823_v11 = vld [vmem:[#allocation3 + $0x54] sm:$0x8]  ;;  %v11542_v41 = vld [vmem:[%s14728_s3] ss:$0 sm:$0xff] }
 0x19d   : > { %v11482_v44 = vcombine.low %v865_v34, %v874_v10  ;;  %14944 = vst [vmem:[#allocation12_spill] sm:$0xff] %v14943_v42  ;;  %v3872_v7 = vsel %vm11489_vm7, 0, %v3871_v61  ;;  %v3386_v49 = vsel %vm3364_vm8, %v3353_v1, %v2980_v28  ;;  %3870 = vst [vmem:[#allocation3 + $0x24] sm:$0x1] %v3869_v24  ;;  %v3824_v56 = vsel %vm11449_vm5, 0, %v3823_v11  ;;  %s14501_s8 = scalar_lea.vmem [#allocation4], %s8083_s29 }
 0x19e   : > { %3873 = vst [vmem:[#allocation3 + $0x38] sm:$0x1] %v3872_v7  ;;  %v3419_v6 = vsel %vm3397_vm10, %v3386_v49, %v3092_v58  ;;  %v3172_v53 = vpop.permute.xlu0 %3171  ;;  %3825 = vst [vmem:[#allocation3 + $0x54] sm:$0x8] %v3824_v56  ;;  %v3219_v28 = vsel %vm3183_vm13, %v11414_v22, %v11343_v17  ;;  %v3826_v17 = vld [vmem:[#allocation3 + $0x68] sm:$0x8] }
 0x19f   : > { %v3452_v51 = vsel %vm3430_vm11, %v3419_v6, %v3172_v53  ;;  %v2982_v4 = vpop.permute.xlu1 %2981  ;;  %v3256_v2 = vsel %vm3232_vm14, %v3219_v28, %v11389_v59  ;;  %v3877_v22 = vld [vmem:[#allocation3 + $0x60] sm:$0x1]  ;;  %v3827_v59 = vsel %vm11449_vm5, 0, %v3826_v17  ;;  %vm14945_vm4 = vcmask 519168   ;;  %s8017_s14 = sshll.u32 %s14501_s8, 4  ;;  %s14673_s14 = int_to_ptr.vmem [resolvable:$true] %s8017_s14 }
 0x1a0   : > { %8969 = vmatprep.mubr.msk.bf16.mxu0 %vm3483_vm0, %v3452_v51  ;;  %6129 = vrot.lane.b32.xlu1 %v8395_v12, %s9293_s17  ;;  %v3289_v54 = vsel %vm3265_vm15, %v3256_v2, %v11422_v3  ;;  %v3874_v3 = vld [vmem:[#allocation3 + $0x4c] sm:$0x1]  ;;  %v3878_v47 = vsel %vm11489_vm7, 0, %v3877_v22  ;;  %3828 = vst [vmem:[#allocation3 + $0x68] sm:$0x8] %v3827_v59  ;;  %vm14946_vm1 = vmmov %vm14945_vm4  ;;  %s9220_s19 = scalar_lea.vmem %s14673_s14, 2048  ;;  %p9227_p0 = scmp.lt.s32.totalorder %s14673_s14, %s9225_s22 }
 0x1a1   : > { %v3322_v30 = vsel %vm3298_vm2, %v3289_v54, %v2822_v19  ;;  %v3875_v36 = vsel %vm11489_vm7, 0, %v3874_v3  ;;  %3879 = vst [vmem:[#allocation3 + $0x60] sm:$0x1] %v3878_v47  ;;  %v4720_v63 = vld [vmem:[#allocation3 + $0x18] sm:$0x8]  ;;  %vm14947_vm3 = vmmov %vm14946_vm1  ;;  %p9221_p11 = scmp.ne.s32.totalorder %s14673_s14, %s9220_s19  ;;  %p9228_p1 = scmp.lt.s32.totalorder %s9226_s23, %s9220_s19 }
 0x1a2   : > { %v2552_v37 = vpop.permute.xlu0 %2551  ;;  %v3355_v52 = vsel %vm3331_vm6, %v3322_v30, %v2902_v21  ;;  %3876 = vst [vmem:[#allocation3 + $0x4c] sm:$0x1] %v3875_v36  ;;  %v4723_v8 = vld [vmem:[#allocation3 + $0x2c] sm:$0x8]  ;;  %v4083_v5 = vld [vmem:[#allocation3 + $0x18] sm:$0x8] }
 0x1a3   : > { %v3094_v14 = vpop.permute.xlu1 %3093  ;;  %v3388_v0 = vsel %vm3364_vm8, %v3355_v52, %v2982_v4  ;;  %v3222_v10 = vsel %vm3183_vm13, %v11424_v39, %v2552_v37  ;;  %v4769_v61 = vshrl.u32 %v4720_v63, 16  ;;  %v4726_v27 = vld [vmem:[#allocation3 + $0x40] sm:$0x8]  ;;  %v4791_v12 = vshrl.u32 %v4723_v8, 16  ;;  %v5361_v47 = vld [vmem:[#allocation3 + $0x2c] sm:$0x8]  ;;  %p9222_p12 = pnand %p9221_p11, %p9373_p5  ;;  %p9229_p2 = por %p9228_p1, %p9227_p0 }
 0x1a4   : > { %v3421_v43 = vsel %vm3397_vm10, %v3388_v0, %v3094_v14  ;;  %v4151_v6 = vshrl.u32 %v4083_v5, 16  ;;  %v4813_v56 = vshrl.u32 %v4726_v27, 16  ;;  %v5120_v4 = vld [vmem:[#allocation3 + $0x24] sm:$0x1]  ;;  %v3829_v63 = vld [vmem:[#allocation3 + $0x7c] sm:$0x8] }
 0x1a5   : > { %v11561_v2 = vrot.slane %v4769_v61, 11  ;;  %v5121_v54 = vld [vmem:[#allocation3 + $0x38] sm:$0x1]  ;;  %v5146_v59 = vshll.u32 %v5120_v4, 16  ;;  %v4481_v3 = vld [vmem:[#allocation3 + $0x24] sm:$0x1]  ;;  %p9223_p13 = pneg %p9222_p12 }
 0x1a6   : > { %v4482_v8 = vld [vmem:[#allocation3 + $0x38] sm:$0x1]  ;;  %v4729_v5 = vld [vmem:[#allocation3 + $0x54] sm:$0x8] }
 0x1a7   : > { %v4732_v61 = vld [vmem:[#allocation3 + $0x68] sm:$0x8]  ;;  %p9230_p3 = pnand %p9229_p2, %p9223_p13 }
 0x1a8   : > { %v2632_v29 = vpop.permute.xlu0 %2631  ;;  %v5123_v27 = vld [vmem:[#allocation3 + $0x60] sm:$0x1] }
 0x1a9   : > { %v3258_v53 = vsel %vm3232_vm14, %v3222_v10, %v2632_v29  ;;  %v11566_v29 = vrot.slane %v4791_v12, 11  ;;  %v3830_v10 = vsel %vm11449_vm5, 0, %v3829_v63  ;;  %v9140_v12 = vld [vmem:[%s14729_s4 + $0x40] sm:$0xff]  }
 0x1aa   : > { %3831 = vst [vmem:[#allocation3 + $0x7c] sm:$0x8] %v3830_v10  ;;  %8699 = vmatprep.subr.bf16.mxu1 %v9140_v12 }
 0x1ae   : > { %v3174_v50 = vpop.permute.xlu1 %3173 }
 0x1af   : > { %v3454_v15 = vsel %vm3430_vm11, %v3421_v43, %v3174_v50  ;;  %v4086_v50 = vld [vmem:[#allocation3 + $0x2c] sm:$0x8] }
 0x1b0   : > { %8970 = vmatmul.mubr.msk.bf16.gmra.mrb[20].mxu0 %vm3483_vm0, %v3454_v15 }
 0x1b2   : > { %v11526_v55 = vpop.permute.xlu1 %2553  ;;  %v2712_v19 = vpop.permute.xlu0 %2711 }
 0x1b3   : > { %v3291_v37 = vsel %vm3265_vm15, %v3258_v53, %v2712_v19 }
 0x1b6   : > { %v11530_v62 = vpop.permute.xlu1 %2633 }
 0x1b7   : > { %v2824_v45 = vpop.permute.xlu0 %2823 }
 0x1b8   : > { %v3324_v30 = vsel %vm3298_vm2, %v3291_v37, %v2824_v45  ;;  %v11571_v45 = vrot.slane %v4813_v56, 11  ;;  %v3832_v56 = vld [vmem:[#allocation3 + $0x90] sm:$0x8] }
 0x1bb   : > { %v2904_v38 = vpop.permute.xlu0 %2903 }
 0x1bc   : > { %v3357_v15 = vsel %vm3331_vm6, %v3324_v30, %v2904_v38  ;;  %v3883_v30 = vld [vmem:[#allocation3 + $0x88] sm:$0x1] }
 0x1be   : > { %v11532_v31 = vpop.permute.xlu1 %2713 }
 0x1c2   : > { %v2984_v46 = vpop.permute.xlu0 %2983  ;;  %v11544_v23 = vpop.permute.xlu1 %2825 }
 0x1c3   : > { %v3390_v19 = vsel %vm3364_vm8, %v3357_v15, %v2984_v46  ;;  %v4089_v46 = vld [vmem:[#allocation3 + $0x40] sm:$0x8]  ;;  %v3884_v15 = vsel %vm11489_vm7, 0, %v3883_v30 }
 0x1c4   : > { %v8951_v33 = vpop.f32.mrb[0].mxu0  ;;  %v4195_v4 = vshrl.u32 %v4089_v46, 16  ;;  %3885 = vst [vmem:[#allocation3 + $0x88] sm:$0x1] %v3884_v15  ;;  %v4092_v46 = vld [vmem:[#allocation3 + $0x54] sm:$0x8] }
 0x1c5   : > { %v3690_v58 = vmul.f32 %v8951_v33, %v11537_v26  ;;  %v3554_v34 = vpop.f32.mrb[1].mxu0  ;;  %v5160_v33 = vshll.u32 %v5121_v54, 16  ;;  %v3880_v54 = vld [vmem:[#allocation3 + $0x74] sm:$0x1] }
 0x1c6   : > { %v3688_v60 = vmul.f32 %v11537_v26, %v3554_v34  ;;  %v8952_v48 = vpop.f32.mrb[2].mxu0  ;;  %v3096_v24 = vpop.permute.xlu0 %3095  ;;  %v11631_v10 = vrot.slane %v4195_v4, 11 }
 0x1c7   : > { %v3729_v32 = vadd.f32 %v11542_v41, %v3690_v58  ;;  %v3691_v18 = vmul.f32 %v8952_v48, %v11537_v26  ;;  %v3557_v1 = vpop.f32.mrb[3].mxu0  ;;  %v3423_v58 = vsel %vm3397_vm10, %v3390_v19, %v3096_v24  ;;  %v9141_v24 = vld [vmem:[%s14729_s4] sm:$0xff]  }
 0x1c8   : > { %v3727_v7 = vadd.f32 %v11542_v41, %v3688_v60  ;;  %v3689_v39 = vmul.f32 %v11537_v26, %v3557_v1  ;;  %v11577_v60 = vrot.slane %v4151_v6, 11  ;;  %v11583_v1 = vrot.slane %v5146_v59, 5  ;;  %8700 = vmatpush3.bf16.msra.mxu1 %v9141_v24  ;;  %v9145_v59 = vld [vmem:[%s14729_s4 + $0x50] sm:$0xff]  }
 0x1c9   : > { %v3761_v51 = vmax.f32 %v3729_v32, 0.0  ;;  %v3730_v11 = vadd.f32 %v11542_v41, %v3691_v18  ;;  %v4520_v32 = vshll.u32 %v4481_v3, 16  ;;  %v4173_v18 = vshrl.u32 %v4086_v50, 16 }
 0x1ca   : > { %v3759_v28 = vmax.f32 %v3727_v7, 0.0  ;;  %v3728_v14 = vadd.f32 %v11542_v41, %v3689_v39  ;;  %v11564_v52 = vpop.permute.xlu1 %2905  ;;  %v9142_v7 = vld [vmem:[%s14729_s4 + $0x48] sm:$0xff]   ;;  %v4534_v39 = vshll.u32 %v4482_v8, 16  ;;  %v5410_v6 = vshrl.u32 %v5361_v47, 16 }
 0x1cb   : > { %v8617_v0 = vpack.c.bf16 %v3761_v51, %v3761_v51  ;;  %v3762_v43 = vmax.f32 %v3730_v11, 0.0  ;;  %v4835_v51 = vshrl.u32 %v4729_v5, 16  ;;  %v5122_v11 = vld [vmem:[#allocation3 + $0x4c] sm:$0x1]  ;;  %v3881_v50 = vsel %vm11489_vm7, 0, %v3880_v54  ;;  %8701 = vmatprep.subr.bf16.mxu1 %v9142_v7 }
 0x1cc   : > { %v8615_v17 = vpack.c.bf16 %v3759_v28, %v3759_v28  ;;  %v3760_v22 = vmax.f32 %v3728_v14, 0.0  ;;  %v4857_v28 = vshrl.u32 %v4732_v61, 16  ;;  %v3833_v14 = vsel %vm11449_vm5, 0, %v3832_v56  ;;  %3882 = vst [vmem:[#allocation3 + $0x74] sm:$0x1] %v3881_v50 }
 0x1cd   : > { %4050 = vst.msk [vmem:[#allocation3 + $0x30] sm:$0xf] %vm14945_vm4, %v8617_v0  ;;  %v8618_v36 = vpack.c.bf16 %v3762_v43, %v3762_v43  ;;  %v3176_v34 = vpop.permute.xlu0 %3175  ;;  %vm14948_vm4 = vmmov %vm14946_vm1  ;;  %v5188_v0 = vshll.u32 %v5123_v27, 16  ;;  %v9143_v43 = vld [vmem:[%s14729_s4 + $0x8] sm:$0xff]   ;;  %v11612_v3 = vrot.slane %v4520_v32, 5  ;;  %v11614_v47 = vrot.slane %v4173_v18, 11 }
 0x1ce   : > { %4048 = vst.msk [vmem:[#allocation3 + $0x1c] sm:$0xf] %vm14946_vm1, %v8615_v17  ;;  %v8616_v38 = vpack.c.bf16 %v3760_v22, %v3760_v22  ;;  %v3456_v48 = vsel %vm3430_vm11, %v3423_v58, %v3176_v34  ;;  %v2986_v53 = vpop.permute.xlu1 %2985  ;;  %3834 = vst [vmem:[#allocation3 + $0x90] sm:$0x8] %v3833_v14  ;;  %v11605_v17 = vld [vmem:[#allocation3 + $0x4c] sm:$0x1]  ;;  %8702 = vmatpush3.bf16.msra.mxu1 %v9143_v43 }
 0x1cf   : > { %4051 = vst.msk [vmem:[#allocation3 + $0x34] sm:$0xf] %vm14947_vm3, %v8618_v36  ;;  %8973 = vmatprep.mubr.msk.bf16.mxu0 %vm3483_vm0, %v3456_v48  ;;  %v11607_v22 = vrot.slane %v5160_v33, 5  ;;  %v11616_v19 = vrot.slane %v5410_v6, 11  ;;  %v3225_v36 = vsel %vm3183_vm13, %v11432_v20, %v11526_v55  ;;  %v11623_v33 = vrot.slane %v4835_v51, 11  ;;  %8703 = vmatprep.subr.bf16.mxu1 %v9145_v59  ;;  %vm14966_vm3 = vmmov %vm14946_vm1 }
 0x1d0   : > { %4049 = vst.msk [vmem:[#allocation3 + $0x20] sm:$0xf] %vm14948_vm4, %v8616_v38  ;;  %v5174_v8 = vshll.u32 %v5122_v11, 16  ;;  %v11625_v58 = vrot.slane %v4534_v39, 5  ;;  %v3260_v34 = vsel %vm3232_vm14, %v3225_v36, %v11530_v62  ;;  %v4548_v5 = vshll.u32 %v11605_v17, 16  ;;  %vm14969_vm4 = vmmov %vm14946_vm1 }
 0x1d1   : > { %v11594_v37 = vpop.permute.xlu0 %2555  ;;  %14949 = vst [vmem:[#allocation11_spill] sm:$0xff] %v11616_v19  ;;  %v3293_v20 = vsel %vm3265_vm15, %v3260_v34, %v11532_v31  ;;  %v11639_v27 = vrot.slane %v4857_v28, 11  ;;  %v11641_v32 = vrot.slane %v5188_v0, 5  ;;  %v5364_v7 = vld [vmem:[#allocation3 + $0x40] sm:$0x8] }
 0x1d2   : > { %v3098_v55 = vpop.permute.xlu1 %3097  ;;  %v3326_v62 = vsel %vm3298_vm2, %v3293_v20, %v11544_v23  ;;  %v11659_v11 = vrot.slane %v5174_v8, 5  ;;  %v4217_v23 = vshrl.u32 %v4092_v46, 16  ;;  %v5432_v43 = vshrl.u32 %v5364_v7, 16 }
 0x1d3   : > { %14951 = vst [vmem:[#allocation15_spill] sm:$0xff] %v11639_v27  ;;  %v3359_v39 = vsel %vm3331_vm6, %v3326_v62, %v11564_v52  ;;  %v14968_v27 = vshll.u32 %v11470_v35, 16 }
 0x1d4   : > { %v11651_v31 = vld [vmem:[#allocation3 + $0x30] sm:$0xf]  ;;  %v3392_v56 = vsel %vm3364_vm8, %v3359_v39, %v2986_v53  ;;  %v4484_v39 = vld [vmem:[#allocation3 + $0x60] sm:$0x1]  ;;  %v11696_v62 = vrot.slane %v5432_v43, 11 }
 0x1d5   : > { %v11621_v63 = vld [vmem:[#allocation3 + $0x1c] sm:$0xf]  ;;  %14953 = vst [vmem:[#allocation16_spill] sm:$0xff] %v11651_v31  ;;  %v3425_v52 = vsel %vm3397_vm10, %v3392_v56, %v3098_v55  ;;  %v11668_v54 = vld [vmem:[#allocation3 + $0x30] sm:$0xf]  ;;  %v4796_v30 = vshrl.u32 %v11651_v31, 16 }
 0x1d6   : > { %14950 = vst [vmem:[#allocation13_spill] sm:$0xff] %v11621_v63  ;;  %v14755_v38 = vshrl.u32 %v11621_v63, 16  ;;  %v11635_v48 = vld [vmem:[#allocation3 + $0x1c] sm:$0xf]  ;;  %v11655_v6 = vld [vmem:[#allocation3 + $0x34] sm:$0xf] }
 0x1d7   : > { %v11637_v61 = vld [vmem:[#allocation3 + $0x20] sm:$0xf]  ;;  %v11645_v18 = vpop.permute.xlu0 %2635  ;;  %v11657_v51 = vld [vmem:[#allocation3 + $0x34] sm:$0xf]  ;;  %v4777_v28 = vshll.u32 %v11621_v63, 16  ;;  %v8397_v53 = vcombine.low %v11668_v54, %v11655_v6  ;;  %v4798_v36 = vrot.slane %v4796_v30, 7 }
 0x1d8   : > { %v8396_v12 = vcombine.low %v11635_v48, %v11637_v61  ;;  %v11649_v24 = vld [vmem:[#allocation3 + $0x20] sm:$0xf]  ;;  %14954 = vst [vmem:[#allocation18_spill] sm:$0xff] %v11657_v51  ;;  %v4776_v4 = vrot.slane %v14755_v38, 7  ;;  %v4805_v0 = vshrl.u32 %v11657_v51, 16  ;;  %v4799_v8 = vshll.u32 %v11651_v31, 16 }
 0x1d9   : > { %14952 = vst [vmem:[#allocation14_spill] sm:$0xff] %v11649_v24  ;;  %v4783_v14 = vshrl.u32 %v11649_v24, 16  ;;  %v4786_v17 = vshll.u32 %v11649_v24, 16  ;;  %v4808_v46 = vshll.u32 %v11657_v51, 16  ;;  %v5367_v56 = vld [vmem:[#allocation3 + $0x54] sm:$0x8] }
 0x1da   : > { %6131 = vrot.lane.b32.xlu1 %v8396_v12, %s9293_s17  ;;  %v4779_v50 = vor.u32 %v4777_v28, %v4776_v4  ;;  %v4807_v34 = vrot.slane %v4805_v0, 7  ;;  %v4781_v12 = vrot.slane %v4776_v4, 4  ;;  %v4801_v21 = vor.u32 %v4799_v8, %v4798_v36  ;;  %14956 = vst [vmem:[#allocation19_spill] sm:$0xff] %v11696_v62 }
 0x1db   : > { %v4785_v15 = vrot.slane %v4783_v14, 7  ;;  %v11684_v38 = vrot.slane %v4548_v5, 5  ;;  %v11691_v4 = vrot.slane %v4217_v23, 11  ;;  %v4562_v49 = vshll.u32 %v4484_v39, 16 }
 0x1dc   : > { %v3178_v59 = vpop.permute.xlu1 %3177  ;;  %v4810_v13 = vor.u32 %v4808_v46, %v4807_v34  ;;  %v5454_v5 = vshrl.u32 %v5367_v56, 16  ;;  %v14957_v34 = vshrl.u32 %v11635_v48, 16  ;;  %v5137_v23 = vrot.slane %v4777_v28, 5 }
 0x1dd   : > { %v3458_v20 = vsel %vm3430_vm11, %v3425_v52, %v3178_v59  ;;  %v11678_v55 = vpop.permute.xlu0 %2715  ;;  %v4788_v7 = vor.u32 %v4786_v17, %v4785_v15  ;;  %v4780_v52 = vsel %vm9518_vm9, %v11561_v2, %v4779_v50  ;;  %14955 = vst [vmem:[#allocation17_spill] sm:$0xff] %v11691_v4  ;;  %v14958_v50 = vshrl.u32 %v11621_v63, 16 }
 0x1de   : > { %6133 = vrot.lane.b32.xlu1 %v8397_v53, %s9293_s17  ;;  %8974 = vmatmul.mubr.msk.bf16.gmra.mrb[24].mxu0 %vm3483_vm0, %v3458_v20  ;;  %v4803_v53 = vrot.slane %v4798_v36, 4  ;;  %v9146_v20 = vld [vmem:[%s14729_s4 + $0x10] sm:$0xff]   ;;  %v4510_v19 = vrot.slane %v14957_v34, 4  ;;  %v4802_v43 = vsel %vm9518_vm9, %v11566_v29, %v4801_v21  ;;  %v5140_v39 = vrot.slane %v4786_v17, 5 }
 0x1df   : > { %v4789_v59 = vsel %vm9518_vm9, %v4781_v12, %v4788_v7  ;;  %v5136_v36 = vrot.slane %v14958_v50, 4  ;;  %v14959_v12 = vshll.u32 %v11635_v48, 16  ;;  %v5142_v56 = vrot.slane %v4783_v14, 4  ;;  %8704 = vmatpush3.bf16.msra.mxu1 %v9146_v20 }
 0x1e0   : > { %v8427_v15 = vcombine.low %v4780_v52, %v4789_v59  ;;  %v4811_v2 = vsel %vm9518_vm9, %v4803_v53, %v4810_v13  ;;  %v5150_v13 = vrot.slane %v4796_v30, 4  ;;  %v5151_v53 = vrot.slane %v4799_v8, 5 }
 0x1e1   : > { %v4511_v7 = vrot.slane %v14959_v12, 5  ;;  %v11710_v52 = vpop.permute.xlu0 %2827  ;;  %v5138_v59 = vor.u32 %v5137_v23, %v5136_v36  ;;  %v5154_v34 = vrot.slane %v4808_v46, 5  ;;  %v8428_v28 = vcombine.low %v4802_v43, %v4811_v2 }
 0x1e2   : > { %6257 = vrot.lane.b32.xlu0 %v8427_v15, %s9293_s17  ;;  %v11712_v50 = vpop.permute.xlu1 %2557  ;;  %v5143_v62 = vor.u32 %v5142_v56, %v5140_v39  ;;  %v5156_v12 = vrot.slane %v4805_v0, 4  ;;  %v11714_v4 = vrot.slane %v5454_v5, 11  ;;  %v11719_v21 = vsel %vm3183_vm13, %v11466_v25, %v11594_v37 }
 0x1e3   : > { %v5139_v29 = vrot.slane %v5138_v59, 4  ;;  %v5152_v14 = vor.u32 %v5151_v53, %v5150_v13  ;;  %v11721_v17 = vrot.slane %v4562_v49, 5  ;;  %v14761_v30 = vshrl.u32 %v11637_v61, 16 }
 0x1e4   : > { %14960 = vst [vmem:[#allocation21_spill] sm:$0xff] %v11714_v4  ;;  %v14757_v8 = vshrl.u32 %v11668_v54, 16  ;;  %v5144_v46 = vrot.slane %v5143_v62, 4  ;;  %v5157_v15 = vor.u32 %v5156_v12, %v5154_v34  ;;  %v14759_v0 = vshll.u32 %v11637_v61, 16  ;;  %v9147_v62 = vld [vmem:[%s14729_s4 + $0x58] sm:$0xff]  }
 0x1e5   : > { %14961 = vst [vmem:[#allocation20_spill] sm:$0xff] %v11721_v17  ;;  %v5141_v20 = vsel %vm9580_vm12, %v5139_v29, %v5140_v39  ;;  %v5153_v5 = vrot.slane %v5152_v14, 4  ;;  %v4512_v25 = vor.u32 %v4511_v7, %v4510_v19  ;;  %v14758_v37 = vshll.u32 %v11668_v54, 16  ;;  %8705 = vmatprep.subr.bf16.mxu1 %v9147_v62  ;;  %v4738_v4 = vld [vmem:[#allocation3 + $0x90] sm:$0x8] }
 0x1e6   : > { %6259 = vrot.lane.b32.xlu0 %v8428_v28, %s9293_s17  ;;  %v14760_v49 = vshrl.u32 %v11655_v6, 16  ;;  %v5149_v36 = vsel %vm9580_vm12, %v5144_v46, %v11583_v1  ;;  %v5158_v23 = vrot.slane %v5157_v15, 4  ;;  %v9149_v1 = vld [vmem:[%s14729_s4 + $0x18] sm:$0xff]   ;;  %v11748_v13 = vpop.permute.xlu1 %2637  ;;  %v11752_v53 = vrot.slane %v14761_v30, 4 }
 0x1e7   : > { %v11741_v56 = vcombine.low %v5141_v20, %v5149_v36  ;;  %v5155_v59 = vsel %vm9580_vm12, %v5153_v5, %v5154_v34  ;;  %v11758_v14 = vrot.slane %v4512_v25, 4  ;;  %8706 = vmatpush3.bf16.msra.mxu1 %v9149_v1  ;;  %v9151_v5 = vld [vmem:[%s14729_s4 + $0x60] sm:$0xff]   ;;  %v11772_v25 = vrot.slane %v14759_v0, 5  ;;  %v11805_v0 = vld [vmem:[#allocation3 + $0x34] sm:$0xf] }
 0x1e8   : > { %v8955_v2 = vpop.f32.mrb[4].mxu0  ;;  %v11737_v43 = vpop.permute.xlu0 %2907  ;;  %v5163_v29 = vsel %vm9580_vm12, %v5158_v23, %v11607_v22  ;;  %v9152_v22 = vld [vmem:[%s14729_s4 + $0x20] sm:$0xff]   ;;  %v11776_v36 = vrot.slane %v14757_v8, 4  ;;  %8707 = vmatprep.subr.bf16.mxu1 %v9151_v5  ;;  %14965 = vst [vmem:[#allocation22_spill] sm:$0xff] %v11805_v0  ;;  %v4497_v17 = vrot.slane %v14968_v27, 5 }
 0x1e9   : > { %v3694_v19 = vmul.f32 %v8955_v2, %v11537_v26  ;;  %v3570_v7 = vpop.f32.mrb[5].mxu0  ;;  %14962 = vst [vmem:[#allocation7_spill] sm:$0xff] %v11741_v56  ;;  %v11762_v20 = vcombine.low %v5155_v59, %v5163_v29  ;;  %v3835_v2 = vld [vmem:[#allocation3 + $0xa4] sm:$0x8]  ;;  %v11787_v59 = vrot.slane %v14758_v37, 5  ;;  %v14967_v56 = vshrl.u32 %v11470_v35, 16 }
 0x1ea   : > { %v3692_v28 = vmul.f32 %v11537_v26, %v3570_v7  ;;  %v8956_v12 = vpop.f32.mrb[6].mxu0  ;;  %v9153_v7 = vld [vmem:[%s14729_s4 + $0x68] sm:$0xff]   ;;  %v11790_v29 = vld [vmem:[#allocation3 + $0x30] sm:$0xf] }
 0x1eb   : > { %v3733_v34 = vadd.f32 %v11542_v41, %v3694_v19  ;;  %v3695_v46 = vmul.f32 %v8956_v12, %v11537_v26  ;;  %v3573_v15 = vpop.f32.mrb[7].mxu0  ;;  %14963 = vst [vmem:[#allocation9_spill] sm:$0xff] %v11762_v20  ;;  %v3836_v19 = vsel %vm11449_vm5, 0, %v3835_v2  ;;  %14964 = vst [vmem:[#allocation8_spill] sm:$0xff] %v11790_v29  ;;  %v11798_v2 = vrot.slane %v14760_v49, 4  ;;  %8708 = vmatpush3.bf16.msra.mxu1 %v9152_v22  ;;  %v11814_v49 = vpop.permute.xlu1 %2717  ;;  %v9157_v22 = vld [vmem:[%s14729_s4 + $0x70] sm:$0xff]  }
 0x1ec   : > { %v3731_v23 = vadd.f32 %v11542_v41, %v3692_v28  ;;  %v3693_v62 = vmul.f32 %v11537_v26, %v3573_v15  ;;  %3837 = vst [vmem:[#allocation3 + $0xa4] sm:$0x8] %v3836_v19  ;;  %v3886_v28 = vld [vmem:[#allocation3 + $0x9c] sm:$0x1]  ;;  %v4515_v15 = vsel %vm9580_vm12, %v11758_v14, %v11772_v25  ;;  %v9155_v14 = vld [vmem:[%s14729_s4 + $0x28] sm:$0xff]   ;;  %8709 = vmatprep.subr.bf16.mxu1 %v9153_v7 }
 0x1ed   : > { %v3765_v1 = vmax.f32 %v3733_v34, 0.0  ;;  %v3734_v12 = vadd.f32 %v11542_v41, %v3695_v46  ;;  %v3887_v34 = vsel %vm11489_vm7, 0, %v3886_v28  ;;  %v3798_v46 = vld [vmem:[#allocation3 + $0x10] sm:$0x1]  ;;  %v4517_v28 = vor.u32 %v11752_v53, %v11772_v25  ;;  %v5124_v25 = vld [vmem:[#allocation3 + $0x74] sm:$0x1] }
 0x1ee   : > { %v3763_v8 = vmax.f32 %v3731_v23, 0.0  ;;  %v3732_v37 = vadd.f32 %v11542_v41, %v3693_v62  ;;  %3888 = vst [vmem:[#allocation3 + $0x9c] sm:$0x1] %v3887_v34  ;;  %v3799_v23 = vsel %vm11489_vm7, 0, %v3798_v46  ;;  %v3811_v62 = vld [vmem:[#allocation3 + $0x4] sm:$0x8]  ;;  %v3262_v34 = vsel %vm3232_vm14, %v11719_v21, %v11645_v18 }
 0x1ef   : > { %v11803_v39 = vpop.permute.xlu0 %2987  ;;  %v8621_v5 = vpack.c.bf16 %v3765_v1, %v3765_v1  ;;  %v3766_v19 = vmax.f32 %v3734_v12, 0.0  ;;  %v4735_v12 = vld [vmem:[#allocation3 + $0x7c] sm:$0x8]  ;;  %3800 = vst [vmem:[#allocation3 + $0x10] sm:$0x1] %v3799_v23  ;;  %v4496_v23 = vrot.slane %v14967_v56, 4  ;;  %8710 = vmatpush3.bf16.msra.mxu1 %v9155_v14 }
 0x1f0   : > { %v8619_v30 = vpack.c.bf16 %v3763_v8, %v3763_v8  ;;  %v3764_v1 = vmax.f32 %v3732_v37, 0.0  ;;  %v4146_v8 = vshll.u32 %v11472_v57, 16  ;;  %v3889_v37 = vld [vmem:[#allocation3 + $0xb0] sm:$0x1]  ;;  %v5125_v20 = vld [vmem:[#allocation3 + $0x88] sm:$0x1]  ;;  %8711 = vmatprep.subr.bf16.mxu1 %v9157_v22 }
 0x1f1   : > { %4054 = vst.msk [vmem:[#allocation3 + $0x58] sm:$0xf] %vm14946_vm1, %v8621_v5  ;;  %v8622_v46 = vpack.c.bf16 %v3766_v19, %v3766_v19  ;;  %v3812_v18 = vsel %vm11449_vm5, 0, %v3811_v62  ;;  %v4879_v5 = vshrl.u32 %v4735_v12, 16  ;;  %v4901_v19 = vshrl.u32 %v4738_v4, 16  ;;  %v9159_v12 = vld [vmem:[%s14729_s4 + $0x78] sm:$0xff]  }
 0x1f2   : > { %4052 = vst.msk [vmem:[#allocation3 + $0x44] sm:$0xf] %vm14966_vm3, %v8619_v30  ;;  %v8620_v7 = vpack.c.bf16 %v3764_v1, %v3764_v1  ;;  %v9158_v30 = vld [vmem:[%s14729_s4 + $0x30] sm:$0xff]   ;;  %3813 = vst [vmem:[#allocation3 + $0x4] sm:$0x8] %v3812_v18  ;;  %v4518_v1 = vrot.slane %v4517_v28, 4  ;;  %v4498_v56 = vor.u32 %v4497_v17, %v4496_v23 }
 0x1f3   : > { %4055 = vst.msk [vmem:[#allocation3 + $0x5c] sm:$0xf] %vm14969_vm4, %v8622_v46  ;;  %v5202_v62 = vshll.u32 %v5124_v25, 16  ;;  %v3890_v4 = vsel %vm11489_vm7, 0, %v3889_v37  ;;  %v3100_v14 = vpop.permute.xlu0 %3099  ;;  %v5216_v46 = vshll.u32 %v5125_v20, 16  ;;  %v11847_v28 = vrot.slane %v4146_v8, 5  ;;  %v2830_v20 = vpop.permute.xlu1 %2829  ;;  %8712 = vmatpush3.bf16.msra.mxu1 %v9158_v30 }
 0x1f4   : > { %4053 = vst.msk [vmem:[#allocation3 + $0x48] sm:$0xf] %vm14946_vm1, %v8620_v7  ;;  %v14970_v7 = vshrl.u32 %v11472_v57, 16  ;;  %v4523_v22 = vsel %vm9580_vm12, %v4518_v1, %v11612_v3  ;;  %3891 = vst [vmem:[#allocation3 + $0xb0] sm:$0x1] %v3890_v4  ;;  %v3231_v25 = vsel %vm3183_vm13, %v11482_v44, %v11712_v50  ;;  %v3295_v37 = vsel %vm3265_vm15, %v3262_v34, %v11678_v55  ;;  %v9160_v44 = vld [vmem:[%s14729_s4 + $0x38] sm:$0xff]  }
 0x1f5   : > { %v11859_v21 = vcombine.low %v4515_v15, %v4523_v22  ;;  %v3264_v27 = vsel %vm3232_vm14, %v3231_v25, %v11748_v13  ;;  %v11865_v53 = vrot.slane %v4879_v5, 11  ;;  %v11867_v3 = vrot.slane %v4901_v19, 11  ;;  %8713 = vmatprep.subr.bf16.mxu1 %v9159_v12  ;;  %v11894_v12 = vld [vmem:[#allocation3 + $0xa4] sm:$0x8]  ;;  %vm15014_vm13 = vmmov %vm14946_vm1 }
 0x1f6   : > { %v4502_v18 = vrot.slane %v14970_v7, 4  ;;  %v3328_v7 = vsel %vm3298_vm2, %v3295_v37, %v11710_v52  ;;  %v11872_v55 = vrot.slane %v5202_v62, 5  ;;  %v14975_v50 = vshrl.u32 %v11470_v35, 16  ;;  %vm15016_vm14 = vmmov %vm14946_vm1 }
 0x1f7   : > { %14971 = vst [vmem:[#allocation23_spill] sm:$0xff] %v11859_v21  ;;  %14972 = vst [vmem:[#allocation24_spill] sm:$0xff] %v11865_v53  ;;  %v3361_v15 = vsel %vm3331_vm6, %v3328_v7, %v11737_v43  ;;  %v11886_v23 = vrot.slane %v5216_v46, 5  ;;  %v14978_v19 = vshrl.u32 %v11472_v57, 16  ;;  %v11896_v4 = vrot.slane %v4498_v56, 4  ;;  %8714 = vmatpush3.bf16.msra.mxu1 %v9160_v44 }
 0x1f8   : > { %14973 = vst [vmem:[#allocation25_spill] sm:$0xff] %v11867_v3  ;;  %14974 = vst [vmem:[#allocation26_spill] sm:$0xff] %v11872_v55  ;;  %v11876_v17 = vrot.slane %v14975_v50, 7  ;;  %v4503_v5 = vor.u32 %v4502_v18, %v11847_v28  ;;  %v3394_v1 = vsel %vm3364_vm8, %v3361_v15, %v11803_v39  ;;  %v14979_v43 = vshrl.u32 %v11635_v48, 16  ;;  %v11909_v39 = vld [vmem:[#allocation3 + $0x58] sm:$0xf]  ;;  %v11916_v15 = vpop.permute.xlu1 %2909 }
 0x1f9   : > { %v11884_v34 = vld [vmem:[#allocation3 + $0x44] sm:$0xf]  ;;  %14977 = vst [vmem:[#allocation28_spill] sm:$0xff] %v11886_v23  ;;  %v4145_v30 = vrot.slane %v14978_v19, 7  ;;  %v3297_v46 = vsel %vm3265_vm15, %v3264_v27, %v11814_v49  ;;  %v3427_v18 = vsel %vm3397_vm10, %v3394_v1, %v3100_v14  ;;  %14980 = vst [vmem:[#allocation29_spill] sm:$0xff] %v11909_v39 }
 0x1fa   : > { %14976 = vst [vmem:[#allocation27_spill] sm:$0xff] %v11884_v34  ;;  %v14762_v62 = vshrl.u32 %v11884_v34, 16  ;;  %v11900_v22 = vrot.slane %v14979_v43, 7  ;;  %v11905_v37 = vld [vmem:[#allocation3 + $0x44] sm:$0xf]  ;;  %v11914_v50 = vsel %vm3298_vm2, %v3297_v46, %v2830_v20  ;;  %v14983_v43 = vshll.u32 %v11470_v35, 16  ;;  %vm15018_vm15 = vmmov %vm14946_vm1 }
 0x1fb   : > { %v11907_v7 = vld [vmem:[#allocation3 + $0x48] sm:$0xf]  ;;  %v11921_v14 = vld [vmem:[#allocation3 + $0x5c] sm:$0xf]  ;;  %v11933_v20 = vld [vmem:[#allocation3 + $0x58] sm:$0xf]  ;;  %v4148_v52 = vor.u32 %v4146_v8, %v4145_v30 }
 0x1fc   : > { %v8398_v27 = vcombine.low %v11905_v37, %v11907_v7  ;;  %v11923_v19 = vld [vmem:[#allocation3 + $0x48] sm:$0xf]  ;;  %v11925_v1 = vld [vmem:[#allocation3 + $0x5c] sm:$0xf]  ;;  %v11930_v44 = vor.u32 %v14983_v43, %v11876_v17  ;;  %v4923_v46 = vshrl.u32 %v11894_v12, 16  ;;  %v4820_v35 = vrot.slane %v14762_v62, 7  ;;  %v2990_v63 = vpop.permute.xlu1 %2989  ;;  %vm15021_vm2 = vmmov %vm14946_vm1 }
 0x1fd   : > { %v3180_v25 = vpop.permute.xlu0 %3179  ;;  %14981 = vst [vmem:[#allocation30_spill] sm:$0xff] %v11923_v19  ;;  %14982 = vst [vmem:[#allocation31_spill] sm:$0xff] %v11925_v1  ;;  %v14767_v43 = vshll.u32 %v11884_v34, 16  ;;  %v11946_v13 = vld [vmem:[#allocation3 + $0x44] sm:$0xf]  ;;  %v8399_v57 = vcombine.low %v11933_v20, %v11921_v14  ;;  %v4849_v30 = vshrl.u32 %v11925_v1, 16 }
 0x1fe   : > { %v3460_v49 = vsel %vm3430_vm11, %v3427_v18, %v3180_v25  ;;  %v11936_v18 = vrot.slane %v4503_v5, 4  ;;  %v4141_v25 = vrot.slane %v11876_v17, 4  ;;  %6135 = vrot.lane.b32.xlu1 %v8398_v27, %s9293_s17  ;;  %v14984_v5 = vshll.u32 %v11635_v48, 16  ;;  %v11958_v27 = vld [vmem:[#allocation3 + $0x48] sm:$0xf] }
 0x1ff   : > { %8977 = vmatprep.mubr.msk.bf16.mxu0 %vm3483_vm0, %v3460_v49  ;;  %v14768_v49 = vshrl.u32 %v11923_v19, 16  ;;  %v4840_v17 = vshrl.u32 %v11909_v39, 16  ;;  %v4823_v56 = vor.u32 %v14767_v43, %v4820_v35  ;;  %v4825_v62 = vrot.slane %v4820_v35, 4 }
 0x200   : > { %v11951_v12 = vor.u32 %v14984_v5, %v11900_v22  ;;  %v4843_v5 = vshll.u32 %v11909_v39, 16  ;;  %v4851_v31 = vrot.slane %v4849_v30, 7  ;;  %v4852_v24 = vshll.u32 %v11925_v1, 16 }
 0x201   : > { %v4829_v48 = vrot.slane %v14768_v49, 7  ;;  %v4842_v51 = vrot.slane %v4840_v17, 7  ;;  %v4824_v21 = vsel %vm9518_vm9, %v11571_v45, %v4823_v56  ;;  %v14985_v35 = vshll.u32 %v11923_v19, 16 }
 0x202   : > { %6137 = vrot.lane.b32.xlu1 %v8399_v57, %s9293_s17  ;;  %v14773_v49 = vshll.u32 %v11946_v13, 16  ;;  %v14774_v3 = vshrl.u32 %v11958_v27, 16  ;;  %v4854_v53 = vor.u32 %v4852_v24, %v4851_v31  ;;  %v14775_v0 = vshll.u32 %v11958_v27, 16 }
 0x203   : > { %v4832_v43 = vor.u32 %v14985_v35, %v4829_v48  ;;  %v4845_v23 = vor.u32 %v4843_v5, %v4842_v51  ;;  %v4847_v55 = vrot.slane %v4842_v51, 4  ;;  %v14986_v57 = vshrl.u32 %v11946_v13, 16  ;;  %v11990_v48 = vld [vmem:[#allocation3 + $0x9c] sm:$0x1] }
 0x204   : > { %v11984_v45 = vrot.slane %v14773_v49, 5  ;;  %v11988_v56 = vrot.slane %v14774_v3, 4  ;;  %v11994_v51 = vrot.slane %v14775_v0, 5  ;;  %v12006_v3 = vrot.slane %v4923_v46, 11  ;;  %v3865_v49 = vld [vmem:[#allocation3 + $0x10] sm:$0x1] }
 0x205   : > { %v4833_v8 = vsel %vm9518_vm9, %v4825_v62, %v4832_v43  ;;  %v11980_v29 = vrot.slane %v14986_v57, 4  ;;  %v14991_v43 = vshrl.u32 %v11637_v61, 16  ;;  %v4855_v57 = vsel %vm9518_vm9, %v4847_v55, %v4854_v53  ;;  %v3102_v53 = vpop.permute.xlu1 %3101 }
 0x206   : > { %14988 = vst [vmem:[#allocation33_spill] sm:$0xff] %v11984_v45  ;;  %14989 = vst [vmem:[#allocation34_spill] sm:$0xff] %v11988_v56  ;;  %v8429_v31 = vcombine.low %v4824_v21, %v4833_v8  ;;  %v4163_v21 = vrot.slane %v11900_v22, 4  ;;  %v4846_v22 = vsel %vm9518_vm9, %v11623_v33, %v4845_v23  ;;  %v4162_v46 = vsel %vm9518_vm9, %v11577_v60, %v11951_v12 }
 0x207   : > { %14987 = vst [vmem:[#allocation32_spill] sm:$0xff] %v11980_v29  ;;  %14990 = vst [vmem:[#allocation35_spill] sm:$0xff] %v11994_v51  ;;  %v4167_v35 = vrot.slane %v14991_v43, 7  ;;  %v12016_v43 = vsel %vm9518_vm9, %v4141_v25, %v4148_v52  ;;  %v3363_v52 = vsel %vm3331_vm6, %v11914_v50, %v11916_v15  ;;  %v14776_v25 = vshrl.u32 %v11905_v37, 16  ;;  %v5127_v51 = vld [vmem:[#allocation3 + $0xb0] sm:$0x1] }
 0x208   : > { %6261 = vrot.lane.b32.xlu0 %v8429_v31, %s9293_s17  ;;  %v4526_v31 = vor.u32 %v11787_v59, %v11776_v36  ;;  %v8430_v0 = vcombine.low %v4846_v22, %v4855_v57  ;;  %v14992_v62 = vshll.u32 %v11637_v61, 16  ;;  %v14779_v33 = vshll.u32 %v11905_v37, 16 }
 0x209   : > { %v14777_v23 = vshrl.u32 %v11921_v14, 16  ;;  %v5178_v8 = vrot.slane %v4840_v17, 4  ;;  %v5179_v60 = vrot.slane %v4843_v5, 5  ;;  %v14993_v36 = vshrl.u32 %v11933_v20, 16 }
 0x20a   : > { %v4170_v55 = vor.u32 %v14992_v62, %v4167_v35  ;;  %v5182_v50 = vrot.slane %v4852_v24, 5  ;;  %v5184_v15 = vrot.slane %v4849_v30, 4  ;;  %v14778_v57 = vshrl.u32 %v11907_v7, 16  ;;  %v3838_v30 = vld [vmem:[#allocation3 + $0xb8] sm:$0x8] }
 0x20b   : > { %v12039_v59 = vrot.slane %v14993_v36, 4  ;;  %v14994_v61 = vshll.u32 %v11933_v20, 16  ;;  %v5180_v35 = vor.u32 %v5179_v60, %v5178_v8  ;;  %v3866_v17 = vsel %vm11489_vm7, 0, %v3865_v49  ;;  %v12052_v36 = vld [vmem:[#allocation3 + $0x58] sm:$0xf] }
 0x20c   : > { %6263 = vrot.lane.b32.xlu0 %v8430_v0, %s9293_s17  ;;  %v3396_v5 = vsel %vm3364_vm8, %v3363_v52, %v2990_v63  ;;  %v4538_v22 = vrot.slane %v14776_v25, 4  ;;  %v5185_v0 = vor.u32 %v5184_v15, %v5182_v50  ;;  %3867 = vst [vmem:[#allocation3 + $0x10] sm:$0x1] %v3866_v17  ;;  %v4171_v24 = vsel %vm9518_vm9, %v4163_v21, %v4170_v55  ;;  %v3892_v63 = vld [vmem:[#allocation3 + $0xc4] sm:$0x1]  ;;  %v9166_v55 = vld [vmem:[%s14729_s4 + $0x80] sm:$0xff]   ;;  %vm15092_vm8 = vmmov %vm14946_vm1 }
 0x20d   : > { %v12045_v62 = vrot.slane %v14994_v61, 5  ;;  %v3429_v61 = vsel %vm3397_vm10, %v3396_v5, %v3102_v53  ;;  %v4539_v8 = vrot.slane %v14779_v33, 5  ;;  %v5181_v49 = vrot.slane %v5180_v35, 4  ;;  %v3841_v52 = vld [vmem:[#allocation3 + $0xcc] sm:$0x8]  ;;  %v9165_v53 = vld [vmem:[%s14729_s4 + $0xc0] sm:$0xff]   ;;  %vm15095_vm10 = vmmov %vm14946_vm1 }
 0x20e   : > { %v3182_v12 = vpop.permute.xlu1 %3181  ;;  %v12059_v60 = vcombine.low %v4162_v46, %v4171_v24  ;;  %v12065_v17 = vrot.slane %v14777_v23, 4  ;;  %v5186_v21 = vrot.slane %v5185_v0, 4  ;;  %v9167_v46 = vld [vmem:[%s14729_s4 + $0xc8] sm:$0xff]   ;;  %v12083_v5 = vld [vmem:[#allocation3 + $0x5c] sm:$0xf]  ;;  %v14780_v0 = vshrl.u32 %v12052_v36, 16  ;;  %8811 = vmatprep.subr.bf16.mxu0 %v9165_v53 }
 0x20f   : > { %v3462_v25 = vsel %vm3430_vm11, %v3429_v61, %v3182_v12  ;;  %v12079_v12 = vrot.slane %v14778_v57, 4  ;;  %14995 = vst [vmem:[#allocation36_spill] sm:$0xff] %v12083_v5  ;;  %v3839_v24 = vsel %vm11449_vm5, 0, %v3838_v30  ;;  %v5183_v23 = vsel %vm9580_vm12, %v5181_v49, %v5182_v50  ;;  %8812 = vmatpush3.bf16.msra.mxu0 %v9166_v55  ;;  %vm15097_vm11 = vmmov %vm14946_vm1 }
 0x210   : > { %8978 = vmatmul.mubr.msk.bf16.gmra.mrb[28].mxu0 %vm3483_vm0, %v3462_v25  ;;  %v5191_v25 = vsel %vm9580_vm12, %v5186_v21, %v11641_v32  ;;  %3840 = vst [vmem:[#allocation3 + $0xb8] sm:$0x8] %v3839_v24  ;;  %v3893_v35 = vsel %vm11489_vm7, 0, %v3892_v63  ;;  %v3842_v30 = vsel %vm11449_vm5, 0, %v3841_v52  ;;  %v4527_v33 = vrot.slane %v4526_v31, 4  ;;  %8813 = vmatprep.subr.bf16.mxu0 %v9167_v46  ;;  %vm15100_vm0 = vmmov %vm14946_vm1 }
 0x211   : > { %v12096_v57 = vcombine.low %v5183_v23, %v5191_v25  ;;  %3894 = vst [vmem:[#allocation3 + $0xc4] sm:$0x1] %v3893_v35  ;;  %v14996_v61 = vshll.u32 %v11655_v6, 16  ;;  %3843 = vst [vmem:[#allocation3 + $0xcc] sm:$0x8] %v3842_v30  ;;  %v14997_v32 = vshrl.u32 %v11668_v54, 16  ;;  %v4540_v23 = vor.u32 %v4539_v8, %v4538_v22 }
 0x212   : > { %v14998_v63 = vshrl.u32 %v11655_v6, 16  ;;  %v12110_v31 = vrot.slane %v14780_v0, 4  ;;  %v15000_v35 = vshll.u32 %v11668_v54, 16  ;;  %v15001_v25 = vshll.u32 %v11655_v6, 16  ;;  %vm15127_vm3 = vmmov %vm15100_vm0 }
 0x213   : > { %v4528_v15 = vrot.slane %v14996_v61, 5  ;;  %v4180_v49 = vrot.slane %v14997_v32, 7  ;;  %v15002_v22 = vshll.u32 %v11907_v7, 16  ;;  %v15003_v32 = vshrl.u32 %v11884_v34, 16  ;;  %vm15129_vm4 = vmmov %vm15100_vm0 }
 0x214   : > { %v4189_v21 = vrot.slane %v14998_v63, 7  ;;  %14999 = vst [vmem:[#allocation37_spill] sm:$0xff] %v12110_v31  ;;  %v15004_v53 = vshll.u32 %v11884_v34, 16  ;;  %v15005_v6 = vshll.u32 %v11923_v19, 16  ;;  %vm6657_vm6 = vcmask 523264   ;;  %vm15132_vm1 = vmmov %vm15100_vm0 }
 0x215   : > { %v4529_v52 = vsel %vm9580_vm12, %v4527_v33, %v4528_v15  ;;  %v4531_v55 = vor.u32 %v11798_v2, %v4528_v15  ;;  %v4183_v24 = vor.u32 %v15000_v35, %v4180_v49  ;;  %v4185_v61 = vrot.slane %v4180_v49, 4 }
 0x216   : > { %v4192_v30 = vor.u32 %v15001_v25, %v4189_v21  ;;  %v4542_v8 = vrot.slane %v15002_v22, 5  ;;  %v12123_v63 = vrot.slane %v15003_v32, 4  ;;  %v12127_v33 = vrot.slane %v15004_v53, 5 }
 0x217   : > { %v8959_v46 = vpop.f32.mrb[8].mxu0  ;;  %v4532_v2 = vrot.slane %v4531_v55, 4  ;;  %v4541_v15 = vrot.slane %v4540_v23, 4  ;;  %v12132_v21 = vrot.slane %v15005_v6, 5  ;;  %v4184_v35 = vsel %vm9518_vm9, %v11614_v47, %v4183_v24 }
 0x218   : > { %v3698_v54 = vmul.f32 %v8959_v46, %v11537_v26  ;;  %v3586_v49 = vpop.f32.mrb[9].mxu0  ;;  %v4193_v25 = vsel %vm9518_vm9, %v4185_v61, %v4192_v30  ;;  %v15006_v55 = vshrl.u32 %v11923_v19, 16  ;;  %v4545_v24 = vor.u32 %v12079_v12, %v4542_v8  ;;  %v9169_v61 = vld [vmem:[%s14729_s4 + $0x88] sm:$0xff]   ;;  %v9170_v30 = vld [vmem:[%s14729_s4 + $0xd0] sm:$0xff]  }
 0x219   : > { %v3696_v22 = vmul.f32 %v11537_v26, %v3586_v49  ;;  %v8960_v53 = vpop.f32.mrb[10].mxu0  ;;  %v12142_v32 = vcombine.low %v4184_v35, %v4193_v25  ;;  %v4543_v46 = vsel %vm9580_vm12, %v4541_v15, %v4542_v8  ;;  %v4537_v47 = vsel %vm9580_vm12, %v4532_v2, %v11625_v58  ;;  %v4080_v25 = vld [vmem:[#allocation3 + $0x4] sm:$0x8]  ;;  %8814 = vmatpush3.bf16.msra.mxu0 %v9169_v61 }
 0x21a   : > { %v5170_v23 = vrot.slane %v15006_v55, 4  ;;  %v3737_v6 = vadd.f32 %v11542_v41, %v3698_v54  ;;  %v3699_v0 = vmul.f32 %v8960_v53, %v11537_v26  ;;  %v3589_v50 = vpop.f32.mrb[11].mxu0  ;;  %v15007_v49 = vshll.u32 %v12052_v36, 16  ;;  %8815 = vmatprep.subr.bf16.mxu0 %v9170_v30 }
 0x21b   : > { %v3735_v15 = vadd.f32 %v11542_v41, %v3696_v22  ;;  %v3697_v54 = vmul.f32 %v11537_v26, %v3589_v50  ;;  %v15009_v58 = vshrl.u32 %v11905_v37, 16  ;;  %v15010_v53 = vshrl.u32 %v12083_v5, 16 }
 0x21c   : > { %v12162_v35 = vrot.slane %v15007_v49, 5  ;;  %v3769_v8 = vmax.f32 %v3737_v6, 0.0  ;;  %v3738_v2 = vadd.f32 %v11542_v41, %v3699_v0  ;;  %v5166_v22 = vor.u32 %v12127_v33, %v12123_v63  ;;  %v3895_v6 = vld [vmem:[#allocation3 + $0xd8] sm:$0x1]  ;;  %v3844_v63 = vld [vmem:[#allocation3 + $0xe0] sm:$0x8] }
 0x21d   : > { %v4202_v12 = vrot.slane %v15009_v58, 7  ;;  %v12169_v55 = vrot.slane %v15010_v53, 4  ;;  %v3767_v26 = vmax.f32 %v3735_v15, 0.0  ;;  %v3736_v50 = vadd.f32 %v11542_v41, %v3697_v54  ;;  %v9171_v53 = vld [vmem:[%s14729_s4 + $0x90] sm:$0xff]  }
 0x21e   : > { %15008 = vst [vmem:[#allocation38_spill] sm:$0xff] %v12162_v35  ;;  %v5171_v49 = vor.u32 %v5170_v23, %v12132_v21  ;;  %v12175_v56 = vcombine.low %v4529_v52, %v4537_v47  ;;  %v8625_v58 = vpack.c.bf16 %v3769_v8, %v3769_v8  ;;  %v3770_v0 = vmax.f32 %v3738_v2, 0.0  ;;  %v4480_v23 = vld [vmem:[#allocation3 + $0x10] sm:$0x1]  ;;  %8816 = vmatpush3.bf16.msra.mxu0 %v9171_v53 }
 0x21f   : > { %15011 = vst [vmem:[#allocation39_spill] sm:$0xff] %v12169_v55  ;;  %v4129_v29 = vshrl.u32 %v4080_v25, 16  ;;  %v4546_v45 = vrot.slane %v4545_v24, 4  ;;  %v8623_v33 = vpack.c.bf16 %v3767_v26, %v3767_v26  ;;  %v3768_v61 = vmax.f32 %v3736_v50, 0.0  ;;  %v9172_v50 = vld [vmem:[%s14729_s4 + $0xd8] sm:$0xff]  }
 0x220   : > { %15012 = vst [vmem:[#allocation40_spill] sm:$0xff] %v12175_v56  ;;  %v5244_v15 = vshll.u32 %v5127_v51, 16  ;;  %v15013_v41 = vshll.u32 %v11905_v37, 16  ;;  %4058 = vst.msk [vmem:[#allocation3 + $0x80] sm:$0xf] %vm15014_vm13, %v8625_v58  ;;  %v8626_v52 = vpack.c.bf16 %v3770_v0, %v3770_v0  ;;  %v15015_v24 = vshrl.u32 %v11907_v7, 16  ;;  %8817 = vmatprep.subr.bf16.mxu0 %v9172_v50 }
 0x221   : > { %v4551_v47 = vsel %vm9580_vm12, %v4546_v45, %v11684_v38  ;;  %v3896_v25 = vsel %vm11489_vm7, 0, %v3895_v6  ;;  %4056 = vst.msk [vmem:[#allocation3 + $0x6c] sm:$0xf] %vm15016_vm14, %v8623_v33  ;;  %v8624_v51 = vpack.c.bf16 %v3768_v61, %v3768_v61  ;;  %v5172_v37 = vrot.slane %v5171_v49, 4  ;;  %v3898_v49 = vld [vmem:[#allocation3 + $0xec] sm:$0x1]  ;;  %vm15133_vm13 = vmmov %vm15100_vm0 }
 0x222   : > { %v4205_v54 = vor.u32 %v15013_v41, %v4202_v12  ;;  %v4211_v30 = vrot.slane %v15015_v24, 7  ;;  %v12191_v8 = vcombine.low %v4543_v46, %v4551_v47  ;;  %3897 = vst [vmem:[#allocation3 + $0xd8] sm:$0x1] %v3896_v25  ;;  %v3845_v2 = vsel %vm11449_vm5, 0, %v3844_v63  ;;  %4059 = vst.msk [vmem:[#allocation3 + $0x84] sm:$0xf] %vm15018_vm15, %v8626_v52 }
 0x223   : > { %v4207_v38 = vrot.slane %v4202_v12, 4  ;;  %v15019_v45 = vshll.u32 %v11907_v7, 16  ;;  %3846 = vst [vmem:[#allocation3 + $0xe0] sm:$0x8] %v3845_v2  ;;  %v9173_v46 = vld [vmem:[%s14729_s4 + $0x98] sm:$0xff]   ;;  %v4554_v6 = vor.u32 %v12045_v62, %v12039_v59  ;;  %v15020_v58 = vshll.u32 %v11921_v14, 16  ;;  %vm15173_vm14 = vmmov %vm15100_vm0 }
 0x224   : > { %15017 = vst [vmem:[#allocation41_spill] sm:$0xff] %v12191_v8  ;;  %4057 = vst.msk [vmem:[#allocation3 + $0x70] sm:$0xf] %vm15021_vm2, %v8624_v51  ;;  %v5167_v7 = vrot.slane %v5166_v22, 4  ;;  %v4506_v12 = vshll.u32 %v4480_v23, 16  ;;  %v4206_v53 = vsel %vm9518_vm9, %v11631_v10, %v4205_v54  ;;  %v3899_v63 = vsel %vm11489_vm7, 0, %v3898_v49  ;;  %8818 = vmatpush3.bf16.msra.mxu0 %v9173_v46 }
 0x225   : > { %v4214_v26 = vor.u32 %v15019_v45, %v4211_v30  ;;  %v4556_v0 = vrot.slane %v15020_v58, 5  ;;  %3900 = vst [vmem:[#allocation3 + $0xec] sm:$0x1] %v3899_v63  ;;  %v4555_v59 = vrot.slane %v4554_v6, 4  ;;  %v15022_v61 = vshrl.u32 %v11933_v20, 16  ;;  %v15028_v50 = vld [vmem:[#allocation20_spill] sm:$0xff]  ;;  %vm15176_vm15 = vmmov %vm15100_vm0 }
 0x226   : > { %v15023_v22 = vshll.u32 %v11990_v48, 16  ;;  %v8331_v10 = vrot.slane %v4129_v29, 11  ;;  %v12225_v54 = vrot.slane %v5244_v15, 5  ;;  %v5177_v47 = vsel %vm9580_vm12, %v5172_v37, %v11659_v11  ;;  %v12243_v51 = vld [vmem:[#allocation3 + $0xb8] sm:$0x8]  ;;  %vm15179_vm2 = vmmov %vm15100_vm0 }
 0x227   : > { %v4215_v33 = vsel %vm9518_vm9, %v4207_v38, %v4214_v26  ;;  %v4559_v62 = vor.u32 %v12065_v17, %v4556_v0  ;;  %v12219_v41 = vrot.slane %v15022_v61, 7  ;;  %v4557_v17 = vsel %vm9580_vm12, %v4555_v59, %v4556_v0  ;;  %v12236_v48 = vld [vmem:[#allocation3 + $0x80] sm:$0xf]  ;;  %v12245_v2 = vld [vmem:[#allocation3 + $0xc4] sm:$0x1] }
 0x228   : > { %v12223_v52 = vrot.slane %v15023_v22, 5  ;;  %v12227_v23 = vcombine.low %v4206_v53, %v4215_v33  ;;  %v15025_v30 = vshrl.u32 %v11921_v14, 16  ;;  %15026 = vst [vmem:[#allocation43_spill] sm:$0xff] %v12236_v48  ;;  %v5169_v15 = vsel %vm9580_vm12, %v5167_v7, %v12132_v21  ;;  %v12251_v38 = vld [vmem:[#allocation3 + $0x6c] sm:$0xf] }
 0x229   : > { %v4560_v24 = vrot.slane %v4559_v62, 4  ;;  %15027 = vst [vmem:[#allocation44_spill] sm:$0xff] %v12251_v38  ;;  %v12253_v45 = vrot.slane %v4506_v12, 5  ;;  %v12255_v26 = vld [vmem:[#allocation3 + $0xcc] sm:$0x8]  ;;  %v4229_v46 = vrot.slane %v12219_v41, 4  ;;  %v15029_v49 = vmov %v15020_v58 }
 0x22a   : > { %15024 = vst [vmem:[#allocation42_spill] sm:$0xff] %v12227_v23  ;;  %v4233_v25 = vrot.slane %v15025_v30, 7  ;;  %v12263_v58 = vld [vmem:[#allocation3 + $0x6c] sm:$0xf]  ;;  %v14789_v0 = vshrl.u32 %v12251_v38, 16  ;;  %v14787_v12 = vshrl.u32 %v12236_v48, 16  ;;  %v12269_v53 = vcombine.low %v5169_v15, %v5177_v47 }
 0x22b   : > { %v4565_v21 = vsel %vm9580_vm12, %v4560_v24, %v15028_v50  ;;  %v12266_v7 = vld [vmem:[#allocation3 + $0x84] sm:$0xf]  ;;  %v4140_v63 = vsel %vm9518_vm9, %v8331_v10, %v11930_v44  ;;  %v12274_v33 = vld [vmem:[#allocation3 + $0x70] sm:$0xf]  ;;  %v4945_v62 = vshrl.u32 %v12243_v51, 16  ;;  %v14788_v24 = vshll.u32 %v12251_v38, 16 }
 0x22c   : > { %v4236_v6 = vor.u32 %v15029_v49, %v4233_v25  ;;  %15030 = vst [vmem:[#allocation20_spill] sm:$0xff] %v12266_v7  ;;  %v12276_v59 = vld [vmem:[#allocation3 + $0x70] sm:$0xf]  ;;  %v14786_v14 = vshrl.u32 %v12266_v7, 16  ;;  %v12280_v61 = vcombine.low %v4557_v17, %v4565_v21  ;;  %v8400_v47 = vcombine.low %v12263_v58, %v12274_v33  ;;  %v12294_v17 = vld [vmem:[#allocation3 + $0x6c] sm:$0xf] }
 0x22d   : > { %15031 = vst [vmem:[#allocation45_spill] sm:$0xff] %v12276_v59  ;;  %v5258_v44 = vshll.u32 %v12245_v2, 16  ;;  %v4967_v10 = vshrl.u32 %v12255_v26, 16  ;;  %v4864_v30 = vrot.slane %v14789_v0, 7  ;;  %v14790_v25 = vshrl.u32 %v12276_v59, 16  ;;  %v15033_v21 = vld [vmem:[#allocation8_spill] sm:$0xff] }
 0x22e   : > { %15032 = vst [vmem:[#allocation46_spill] sm:$0xff] %v12280_v61  ;;  %v12284_v22 = vsel %vm9518_vm9, %v4229_v46, %v4236_v6  ;;  %v12296_v15 = vld [vmem:[#allocation3 + $0x70] sm:$0xf]  ;;  %v4509_v51 = vsel %vm9580_vm12, %v11936_v18, %v12253_v45  ;;  %v8379_v50 = vcombine.low %v4140_v63, %v12016_v43  ;;  %6139 = vrot.lane.b32.xlu1 %v8400_v47, %s9293_s17  ;;  %v4886_v2 = vrot.slane %v14787_v12, 7  ;;  %v15035_v6 = vld [vmem:[#allocation22_spill] sm:$0xff] }
 0x22f   : > { %v4895_v26 = vrot.slane %v14786_v14, 7  ;;  %v15034_v46 = vshrl.u32 %v15033_v21, 16  ;;  %v15036_v37 = vshrl.u32 %v15035_v6, 16  ;;  %v4867_v18 = vor.u32 %v14788_v24, %v4864_v30  ;;  %v3850_v61 = vld [vmem:[#allocation3 + $0x108] sm:$0x8] }
 0x230   : > { %v4873_v43 = vrot.slane %v14790_v25, 7  ;;  %v4874_v45 = vshll.u32 %v12276_v59, 16  ;;  %v14791_v63 = vshll.u32 %v12266_v7, 16  ;;  %v14792_v47 = vshll.u32 %v12236_v48, 16 }
 0x231   : > { %v12310_v49 = vrot.slane %v15034_v46, 7  ;;  %v5426_v11 = vrot.slane %v15036_v37, 7  ;;  %v14794_v14 = vshrl.u32 %v12294_v17, 16  ;;  %v4869_v12 = vrot.slane %v4864_v30, 4 }
 0x232   : > { %v4876_v37 = vor.u32 %v4874_v45, %v4873_v43  ;;  %v4898_v24 = vor.u32 %v14791_v63, %v4895_v26  ;;  %v15037_v25 = vcombine.low %v15033_v21, %v15035_v6  ;;  %v4889_v55 = vor.u32 %v14792_v47, %v4886_v2  ;;  %v15040_v26 = vld [vmem:[#allocation15_spill] sm:$0xff] }
 0x233   : > { %v5819_v46 = vrot.slane %v14794_v14, 4  ;;  %v15038_v29 = vshll.u32 %v12294_v17, 16  ;;  %v15039_v43 = vshrl.u32 %v12296_v15, 16  ;;  %v4868_v63 = vsel %vm9518_vm9, %v15040_v26, %v4867_v18 }
 0x234   : > { %6577 = vrot.lane.b32.xlu1 %v15037_v25, %s9293_s17  ;;  %v4877_v0 = vsel %vm9518_vm9, %v4869_v12, %v4876_v37  ;;  %v4891_v25 = vrot.slane %v4886_v2, 4  ;;  %v15041_v31 = vshll.u32 %v12296_v15, 16  ;;  %v14798_v18 = vshrl.u32 %v12263_v58, 16  ;;  %v12363_v2 = vld [vmem:[#allocation3 + $0x80] sm:$0xf] }
 0x235   : > { %v5820_v30 = vrot.slane %v15038_v29, 5  ;;  %v5825_v35 = vrot.slane %v15039_v43, 4  ;;  %v8431_v1 = vcombine.low %v4868_v63, %v4877_v0  ;;  %v15043_v29 = vshll.u32 %v15033_v21, 16  ;;  %v6130_v63 = vpop.permute.xlu1 %6129 }
 0x236   : > { %v12346_v47 = vrot.slane %v15041_v31, 5  ;;  %v15044_v43 = vshll.u32 %v11933_v20, 16  ;;  %v14797_v12 = vshll.u32 %v12263_v58, 16  ;;  %v4899_v31 = vsel %vm9518_vm9, %v4891_v25, %v4898_v24  ;;  %v12386_v25 = vld [vmem:[#allocation3 + $0x84] sm:$0xf] }
 0x237   : > { %v5821_v14 = vor.u32 %v5820_v30, %v5819_v46  ;;  %v12351_v39 = vor.u32 %v15043_v29, %v12310_v49  ;;  %6265 = vrot.lane.b32.xlu0 %v8431_v1, %s9293_s17  ;;  %v15045_v46 = vld [vmem:[#allocation7_spill] sm:$0xff]  ;;  %v15046_v20 = vsel %vm9580_vm12, %v11896_v4, %v11847_v28  ;;  %v12376_v37 = vsel %vm6657_vm6, %v8379_v50, %v6130_v63  ;;  %v15048_v1 = vld [vmem:[#allocation24_spill] sm:$0xff]  ;;  %v12401_v63 = vld [vmem:[#allocation3 + $0x80] sm:$0xf] }
 0x238   : > { %15042 = vst [vmem:[#allocation15_spill] sm:$0xff] %v12346_v47  ;;  %v12356_v19 = vor.u32 %v15044_v43, %v12219_v41  ;;  %v5826_v0 = vor.u32 %v5825_v35, %v12346_v47  ;;  %6417 = vrot.lane.b32.xlu1 %v15045_v46, %s9293_s17  ;;  %v12373_v41 = vcombine.low %v15046_v20, %v4509_v51  ;;  %v12378_v24 = vrot.slane %v4945_v62, 11  ;;  %v15053_v46 = vld [vmem:[#allocation17_spill] sm:$0xff] }
 0x239   : > { %v12380_v35 = vrot.slane %v5258_v44, 5  ;;  %v14799_v30 = vshrl.u32 %v12274_v33, 16  ;;  %v4890_v26 = vsel %vm9518_vm9, %v15048_v1, %v4889_v55  ;;  %15049 = vst [vmem:[#allocation24_spill] sm:$0xff] %v12386_v25  ;;  %v12388_v29 = vrot.slane %v4967_v10, 11  ;;  %v15052_v10 = vld [vmem:[#allocation11_spill] sm:$0xff] }
 0x23a   : > { %v8432_v4 = vcombine.low %v4890_v26, %v4899_v31  ;;  %v14802_v51 = vshrl.u32 %v12363_v2, 16  ;;  %v15051_v44 = vshll.u32 %v15035_v6, 16  ;;  %v4566_v43 = vrot.slane %v14798_v18, 4  ;;  %v3901_v18 = vld [vmem:[#allocation3 + $0x100] sm:$0x1]  ;;  %v9175_v6 = vld [vmem:[%s14729_s4 + $0xe0] sm:$0xff]  }
 0x23b   : > { %15047 = vst [vmem:[#allocation7_spill] sm:$0xff] %v12380_v35  ;;  %15050 = vst [vmem:[#allocation47_spill] sm:$0xff] %v12388_v29  ;;  %v4567_v55 = vrot.slane %v14797_v12, 5  ;;  %v4228_v20 = vsel %vm9518_vm9, %v15053_v46, %v12356_v19  ;;  %v15054_v1 = vcombine.low %v11946_v13, %v11958_v27  ;;  %v15056_v31 = vshll.u32 %v12251_v38, 16  ;;  %v12432_v26 = vld [vmem:[#allocation3 + $0x84] sm:$0xf]  ;;  %8819 = vmatprep.subr.bf16.mxu0 %v9175_v6 }
 0x23c   : > { %v12395_v50 = vor.u32 %v15051_v44, %v5426_v11  ;;  %6267 = vrot.lane.b32.xlu0 %v8432_v4, %s9293_s17  ;;  %v15055_v44 = vshrl.u32 %v12251_v38, 16  ;;  %v4572_v19 = vrot.slane %v14799_v30, 4  ;;  %v12426_v46 = vrot.slane %v4874_v45, 5  ;;  %v3847_v45 = vld [vmem:[#allocation3 + $0xf4] sm:$0x8] }
 0x23d   : > { %6579 = vrot.lane.b32.xlu1 %v15054_v1, %s9293_s17  ;;  %v5193_v12 = vrot.slane %v15056_v31, 5  ;;  %v15057_v11 = vshrl.u32 %v12276_v59, 16  ;;  %v12434_v62 = vrot.slane %v5821_v14, 4  ;;  %v12439_v31 = vrot.slane %v14802_v51, 4 }
 0x23e   : > { %v5192_v28 = vrot.slane %v15055_v44, 4  ;;  %v15060_v30 = vshll.u32 %v12363_v2, 16  ;;  %v3902_v14 = vsel %vm11489_vm7, 0, %v3901_v18  ;;  %v4485_v44 = vld [vmem:[#allocation3 + $0x74] sm:$0x1]  ;;  %v12453_v51 = vrot.slane %v5826_v0, 4 }
 0x23f   : > { %v12430_v1 = vrot.slane %v15057_v11, 4  ;;  %15058 = vst [vmem:[#allocation11_spill] sm:$0xff] %v12434_v62  ;;  %15059 = vst [vmem:[#allocation17_spill] sm:$0xff] %v12439_v31  ;;  %v15062_v62 = vld [vmem:[#allocation9_spill] sm:$0xff]  ;;  %v4568_v4 = vor.u32 %v4567_v55, %v4566_v43  ;;  %v15071_v6 = vshrl.u32 %v11946_v13, 16  ;;  %v15072_v55 = vshrl.u32 %v11958_v27, 16 }
 0x240   : > { %v12443_v21 = vrot.slane %v15060_v30, 5  ;;  %15063 = vst [vmem:[#allocation9_spill] sm:$0xff] %v12453_v51  ;;  %v15064_v30 = vshrl.u32 %v12386_v25, 16  ;;  %v5194_v31 = vor.u32 %v5193_v12, %v5192_v28  ;;  %v9176_v18 = vld [vmem:[%s14729_s4 + $0xa0] sm:$0xff]   ;;  %3903 = vst [vmem:[#allocation3 + $0x100] sm:$0x1] %v3902_v14  ;;  %v12479_v14 = vcombine.low %v4228_v20, %v12284_v22 }
 0x241   : > { %6419 = vrot.lane.b32.xlu1 %v15062_v62, %s9293_s17  ;;  %v5199_v0 = vor.u32 %v12430_v1, %v12426_v46  ;;  %v3848_v12 = vsel %vm11449_vm5, 0, %v3847_v45  ;;  %v9177_v28 = vld [vmem:[%s14729_s4 + $0xe8] sm:$0xff]   ;;  %v15068_v1 = vshll.u32 %v12274_v33, 16  ;;  %v4576_v51 = vshll.u32 %v4485_v44, 16  ;;  %8820 = vmatpush3.bf16.msra.mxu0 %v9176_v18  ;;  %v9180_v18 = vld [vmem:[%s14729_s4 + $0xf0] sm:$0xff]  }
 0x242   : > { %15061 = vst [vmem:[#allocation48_spill] sm:$0xff] %v12443_v21  ;;  %v12457_v21 = vrot.slane %v15064_v30, 4  ;;  %v15066_v30 = vshrl.u32 %v12236_v48, 16  ;;  %3849 = vst [vmem:[#allocation3 + $0xf4] sm:$0x8] %v3848_v12  ;;  %v15070_v45 = vshll.u32 %v12401_v63, 16  ;;  %v15073_v44 = vcombine.low %v12052_v36, %v12083_v5  ;;  %8821 = vmatprep.subr.bf16.mxu0 %v9177_v28 }
 0x243   : > { %15067 = vst [vmem:[#allocation50_spill] sm:$0xff] %v12479_v14  ;;  %v4570_v62 = vrot.slane %v15068_v1, 5  ;;  %v9178_v22 = vld [vmem:[%s14729_s4 + $0xa8] sm:$0xff]   ;;  %v5439_v43 = vrot.slane %v15071_v6, 7  ;;  %v5448_v20 = vrot.slane %v15072_v55, 7  ;;  %v15074_v12 = vshrl.u32 %v12432_v26, 16 }
 0x244   : > { %15065 = vst [vmem:[#allocation49_spill] sm:$0xff] %v12457_v21  ;;  %v12471_v11 = vrot.slane %v15066_v30, 4  ;;  %v4095_v21 = vld [vmem:[#allocation3 + $0x68] sm:$0x8]  ;;  %v15069_v30 = vshrl.u32 %v12401_v63, 16  ;;  %v12489_v34 = vrot.slane %v15070_v45, 5 }
 0x245   : > { %6581 = vrot.lane.b32.xlu1 %v15073_v44, %s9293_s17  ;;  %v12504_v1 = vrot.slane %v15074_v12, 4  ;;  %v4573_v45 = vor.u32 %v4572_v19, %v4570_v62  ;;  %v4578_v6 = vrot.slane %v4576_v51, 5  ;;  %v15075_v55 = vshll.u32 %v11946_v13, 16  ;;  %v8963_v19 = vpop.f32.mrb[12].mxu0  ;;  %8822 = vmatpush3.bf16.msra.mxu0 %v9178_v22  ;;  %v9181_v13 = vld [vmem:[%s14729_s4 + $0xb0] sm:$0xff]  }
 0x246   : > { %v12485_v47 = vrot.slane %v15069_v30, 4  ;;  %v4569_v30 = vrot.slane %v4568_v4, 4  ;;  %v5444_v29 = vrot.slane %v5439_v43, 4  ;;  %v15076_v23 = vshll.u32 %v11958_v27, 16  ;;  %v15078_v51 = vld [vmem:[#allocation19_spill] sm:$0xff]  ;;  %8823 = vmatprep.subr.bf16.mxu0 %v9180_v18 }
 0x247   : > { %v5442_v14 = vor.u32 %v15075_v55, %v5439_v43  ;;  %v4239_v8 = vshrl.u32 %v4095_v21, 16  ;;  %v12513_v56 = vrot.slane %v5194_v31, 4  ;;  %v4574_v12 = vrot.slane %v4573_v45, 4  ;;  %v3602_v43 = vpop.f32.mrb[13].mxu0 }
 0x248   : > { %v5451_v44 = vor.u32 %v15076_v23, %v5448_v20  ;;  %v4571_v28 = vsel %vm9580_vm12, %v4569_v30, %v4570_v62  ;;  %v15077_v35 = vshrl.u32 %v12263_v58, 16  ;;  %v15079_v21 = vshrl.u32 %v12274_v33, 16  ;;  %v8964_v45 = vpop.f32.mrb[14].mxu0 }
 0x249   : > { %v5443_v27 = vsel %vm9518_vm9, %v15078_v51, %v5442_v14  ;;  %v3851_v62 = vsel %vm11449_vm5, 0, %v3850_v61  ;;  %6421 = vrot.lane.b32.xlu1 %v12269_v53, %s9293_s17  ;;  %v4579_v14 = vsel %vm9580_vm12, %v4574_v12, %v4578_v6  ;;  %v8336_v20 = vrot.slane %v4239_v8, 11  ;;  %v12558_v6 = vld [vmem:[%s14728_s3] ss:$0 sm:$0xff]  ;;  %v3605_v51 = vpop.f32.mrb[15].mxu0  ;;  %8824 = vmatpush3.bf16.msra.mxu0 %v9181_v13 }
 0x24a   : > { %v4246_v4 = vrot.slane %v15077_v35, 7  ;;  %v5452_v23 = vsel %vm9518_vm9, %v5444_v29, %v5451_v44  ;;  %v4255_v31 = vrot.slane %v15079_v21, 7  ;;  %v12534_v35 = vld [vmem:[%s14727_s2] ss:$0 sm:$0xff]  ;;  %v9182_v29 = vld [vmem:[%s14729_s4 + $0xf8] sm:$0xff]   ;;  %v15081_v55 = vshll.u32 %v12266_v7, 16 }
 0x24b   : > { %v3702_v22 = vmul.f32 %v12534_v35, %v8963_v19  ;;  %v12544_v61 = vcombine.low %v5443_v27, %v5452_v23  ;;  %3852 = vst [vmem:[#allocation3 + $0x108] sm:$0x8] %v3851_v62  ;;  %v3700_v30 = vmul.f32 %v12534_v35, %v3602_v43  ;;  %v12551_v53 = vcombine.low %v4571_v28, %v4579_v14  ;;  %v9183_v62 = vld [vmem:[%s14729_s4 + $0xb8] sm:$0xff]  }
 0x24c   : > { %v12549_v44 = vrot.slane %v15081_v55, 5  ;;  %v15083_v18 = vshll.u32 %v12263_v58, 16  ;;  %v3703_v12 = vmul.f32 %v12534_v35, %v8964_v45  ;;  %v12562_v27 = vrot.slane %v5199_v0, 4  ;;  %8825 = vmatprep.subr.bf16.mxu0 %v9182_v29 }
 0x24d   : > { %15080 = vst [vmem:[#allocation19_spill] sm:$0xff] %v12544_v61  ;;  %15082 = vst [vmem:[#allocation51_spill] sm:$0xff] %v12551_v53  ;;  %v3741_v8 = vadd.f32 %v12558_v6, %v3702_v22  ;;  %v15084_v23 = vshrl.u32 %v12266_v7, 16  ;;  %v3739_v28 = vadd.f32 %v12558_v6, %v3700_v30  ;;  %v3701_v58 = vmul.f32 %v12534_v35, %v3605_v51 }
 0x24e   : > { %v4249_v19 = vor.u32 %v15083_v18, %v4246_v4  ;;  %v4251_v43 = vrot.slane %v4246_v4, 4  ;;  %v15085_v22 = vshll.u32 %v12274_v33, 16  ;;  %v3742_v0 = vadd.f32 %v12558_v6, %v3703_v12  ;;  %8826 = vmatpush3.bf16.msra.mxu0 %v9183_v62 }
 0x24f   : > { %v5212_v21 = vrot.slane %v15084_v23, 4  ;;  %v3773_v45 = vmax.f32 %v3741_v8, 0.0  ;;  %v15086_v55 = vcombine.low %v12294_v17, %v12296_v15  ;;  %v15087_v30 = vshrl.u32 %v12052_v36, 16 }
 0x250   : > { %v4258_v14 = vor.u32 %v15085_v22, %v4255_v31  ;;  %v4250_v13 = vsel %vm9518_vm9, %v8336_v20, %v4249_v19  ;;  %v3771_v51 = vmax.f32 %v3739_v28, 0.0  ;;  %v3740_v4 = vadd.f32 %v12558_v6, %v3701_v58  ;;  %v5370_v20 = vld [vmem:[#allocation3 + $0x68] sm:$0x8]  ;;  %v4750_v28 = vld [vmem:[#allocation3 + $0xe0] sm:$0x8] }
 0x251   : > { %6583 = vrot.lane.b32.xlu1 %v15086_v55, %s9293_s17  ;;  %v5461_v18 = vrot.slane %v15087_v30, 7  ;;  %v15088_v31 = vshrl.u32 %v12083_v5, 16  ;;  %v8629_v12 = vpack.c.bf16 %v3773_v45, %v3773_v45  ;;  %v3774_v23 = vmax.f32 %v3742_v0, 0.0  ;;  %v5129_v30 = vld [vmem:[#allocation3 + $0xd8] sm:$0x1] }
 0x252   : > { %v4259_v33 = vsel %vm9518_vm9, %v4251_v43, %v4258_v14  ;;  %v15090_v29 = vshll.u32 %v12052_v36, 16  ;;  %v8627_v19 = vpack.c.bf16 %v3771_v51, %v3771_v51  ;;  %v3772_v61 = vmax.f32 %v3740_v4, 0.0 }
 0x253   : > { %v5470_v8 = vrot.slane %v15088_v31, 7  ;;  %v12587_v22 = vcombine.low %v4250_v13, %v4259_v33  ;;  %v5466_v58 = vrot.slane %v5461_v18, 4  ;;  %v15091_v53 = vshll.u32 %v12083_v5, 16  ;;  %4062 = vst.msk [vmem:[#allocation3 + $0xa8] sm:$0xf] %vm15092_vm8, %v8629_v12  ;;  %v15094_v13 = vld [vmem:[#allocation21_spill] sm:$0xff]  ;;  %vm15181_vm8 = vmmov %vm15100_vm0 }
 0x254   : > { %v5464_v55 = vor.u32 %v15090_v29, %v5461_v18  ;;  %v8630_v14 = vpack.c.bf16 %v3774_v23, %v3774_v23  ;;  %v15093_v45 = vshll.u32 %v12236_v48, 16  ;;  %v5213_v0 = vor.u32 %v5212_v21, %v12549_v44  ;;  %4060 = vst.msk [vmem:[#allocation3 + $0x94] sm:$0xf] %vm15095_vm10, %v8627_v19  ;;  %v5130_v18 = vld [vmem:[#allocation3 + $0xec] sm:$0x1]  ;;  %vm15230_vm10 = vmmov %vm15100_vm0 }
 0x255   : > { %15089 = vst [vmem:[#allocation52_spill] sm:$0xff] %v12587_v22  ;;  %v5473_v43 = vor.u32 %v15091_v53, %v5470_v8  ;;  %6423 = vrot.lane.b32.xlu1 %v12096_v57, %s9293_s17  ;;  %v8628_v62 = vpack.c.bf16 %v3772_v61, %v3772_v61  ;;  %v5476_v4 = vshrl.u32 %v5370_v20, 16  ;;  %v15096_v33 = vshrl.u32 %v12294_v17, 16  ;;  %v3904_v12 = vld [vmem:[#allocation3 + $0x114] sm:$0x1]  ;;  %v15101_v61 = vld [vmem:[#allocation26_spill] sm:$0xff] }
 0x256   : > { %v5207_v36 = vrot.slane %v15093_v45, 5  ;;  %v5465_v51 = vsel %vm9518_vm9, %v15094_v13, %v5464_v55  ;;  %4063 = vst.msk [vmem:[#allocation3 + $0xac] sm:$0xf] %vm15097_vm11, %v8630_v14  ;;  %v5272_v31 = vshll.u32 %v5129_v30, 16  ;;  %v4989_v8 = vshrl.u32 %v4750_v28, 16  ;;  %vm15235_vm11 = vmmov %vm15100_vm0 }
 0x257   : > { %v5474_v53 = vsel %vm9518_vm9, %v5466_v58, %v5473_v43  ;;  %v5483_v57 = vrot.slane %v15096_v33, 7  ;;  %v15099_v23 = vshrl.u32 %v12296_v15, 16  ;;  %4061 = vst.msk [vmem:[#allocation3 + $0x98] sm:$0xf] %vm15100_vm0, %v8628_v62  ;;  %v5205_v55 = vsel %vm9580_vm12, %v12562_v27, %v15101_v61  ;;  %v5131_v61 = vld [vmem:[#allocation3 + $0x100] sm:$0x1] }
 0x258   : > { %v12608_v21 = vcombine.low %v5465_v51, %v5474_v53  ;;  %v3905_v20 = vsel %vm11489_vm7, 0, %v3904_v12  ;;  %v8366_v19 = vrot.slane %v5476_v4, 11  ;;  %v15102_v30 = vshll.u32 %v12294_v17, 16 }
 0x259   : > { %v5492_v29 = vrot.slane %v15099_v23, 7  ;;  %v15103_v58 = vcombine.low %v12363_v2, %v12386_v25  ;;  %v5286_v43 = vshll.u32 %v5130_v18, 16  ;;  %3906 = vst [vmem:[#allocation3 + $0x114] sm:$0x1] %v3905_v20  ;;  %v5488_v14 = vrot.slane %v5483_v57, 4  ;;  %v6258_v20 = vpop.permute.xlu0 %6257 }
 0x25a   : > { %15098 = vst [vmem:[#allocation21_spill] sm:$0xff] %v12608_v21  ;;  %v5486_v28 = vor.u32 %v15102_v30, %v5483_v57  ;;  %v15104_v45 = vshll.u32 %v12296_v15, 16  ;;  %v15105_v27 = vshrl.u32 %v12363_v2, 16  ;;  %v5197_v17 = vsel %vm9580_vm12, %v12513_v56, %v12426_v46  ;;  %v5373_v23 = vld [vmem:[#allocation3 + $0x7c] sm:$0x8] }
 0x25b   : > { %6585 = vrot.lane.b32.xlu1 %v15103_v58, %s9293_s17  ;;  %v5208_v62 = vor.u32 %v5207_v36, %v12471_v11  ;;  %v5214_v53 = vrot.slane %v5213_v0, 4  ;;  %v15106_v4 = vshrl.u32 %v12386_v25, 16  ;;  %v8463_v18 = vcombine.low %v5197_v17, %v5205_v55  ;;  %v4753_v56 = vld [vmem:[#allocation3 + $0xf4] sm:$0x8]  ;;  %v12653_v55 = vld [vmem:[#allocation3 + $0xa8] sm:$0xf] }
 0x25c   : > { %v5495_v13 = vor.u32 %v15104_v45, %v5492_v29  ;;  %v5505_v51 = vrot.slane %v15105_v27, 7  ;;  %v12636_v12 = vrot.slane %v5272_v31, 5  ;;  %v5487_v15 = vsel %vm9518_vm9, %v8366_v19, %v5486_v28  ;;  %v12650_v31 = vld [vmem:[#allocation3 + $0x94] sm:$0xf]  ;;  %v4756_v17 = vld [vmem:[#allocation3 + $0x108] sm:$0x8] }
 0x25d   : > { %v5514_v33 = vrot.slane %v15106_v4, 7  ;;  %v12642_v29 = vrot.slane %v4989_v8, 11  ;;  %v15108_v11 = vshll.u32 %v12386_v25, 16  ;;  %15109 = vst [vmem:[#allocation53_spill] sm:$0xff] %v12650_v31  ;;  %v12655_v19 = vrot.slane %v5286_v43, 5  ;;  %v15111_v27 = vld [vmem:[#allocation28_spill] sm:$0xff] }
 0x25e   : > { %v5496_v57 = vsel %vm9518_vm9, %v5488_v14, %v5495_v13  ;;  %v15110_v8 = vrot.slane %v12310_v49, 4  ;;  %v5510_v28 = vrot.slane %v5505_v51, 4  ;;  %v14805_v14 = vshrl.u32 %v12650_v31, 16  ;;  %v12669_v13 = vld [vmem:[#allocation3 + $0xac] sm:$0xf] }
 0x25f   : > { %v12644_v46 = vcombine.low %v5487_v15, %v5496_v57  ;;  %v5517_v36 = vor.u32 %v15108_v11, %v5514_v33  ;;  %6425 = vrot.lane.b32.xlu1 %v8463_v18, %s9293_s17  ;;  %v5209_v43 = vrot.slane %v5208_v62, 4  ;;  %v5219_v49 = vsel %vm9580_vm12, %v5214_v53, %v15111_v27  ;;  %v12674_v4 = vld [vmem:[#allocation3 + $0x98] sm:$0xf] }
 0x260   : > { %v12662_v30 = vsel %vm9518_vm9, %v15110_v8, %v12395_v50  ;;  %15112 = vst [vmem:[#allocation28_spill] sm:$0xff] %v12674_v4  ;;  %v12676_v50 = vld [vmem:[#allocation3 + $0x98] sm:$0xf]  ;;  %v14809_v33 = vshrl.u32 %v12669_v13, 16  ;;  %v6724_v18 = vsel %vm6657_vm6, %v12373_v41, %v6258_v20  ;;  %v5498_v15 = vshrl.u32 %v5373_v23, 16 }
 0x261   : > { %15107 = vst [vmem:[#allocation26_spill] sm:$0xff] %v12644_v46  ;;  %15113 = vst [vmem:[#allocation54_spill] sm:$0xff] %v12676_v50  ;;  %v12683_v57 = vsel %vm9518_vm9, %v5510_v28, %v5517_v36  ;;  %v4908_v62 = vrot.slane %v14805_v14, 7  ;;  %v4909_v53 = vshll.u32 %v12650_v31, 16  ;;  %v4915_v11 = vshrl.u32 %v12674_v4, 16  ;;  %7282 = vmatprep.mubr.bf16.mxu1 %v6724_v18  ;;  %v6132_v14 = vpop.permute.xlu1 %6131 }
 0x262   : > { %v12689_v8 = vld [vmem:[#allocation3 + $0x94] sm:$0xf]  ;;  %7283 = vmatmul.mubr.bf16.vlgmr.msra.gmra.mrb[0].mxu1 %v12376_v37  ;;  %v5300_v23 = vshll.u32 %v5131_v61, 16  ;;  %v5011_v36 = vshrl.u32 %v4753_v56, 16  ;;  %v5033_v20 = vshrl.u32 %v4756_v17, 16  ;;  %v4918_v0 = vshll.u32 %v12674_v4, 16 }
 0x263   : > { %v8496_v41 = vcombine.low %v12689_v8, %v12676_v50  ;;  %v4911_v28 = vor.u32 %v4909_v53, %v4908_v62  ;;  %v4917_v58 = vrot.slane %v4915_v11, 7  ;;  %v5211_v45 = vsel %vm9580_vm12, %v5209_v43, %v12549_v44 }
 0x264   : > { %v4939_v18 = vrot.slane %v14809_v33, 7  ;;  %v8464_v27 = vcombine.low %v5211_v45, %v5219_v49  ;;  %v12702_v25 = vrot.slane %v5498_v15, 11  ;;  %v15114_v37 = vshll.u32 %v12363_v2, 16  ;;  %v12719_v49 = vld [vmem:[#allocation3 + $0x88] sm:$0x1]  ;;  %v15117_v2 = vld [vmem:[#allocation25_spill] sm:$0xff] }
 0x265   : > { %6587 = vrot.lane.b32.xlu1 %v8496_v41, %s9293_s17  ;;  %v4913_v56 = vrot.slane %v4908_v62, 4  ;;  %v4920_v17 = vor.u32 %v4918_v0, %v4917_v58  ;;  %v15115_v5 = vshrl.u32 %v12653_v55, 16  ;;  %v14810_v44 = vshll.u32 %v12669_v13, 16 }
 0x266   : > { %v12706_v61 = vor.u32 %v15114_v37, %v5505_v51  ;;  %v6664_v43 = vsel %vm6657_vm6, %v12059_v60, %v6132_v14  ;;  %v12713_v41 = vrot.slane %v5300_v23, 5  ;;  %v12715_v33 = vrot.slane %v5011_v36, 11  ;;  %v12729_v14 = vld [vmem:[#allocation3 + $0xac] sm:$0xf] }
 0x267   : > { %v4930_v7 = vrot.slane %v15115_v5, 7  ;;  %v12717_v45 = vrot.slane %v5033_v20, 11  ;;  %v4912_v51 = vsel %vm9518_vm9, %v15117_v2, %v4911_v28  ;;  %v4921_v5 = vsel %vm9518_vm9, %v4913_v56, %v4920_v17  ;;  %15118 = vst [vmem:[#allocation25_spill] sm:$0xff] %v12729_v14  ;;  %v8967_v28 = vpop.f32.mrb[16].mxu0  ;;  %v12740_v17 = vld [vmem:[#allocation3 + $0xa8] sm:$0xf] }
 0x268   : > { %v4942_v60 = vor.u32 %v14810_v44, %v4939_v18  ;;  %v8433_v15 = vcombine.low %v4912_v51, %v4921_v5  ;;  %v4931_v62 = vshll.u32 %v12653_v55, 16  ;;  %v15119_v36 = vshll.u32 %v12432_v26, 16  ;;  %v3618_v51 = vpop.f32.mrb[17].mxu0  ;;  %v6260_v44 = vpop.permute.xlu0 %6259 }
 0x269   : > { %15116 = vst [vmem:[#allocation55_spill] sm:$0xff] %v12717_v45  ;;  %6427 = vrot.lane.b32.xlu1 %v8464_v27, %s9293_s17  ;;  %v4935_v56 = vrot.slane %v4930_v7, 4  ;;  %v3706_v2 = vmul.f32 %v12534_v35, %v8967_v28  ;;  %v15120_v23 = vshrl.u32 %v12650_v31, 16  ;;  %v3704_v58 = vmul.f32 %v12534_v35, %v3618_v51  ;;  %v8968_v27 = vpop.f32.mrb[18].mxu0 }
 0x26a   : > { %v12737_v20 = vrot.slane %v15119_v36, 5  ;;  %6269 = vrot.lane.b32.xlu0 %v8433_v15, %s9293_s17  ;;  %v4933_v5 = vor.u32 %v4931_v62, %v4930_v7  ;;  %v8497_v36 = vcombine.low %v12740_v17, %v12729_v14  ;;  %v15121_v48 = vshrl.u32 %v12689_v8, 16  ;;  %v3621_v38 = vpop.f32.mrb[19].mxu0 }
 0x26b   : > { %v5220_v37 = vrot.slane %v15120_v23, 4  ;;  %v4943_v15 = vsel %vm9518_vm9, %v4935_v56, %v4942_v60  ;;  %v5221_v28 = vrot.slane %v4909_v53, 5  ;;  %v3745_v7 = vadd.f32 %v12558_v6, %v3706_v2 }
 0x26c   : > { %v12756_v18 = vrot.slane %v15121_v48, 4  ;;  %v3707_v59 = vmul.f32 %v12534_v35, %v8968_v27  ;;  %v5224_v23 = vrot.slane %v4918_v0, 5  ;;  %v5226_v45 = vrot.slane %v4915_v11, 4  ;;  %v12776_v27 = vld [vmem:[#allocation3 + $0x94] sm:$0xf] }
 0x26d   : > { %6589 = vrot.lane.b32.xlu1 %v8497_v36, %s9293_s17  ;;  %v3743_v51 = vadd.f32 %v12558_v6, %v3704_v58  ;;  %v3705_v46 = vmul.f32 %v12534_v35, %v3621_v38  ;;  %v5222_v48 = vor.u32 %v5221_v28, %v5220_v37  ;;  %v3777_v22 = vmax.f32 %v3745_v7, 0.0 }
 0x26e   : > { %15122 = vst [vmem:[#allocation56_spill] sm:$0xff] %v12756_v18  ;;  %v15123_v18 = vld [vmem:[#allocation23_spill] sm:$0xff]  ;;  %v15124_v53 = vcombine.low %v12401_v63, %v12432_v26  ;;  %v3746_v60 = vadd.f32 %v12558_v6, %v3707_v59  ;;  %v4934_v0 = vsel %vm9518_vm9, %v12006_v3, %v4933_v5  ;;  %v5227_v11 = vor.u32 %v5226_v45, %v5224_v23 }
 0x26f   : > { %v6728_v21 = vsel %vm6657_vm6, %v15123_v18, %v6260_v44  ;;  %v3775_v58 = vmax.f32 %v3743_v51, 0.0  ;;  %v3744_v38 = vadd.f32 %v12558_v6, %v3705_v46  ;;  %v8434_v37 = vcombine.low %v4934_v0, %v4943_v15  ;;  %v3853_v0 = vld [vmem:[#allocation3 + $0x11c] sm:$0x8] }
 0x270   : > { %6141 = vrot.lane.b32.xlu0 %v15124_v53, %s9293_s17  ;;  %7290 = vmatprep.mubr.bf16.mxu1 %v6728_v21  ;;  %v5223_v56 = vrot.slane %v5222_v48, 4  ;;  %v8633_v44 = vpack.c.bf16 %v3777_v22, %v3777_v22  ;;  %v3778_v18 = vmax.f32 %v3746_v60, 0.0  ;;  %v5228_v2 = vrot.slane %v5227_v11, 4  ;;  %v12780_v53 = vld [vmem:[#allocation3 + $0x98] sm:$0xf] }
 0x271   : > { %7291 = vmatmul.mubr.bf16.gmra.mrb[4].mxu1 %v6664_v43  ;;  %v15125_v36 = vshrl.u32 %v12653_v55, 16  ;;  %v8631_v28 = vpack.c.bf16 %v3775_v58, %v3775_v58  ;;  %v3776_v7 = vmax.f32 %v3744_v38, 0.0  ;;  %v5235_v3 = vrot.slane %v4931_v62, 5  ;;  %v3907_v60 = vld [vmem:[#allocation3 + $0x128] sm:$0x1] }
 0x272   : > { %v15126_v21 = vshll.u32 %v12669_v13, 16  ;;  %4066 = vst.msk [vmem:[#allocation3 + $0xd0] sm:$0xf] %vm15127_vm3, %v8633_v44  ;;  %v8634_v46 = vpack.c.bf16 %v3778_v18, %v3778_v18  ;;  %v5225_v22 = vsel %vm9580_vm12, %v5223_v56, %v5224_v23  ;;  %v5233_v55 = vsel %vm9580_vm12, %v5228_v2, %v12223_v52  ;;  %vm15241_vm3 = vmmov %vm15100_vm0 }
 0x273   : > { %v5234_v59 = vrot.slane %v15125_v36, 4  ;;  %v15128_v43 = vshrl.u32 %v12669_v13, 16  ;;  %4064 = vst.msk [vmem:[#allocation3 + $0xbc] sm:$0xf] %vm15129_vm4, %v8631_v28  ;;  %v14821_v62 = vshrl.u32 %v12676_v50, 16  ;;  %v8632_v15 = vpack.c.bf16 %v3776_v7, %v3776_v7  ;;  %vm15295_vm4 = vmmov %vm15100_vm0 }
 0x274   : > { %v12784_v45 = vrot.slane %v15126_v21, 5  ;;  %6271 = vrot.lane.b32.xlu0 %v8434_v37, %s9293_s17  ;;  %v14819_v51 = vshrl.u32 %v12776_v27, 16  ;;  %v8465_v48 = vcombine.low %v5225_v22, %v5233_v55  ;;  %v15130_v11 = vshll.u32 %v12689_v8, 16  ;;  %4067 = vst.msk [vmem:[#allocation3 + $0xd4] sm:$0xf] %vm15132_vm1, %v8634_v46  ;;  %vm15298_vm1 = vmmov %vm15100_vm0 }
 0x275   : > { %v5240_v5 = vrot.slane %v15128_v43, 4  ;;  %v14814_v52 = vshll.u32 %v12776_v27, 16  ;;  %v8402_v13 = vcombine.low %v12776_v27, %v12780_v53  ;;  %v14818_v58 = vshrl.u32 %v12780_v53, 16  ;;  %4065 = vst.msk [vmem:[#allocation3 + $0xc0] sm:$0xf] %vm15133_vm13, %v8632_v15  ;;  %vm15299_vm13 = vmmov %vm15100_vm0 }
 0x276   : > { %v12800_v23 = vrot.slane %v15130_v11, 5  ;;  %v14816_v37 = vshrl.u32 %v12740_v17, 16  ;;  %v14815_v56 = vshll.u32 %v12740_v17, 16  ;;  %6429 = vrot.lane.b32.xlu1 %v8465_v48, %s9293_s17  ;;  %v14817_v18 = vshrl.u32 %v12729_v14, 16  ;;  %v12815_v36 = vld [vmem:[#allocation3 + $0xa8] sm:$0xf] }
 0x277   : > { %v5241_v44 = vor.u32 %v5240_v5, %v12784_v45  ;;  %v5236_v2 = vor.u32 %v5235_v3, %v5234_v59  ;;  %15134 = vst [vmem:[#allocation57_spill] sm:$0xff] %v12815_v36  ;;  %v3908_v28 = vsel %vm11489_vm7, 0, %v3907_v60  ;;  %v3854_v7 = vsel %vm11449_vm5, 0, %v3853_v0  ;;  %v5132_v48 = vld [vmem:[#allocation3 + $0x114] sm:$0x1] }
 0x278   : > { %15131 = vst [vmem:[#allocation23_spill] sm:$0xff] %v12800_v23  ;;  %6143 = vrot.lane.b32.xlu0 %v8402_v13, %s9293_s17  ;;  %v12823_v21 = vrot.slane %v14821_v62, 4  ;;  %v12827_v46 = vrot.slane %v14819_v51, 4  ;;  %3909 = vst [vmem:[#allocation3 + $0x128] sm:$0x1] %v3908_v28  ;;  %v15136_v59 = vsel %vm9518_vm9, %v12702_v25, %v12706_v61  ;;  %v15138_v22 = vor.u32 %v12489_v34, %v12485_v47 }
 0x279   : > { %3855 = vst [vmem:[#allocation3 + $0x11c] sm:$0x8] %v3854_v7  ;;  %v12835_v3 = vcombine.low %v15136_v59, %v12683_v57  ;;  %v12844_v43 = vrot.slane %v14814_v52, 5  ;;  %v12849_v15 = vrot.slane %v14818_v58, 4  ;;  %v12852_v25 = vld [vmem:[#allocation3 + $0xac] sm:$0xf]  ;;  %v6134_v57 = vpop.permute.xlu1 %6133  ;;  %v4587_v60 = vor.u32 %v12504_v1, %v12737_v20 }
 0x27a   : > { %15135 = vst [vmem:[#allocation58_spill] sm:$0xff] %v12823_v21  ;;  %v12840_v55 = vrot.slane %v15138_v22, 4  ;;  %v5242_v61 = vrot.slane %v5241_v44, 4  ;;  %v14820_v34 = vshrl.u32 %v12815_v36, 16  ;;  %v12863_v0 = vrot.slane %v14816_v37, 4 }
 0x27b   : > { %15137 = vst [vmem:[#allocation59_spill] sm:$0xff] %v12835_v3  ;;  %v12867_v11 = vrot.slane %v14815_v56, 5  ;;  %v12871_v13 = vrot.slane %v14817_v18, 4  ;;  %v5237_v44 = vrot.slane %v5236_v2, 4  ;;  %v12873_v28 = vld [vmem:[#allocation3 + $0xbc] sm:$0xf]  ;;  %v12887_v2 = vsel %vm6657_vm6, %v12142_v32, %v6134_v57 }
 0x27c   : > { %15139 = vst [vmem:[#allocation60_spill] sm:$0xff] %v12863_v0  ;;  %15142 = vst [vmem:[#allocation63_spill] sm:$0xff] %v12873_v28  ;;  %v4950_v7 = vshrl.u32 %v12873_v28, 16  ;;  %v14822_v59 = vshll.u32 %v12815_v36, 16  ;;  %v14823_v22 = vshrl.u32 %v12852_v25, 16  ;;  %v15145_v18 = vsel %vm9518_vm9, %v15052_v10, %v12351_v39 }
 0x27d   : > { %15140 = vst [vmem:[#allocation61_spill] sm:$0xff] %v12867_v11  ;;  %15141 = vst [vmem:[#allocation62_spill] sm:$0xff] %v12871_v13  ;;  %v12879_v52 = vld [vmem:[#allocation3 + $0xbc] sm:$0xf]  ;;  %v12881_v56 = vld [vmem:[#allocation3 + $0xc0] sm:$0xf]  ;;  %v12895_v58 = vcombine.low %v15145_v18, %v12662_v30  ;;  %v5247_v5 = vsel %vm9580_vm12, %v5242_v61, %v12225_v54  ;;  %v5239_v54 = vsel %vm9580_vm12, %v5237_v44, %v12784_v45 }
 0x27e   : > { %15143 = vst [vmem:[#allocation64_spill] sm:$0xff] %v12881_v56  ;;  %v12883_v37 = vld [vmem:[#allocation3 + $0xc0] sm:$0xf]  ;;  %v8498_v51 = vcombine.low %v12879_v52, %v12881_v56  ;;  %v4953_v32 = vshll.u32 %v12873_v28, 16  ;;  %v12907_v57 = vrot.slane %v14820_v34, 4  ;;  %v4952_v38 = vrot.slane %v4950_v7, 7 }
 0x27f   : > { %15144 = vst [vmem:[#allocation65_spill] sm:$0xff] %v12883_v37  ;;  %v4959_v39 = vshrl.u32 %v12883_v37, 16  ;;  %v4962_v10 = vshll.u32 %v12883_v37, 16  ;;  %v12911_v30 = vld [vmem:[#allocation3 + $0xd0] sm:$0xf]  ;;  %v5314_v1 = vshll.u32 %v5132_v48, 16  ;;  %v8403_v34 = vcombine.low %v12815_v36, %v12852_v25 }
 0x280   : > { %6591 = vrot.lane.b32.xlu1 %v8498_v51, %s9293_s17  ;;  %v12919_v18 = vrot.slane %v14822_v59, 5  ;;  %v12923_v61 = vrot.slane %v14823_v22, 4  ;;  %v12927_v62 = vld [vmem:[#allocation3 + $0xd4] sm:$0xf]  ;;  %v8466_v48 = vcombine.low %v5239_v54, %v5247_v5  ;;  %v4955_v47 = vor.u32 %v4953_v32, %v4952_v38  ;;  %v6262_v54 = vpop.permute.xlu0 %6261  ;;  %v12941_v44 = vld [vmem:[#allocation3 + $0x7c] sm:$0x8] }
 0x281   : > { %v4961_v51 = vrot.slane %v4959_v39, 7  ;;  %v5248_v13 = vrot.slane %v4950_v7, 4  ;;  %v5249_v21 = vrot.slane %v4953_v32, 5  ;;  %v5252_v11 = vrot.slane %v4962_v10, 5  ;;  %v12930_v23 = vld [vmem:[#allocation3 + $0xd4] sm:$0xf] }
 0x282   : > { %v5254_v45 = vrot.slane %v4959_v39, 4  ;;  %v4957_v59 = vrot.slane %v4952_v38, 4  ;;  %15146 = vst [vmem:[#allocation66_spill] sm:$0xff] %v12930_v23  ;;  %v4981_v22 = vshrl.u32 %v12927_v62, 16  ;;  %v12933_v4 = vrot.slane %v5314_v1, 5 }
 0x283   : > { %v4964_v0 = vor.u32 %v4962_v10, %v4961_v51  ;;  %v4956_v5 = vsel %vm9518_vm9, %v12378_v24, %v4955_v47  ;;  %v5250_v7 = vor.u32 %v5249_v21, %v5248_v13  ;;  %v12939_v39 = vrot.slane %v4587_v60, 4  ;;  %v12945_v10 = vld [vmem:[#allocation3 + $0xd0] sm:$0xf]  ;;  %v5379_v36 = vld [vmem:[#allocation3 + $0xa4] sm:$0x8] }
 0x284   : > { %15147 = vst [vmem:[#allocation67_spill] sm:$0xff] %v12933_v4  ;;  %6431 = vrot.lane.b32.xlu1 %v8466_v48, %s9293_s17  ;;  %v5255_v32 = vor.u32 %v5254_v45, %v5252_v11  ;;  %v15148_v1 = vshrl.u32 %v12911_v30, 16  ;;  %v4983_v48 = vrot.slane %v4981_v22, 7  ;;  %v4984_v31 = vshll.u32 %v12927_v62, 16  ;;  %v15150_v62 = vld [vmem:[#allocation7_spill] sm:$0xff] }
 0x285   : > { %v4965_v38 = vsel %vm9518_vm9, %v4957_v59, %v4964_v0  ;;  %v8499_v24 = vcombine.low %v12945_v10, %v12930_v23  ;;  %v5251_v21 = vrot.slane %v5250_v7, 4  ;;  %v14826_v60 = vshll.u32 %v12911_v30, 16  ;;  %v6264_v7 = vpop.permute.xlu0 %6263 }
 0x286   : > { %v4974_v51 = vrot.slane %v15148_v1, 7  ;;  %v8435_v3 = vcombine.low %v4956_v5, %v4965_v38  ;;  %v5256_v47 = vrot.slane %v5255_v32, 4  ;;  %v4986_v13 = vor.u32 %v4984_v31, %v4983_v48 }
 0x287   : > { %v15149_v45 = vshll.u32 %v12719_v49, 16  ;;  %v4261_v59 = vshrl.u32 %v12941_v44, 16  ;;  %v15151_v32 = vshrl.u32 %v12401_v63, 16  ;;  %v5253_v1 = vsel %vm9580_vm12, %v5251_v21, %v5252_v11  ;;  %v15153_v11 = vld [vmem:[#allocation41_spill] sm:$0xff] }
 0x288   : > { %6273 = vrot.lane.b32.xlu0 %v8435_v3, %s9293_s17  ;;  %6593 = vrot.lane.b32.xlu1 %v8499_v24, %s9293_s17  ;;  %v5261_v5 = vsel %vm9580_vm12, %v5256_v47, %v15150_v62  ;;  %v4977_v3 = vor.u32 %v14826_v60, %v4974_v51  ;;  %v4979_v48 = vrot.slane %v4974_v51, 4  ;;  %v6136_v24 = vpop.permute.xlu1 %6135  ;;  %v14827_v47 = vshrl.u32 %v12881_v56, 16 }
 0x289   : > { %v4592_v0 = vrot.slane %v15149_v45, 5  ;;  %v12964_v38 = vrot.slane %v15151_v32, 7  ;;  %v14828_v45 = vshrl.u32 %v12945_v10, 16  ;;  %v8467_v62 = vcombine.low %v5253_v1, %v5261_v5  ;;  %v15152_v32 = vld [vmem:[#allocation40_spill] sm:$0xff]  ;;  %v15155_v1 = vld [vmem:[#allocation42_spill] sm:$0xff] }
 0x28a   : > { %v6732_v4 = vsel %vm6657_vm6, %v15152_v32, %v6262_v54  ;;  %v4987_v44 = vsel %vm9518_vm9, %v4979_v48, %v4986_v13  ;;  %v6736_v21 = vsel %vm6657_vm6, %v15153_v11, %v6264_v7  ;;  %v12989_v54 = vld [vmem:[#allocation3 + $0xbc] sm:$0xf]  ;;  %v15156_v13 = vshll.u32 %v12401_v63, 16 }
 0x28b   : > { %7298 = vmatprep.mubr.bf16.mxu1 %v6732_v4  ;;  %v4593_v51 = vsel %vm9580_vm12, %v12939_v39, %v4592_v0  ;;  %15154 = vst [vmem:[#allocation7_spill] sm:$0xff] %v12989_v54  ;;  %v6672_v4 = vsel %vm6657_vm6, %v15155_v1, %v6136_v24  ;;  %v15157_v39 = vshrl.u32 %v12879_v52, 16  ;;  %v15159_v48 = vshll.u32 %v12879_v52, 16  ;;  %v13010_v24 = vld [vmem:[#allocation3 + $0xc0] sm:$0xf]  ;;  %v8971_v1 = vpop.f32.mrb[20].mxu0 }
 0x28c   : > { %6145 = vrot.lane.b32.xlu0 %v8403_v34, %s9293_s17  ;;  %6433 = vrot.lane.b32.xlu1 %v8467_v62, %s9293_s17  ;;  %v12996_v7 = vor.u32 %v15156_v13, %v12964_v38  ;;  %v15161_v62 = vld [vmem:[#allocation47_spill] sm:$0xff]  ;;  %15162 = vst [vmem:[#allocation42_spill] sm:$0xff] %v13010_v24  ;;  %v13015_v63 = vrot.slane %v14827_v47, 4  ;;  %v13023_v5 = vrot.slane %v14828_v45, 4 }
 0x28d   : > { %v13000_v0 = vrot.slane %v15157_v39, 4  ;;  %v13004_v32 = vrot.slane %v15159_v48, 5  ;;  %v4978_v11 = vsel %vm9518_vm9, %v15161_v62, %v4977_v3  ;;  %7299 = vmatmul.mubr.bf16.gmra.mrb[8].mxu1 %v12887_v2  ;;  %v13017_v39 = vrot.slane %v4984_v31, 5  ;;  %v3634_v62 = vpop.f32.mrb[21].mxu0  ;;  %v5376_v31 = vld [vmem:[#allocation3 + $0x90] sm:$0x8] }
 0x28e   : > { %15163 = vst [vmem:[#allocation47_spill] sm:$0xff] %v13015_v63  ;;  %v8436_v13 = vcombine.low %v4978_v11, %v4987_v44  ;;  %7306 = vmatprep.mubr.bf16.mxu1 %v6736_v21  ;;  %v13019_v48 = vrot.slane %v4981_v22, 4  ;;  %15164 = vst [vmem:[#allocation68_spill] sm:$0xff] %v13023_v5  ;;  %v3710_v3 = vmul.f32 %v12534_v35, %v8971_v1  ;;  %v8972_v60 = vpop.f32.mrb[22].mxu0  ;;  %v8337_v21 = vrot.slane %v4261_v59, 11 }
 0x28f   : > { %15158 = vst [vmem:[#allocation40_spill] sm:$0xff] %v13000_v0  ;;  %15160 = vst [vmem:[#allocation41_spill] sm:$0xff] %v13004_v32  ;;  %v3708_v47 = vmul.f32 %v12534_v35, %v3634_v62  ;;  %v15165_v22 = vsel %vm9580_vm12, %v12840_v55, %v12737_v20  ;;  %v3711_v1 = vmul.f32 %v12534_v35, %v8972_v60  ;;  %v3637_v45 = vpop.f32.mrb[23].mxu0  ;;  %v15168_v55 = vshll.u32 %v12911_v30, 16  ;;  %v5133_v0 = vld [vmem:[#allocation3 + $0x128] sm:$0x1] }
 0x290   : > { %6275 = vrot.lane.b32.xlu0 %v8436_v13, %s9293_s17  ;;  %v13036_v44 = vcombine.low %v15165_v22, %v4593_v51  ;;  %v3749_v11 = vadd.f32 %v12558_v6, %v3710_v3  ;;  %v8404_v62 = vcombine.low %v12989_v54, %v13010_v24  ;;  %v15167_v13 = vshrl.u32 %v12911_v30, 16  ;;  %v13057_v51 = vld [vmem:[%s14729_s4 + $0x100] sm:$0xff]  }
 0x291   : > { %v3747_v2 = vadd.f32 %v12558_v6, %v3708_v47  ;;  %v3709_v20 = vmul.f32 %v12534_v35, %v3637_v45  ;;  %v13050_v59 = vrot.slane %v15168_v55, 5  ;;  %v5269_v60 = vor.u32 %v13019_v48, %v13017_v39  ;;  %9021 = vmatprep.subr.bf16.mxu1 %v13057_v51  ;;  %8981 = vmatprep.subr.bf16.mxu0 %v13057_v51 }
 0x292   : > { %15166 = vst [vmem:[#allocation69_spill] sm:$0xff] %v13036_v44  ;;  %v13044_v34 = vrot.slane %v15167_v13, 4  ;;  %v3781_v3 = vmax.f32 %v3749_v11, 0.0  ;;  %v3750_v22 = vadd.f32 %v12558_v6, %v3711_v1  ;;  %v4272_v47 = vsel %vm9518_vm9, %v8337_v21, %v12996_v7  ;;  %9025 = vmatpush3.bf16.msra.mxu1 %v13057_v51 }
 0x293   : > { %v4273_v35 = vrot.slane %v12964_v38, 4  ;;  %v3779_v30 = vmax.f32 %v3747_v2, 0.0  ;;  %v3748_v45 = vadd.f32 %v12558_v6, %v3709_v20  ;;  %v15169_v48 = vshrl.u32 %v12432_v26, 16 }
 0x294   : > { %6147 = vrot.lane.b32.xlu0 %v8404_v62, %s9293_s17  ;;  %v5520_v55 = vshrl.u32 %v5376_v31, 16  ;;  %v8637_v11 = vpack.c.bf16 %v3781_v3, %v3781_v3  ;;  %v3782_v49 = vmax.f32 %v3750_v22, 0.0  ;;  %v15170_v1 = vshrl.u32 %v12689_v8, 16  ;;  %v4487_v31 = vld [vmem:[#allocation3 + $0x9c] sm:$0x1] }
 0x295   : > { %v4277_v13 = vrot.slane %v15169_v48, 7  ;;  %7307 = vmatmul.mubr.bf16.gmra.mrb[12].mxu1 %v6672_v4  ;;  %v15171_v7 = vshrl.u32 %v12676_v50, 16  ;;  %v8635_v6 = vpack.c.bf16 %v3779_v30, %v3779_v30  ;;  %v3780_v2 = vmax.f32 %v3748_v45, 0.0 }
 0x296   : > { %v5527_v63 = vrot.slane %v15170_v1, 7  ;;  %v15172_v21 = vshll.u32 %v12432_v26, 16  ;;  %v8368_v20 = vrot.slane %v5520_v55, 11  ;;  %4070 = vst.msk [vmem:[#allocation3 + $0xf8] sm:$0xf] %vm15173_vm14, %v8637_v11  ;;  %v8638_v4 = vpack.c.bf16 %v3782_v49, %v3782_v49  ;;  %vm15303_vm14 = vmmov %vm15100_vm0 }
 0x297   : > { %v5536_v38 = vrot.slane %v15171_v7, 7  ;;  %v15174_v3 = vshll.u32 %v12689_v8, 16  ;;  %v15175_v1 = vshll.u32 %v12676_v50, 16  ;;  %4068 = vst.msk [vmem:[#allocation3 + $0xe4] sm:$0xf] %vm15176_vm15, %v8635_v6  ;;  %v8636_v30 = vpack.c.bf16 %v3780_v2, %v3780_v2  ;;  %vm15428_vm15 = vmmov %vm15100_vm0 }
 0x298   : > { %v4280_v62 = vor.u32 %v15172_v21, %v4277_v13  ;;  %v5532_v48 = vrot.slane %v5527_v63, 4  ;;  %v15177_v45 = vor.u32 %v12844_v43, %v12827_v46  ;;  %v15178_v55 = vshll.u32 %v12780_v53, 16  ;;  %v3856_v11 = vld [vmem:[#allocation3 + $0x130] sm:$0x8]  ;;  %4071 = vst.msk [vmem:[#allocation3 + $0xfc] sm:$0xf] %vm15179_vm2, %v8638_v4  ;;  %vm15429_vm2 = vmmov %vm15100_vm0 }
 0x299   : > { %v5530_v22 = vor.u32 %v15174_v3, %v5527_v63  ;;  %v5539_v7 = vor.u32 %v15175_v1, %v5536_v38  ;;  %v4604_v6 = vshll.u32 %v4487_v31, 16  ;;  %4069 = vst.msk [vmem:[#allocation3 + $0xe8] sm:$0xf] %vm15181_vm8, %v8636_v30  ;;  %v5264_v46 = vor.u32 %v13050_v59, %v13044_v34  ;;  %v13105_v2 = vld [vmem:[#allocation3 + $0xd0] sm:$0xf]  ;;  %vm15430_vm8 = vmmov %vm15100_vm0 }
 0x29a   : > { %v4281_v26 = vsel %vm9518_vm9, %v4273_v35, %v4280_v62  ;;  %v4597_v13 = vrot.slane %v15177_v45, 4  ;;  %v4598_v49 = vrot.slane %v15178_v55, 5  ;;  %v15183_v62 = vshrl.u32 %v12776_v27, 16 }
 0x29b   : > { %v13091_v8 = vcombine.low %v4272_v47, %v4281_v26  ;;  %v5531_v63 = vsel %vm9518_vm9, %v8368_v20, %v5530_v22  ;;  %v5540_v38 = vsel %vm9518_vm9, %v5532_v48, %v5539_v7  ;;  %v4606_v21 = vrot.slane %v4604_v6, 5  ;;  %v13127_v7 = vld [vmem:[#allocation3 + $0xd4] sm:$0xf]  ;;  %v6138_v6 = vpop.permute.xlu1 %6137 }
 0x29c   : > { %v13100_v43 = vcombine.low %v5531_v63, %v5540_v38  ;;  %v4599_v35 = vsel %vm9580_vm12, %v4597_v13, %v4598_v49  ;;  %v4601_v47 = vor.u32 %v12849_v15, %v4598_v49  ;;  %v13109_v20 = vrot.slane %v15183_v62, 7 }
 0x29d   : > { %15180 = vst [vmem:[#allocation70_spill] sm:$0xff] %v13091_v8  ;;  %v15184_v31 = vshrl.u32 %v12780_v53, 16  ;;  %v3857_v34 = vsel %vm11449_vm5, 0, %v3856_v11  ;;  %v15185_v59 = vshll.u32 %v12945_v10, 16  ;;  %v15187_v22 = vshrl.u32 %v12930_v23, 16 }
 0x29e   : > { %15182 = vst [vmem:[#allocation71_spill] sm:$0xff] %v13100_v43  ;;  %v15189_v48 = vshrl.u32 %v12989_v54, 16  ;;  %v4602_v30 = vrot.slane %v4601_v47, 4  ;;  %3858 = vst [vmem:[#allocation3 + $0x130] sm:$0x8] %v3857_v34  ;;  %v15190_v26 = vshll.u32 %v12989_v54, 16 }
 0x29f   : > { %v4299_v4 = vrot.slane %v15184_v31, 7  ;;  %v13117_v3 = vrot.slane %v15185_v59, 5  ;;  %v13121_v15 = vrot.slane %v15187_v22, 4  ;;  %v5270_v55 = vrot.slane %v5269_v60, 4  ;;  %v13141_v47 = vld [vmem:[#allocation3 + $0xf8] sm:$0xf] }
 0x2a0   : > { %v13125_v1 = vrot.slane %v15189_v48, 4  ;;  %v13131_v45 = vrot.slane %v15190_v26, 5  ;;  %v15191_v49 = vshll.u32 %v12780_v53, 16  ;;  %v15192_v63 = vshrl.u32 %v13010_v24, 16  ;;  %v4751_v59 = vld [vmem:[#allocation3 + $0xe4] sm:$0xf] }
 0x2a1   : > { %15186 = vst [vmem:[#allocation72_spill] sm:$0xff] %v13117_v3  ;;  %15188 = vst [vmem:[#allocation73_spill] sm:$0xff] %v13121_v15  ;;  %v5265_v62 = vrot.slane %v5264_v46, 4  ;;  %v4607_v34 = vsel %vm9580_vm12, %v4602_v30, %v4606_v21  ;;  %v4994_v48 = vshrl.u32 %v4751_v59, 16  ;;  %v4997_v26 = vshll.u32 %v4751_v59, 16 }
 0x2a2   : > { %v4302_v11 = vor.u32 %v15191_v49, %v4299_v4  ;;  %v13138_v38 = vrot.slane %v15192_v63, 4  ;;  %v13147_v53 = vcombine.low %v4599_v35, %v4607_v34  ;;  %v4295_v4 = vrot.slane %v13109_v20, 4  ;;  %v4755_v49 = vld [vmem:[#allocation3 + $0xfc] sm:$0xf]  ;;  %v13152_v13 = vld [vmem:[#allocation3 + $0xe4] sm:$0xf] }
 0x2a3   : > { %v5016_v63 = vshrl.u32 %v13141_v47, 16  ;;  %15195 = vst [vmem:[#allocation76_spill] sm:$0xff] %v13152_v13  ;;  %v13154_v31 = vld [vmem:[#allocation3 + $0xe8] sm:$0xf]  ;;  %v5275_v21 = vsel %vm9580_vm12, %v5270_v55, %v12636_v12  ;;  %v15197_v34 = vld [vmem:[#allocation50_spill] sm:$0xff]  ;;  %v5267_v22 = vsel %vm9580_vm12, %v5265_v62, %v13017_v39  ;;  %v5019_v12 = vshll.u32 %v13141_v47, 16 }
 0x2a4   : > { %15193 = vst [vmem:[#allocation74_spill] sm:$0xff] %v13138_v38  ;;  %15194 = vst [vmem:[#allocation75_spill] sm:$0xff] %v13147_v53  ;;  %v4752_v30 = vld [vmem:[#allocation3 + $0xe8] sm:$0xf]  ;;  %v13163_v59 = vsel %vm6657_vm6, %v15197_v34, %v6138_v6  ;;  %v13167_v46 = vsel %vm9518_vm9, %v4295_v4, %v4302_v11  ;;  %v8500_v60 = vcombine.low %v13152_v13, %v13154_v31  ;;  %v5028_v55 = vshll.u32 %v4755_v49, 16 }
 0x2a5   : > { %15196 = vst [vmem:[#allocation77_spill] sm:$0xff] %v13154_v31  ;;  %v4101_v15 = vld [vmem:[#allocation3 + $0x90] sm:$0x8]  ;;  %v4996_v35 = vrot.slane %v4994_v48, 7  ;;  %v5003_v3 = vshrl.u32 %v4752_v30, 16  ;;  %v5006_v5 = vshll.u32 %v4752_v30, 16  ;;  %v8468_v34 = vcombine.low %v5267_v22, %v5275_v21 }
 0x2a6   : > { %v5025_v6 = vshrl.u32 %v4755_v49, 16  ;;  %6595 = vrot.lane.b32.xlu1 %v8500_v60, %s9293_s17  ;;  %v5276_v11 = vrot.slane %v4994_v48, 4  ;;  %v5277_v4 = vrot.slane %v4997_v26, 5  ;;  %v5290_v32 = vrot.slane %v5016_v63, 4  ;;  %v4759_v49 = vld [vmem:[#allocation3 + $0x11c] sm:$0x8] }
 0x2a7   : > { %v4999_v50 = vor.u32 %v4997_v26, %v4996_v35  ;;  %v5005_v53 = vrot.slane %v5003_v3, 7  ;;  %v5280_v8 = vrot.slane %v5006_v5, 5  ;;  %v4283_v44 = vshrl.u32 %v4101_v15, 16 }
 0x2a8   : > { %v5278_v39 = vor.u32 %v5277_v4, %v5276_v11  ;;  %v5282_v62 = vrot.slane %v5003_v3, 4  ;;  %v5291_v47 = vrot.slane %v5019_v12, 5  ;;  %v5294_v43 = vrot.slane %v5028_v55, 5 }
 0x2a9   : > { %v5001_v38 = vrot.slane %v4996_v35, 4  ;;  %v5008_v54 = vor.u32 %v5006_v5, %v5005_v53  ;;  %v5296_v24 = vrot.slane %v5025_v6, 4  ;;  %v5328_v30 = vshll.u32 %v5133_v0, 16  ;;  %v13182_v5 = vpop.permute.xlu1 %6139 }
 0x2aa   : > { %6435 = vrot.lane.b32.xlu1 %v8468_v34, %s9293_s17  ;;  %v5279_v22 = vrot.slane %v5278_v39, 4  ;;  %v5283_v60 = vor.u32 %v5282_v62, %v5280_v8  ;;  %v5292_v48 = vor.u32 %v5291_v47, %v5290_v32  ;;  %v5027_v21 = vrot.slane %v5025_v6, 7 }
 0x2ab   : > { %v5000_v15 = vsel %vm9518_vm9, %v12642_v29, %v4999_v50  ;;  %v5009_v3 = vsel %vm9518_vm9, %v5001_v38, %v5008_v54  ;;  %v5297_v26 = vor.u32 %v5296_v24, %v5294_v43  ;;  %v5018_v35 = vrot.slane %v5016_v63, 7  ;;  %v13191_v29 = vld [vmem:[%s14729_s4 + $0x108] sm:$0xff]  }
 0x2ac   : > { %v8437_v0 = vcombine.low %v5000_v15, %v5009_v3  ;;  %v5284_v53 = vrot.slane %v5283_v60, 4  ;;  %v5055_v11 = vshrl.u32 %v4759_v49, 16  ;;  %v8338_v34 = vrot.slane %v4283_v44, 11  ;;  %9022 = vmatprep.subr.bf16.mxu1 %v13191_v29 }
 0x2ad   : > { %v5298_v4 = vrot.slane %v5297_v26, 4  ;;  %v5030_v39 = vor.u32 %v5028_v55, %v5027_v21  ;;  %v5542_v32 = vshrl.u32 %v5379_v36, 16  ;;  %v15198_v6 = vshrl.u32 %v12740_v17, 16  ;;  %v6578_v60 = vpop.permute.xlu1 %6577  ;;  %9026 = vmatpush3.bf16.msra.mxu1 %v13191_v29  ;;  %v13224_v21 = vld [vmem:[#allocation3 + $0xe4] sm:$0xf] }
 0x2ae   : > { %6277 = vrot.lane.b32.xlu0 %v8437_v0, %s9293_s17  ;;  %v5281_v50 = vsel %vm9580_vm12, %v5279_v22, %v5280_v8  ;;  %v5289_v54 = vsel %vm9580_vm12, %v5284_v53, %v12655_v19  ;;  %v5293_v24 = vrot.slane %v5292_v48, 4  ;;  %v15199_v36 = vshll.u32 %v12776_v27, 16 }
 0x2af   : > { %v13186_v62 = vrot.slane %v15198_v6, 7  ;;  %v8469_v38 = vcombine.low %v5281_v50, %v5289_v54  ;;  %v15200_v63 = vshrl.u32 %v13105_v2, 16  ;;  %v5021_v47 = vor.u32 %v5019_v12, %v5018_v35  ;;  %v3913_v6 = vld [vmem:[#allocation3 + $0x150] sm:$0x1] }
 0x2b0   : > { %v4293_v44 = vor.u32 %v15199_v36, %v13109_v20  ;;  %v5023_v49 = vrot.slane %v5018_v35, 4  ;;  %v15201_v8 = vshll.u32 %v13105_v2, 16  ;;  %v15202_v19 = vshrl.u32 %v13127_v7, 16  ;;  %v6266_v36 = vpop.permute.xlu0 %6265 }
 0x2b1   : > { %v13204_v55 = vrot.slane %v15200_v63, 4  ;;  %v5303_v27 = vsel %vm9580_vm12, %v5298_v4, %v12713_v41  ;;  %v13218_v20 = vrot.slane %v5328_v30, 5  ;;  %6437 = vrot.lane.b32.xlu1 %v8469_v38, %s9293_s17  ;;  %v6852_v15 = vsel %vm6657_vm6, %v12895_v58, %v6578_v60  ;;  %v13235_v41 = vld [vmem:[%s14729_s4 + $0x110] sm:$0xff]   ;;  %v6418_v38 = vpop.permute.xlu1 %6417  ;;  %v15207_v60 = vld [vmem:[#allocation14_spill] sm:$0xff] }
 0x2b2   : > { %v13209_v22 = vrot.slane %v15201_v8, 5  ;;  %v13213_v48 = vrot.slane %v15202_v19, 4  ;;  %v5031_v12 = vsel %vm9518_vm9, %v5023_v49, %v5030_v39  ;;  %v13228_v3 = vrot.slane %v5055_v11, 11  ;;  %7443 = vmatprep.mubr.bf16.mxu0 %v6852_v15  ;;  %v3910_v39 = vld [vmem:[#allocation3 + $0x13c] sm:$0x1]  ;;  %9023 = vmatprep.subr.bf16.mxu1 %v13235_v41 }
 0x2b3   : > { %v15203_v26 = vshrl.u32 %v12729_v14, 16  ;;  %v15204_v30 = vcombine.low %v13105_v2, %v13127_v7  ;;  %v5295_v0 = vsel %vm9580_vm12, %v5293_v24, %v5294_v43  ;;  %v4294_v58 = vsel %vm9518_vm9, %v8338_v34, %v4293_v44  ;;  %v3859_v34 = vld [vmem:[#allocation3 + $0x144] sm:$0x8]  ;;  %v13256_v44 = vld [vmem:[#allocation3 + $0xe8] sm:$0xf]  ;;  %v15206_v49 = vld [vmem:[#allocation13_spill] sm:$0xff]  ;;  %9027 = vmatpush3.bf16.msra.mxu1 %v13235_v41 }
 0x2b4   : > { %v8369_v53 = vrot.slane %v5542_v32, 11  ;;  %v15205_v11 = vshll.u32 %v12740_v17, 16  ;;  %v8470_v50 = vcombine.low %v5295_v0, %v5303_v27  ;;  %v5022_v54 = vsel %vm9518_vm9, %v12715_v33, %v5021_v47  ;;  %v5382_v32 = vld [vmem:[#allocation3 + $0xb8] sm:$0x8]  ;;  %v15209_v47 = vld [vmem:[#allocation46_spill] sm:$0xff] }
 0x2b5   : > { %v5558_v35 = vrot.slane %v15203_v26, 7  ;;  %6149 = vrot.lane.b32.xlu0 %v15204_v30, %s9293_s17  ;;  %v13252_v43 = vcombine.low %v4294_v58, %v13167_v46  ;;  %v5554_v24 = vrot.slane %v13186_v62, 4  ;;  %v8438_v17 = vcombine.low %v5022_v54, %v5031_v12 }
 0x2b6   : > { %v5552_v4 = vor.u32 %v15205_v11, %v13186_v62  ;;  %v14837_v63 = vshrl.u32 %v13224_v21, 16  ;;  %v15208_v8 = vcombine.low %v15206_v49, %v15207_v60  ;;  %v6740_v46 = vsel %vm6657_vm6, %v15209_v47, %v6266_v36  ;;  %6439 = vrot.lane.b32.xlu1 %v8470_v50, %s9293_s17  ;;  %v6268_v50 = vpop.permute.xlu0 %6267 }
 0x2b7   : > { %v14836_v62 = vshll.u32 %v13224_v21, 16  ;;  %7314 = vmatprep.mubr.bf16.mxu1 %v6740_v46  ;;  %v15210_v19 = vshll.u32 %v12729_v14, 16  ;;  %v3911_v12 = vsel %vm11489_vm7, 0, %v3910_v39  ;;  %v3914_v15 = vsel %vm11489_vm7, 0, %v3913_v6  ;;  %v4488_v46 = vld [vmem:[#allocation3 + $0xb0] sm:$0x1] }
 0x2b8   : > { %v6788_v33 = vsel %vm6657_vm6, %v15208_v8, %v6418_v38  ;;  %7315 = vmatmul.mubr.bf16.gmra.mrb[16].mxu1 %v13163_v59  ;;  %3912 = vst [vmem:[#allocation3 + $0x13c] sm:$0x1] %v3911_v12  ;;  %3915 = vst [vmem:[#allocation3 + $0x150] sm:$0x1] %v3914_v15  ;;  %v3860_v26 = vsel %vm11449_vm5, 0, %v3859_v34  ;;  %v5564_v30 = vshrl.u32 %v5382_v32, 16  ;;  %v8406_v6 = vcombine.low %v13224_v21, %v13256_v44  ;;  %v6580_v59 = vpop.permute.xlu1 %6579 }
 0x2b9   : > { %v5561_v27 = vor.u32 %v15210_v19, %v5558_v35  ;;  %6279 = vrot.lane.b32.xlu0 %v8438_v17, %s9293_s17  ;;  %v15211_v0 = vshrl.u32 %v12879_v52, 16  ;;  %v15212_v35 = vshrl.u32 %v12881_v56, 16  ;;  %7444 = vmatmul.mubr.bf16.vlgmr.msra.gmra.mrb[32].mxu0 %v6788_v33  ;;  %v5553_v54 = vsel %vm9518_vm9, %v8369_v53, %v5552_v4  ;;  %3861 = vst [vmem:[#allocation3 + $0x144] sm:$0x8] %v3860_v26  ;;  %v15213_v38 = vld [vmem:[#allocation51_spill] sm:$0xff]  ;;  %v15226_v39 = vld [vmem:[#allocation30_spill] sm:$0xff] }
 0x2ba   : > { %v6744_v34 = vsel %vm6657_vm6, %v15213_v38, %v6268_v50  ;;  %v15214_v32 = vld [vmem:[#allocation19_spill] sm:$0xff]  ;;  %v8370_v60 = vrot.slane %v5564_v30, 11  ;;  %8982 = vmatpush3.bf16.msra.mxu0 %v13057_v51  ;;  %v15215_v53 = vshll.u32 %v12879_v52, 16  ;;  %v15216_v33 = vshll.u32 %v12881_v56, 16  ;;  %v13314_v30 = vld [vmem:[#allocation3 + $0xf8] sm:$0xf] }
 0x2bb   : > { %v5571_v58 = vrot.slane %v15211_v0, 7  ;;  %v5580_v11 = vrot.slane %v15212_v35, 7  ;;  %v5562_v36 = vsel %vm9518_vm9, %v5554_v24, %v5561_v27  ;;  %v6856_v17 = vsel %vm6657_vm6, %v15214_v32, %v6580_v59  ;;  %7322 = vmatprep.mubr.bf16.mxu1 %v6744_v34  ;;  %v5385_v52 = vld [vmem:[#allocation3 + $0xcc] sm:$0x8]  ;;  %8983 = vmatprep.subr.bf16.mxu0 %v13191_v29  ;;  %v15218_v50 = vld [vmem:[#allocation18_spill] sm:$0xff] }
 0x2bc   : > { %v13293_v49 = vcombine.low %v5553_v54, %v5562_v36  ;;  %7451 = vmatprep.mubr.bf16.mxu0 %v6856_v17  ;;  %v13305_v12 = vrot.slane %v14837_v63, 4  ;;  %v13309_v51 = vrot.slane %v14836_v62, 5  ;;  %v14842_v15 = vshrl.u32 %v13256_v44, 16  ;;  %v6420_v26 = vpop.permute.xlu1 %6419  ;;  %v13326_v54 = vld [vmem:[#allocation3 + $0xfc] sm:$0xf]  ;;  %v15221_v17 = vld [vmem:[#allocation52_spill] sm:$0xff] }
 0x2bd   : > { %v5574_v4 = vor.u32 %v15215_v53, %v5571_v58  ;;  %v5576_v24 = vrot.slane %v5571_v58, 4  ;;  %v5583_v47 = vor.u32 %v15216_v33, %v5580_v11  ;;  %6151 = vrot.lane.b32.xlu0 %v8406_v6, %s9293_s17  ;;  %v4610_v35 = vor.u32 %v12919_v18, %v12907_v57  ;;  %v15217_v11 = vld [vmem:[#allocation16_spill] sm:$0xff] }
 0x2be   : > { %v15219_v6 = vcombine.low %v15217_v11, %v15218_v50  ;;  %v15220_v38 = vshll.u32 %v12852_v25, 16  ;;  %v4618_v32 = vshll.u32 %v4488_v46, 16  ;;  %8984 = vmatpush3.bf16.msra.mxu0 %v13191_v29  ;;  %v13336_v57 = vld [vmem:[#allocation3 + $0x130] sm:$0x8]  ;;  %v5586_v53 = vshrl.u32 %v5385_v52, 16 }
 0x2bf   : > { %v5575_v0 = vsel %vm9518_vm9, %v8370_v60, %v5574_v4  ;;  %v5584_v58 = vsel %vm9518_vm9, %v5576_v24, %v5583_v47  ;;  %v6680_v60 = vsel %vm6657_vm6, %v15221_v17, %v13182_v5  ;;  %v4611_v18 = vrot.slane %v4610_v35, 4  ;;  %8985 = vmatprep.subr.bf16.mxu0 %v13235_v41  ;;  %v8975_v24 = vpop.f32.mrb[24].mxu0  ;;  %v13348_v5 = vld [vmem:[%s14727_s2] ss:$0 sm:$0xff] }
 0x2c0   : > { %v6792_v59 = vsel %vm6657_vm6, %v15219_v6, %v6420_v26  ;;  %v13328_v36 = vcombine.low %v5575_v0, %v5584_v58  ;;  %v4612_v34 = vrot.slane %v15220_v38, 5  ;;  %7323 = vmatmul.mubr.bf16.gmra.mrb[20].mxu1 %v6680_v60  ;;  %v14841_v47 = vshrl.u32 %v13314_v30, 16  ;;  %v3650_v26 = vpop.f32.mrb[25].mxu0  ;;  %v6582_v0 = vpop.permute.xlu1 %6581  ;;  %v4104_v60 = vld [vmem:[#allocation3 + $0xa4] sm:$0x8] }
 0x2c1   : > { %v14840_v29 = vshll.u32 %v13314_v30, 16  ;;  %v3714_v52 = vmul.f32 %v13348_v5, %v8975_v24  ;;  %7452 = vmatmul.mubr.bf16.gmra.mrb[36].mxu0 %v6792_v59  ;;  %v4620_v11 = vrot.slane %v4618_v32, 5  ;;  %v3712_v50 = vmul.f32 %v13348_v5, %v3650_v26  ;;  %v8976_v6 = vpop.f32.mrb[26].mxu0  ;;  %v13364_v59 = vld [vmem:[%s14728_s3] ss:$0 sm:$0xff] }
 0x2c2   : > { %v4615_v46 = vor.u32 %v12923_v61, %v4612_v34  ;;  %v4613_v35 = vsel %vm9580_vm12, %v4611_v18, %v4612_v34  ;;  %v15222_v61 = vld [vmem:[#allocation21_spill] sm:$0xff]  ;;  %v4624_v24 = vor.u32 %v13131_v45, %v13125_v1  ;;  %8986 = vmatpush3.bf16.msra.mxu0 %v13235_v41  ;;  %v3715_v32 = vmul.f32 %v13348_v5, %v8976_v6  ;;  %v3653_v18 = vpop.f32.mrb[27].mxu0 }
 0x2c3   : > { %v6860_v38 = vsel %vm6657_vm6, %v15222_v61, %v6582_v0  ;;  %v3753_v34 = vadd.f32 %v13364_v59, %v3714_v52  ;;  %v8371_v0 = vrot.slane %v5586_v53, 11  ;;  %v3751_v61 = vadd.f32 %v13364_v59, %v3712_v50  ;;  %v15225_v50 = vld [vmem:[#allocation27_spill] sm:$0xff] }
 0x2c4   : > { %7459 = vmatprep.mubr.bf16.mxu0 %v6860_v38  ;;  %v4616_v26 = vrot.slane %v4615_v46, 4  ;;  %v3713_v27 = vmul.f32 %v13348_v5, %v3653_v18  ;;  %v15223_v1 = vshrl.u32 %v12945_v10, 16  ;;  %v15224_v41 = vshrl.u32 %v12930_v23, 16  ;;  %v6422_v52 = vpop.permute.xlu1 %6421 }
 0x2c5   : > { %v3785_v4 = vmax.f32 %v3753_v34, 0.0  ;;  %v3754_v19 = vadd.f32 %v13364_v59, %v3715_v32  ;;  %v4305_v38 = vshrl.u32 %v4104_v60, 16  ;;  %v3783_v46 = vmax.f32 %v3751_v61, 0.0  ;;  %v13389_v61 = vld [vmem:[#allocation3 + $0xf8] sm:$0xf] }
 0x2c6   : > { %v5593_v45 = vrot.slane %v15223_v1, 7  ;;  %v5602_v8 = vrot.slane %v15224_v41, 7  ;;  %v4621_v6 = vsel %vm9580_vm12, %v4616_v26, %v4620_v11  ;;  %v3752_v53 = vadd.f32 %v13364_v59, %v3713_v27  ;;  %15231 = vst [vmem:[#allocation50_spill] sm:$0xff] %v13389_v61 }
 0x2c7   : > { %v15227_v18 = vcombine.low %v15225_v50, %v15226_v39  ;;  %v13382_v1 = vcombine.low %v4613_v35, %v4621_v6  ;;  %v8641_v63 = vpack.c.bf16 %v3785_v4, %v3785_v4  ;;  %v3786_v41 = vmax.f32 %v3754_v19, 0.0  ;;  %v15232_v4 = vld [vmem:[#allocation57_spill] sm:$0xff]  ;;  %v15236_v6 = vld [vmem:[#allocation26_spill] sm:$0xff] }
 0x2c8   : > { %v15228_v34 = vshll.u32 %v12945_v10, 16  ;;  %v5598_v33 = vrot.slane %v5593_v45, 4  ;;  %v8639_v17 = vpack.c.bf16 %v3783_v46, %v3783_v46  ;;  %v3784_v58 = vmax.f32 %v3752_v53, 0.0  ;;  %v6584_v39 = vpop.permute.xlu1 %6583 }
 0x2c9   : > { %v6796_v62 = vsel %vm6657_vm6, %v15227_v18, %v6422_v52  ;;  %v15229_v11 = vshll.u32 %v12930_v23, 16  ;;  %v8339_v26 = vrot.slane %v4305_v38, 11  ;;  %4074 = vst.msk [vmem:[#allocation3 + $0x120] sm:$0xf] %vm15230_vm10, %v8641_v63  ;;  %v8642_v27 = vpack.c.bf16 %v3786_v41, %v3786_v41  ;;  %v13400_v38 = vld [vmem:[#allocation3 + $0xfc] sm:$0xf]  ;;  %vm15431_vm10 = vmmov %vm15100_vm0 }
 0x2ca   : > { %v5596_v32 = vor.u32 %v15228_v34, %v5593_v45  ;;  %7460 = vmatmul.mubr.bf16.gmra.mrb[40].mxu0 %v6796_v62  ;;  %v15233_v10 = vshrl.u32 %v15232_v4, 16  ;;  %v15234_v45 = vshrl.u32 %v12852_v25, 16  ;;  %4072 = vst.msk [vmem:[#allocation3 + $0x10c] sm:$0xf] %vm15235_vm11, %v8639_v17  ;;  %v6864_v63 = vsel %vm6657_vm6, %v15236_v6, %v6584_v39  ;;  %15237 = vst [vmem:[#allocation13_spill] sm:$0xff] %v13400_v38  ;;  %v15242_v34 = vld [vmem:[#allocation42_spill] sm:$0xff] }
 0x2cb   : > { %v5605_v60 = vor.u32 %v15229_v11, %v5602_v8  ;;  %v8640_v8 = vpack.c.bf16 %v3784_v58, %v3784_v58  ;;  %v13404_v46 = vrot.slane %v4624_v24, 4  ;;  %4075 = vst.msk [vmem:[#allocation3 + $0x124] sm:$0xf] %vm15100_vm0, %v8642_v27  ;;  %7467 = vmatprep.mubr.bf16.mxu0 %v6864_v63  ;;  %v15239_v53 = vshll.u32 %v15232_v4, 16  ;;  %vm15432_vm11 = vmmov %vm15100_vm0 }
 0x2cc   : > { %v5597_v19 = vsel %vm9518_vm9, %v8371_v0, %v5596_v32  ;;  %v4312_v35 = vrot.slane %v15233_v10, 7  ;;  %v4321_v52 = vrot.slane %v15234_v45, 7  ;;  %v15240_v58 = vshll.u32 %v12852_v25, 16  ;;  %v6424_v27 = vpop.permute.xlu1 %6423  ;;  %v15244_v10 = vld [vmem:[#allocation29_spill] sm:$0xff] }
 0x2cd   : > { %v5606_v62 = vsel %vm9518_vm9, %v5598_v33, %v5605_v60  ;;  %4073 = vst.msk [vmem:[#allocation3 + $0x110] sm:$0xf] %vm15241_vm3, %v8640_v8  ;;  %v13416_v41 = vrot.slane %v14842_v15, 4  ;;  %v14838_v33 = vshrl.u32 %v13389_v61, 16  ;;  %v14839_v24 = vshll.u32 %v13389_v61, 16  ;;  %vm15433_vm3 = vmmov %vm15100_vm0 }
 0x2ce   : > { %v13407_v0 = vcombine.low %v5597_v19, %v5606_v62  ;;  %v4315_v50 = vor.u32 %v15239_v53, %v4312_v35  ;;  %v4317_v17 = vrot.slane %v4312_v35, 4  ;;  %v4324_v18 = vor.u32 %v15240_v58, %v4321_v52  ;;  %v15245_v35 = vld [vmem:[#allocation31_spill] sm:$0xff]  ;;  %v5134_v8 = vld [vmem:[#allocation3 + $0x13c] sm:$0x1] }
 0x2cf   : > { %v15243_v32 = vshll.u32 %v15242_v34, 16  ;;  %v14846_v25 = vshrl.u32 %v13400_v38, 16  ;;  %v13432_v4 = vrot.slane %v14841_v47, 4  ;;  %v15246_v45 = vcombine.low %v15244_v10, %v15245_v35 }
 0x2d0   : > { %15238 = vst [vmem:[#allocation14_spill] sm:$0xff] %v13407_v0  ;;  %v4316_v39 = vsel %vm9518_vm9, %v8339_v26, %v4315_v50  ;;  %v4325_v19 = vsel %vm9518_vm9, %v4317_v17, %v4324_v18  ;;  %v13446_v63 = vrot.slane %v14840_v29, 5  ;;  %v15248_v62 = vshrl.u32 %v13326_v54, 16  ;;  %v13457_v18 = vld [vmem:[#allocation3 + $0x120] sm:$0xf]  ;;  %v13469_v35 = vpop.permute.xlu1 %6585 }
 0x2d1   : > { %v13422_v11 = vrot.slane %v15243_v32, 5  ;;  %v6800_v52 = vsel %vm6657_vm6, %v15246_v45, %v6424_v27  ;;  %v13438_v6 = vcombine.low %v4316_v39, %v4325_v19  ;;  %v15249_v50 = vshrl.u32 %v13336_v57, 16  ;;  %v5135_v32 = vld [vmem:[#allocation3 + $0x150] sm:$0x1]  ;;  %v4757_v19 = vld [vmem:[#allocation3 + $0x10c] sm:$0xf] }
 0x2d2   : > { %v13450_v53 = vrot.slane %v15248_v62, 4  ;;  %v13461_v27 = vrot.slane %v14838_v33, 4  ;;  %v13465_v39 = vrot.slane %v14839_v24, 5  ;;  %v5060_v10 = vshrl.u32 %v13457_v18, 16  ;;  %7468 = vmatmul.mubr.bf16.gmra.mrb[44].mxu0 %v6800_v52  ;;  %v4761_v24 = vld [vmem:[#allocation3 + $0x124] sm:$0xf] }
 0x2d3   : > { %15247 = vst [vmem:[#allocation46_spill] sm:$0xff] %v13438_v6  ;;  %v13454_v17 = vrot.slane %v15249_v50, 11  ;;  %v5342_v45 = vshll.u32 %v5134_v8, 16  ;;  %v13473_v62 = vrot.slane %v14846_v25, 4  ;;  %v5038_v50 = vshrl.u32 %v4757_v19, 16 }
 0x2d4   : > { %15251 = vst [vmem:[#allocation19_spill] sm:$0xff] %v13461_v27  ;;  %15252 = vst [vmem:[#allocation16_spill] sm:$0xff] %v13465_v39  ;;  %v5041_v58 = vshll.u32 %v4757_v19, 16  ;;  %v4765_v29 = vld [vmem:[#allocation3 + $0x144] sm:$0x8]  ;;  %v5069_v15 = vshrl.u32 %v4761_v24, 16  ;;  %v6426_v23 = vpop.permute.xlu1 %6425 }
 0x2d5   : > { %15250 = vst [vmem:[#allocation51_spill] sm:$0xff] %v13454_v17  ;;  %15253 = vst [vmem:[#allocation18_spill] sm:$0xff] %v13473_v62  ;;  %v4758_v60 = vld [vmem:[#allocation3 + $0x110] sm:$0xf]  ;;  %v5072_v52 = vshll.u32 %v4761_v24, 16  ;;  %v5318_v26 = vrot.slane %v5060_v10, 4 }
 0x2d6   : > { %v5356_v57 = vshll.u32 %v5135_v32, 16  ;;  %v5040_v8 = vrot.slane %v5038_v50, 7  ;;  %v5047_v42 = vshrl.u32 %v4758_v60, 16  ;;  %v5050_v16 = vshll.u32 %v4758_v60, 16  ;;  %v13484_v17 = vld [vmem:[#allocation3 + $0xa8] sm:$0xf] }
 0x2d7   : > { %v5304_v25 = vrot.slane %v5038_v50, 4  ;;  %v5305_v62 = vrot.slane %v5041_v58, 5  ;;  %v15254_v19 = vshll.u32 %v13457_v18, 16  ;;  %v13481_v27 = vrot.slane %v5072_v52, 5  ;;  %v13486_v60 = vld [vmem:[#allocation3 + $0xac] sm:$0xf] }
 0x2d8   : > { %v5324_v33 = vrot.slane %v5069_v15, 4  ;;  %v5043_v56 = vor.u32 %v5041_v58, %v5040_v8  ;;  %v5049_v14 = vrot.slane %v5047_v42, 7  ;;  %v5308_v47 = vrot.slane %v5050_v16, 5  ;;  %v4489_v58 = vld [vmem:[#allocation3 + $0xc4] sm:$0x1] }
 0x2d9   : > { %v5319_v39 = vrot.slane %v15254_v19, 5  ;;  %v5099_v38 = vshrl.u32 %v4765_v29, 16  ;;  %v5306_v61 = vor.u32 %v5305_v62, %v5304_v25  ;;  %v5310_v24 = vrot.slane %v5047_v42, 4  ;;  %v4107_v42 = vld [vmem:[#allocation3 + $0xb8] sm:$0x8] }
 0x2da   : > { %v5325_v32 = vor.u32 %v5324_v33, %v13481_v27  ;;  %v5045_v19 = vrot.slane %v5040_v8, 4  ;;  %v5052_v37 = vor.u32 %v5050_v16, %v5049_v14  ;;  %v5071_v28 = vrot.slane %v5069_v15, 7  ;;  %v15257_v33 = vld [vmem:[#allocation55_spill] sm:$0xff] }
 0x2db   : > { %v13490_v6 = vrot.slane %v5342_v45, 5  ;;  %v5307_v31 = vrot.slane %v5306_v61, 4  ;;  %v5311_v13 = vor.u32 %v5310_v24, %v5308_v47  ;;  %v5320_v29 = vor.u32 %v5319_v39, %v5318_v26  ;;  %v6588_v45 = vpop.permute.xlu1 %6587  ;;  %v15258_v39 = vld [vmem:[#allocation7_spill] sm:$0xff] }
 0x2dc   : > { %v13492_v25 = vrot.slane %v5356_v57, 5  ;;  %v5044_v62 = vsel %vm9518_vm9, %v15257_v33, %v5043_v56  ;;  %v5053_v0 = vsel %vm9518_vm9, %v5045_v19, %v5052_v37  ;;  %v5062_v50 = vrot.slane %v5060_v10, 7  ;;  %v13507_v33 = vld [vmem:[#allocation3 + $0xe0] sm:$0x8] }
 0x2dd   : > { %15255 = vst [vmem:[#allocation52_spill] sm:$0xff] %v13490_v6  ;;  %v13499_v8 = vrot.slane %v5099_v38, 11  ;;  %v8439_v16 = vcombine.low %v5044_v62, %v5053_v0  ;;  %v5312_v14 = vrot.slane %v5311_v13, 4  ;;  %v5326_v15 = vrot.slane %v5325_v32, 4  ;;  %v15261_v13 = vld [vmem:[#allocation67_spill] sm:$0xff]  ;;  %v15262_v10 = vld [vmem:[#allocation74_spill] sm:$0xff] }
 0x2de   : > { %15256 = vst [vmem:[#allocation21_spill] sm:$0xff] %v13492_v25  ;;  %v4632_v61 = vshll.u32 %v4489_v58, 16  ;;  %v5074_v24 = vor.u32 %v5072_v52, %v5071_v28  ;;  %v4327_v26 = vshrl.u32 %v4107_v42, 16  ;;  %v15259_v57 = vshrl.u32 %v15258_v39, 16  ;;  %v13515_v0 = vld [vmem:[#allocation3 + $0x10c] sm:$0xf] }
 0x2df   : > { %v15260_v6 = vshrl.u32 %v15242_v34, 16  ;;  %6281 = vrot.lane.b32.xlu0 %v8439_v16, %s9293_s17  ;;  %v5309_v37 = vsel %vm9580_vm12, %v5307_v31, %v5308_v47  ;;  %v5317_v38 = vsel %vm9580_vm12, %v5312_v14, %v15261_v13  ;;  %v5321_v28 = vrot.slane %v5320_v29, 4  ;;  %v15264_v31 = vld [vmem:[#allocation59_spill] sm:$0xff]  ;;  %v15265_v62 = vld [vmem:[#allocation44_spill] sm:$0xff]  ;;  %v15266_v16 = vld [vmem:[#allocation45_spill] sm:$0xff] }
 0x2e0   : > { %v13503_v25 = vrot.slane %v15259_v57, 7  ;;  %v4629_v52 = vor.u32 %v15262_v10, %v13422_v11  ;;  %v8471_v32 = vcombine.low %v5309_v37, %v5317_v38  ;;  %v15263_v19 = vshll.u32 %v13457_v18, 16  ;;  %v15268_v13 = vld [vmem:[#allocation71_spill] sm:$0xff]  ;;  %v6428_v18 = vpop.permute.xlu1 %6427  ;;  %v13540_v38 = vld [vmem:[#allocation3 + $0x110] sm:$0xf] }
 0x2e1   : > { %v4343_v56 = vrot.slane %v15260_v6, 7  ;;  %v9197_v6 = vld [vmem:[%s14729_s4 + $0x118] sm:$0xff]   ;;  %v5067_v42 = vrot.slane %v5062_v50, 4  ;;  %v6868_v47 = vsel %vm6657_vm6, %v15264_v31, %v13469_v35  ;;  %v5331_v29 = vsel %vm9580_vm12, %v5326_v15, %v13218_v20 }
 0x2e2   : > { %v5065_v58 = vor.u32 %v15263_v19, %v5062_v50  ;;  %7475 = vmatprep.mubr.bf16.mxu0 %v6868_v47  ;;  %v15267_v14 = vcombine.low %v15265_v62, %v15266_v16  ;;  %v6872_v37 = vsel %vm6657_vm6, %v15268_v13, %v6588_v45  ;;  %9024 = vmatprep.subr.bf16.mxu1 %v9197_v6  ;;  %v14865_v20 = vshrl.u32 %v13515_v0, 16  ;;  %v6270_v19 = vpop.permute.xlu0 %6269  ;;  %v13556_v47 = vld [vmem:[#allocation3 + $0x15c] sm:$0xf]  ;;  %v13569_v13 = vld [vmem:[#allocation3 + $0xd0] sm:$0xf] }
 0x2e3   : > { %6441 = vrot.lane.b32.xlu1 %v8471_v32, %s9293_s17  ;;  %v5075_v35 = vsel %vm9518_vm9, %v5067_v42, %v5074_v24  ;;  %v8340_v15 = vrot.slane %v4327_v26, 11  ;;  %v15270_v45 = vcombine.low %v13314_v30, %v13326_v54  ;;  %v5323_v32 = vsel %vm9580_vm12, %v5321_v28, %v13481_v27  ;;  %v13565_v28 = vld [vmem:[#allocation3 + $0x120] sm:$0xf]  ;;  %9028 = vmatpush3.bf16.msra.mxu1 %v9197_v6 }
 0x2e4   : > { %v6804_v57 = vsel %vm6657_vm6, %v15267_v14, %v6426_v23  ;;  %v15269_v23 = vshll.u32 %v15258_v39, 16  ;;  %v14862_v24 = vshll.u32 %v13515_v0, 16  ;;  %v4634_v42 = vrot.slane %v4632_v61, 5  ;;  %v13558_v39 = vld [vmem:[#allocation3 + $0x160] sm:$0xf]  ;;  %v15272_v14 = vld [vmem:[#allocation69_spill] sm:$0xff]  ;;  %8987 = vmatprep.subr.bf16.mxu0 %v9197_v6 }
 0x2e5   : > { %7476 = vmatmul.mubr.bf16.gmra.mrb[48].mxu0 %v6804_v57  ;;  %6153 = vrot.lane.b32.xlu0 %v15270_v45, %s9293_s17  ;;  %v15271_v26 = vshll.u32 %v15242_v34, 16  ;;  %v8472_v62 = vcombine.low %v5323_v32, %v5331_v29  ;;  %v5066_v16 = vsel %vm9518_vm9, %v13228_v3, %v5065_v58  ;;  %v6748_v27 = vsel %vm6657_vm6, %v15272_v14, %v6270_v19  ;;  %v13571_v29 = vld [vmem:[#allocation3 + $0xd4] sm:$0xf]  ;;  %v13667_v50 = vld [vmem:[#allocation3 + $0x120] sm:$0xf] }
 0x2e6   : > { %v4337_v10 = vor.u32 %v15269_v23, %v13503_v25  ;;  %7483 = vmatprep.mubr.bf16.mxu0 %v6872_v37  ;;  %v4339_v57 = vrot.slane %v13503_v25, 4  ;;  %v8440_v34 = vcombine.low %v5066_v16, %v5075_v35  ;;  %v14863_v61 = vshrl.u32 %v13540_v38, 16  ;;  %7330 = vmatprep.mubr.bf16.mxu1 %v6748_v27  ;;  %v15274_v45 = vld [vmem:[#allocation20_spill] sm:$0xff]  ;;  %v4490_v35 = vld [vmem:[#allocation3 + $0xd8] sm:$0x1] }
 0x2e7   : > { %v4346_v31 = vor.u32 %v15271_v26, %v4343_v56  ;;  %v6590_v56 = vpop.permute.xlu1 %6589  ;;  %v4638_v58 = vor.u32 %v13209_v22, %v13204_v55  ;;  %8988 = vmatpush3.bf16.msra.mxu0 %v9197_v6  ;;  %6443 = vrot.lane.b32.xlu1 %v8472_v62, %s9293_s17  ;;  %v13580_v25 = vrot.slane %v14865_v20, 4  ;;  %v4652_v23 = vor.u32 %v13309_v51, %v13305_v12  ;;  %v6142_v22 = vpop.permute.xlu0 %6141  ;;  %v15273_v6 = vld [vmem:[#allocation43_spill] sm:$0xff]  ;;  %v13597_v26 = vld [vmem:[#allocation3 + $0x124] sm:$0xf] }
 0x2e8   : > { %v4338_v37 = vsel %vm9518_vm9, %v8340_v15, %v4337_v10  ;;  %v13591_v55 = vrot.slane %v14862_v24, 5  ;;  %v15275_v32 = vcombine.low %v15273_v6, %v15274_v45  ;;  %v14860_v15 = vshrl.u32 %v13565_v28, 16  ;;  %v15276_v62 = vld [vmem:[#allocation70_spill] sm:$0xff] }
 0x2e9   : > { %6283 = vrot.lane.b32.xlu0 %v8440_v34, %s9293_s17  ;;  %v14861_v10 = vshll.u32 %v13565_v28, 16  ;;  %v6684_v16 = vsel %vm6657_vm6, %v15276_v62, %v6142_v22  ;;  %v6876_v14 = vsel %vm6657_vm6, %v13293_v49, %v6590_v56  ;;  %v4630_v27 = vrot.slane %v4629_v52, 4  ;;  %v4110_v22 = vld [vmem:[#allocation3 + $0xcc] sm:$0x8] }
 0x2ea   : > { %v6808_v19 = vsel %vm6657_vm6, %v15275_v32, %v6428_v18  ;;  %v4347_v34 = vsel %vm9518_vm9, %v4339_v57, %v4346_v31  ;;  %v8408_v18 = vcombine.low %v13515_v0, %v13540_v38  ;;  %v13612_v45 = vrot.slane %v14863_v61, 4  ;;  %7331 = vmatmul.mubr.bf16.gmra.mrb[24].mxu1 %v6684_v16  ;;  %v13617_v52 = vld [vmem:[#allocation3 + $0x10c] sm:$0xf] }
 0x2eb   : > { %v13614_v32 = vcombine.low %v4338_v37, %v4347_v34  ;;  %v14864_v49 = vshrl.u32 %v13597_v26, 16  ;;  %v4635_v31 = vsel %vm9580_vm12, %v4630_v27, %v4634_v42  ;;  %v4639_v57 = vrot.slane %v4638_v58, 4  ;;  %v6272_v3 = vpop.permute.xlu0 %6271  ;;  %v15279_v27 = vld [vmem:[#allocation75_spill] sm:$0xff] }
 0x2ec   : > { %v15277_v56 = vshll.u32 %v13127_v7, 16  ;;  %v15278_v16 = vsel %vm9580_vm12, %v13404_v46, %v13422_v11  ;;  %v4646_v58 = vshll.u32 %v4490_v35, 16  ;;  %v6752_v34 = vsel %vm6657_vm6, %v15279_v27, %v6272_v3  ;;  %v13654_v27 = vld [vmem:[#allocation3 + $0x110] sm:$0xf] }
 0x2ed   : > { %7484 = vmatmul.mubr.bf16.gmra.mrb[52].mxu0 %v6808_v19  ;;  %6155 = vrot.lane.b32.xlu0 %v8408_v18, %s9293_s17  ;;  %v13627_v19 = vrot.slane %v14860_v15, 4  ;;  %v13634_v42 = vcombine.low %v15278_v16, %v4635_v31  ;;  %v14867_v15 = vshrl.u32 %v13617_v52, 16  ;;  %v4349_v46 = vshrl.u32 %v4110_v22, 16  ;;  %v6430_v31 = vpop.permute.xlu1 %6429  ;;  %v15283_v22 = vld [vmem:[#allocation28_spill] sm:$0xff] }
 0x2ee   : > { %v4640_v62 = vrot.slane %v15277_v56, 5  ;;  %7491 = vmatprep.mubr.bf16.mxu0 %v6876_v14  ;;  %v13640_v14 = vrot.slane %v14861_v10, 5  ;;  %7338 = vmatprep.mubr.bf16.mxu1 %v6752_v34  ;;  %v4648_v37 = vrot.slane %v4646_v58, 5  ;;  %v15280_v11 = vshrl.u32 %v13105_v2, 16  ;;  %v15282_v58 = vld [vmem:[#allocation53_spill] sm:$0xff] }
 0x2ef   : > { %v13650_v3 = vrot.slane %v14864_v49, 4  ;;  %v6144_v34 = vpop.permute.xlu0 %6143  ;;  %v15284_v10 = vcombine.low %v15282_v58, %v15283_v22  ;;  %v14866_v24 = vshll.u32 %v13617_v52, 16  ;;  %v8341_v61 = vrot.slane %v4349_v46, 11  ;;  %v4113_v22 = vld [vmem:[#allocation3 + $0xe0] sm:$0x8] }
 0x2f0   : > { %v4641_v18 = vsel %vm9580_vm12, %v4639_v57, %v4640_v62  ;;  %v4643_v56 = vor.u32 %v13213_v48, %v4640_v62  ;;  %v4356_v35 = vrot.slane %v15280_v11, 7  ;;  %v15281_v48 = vshrl.u32 %v13127_v7, 16 }
 0x2f1   : > { %v6812_v11 = vsel %vm6657_vm6, %v15284_v10, %v6430_v31  ;;  %v15285_v49 = vshll.u32 %v13105_v2, 16  ;;  %v6688_v16 = vsel %vm6657_vm6, %v13252_v43, %v6144_v34  ;;  %v15286_v6 = vshll.u32 %v13127_v7, 16  ;;  %v8979_v34 = vpop.f32.mrb[28].mxu0 }
 0x2f2   : > { %v4644_v57 = vrot.slane %v4643_v56, 4  ;;  %v4365_v62 = vrot.slane %v15281_v48, 7  ;;  %v4361_v48 = vrot.slane %v4356_v35, 4  ;;  %7339 = vmatmul.mubr.bf16.gmra.mrb[28].mxu1 %v6688_v16  ;;  %v14868_v10 = vshrl.u32 %v13654_v27, 16 }
 0x2f3   : > { %v4359_v20 = vor.u32 %v15285_v49, %v4356_v35  ;;  %v13677_v2 = vrot.slane %v14867_v15, 4  ;;  %v4491_v49 = vld [vmem:[#allocation3 + $0xec] sm:$0x1]  ;;  %v4653_v35 = vrot.slane %v4652_v23, 4  ;;  %v13692_v31 = vrot.slane %v14866_v24, 5 }
 0x2f4   : > { %v4649_v56 = vsel %vm9580_vm12, %v4644_v57, %v4648_v37  ;;  %v4368_v58 = vor.u32 %v15286_v6, %v4365_v62  ;;  %v15289_v57 = vshll.u32 %v13256_v44, 16  ;;  %v15291_v12 = vshrl.u32 %v13256_v44, 16 }
 0x2f5   : > { %15287 = vst [vmem:[#allocation27_spill] sm:$0xff] %v13677_v2  ;;  %v13679_v43 = vcombine.low %v4641_v18, %v4649_v56  ;;  %7492 = vmatmul.mubr.bf16.gmra.mrb[56].mxu0 %v6812_v11  ;;  %v4360_v7 = vsel %vm9518_vm9, %v8341_v61, %v4359_v20  ;;  %15288 = vst [vmem:[#allocation30_spill] sm:$0xff] %v13692_v31  ;;  %v4660_v20 = vshll.u32 %v4491_v49, 16  ;;  %v4371_v61 = vshrl.u32 %v4113_v22, 16 }
 0x2f6   : > { %v4369_v6 = vsel %vm9518_vm9, %v4361_v48, %v4368_v58  ;;  %v4654_v62 = vrot.slane %v15289_v57, 5  ;;  %v15290_v11 = vshrl.u32 %v13224_v21, 16  ;;  %v4387_v51 = vrot.slane %v15291_v12, 7  ;;  %v3666_v48 = vpop.f32.mrb[29].mxu0 }
 0x2f7   : > { %v13695_v16 = vcombine.low %v4360_v7, %v4369_v6  ;;  %v3718_v23 = vmul.f32 %v13348_v5, %v8979_v34  ;;  %v4666_v6 = vor.u32 %v13446_v63, %v13432_v4  ;;  %v3716_v49 = vmul.f32 %v13348_v5, %v3666_v48  ;;  %v8980_v22 = vpop.f32.mrb[30].mxu0  ;;  %v6592_v4 = vpop.permute.xlu1 %6591 }
 0x2f8   : > { %v4378_v56 = vrot.slane %v15290_v11, 7  ;;  %v4655_v58 = vsel %vm9580_vm12, %v4653_v35, %v4654_v62  ;;  %v4657_v7 = vor.u32 %v13416_v41, %v4654_v62  ;;  %v4662_v57 = vrot.slane %v4660_v20, 5  ;;  %v3669_v24 = vpop.f32.mrb[31].mxu0 }
 0x2f9   : > { %v8342_v18 = vrot.slane %v4371_v61, 11  ;;  %v15292_v11 = vshll.u32 %v13224_v21, 16  ;;  %v3757_v12 = vadd.f32 %v13364_v59, %v3718_v23  ;;  %v3719_v34 = vmul.f32 %v13348_v5, %v8980_v22 }
 0x2fa   : > { %v4658_v15 = vrot.slane %v4657_v7, 4  ;;  %v4383_v35 = vrot.slane %v4378_v56, 4  ;;  %v3755_v41 = vadd.f32 %v13364_v59, %v3716_v49  ;;  %v3717_v62 = vmul.f32 %v13348_v5, %v3669_v24  ;;  %v4492_v7 = vld [vmem:[#allocation3 + $0x100] sm:$0x1] }
 0x2fb   : > { %v4381_v46 = vor.u32 %v15292_v11, %v4378_v56  ;;  %v15293_v20 = vshll.u32 %v13256_v44, 16  ;;  %v3789_v21 = vmax.f32 %v3757_v12, 0.0  ;;  %v3758_v48 = vadd.f32 %v13364_v59, %v3719_v34  ;;  %v6432_v34 = vpop.permute.xlu1 %6431 }
 0x2fc   : > { %v6880_v23 = vsel %vm6657_vm6, %v13328_v36, %v6592_v4  ;;  %v4663_v56 = vsel %vm9580_vm12, %v4658_v15, %v4662_v57  ;;  %v3787_v49 = vmax.f32 %v3755_v41, 0.0  ;;  %v3756_v5 = vadd.f32 %v13364_v59, %v3717_v62  ;;  %v13739_v62 = vld [vmem:[#allocation3 + $0x124] sm:$0xf] }
 0x2fd   : > { %v4382_v63 = vsel %vm9518_vm9, %v8342_v18, %v4381_v46  ;;  %v4390_v61 = vor.u32 %v15293_v20, %v4387_v51  ;;  %7499 = vmatprep.mubr.bf16.mxu0 %v6880_v23  ;;  %v13726_v24 = vcombine.low %v4655_v58, %v4663_v56  ;;  %v4116_v46 = vld [vmem:[#allocation3 + $0xf4] sm:$0x8]  ;;  %v8645_v18 = vpack.c.bf16 %v3789_v21, %v3789_v21 }
 0x2fe   : > { %v3790_v51 = vmax.f32 %v3758_v48, 0.0  ;;  %v4667_v11 = vrot.slane %v4666_v6, 4  ;;  %v8643_v36 = vpack.c.bf16 %v3787_v49, %v3787_v49  ;;  %v3788_v12 = vmax.f32 %v3756_v5, 0.0  ;;  %v6274_v5 = vpop.permute.xlu0 %6273 }
 0x2ff   : > { %v4391_v44 = vsel %vm9518_vm9, %v4383_v35, %v4390_v61  ;;  %v15294_v15 = vshll.u32 %v13326_v54, 16  ;;  %v4674_v41 = vshll.u32 %v4492_v7, 16  ;;  %4078 = vst.msk [vmem:[#allocation3 + $0x148] sm:$0xf] %vm15295_vm4, %v8645_v18  ;;  %v15296_v58 = vcombine.low %v13484_v17, %v13486_v60  ;;  %vm15434_vm4 = vmmov %vm15100_vm0 }
 0x300   : > { %v13730_v22 = vcombine.low %v4382_v63, %v4391_v44  ;;  %v8646_v59 = vpack.c.bf16 %v3790_v51, %v3790_v51  ;;  %v4393_v4 = vshrl.u32 %v4116_v46, 16  ;;  %v15297_v6 = vshrl.u32 %v13314_v30, 16  ;;  %4076 = vst.msk [vmem:[#allocation3 + $0x134] sm:$0xf] %vm15298_vm1, %v8643_v36  ;;  %v6594_v44 = vpop.permute.xlu1 %6593  ;;  %vm15435_vm1 = vmmov %vm15100_vm0 }
 0x301   : > { %v4668_v57 = vrot.slane %v15294_v15, 5  ;;  %v6816_v35 = vsel %vm6657_vm6, %v15296_v58, %v6432_v34  ;;  %v8644_v20 = vpack.c.bf16 %v3788_v12, %v3788_v12  ;;  %v4676_v48 = vrot.slane %v4674_v41, 5 }
 0x302   : > { %v4400_v63 = vrot.slane %v15297_v6, 7  ;;  %7500 = vmatmul.mubr.bf16.gmra.mrb[60].mxu0 %v6816_v35  ;;  %4079 = vst.msk [vmem:[#allocation3 + $0x14c] sm:$0xf] %vm15299_vm13, %v8646_v59  ;;  %v13750_v17 = vrot.slane %v14868_v10, 4  ;;  %v8343_v60 = vrot.slane %v4393_v4, 11  ;;  %v15301_v23 = vshll.u32 %v13314_v30, 16  ;;  %vm15436_vm13 = vmmov %vm15100_vm0 }
 0x303   : > { %v4669_v61 = vsel %vm9580_vm12, %v4667_v11, %v4668_v57  ;;  %v4671_v21 = vor.u32 %v13450_v53, %v4668_v57  ;;  %v15302_v7 = vshrl.u32 %v13326_v54, 16  ;;  %4077 = vst.msk [vmem:[#allocation3 + $0x138] sm:$0xf] %vm15303_vm14, %v8644_v20  ;;  %v4680_v51 = vor.u32 %v13591_v55, %v13580_v25  ;;  %v15304_v30 = vld [vmem:[#allocation14_spill] sm:$0xff]  ;;  %v15306_v57 = vld [vmem:[#allocation76_spill] sm:$0xff]  ;;  %v6146_v20 = vpop.permute.xlu0 %6145  ;;  %vm15437_vm14 = vmmov %vm15100_vm0 }
 0x304   : > { %15300 = vst [vmem:[#allocation57_spill] sm:$0xff] %v13750_v17  ;;  %v4403_v56 = vor.u32 %v15301_v23, %v4400_v63  ;;  %v6756_v11 = vsel %vm6657_vm6, %v13382_v1, %v6274_v5  ;;  %v6884_v36 = vsel %vm6657_vm6, %v15304_v30, %v6594_v44  ;;  %v4405_v12 = vrot.slane %v4400_v63, 4  ;;  %v15310_v23 = vld [vmem:[#allocation77_spill] sm:$0xff] }
 0x305   : > { %v4409_v49 = vrot.slane %v15302_v7, 7  ;;  %v4672_v18 = vrot.slane %v4671_v21, 4  ;;  %v15305_v34 = vmov %v15294_v15  ;;  %7346 = vmatprep.mubr.bf16.mxu1 %v6756_v11  ;;  %7507 = vmatprep.mubr.bf16.mxu0 %v6884_v36  ;;  %v15307_v41 = vshrl.u32 %v15306_v57, 16  ;;  %v6434_v21 = vpop.permute.xlu1 %6433  ;;  %v15314_v11 = vld [vmem:[#allocation63_spill] sm:$0xff]  ;;  %v15315_v30 = vld [vmem:[#allocation65_spill] sm:$0xff] }
 0x306   : > { %v13773_v25 = vrot.slane %v4680_v51, 4  ;;  %v15308_v1 = vshll.u32 %v13540_v38, 16  ;;  %v4404_v54 = vsel %vm9518_vm9, %v8343_v60, %v4403_v56  ;;  %v4766_v63 = vld [vmem:[#allocation3 + $0x148] sm:$0xf]  ;;  %v15311_v7 = vshrl.u32 %v15310_v23, 16 }
 0x307   : > { %v4412_v15 = vor.u32 %v15305_v34, %v4409_v49  ;;  %v13769_v59 = vrot.slane %v15307_v41, 7  ;;  %v4677_v58 = vsel %vm9580_vm12, %v4672_v18, %v4676_v48  ;;  %v4763_v60 = vld [vmem:[#allocation3 + $0x134] sm:$0xf]  ;;  %v5104_v56 = vshrl.u32 %v4766_v63, 16  ;;  %v15313_v18 = vld [vmem:[#allocation46_spill] sm:$0xff] }
 0x308   : > { %v13777_v55 = vrot.slane %v15308_v1, 5  ;;  %v13780_v4 = vcombine.low %v4669_v61, %v4677_v58  ;;  %v5624_v49 = vrot.slane %v15311_v7, 7  ;;  %v5107_v44 = vshll.u32 %v4766_v63, 16  ;;  %v4493_v34 = vld [vmem:[#allocation3 + $0x114] sm:$0x1] }
 0x309   : > { %v4413_v6 = vsel %vm9518_vm9, %v4405_v12, %v4412_v15  ;;  %v6692_v51 = vsel %vm6657_vm6, %v15313_v18, %v6146_v20  ;;  %v15316_v36 = vcombine.low %v15314_v11, %v15315_v30  ;;  %v5082_v15 = vshrl.u32 %v4763_v60, 16  ;;  %v4767_v58 = vld [vmem:[#allocation3 + $0x14c] sm:$0xf] }
 0x30a   : > { %15309 = vst [vmem:[#allocation26_spill] sm:$0xff] %v13780_v4  ;;  %v13790_v5 = vcombine.low %v4404_v54, %v4413_v6  ;;  %v5085_v41 = vshll.u32 %v4763_v60, 16  ;;  %7347 = vmatmul.mubr.bf16.gmra.mrb[32].mxu1 %v6692_v51  ;;  %v15317_v1 = vshrl.u32 %v13507_v33, 16  ;;  %v15318_v6 = vshll.u32 %v15306_v57, 16  ;;  %v4764_v20 = vld [vmem:[#allocation3 + $0x138] sm:$0xf] }
 0x30b   : > { %v6820_v12 = vsel %vm6657_vm6, %v15316_v36, %v6434_v21  ;;  %v5113_v7 = vshrl.u32 %v4767_v58, 16  ;;  %v5116_v18 = vshll.u32 %v4767_v58, 16  ;;  %v5346_v11 = vrot.slane %v5104_v56, 4 }
 0x30c   : > { %15312 = vst [vmem:[#allocation42_spill] sm:$0xff] %v13790_v5  ;;  %7508 = vmatmul.mubr.bf16.gmra.mrb[64].mxu0 %v6820_v12  ;;  %v13804_v54 = vrot.slane %v15317_v1, 11  ;;  %v13809_v63 = vor.u32 %v15318_v6, %v13769_v59  ;;  %v5347_v21 = vrot.slane %v5107_v44, 5  ;;  %v5084_v30 = vrot.slane %v5082_v15, 7  ;;  %v6276_v5 = vpop.permute.xlu0 %6275 }
 0x30d   : > { %v5091_v36 = vshrl.u32 %v4764_v20, 16  ;;  %v5094_v60 = vshll.u32 %v4764_v20, 16  ;;  %v5332_v35 = vrot.slane %v5082_v15, 4  ;;  %v5333_v51 = vrot.slane %v5085_v41, 5 }
 0x30e   : > { %v5350_v12 = vrot.slane %v5116_v18, 5  ;;  %v5352_v53 = vrot.slane %v5113_v7, 4  ;;  %v15319_v33 = vshll.u32 %v15310_v23, 16  ;;  %v5087_v46 = vor.u32 %v5085_v41, %v5084_v30 }
 0x30f   : > { %v5093_v48 = vrot.slane %v5091_v36, 7  ;;  %v5336_v10 = vrot.slane %v5094_v60, 5  ;;  %v4688_v6 = vshll.u32 %v4493_v34, 16  ;;  %v5334_v37 = vor.u32 %v5333_v51, %v5332_v35  ;;  %v13846_v51 = vld [vmem:[#allocation3 + $0x134] sm:$0xf] }
 0x310   : > { %v5627_v1 = vor.u32 %v15319_v33, %v5624_v49  ;;  %v5338_v61 = vrot.slane %v5091_v36, 4  ;;  %v5348_v57 = vor.u32 %v5347_v21, %v5346_v11  ;;  %v5353_v58 = vor.u32 %v5352_v53, %v5350_v12  ;;  %v15320_v33 = vld [vmem:[#allocation51_spill] sm:$0xff] }
 0x311   : > { %v5089_v4 = vrot.slane %v5084_v30, 4  ;;  %v5096_v17 = vor.u32 %v5094_v60, %v5093_v48  ;;  %v5106_v31 = vrot.slane %v5104_v56, 7  ;;  %v5115_v20 = vrot.slane %v5113_v7, 7  ;;  %v13823_v56 = vld [vmem:[#allocation3 + $0x134] sm:$0xf] }
 0x312   : > { %v5335_v15 = vrot.slane %v5334_v37, 4  ;;  %v5339_v2 = vor.u32 %v5338_v61, %v5336_v10  ;;  %v5619_v49 = vsel %vm9518_vm9, %v13804_v54, %v13809_v63  ;;  %v5620_v41 = vrot.slane %v13769_v59, 4 }
 0x313   : > { %v5088_v35 = vsel %vm9518_vm9, %v15320_v33, %v5087_v46  ;;  %v5097_v53 = vsel %vm9518_vm9, %v5089_v4, %v5096_v17  ;;  %v5354_v34 = vrot.slane %v5353_v58, 4  ;;  %v5118_v48 = vor.u32 %v5116_v18, %v5115_v20  ;;  %v4119_v46 = vld [vmem:[#allocation3 + $0x108] sm:$0x8]  ;;  %v15321_v4 = vld [vmem:[#allocation52_spill] sm:$0xff]  ;;  %v13835_v18 = vld [vmem:[#allocation3 + $0x138] sm:$0xf] }
 0x314   : > { %v8441_v37 = vcombine.low %v5088_v35, %v5097_v53  ;;  %v5340_v61 = vrot.slane %v5339_v2, 4  ;;  %v5628_v7 = vsel %vm9518_vm9, %v5620_v41, %v5627_v1  ;;  %v4685_v54 = vor.u32 %v13612_v45, %v13777_v55 }
 0x315   : > { %v5349_v59 = vrot.slane %v5348_v57, 4  ;;  %v5109_v63 = vor.u32 %v5107_v44, %v5106_v31  ;;  %v5111_v11 = vrot.slane %v5106_v31, 4  ;;  %v4690_v21 = vrot.slane %v4688_v6, 5  ;;  %v6148_v57 = vpop.permute.xlu0 %6147  ;;  %v15322_v31 = vld [vmem:[#allocation21_spill] sm:$0xff] }
 0x316   : > { %6285 = vrot.lane.b32.xlu0 %v8441_v37, %s9293_s17  ;;  %v5337_v17 = vsel %vm9580_vm12, %v5335_v15, %v5336_v10  ;;  %v5345_v2 = vsel %vm9580_vm12, %v5340_v61, %v15321_v4  ;;  %v4464_v30 = vshrl.u32 %v13823_v56, 16  ;;  %v4467_v45 = vshll.u32 %v13823_v56, 16 }
 0x317   : > { %v8473_v44 = vcombine.low %v5337_v17, %v5345_v2  ;;  %v5359_v36 = vsel %vm9580_vm12, %v5354_v34, %v15322_v31  ;;  %v5119_v60 = vsel %vm9518_vm9, %v5111_v11, %v5118_v48  ;;  %v6760_v10 = vsel %vm6657_vm6, %v13634_v42, %v6276_v5 }
 0x318   : > { %7354 = vmatprep.mubr.bf16.mxu1 %v6760_v10  ;;  %v4686_v1 = vrot.slane %v4685_v54, 4  ;;  %v4415_v6 = vshrl.u32 %v4119_v46, 16  ;;  %v15323_v58 = vshrl.u32 %v13515_v0, 16  ;;  %v15324_v15 = vshrl.u32 %v13540_v38, 16 }
 0x319   : > { %6445 = vrot.lane.b32.xlu1 %v8473_v44, %s9293_s17  ;;  %v5351_v33 = vsel %vm9580_vm12, %v5349_v59, %v5350_v12  ;;  %v5110_v42 = vsel %vm9518_vm9, %v13499_v8, %v5109_v63  ;;  %v4473_v5 = vshrl.u32 %v13835_v18, 16  ;;  %v6696_v35 = vsel %vm6657_vm6, %v13614_v32, %v6148_v57  ;;  %v4494_v59 = vld [vmem:[#allocation3 + $0x128] sm:$0x1] }
 0x31a   : > { %v4422_v20 = vrot.slane %v15323_v58, 7  ;;  %v4431_v41 = vrot.slane %v15324_v15, 7  ;;  %v15325_v53 = vcombine.low %v13565_v28, %v13597_v26  ;;  %v8474_v34 = vcombine.low %v5351_v33, %v5359_v36  ;;  %7355 = vmatmul.mubr.bf16.gmra.mrb[36].mxu1 %v6696_v35 }
 0x31b   : > { %v8442_v48 = vcombine.low %v5110_v42, %v5119_v60  ;;  %v4706_v37 = vrot.slane %v4464_v30, 4  ;;  %v8484_v12 = vcombine.low %v5619_v49, %v5628_v7  ;;  %v4707_v8 = vrot.slane %v4467_v45, 5  ;;  %v4122_v7 = vld [vmem:[#allocation3 + $0x11c] sm:$0x8]  ;;  %v6596_v42 = vpop.permute.xlu1 %6595 }
 0x31c   : > { %6157 = vrot.lane.b32.xlu0 %v15325_v53, %s9293_s17  ;;  %v8410_v61 = vcombine.low %v13823_v56, %v13835_v18  ;;  %v4476_v32 = vshll.u32 %v13835_v18, 16  ;;  %v5701_v54 = vshrl.u32 %v13846_v51, 16  ;;  %v5704_v63 = vshll.u32 %v13846_v51, 16 }
 0x31d   : > { %v4691_v11 = vsel %vm9580_vm12, %v4686_v1, %v4690_v21  ;;  %v8344_v46 = vrot.slane %v4415_v6, 11  ;;  %v15326_v17 = vshll.u32 %v13515_v0, 16  ;;  %6447 = vrot.lane.b32.xlu1 %v8474_v34, %s9293_s17  ;;  %v4712_v4 = vrot.slane %v4473_v5, 4 }
 0x31e   : > { %v15327_v2 = vsel %vm9580_vm12, %v13773_v25, %v13777_v55  ;;  %v4427_v44 = vrot.slane %v4422_v20, 4  ;;  %v15328_v21 = vshll.u32 %v13540_v38, 16  ;;  %v4694_v36 = vor.u32 %v13640_v14, %v13627_v19  ;;  %v4495_v14 = vld [vmem:[#allocation3 + $0x13c] sm:$0x1] }
 0x31f   : > { %v4425_v49 = vor.u32 %v15326_v17, %v4422_v20  ;;  %v13886_v57 = vcombine.low %v15327_v2, %v4691_v11  ;;  %v15329_v60 = vshll.u32 %v13597_v26, 16  ;;  %v4702_v1 = vshll.u32 %v4494_v59, 16 }
 0x320   : > { %v4434_v31 = vor.u32 %v15328_v21, %v4431_v41  ;;  %6287 = vrot.lane.b32.xlu0 %v8442_v48, %s9293_s17  ;;  %v4437_v55 = vshrl.u32 %v4122_v7, 16  ;;  %v15330_v6 = vshrl.u32 %v13565_v28, 16  ;;  %v15331_v58 = vshrl.u32 %v13597_v26, 16 }
 0x321   : > { %v4426_v0 = vsel %vm9518_vm9, %v8344_v46, %v4425_v49  ;;  %v4696_v10 = vrot.slane %v15329_v60, 5  ;;  %v4695_v41 = vrot.slane %v4694_v36, 4  ;;  %v4704_v19 = vrot.slane %v4702_v1, 5  ;;  %v4125_v46 = vld [vmem:[#allocation3 + $0x130] sm:$0x8] }
 0x322   : > { %v4435_v25 = vsel %vm9518_vm9, %v4427_v44, %v4434_v31  ;;  %v4444_v38 = vrot.slane %v15330_v6, 7  ;;  %v4453_v20 = vrot.slane %v15331_v58, 7  ;;  %v8345_v35 = vrot.slane %v4437_v55, 11  ;;  %v5391_v1 = vld [vmem:[#allocation3 + $0xf4] sm:$0x8]  ;;  %v15335_v55 = vld [vmem:[#allocation13_spill] sm:$0xff] }
 0x323   : > { %v13903_v15 = vcombine.low %v4426_v0, %v4435_v25  ;;  %v4699_v33 = vor.u32 %v13650_v3, %v4696_v10  ;;  %v15332_v53 = vshll.u32 %v13565_v28, 16  ;;  %v15333_v59 = vmov %v15329_v60  ;;  %v6436_v0 = vpop.permute.xlu1 %6435  ;;  %v15334_v25 = vld [vmem:[#allocation50_spill] sm:$0xff] }
 0x324   : > { %v4449_v48 = vrot.slane %v4444_v38, 4  ;;  %v4456_v11 = vor.u32 %v15333_v59, %v4453_v20  ;;  %6159 = vrot.lane.b32.xlu0 %v8410_v61, %s9293_s17  ;;  %v6888_v17 = vsel %vm6657_vm6, %v8484_v12, %v6596_v42  ;;  %v4697_v49 = vsel %vm9580_vm12, %v4695_v41, %v4696_v10  ;;  %v5763_v10 = vld [vmem:[#allocation3 + $0x60] sm:$0x1] }
 0x325   : > { %v4447_v34 = vor.u32 %v15332_v53, %v4444_v38  ;;  %v4700_v3 = vrot.slane %v4699_v33, 4  ;;  %v4708_v7 = vor.u32 %v4707_v8, %v4706_v37  ;;  %7515 = vmatprep.mubr.bf16.mxu0 %v6888_v17  ;;  %v4710_v26 = vrot.slane %v4476_v32, 5  ;;  %v15339_v42 = vld [vmem:[#allocation38_spill] sm:$0xff]  ;;  %v13944_v53 = vld [vmem:[#allocation3 + $0x138] sm:$0xf] }
 0x326   : > { %v4457_v28 = vsel %vm9518_vm9, %v4449_v48, %v4456_v11  ;;  %v4716_v44 = vshll.u32 %v4495_v14, 16  ;;  %v4459_v31 = vshrl.u32 %v4125_v46, 16  ;;  %v4466_v60 = vrot.slane %v4464_v30, 7  ;;  %v15338_v14 = vld [vmem:[#allocation37_spill] sm:$0xff] }
 0x327   : > { %v4448_v2 = vsel %vm9518_vm9, %v8345_v35, %v4447_v34  ;;  %v4705_v61 = vsel %vm9580_vm12, %v4700_v3, %v4704_v19  ;;  %v4709_v21 = vrot.slane %v4708_v7, 4  ;;  %v4713_v8 = vor.u32 %v4712_v4, %v4710_v26 }
 0x328   : > { %v13922_v12 = vcombine.low %v4448_v2, %v4457_v28  ;;  %v13924_v37 = vcombine.low %v4697_v49, %v4705_v61  ;;  %v4718_v36 = vrot.slane %v4716_v44, 5  ;;  %v15336_v6 = vcombine.low %v15334_v25, %v15335_v55  ;;  %v15344_v2 = vld [vmem:[#allocation39_spill] sm:$0xff] }
 0x329   : > { %v15337_v38 = vcombine.low %v13569_v13, %v13571_v29  ;;  %v4711_v20 = vsel %vm9580_vm12, %v4709_v21, %v4710_v26  ;;  %v8346_v4 = vrot.slane %v4459_v31, 11  ;;  %v4475_v41 = vrot.slane %v4473_v5, 7  ;;  %v15340_v29 = vld [vmem:[#allocation36_spill] sm:$0xff]  ;;  %v6278_v5 = vpop.permute.xlu0 %6277  ;;  %v5394_v26 = vld [vmem:[#allocation3 + $0x108] sm:$0x8] }
 0x32a   : > { %6597 = vrot.lane.b32.xlu0 %v15336_v6, %s9293_s17  ;;  %v4714_v30 = vrot.slane %v4713_v8, 4  ;;  %v4469_v33 = vor.u32 %v4467_v45, %v4466_v60  ;;  %v4471_v19 = vrot.slane %v4466_v60, 4  ;;  %v5807_v35 = vor.u32 %v15339_v42, %v15338_v14 }
 0x32b   : > { %v6824_v58 = vsel %vm6657_vm6, %v15337_v38, %v6436_v0  ;;  %v4478_v13 = vor.u32 %v4476_v32, %v4475_v41  ;;  %v15341_v34 = vshll.u32 %v15340_v29, 16  ;;  %v5815_v59 = vshll.u32 %v5763_v10, 16 }
 0x32c   : > { %7516 = vmatmul.mubr.bf16.gmra.mrb[68].mxu0 %v6824_v58  ;;  %v5630_v11 = vshrl.u32 %v5391_v1, 16  ;;  %v4719_v46 = vsel %vm9580_vm12, %v4714_v30, %v4718_v36  ;;  %v4470_v56 = vsel %vm9518_vm9, %v8346_v4, %v4469_v33  ;;  %v5808_v45 = vrot.slane %v5807_v35, 4  ;;  %v5764_v35 = vld [vmem:[#allocation3 + $0x74] sm:$0x1] }
 0x32d   : > { %v5809_v48 = vrot.slane %v15341_v34, 5  ;;  %v15342_v17 = vshrl.u32 %v15334_v25, 16  ;;  %v15343_v18 = vcombine.low %v13617_v52, %v13654_v27  ;;  %v6764_v32 = vsel %vm6657_vm6, %v13679_v43, %v6278_v5  ;;  %v6150_v1 = vpop.permute.xlu0 %6149 }
 0x32e   : > { %v13962_v3 = vcombine.low %v4711_v20, %v4719_v46  ;;  %v4479_v7 = vsel %vm9518_vm9, %v4471_v19, %v4478_v13  ;;  %v5710_v44 = vshrl.u32 %v13944_v53, 16  ;;  %7362 = vmatprep.mubr.bf16.mxu1 %v6764_v32  ;;  %v5817_v21 = vrot.slane %v5815_v59, 5 }
 0x32f   : > { %v5637_v49 = vrot.slane %v15342_v17, 7  ;;  %6599 = vrot.lane.b32.xlu0 %v15343_v18, %s9293_s17  ;;  %v5812_v28 = vor.u32 %v15344_v2, %v5809_v48  ;;  %v13968_v61 = vcombine.low %v4470_v56, %v4479_v7  ;;  %v8373_v31 = vrot.slane %v5630_v11, 11  ;;  %v5765_v11 = vld [vmem:[#allocation3 + $0x88] sm:$0x1] }
 0x330   : > { %v8504_v0 = vcombine.low %v13846_v51, %v13944_v53  ;;  %v15345_v43 = vshll.u32 %v15334_v25, 16  ;;  %v15346_v60 = vshrl.u32 %v15335_v55, 16  ;;  %v5810_v6 = vsel %vm9580_vm12, %v5808_v45, %v5809_v48  ;;  %v15353_v17 = vld [vmem:[#allocation15_spill] sm:$0xff] }
 0x331   : > { %v5813_v8 = vrot.slane %v5812_v28, 4  ;;  %v5652_v38 = vshrl.u32 %v5394_v26, 16  ;;  %v15347_v58 = vshrl.u32 %v13617_v52, 16  ;;  %v15348_v4 = vshrl.u32 %v13654_v27, 16  ;;  %v6280_v32 = vpop.permute.xlu0 %6279  ;;  %v15355_v28 = vld [vmem:[#allocation17_spill] sm:$0xff]  ;;  %v15356_v26 = vld [vmem:[#allocation48_spill] sm:$0xff] }
 0x332   : > { %v5640_v36 = vor.u32 %v15345_v43, %v5637_v49  ;;  %v5646_v10 = vrot.slane %v15346_v60, 7  ;;  %v15349_v30 = vcombine.low %v13667_v50, %v13739_v62  ;;  %v6700_v25 = vsel %vm6657_vm6, %v13695_v16, %v6150_v1  ;;  %v13998_v16 = vld [vmem:[#allocation3 + $0x14c] sm:$0xf]  ;;  %v15357_v60 = vld [vmem:[#allocation24_spill] sm:$0xff] }
 0x333   : > { %v5659_v20 = vrot.slane %v15347_v58, 7  ;;  %v5668_v41 = vrot.slane %v15348_v4, 7  ;;  %v5818_v33 = vsel %vm9580_vm12, %v5813_v8, %v5817_v21  ;;  %v5642_v19 = vrot.slane %v5637_v49, 4  ;;  %7363 = vmatmul.mubr.bf16.gmra.mrb[40].mxu1 %v6700_v25  ;;  %v15354_v49 = vld [vmem:[#allocation11_spill] sm:$0xff]  ;;  %v15359_v4 = vld [vmem:[#allocation49_spill] sm:$0xff] }
 0x334   : > { %6601 = vrot.lane.b32.xlu0 %v15349_v30, %s9293_s17  ;;  %v15350_v14 = vshll.u32 %v15335_v55, 16  ;;  %v13992_v13 = vcombine.low %v5810_v6, %v5818_v33  ;;  %v5641_v29 = vsel %vm9518_vm9, %v8373_v31, %v5640_v36  ;;  %v8374_v34 = vrot.slane %v5652_v38, 11  ;;  %v5397_v31 = vld [vmem:[#allocation3 + $0x11c] sm:$0x8]  ;;  %v14015_v8 = vld [vmem:[#allocation3 + $0x148] sm:$0xf] }
 0x335   : > { %v15351_v48 = vshll.u32 %v13617_v52, 16  ;;  %v5664_v46 = vrot.slane %v5659_v20, 4  ;;  %v15352_v56 = vshll.u32 %v13654_v27, 16  ;;  %v5824_v18 = vsel %vm9580_vm12, %v15354_v49, %v15353_v17 }
 0x336   : > { %v5649_v42 = vor.u32 %v15350_v14, %v5646_v10  ;;  %v5829_v2 = vshll.u32 %v5764_v35, 16  ;;  %v5835_v21 = vor.u32 %v15356_v26, %v15355_v28  ;;  %v6768_v43 = vsel %vm6657_vm6, %v13726_v24, %v6280_v32  ;;  %v6152_v14 = vpop.permute.xlu0 %6151  ;;  %v15366_v28 = vld [vmem:[#allocation23_spill] sm:$0xff] }
 0x337   : > { %v5662_v59 = vor.u32 %v15351_v48, %v5659_v20  ;;  %v5671_v45 = vor.u32 %v15352_v56, %v5668_v41  ;;  %v15358_v10 = vshll.u32 %v15357_v60, 16  ;;  %v5843_v6 = vshll.u32 %v5765_v11, 16  ;;  %7370 = vmatprep.mubr.bf16.mxu1 %v6768_v43  ;;  %v15369_v60 = vld [vmem:[#allocation60_spill] sm:$0xff] }
 0x338   : > { %v5650_v5 = vsel %vm9518_vm9, %v5642_v19, %v5649_v42  ;;  %6603 = vrot.lane.b32.xlu0 %v8504_v0, %s9293_s17  ;;  %v8505_v38 = vcombine.low %v14015_v8, %v13998_v16  ;;  %v5831_v20 = vrot.slane %v5829_v2, 5  ;;  %v5836_v0 = vrot.slane %v5835_v21, 4  ;;  %v15361_v42 = vld [vmem:[#allocation9_spill] sm:$0xff]  ;;  %v15365_v2 = vld [vmem:[#allocation56_spill] sm:$0xff] }
 0x339   : > { %v14008_v7 = vcombine.low %v5641_v29, %v5650_v5  ;;  %v5663_v52 = vsel %vm9518_vm9, %v8374_v34, %v5662_v59  ;;  %v5672_v36 = vsel %vm9518_vm9, %v5664_v46, %v5671_v45  ;;  %v5837_v1 = vrot.slane %v15358_v10, 5  ;;  %v5766_v59 = vld [vmem:[#allocation3 + $0x9c] sm:$0x1] }
 0x33a   : > { %v14025_v58 = vcombine.low %v5663_v52, %v5672_v36  ;;  %v5845_v30 = vrot.slane %v5843_v6, 5  ;;  %v5674_v25 = vshrl.u32 %v5397_v31, 16  ;;  %v15360_v24 = vshrl.u32 %v13667_v50, 16  ;;  %v15367_v31 = vld [vmem:[#allocation54_spill] sm:$0xff]  ;;  %v5767_v36 = vld [vmem:[#allocation3 + $0xb0] sm:$0x1] }
 0x33b   : > { %v5840_v41 = vor.u32 %v15359_v4, %v5837_v1  ;;  %v14872_v19 = vshll.u32 %v13944_v53, 16  ;;  %v5832_v35 = vsel %vm9580_vm12, %v15361_v42, %v5831_v20  ;;  %v5838_v29 = vsel %vm9580_vm12, %v5836_v0, %v5837_v1  ;;  %v15370_v10 = vld [vmem:[#allocation61_spill] sm:$0xff]  ;;  %v5400_v4 = vld [vmem:[#allocation3 + $0x130] sm:$0x8] }
 0x33c   : > { %v5681_v33 = vrot.slane %v15360_v24, 7  ;;  %v15362_v34 = vshrl.u32 %v13739_v62, 16  ;;  %6605 = vrot.lane.b32.xlu0 %v8505_v38, %s9293_s17  ;;  %v6704_v11 = vsel %vm6657_vm6, %v13730_v22, %v6152_v14  ;;  %v14041_v5 = vcombine.low %v5824_v18, %v5832_v35 }
 0x33d   : > { %v5841_v46 = vrot.slane %v5840_v41, 4  ;;  %v8375_v56 = vrot.slane %v5674_v25, 11  ;;  %7371 = vmatmul.mubr.bf16.gmra.mrb[44].mxu1 %v6704_v11  ;;  %v15363_v45 = vshll.u32 %v13667_v50, 16  ;;  %v15364_v32 = vshll.u32 %v13739_v62, 16  ;;  %v15372_v25 = vld [vmem:[#allocation58_spill] sm:$0xff] }
 0x33e   : > { %v5690_v48 = vrot.slane %v15362_v34, 7  ;;  %v5686_v49 = vrot.slane %v5681_v33, 4  ;;  %v5849_v26 = vor.u32 %v15366_v28, %v15365_v2  ;;  %v15368_v22 = vshll.u32 %v15367_v31, 16  ;;  %v5768_v2 = vld [vmem:[#allocation3 + $0xc4] sm:$0x1]  ;;  %v15376_v28 = vld [vmem:[#allocation40_spill] sm:$0xff] }
 0x33f   : > { %v5684_v17 = vor.u32 %v15363_v45, %v5681_v33  ;;  %v5846_v21 = vsel %vm9580_vm12, %v5841_v46, %v5845_v30  ;;  %v5857_v43 = vshll.u32 %v5766_v59, 16  ;;  %v5863_v1 = vor.u32 %v15370_v10, %v15369_v60  ;;  %v5769_v60 = vld [vmem:[#allocation3 + $0xd8] sm:$0x1] }
 0x340   : > { %v5693_v52 = vor.u32 %v15364_v32, %v5690_v48  ;;  %v5851_v18 = vrot.slane %v15368_v22, 5  ;;  %v14055_v6 = vcombine.low %v5838_v29, %v5846_v21  ;;  %v5850_v0 = vrot.slane %v5849_v26, 4  ;;  %v15373_v29 = vld [vmem:[#allocation25_spill] sm:$0xff] }
 0x341   : > { %v5685_v38 = vsel %vm9518_vm9, %v8375_v56, %v5684_v17  ;;  %v15371_v41 = vcombine.low %v13556_v47, %v13558_v39  ;;  %v5859_v33 = vrot.slane %v5857_v43, 5  ;;  %v5864_v14 = vrot.slane %v5863_v1, 4  ;;  %v15377_v26 = vld [vmem:[#allocation41_spill] sm:$0xff] }
 0x342   : > { %v5694_v20 = vsel %vm9518_vm9, %v5686_v49, %v5693_v52  ;;  %v5854_v24 = vor.u32 %v15372_v25, %v5851_v18  ;;  %v5723_v42 = vshrl.u32 %v14015_v8, 16  ;;  %v14871_v35 = vshrl.u32 %v13998_v16, 16  ;;  %v15375_v49 = vld [vmem:[#allocation62_spill] sm:$0xff] }
 0x343   : > { %6607 = vrot.lane.b32.xlu0 %v15371_v41, %s9293_s17  ;;  %v14065_v30 = vcombine.low %v5685_v38, %v5694_v20  ;;  %v15374_v34 = vshll.u32 %v15373_v29, 16  ;;  %v5871_v59 = vshll.u32 %v5767_v36, 16  ;;  %v5696_v46 = vshrl.u32 %v5400_v4, 16  ;;  %v8715_v29 = vpop.f32.mrb[0].mxu1 }
 0x344   : > { %v5855_v11 = vrot.slane %v5854_v24, 4  ;;  %v5703_v56 = vrot.slane %v5701_v54, 7  ;;  %v5712_v45 = vrot.slane %v5710_v44, 7  ;;  %v5852_v17 = vsel %vm9580_vm12, %v5850_v0, %v5851_v18  ;;  %v15378_v0 = vld [vmem:[#allocation64_spill] sm:$0xff] }
 0x345   : > { %v5865_v48 = vrot.slane %v15374_v34, 5  ;;  %v5873_v52 = vrot.slane %v5871_v59, 5  ;;  %v5877_v21 = vor.u32 %v15377_v26, %v15376_v28  ;;  %v8376_v43 = vrot.slane %v5696_v46, 11  ;;  %v15380_v24 = vld [vmem:[#allocation68_spill] sm:$0xff]  ;;  %v15382_v59 = vld [vmem:[#allocation66_spill] sm:$0xff]  ;;  %v15384_v28 = vld [vmem:[#allocation47_spill] sm:$0xff] }
 0x346   : > { %v5860_v31 = vsel %vm9580_vm12, %v5855_v11, %v5859_v33  ;;  %v5706_v36 = vor.u32 %v5704_v63, %v5703_v56  ;;  %v5708_v1 = vrot.slane %v5703_v56, 4  ;;  %v5715_v38 = vor.u32 %v14872_v19, %v5712_v45  ;;  %v15381_v33 = vld [vmem:[#allocation72_spill] sm:$0xff]  ;;  %v5403_v45 = vld [vmem:[#allocation3 + $0x144] sm:$0x8] }
 0x347   : > { %v5868_v32 = vor.u32 %v15375_v49, %v5865_v48  ;;  %v5866_v22 = vsel %vm9580_vm12, %v5864_v14, %v5865_v48  ;;  %v14087_v10 = vcombine.low %v5852_v17, %v5860_v31  ;;  %v15379_v4 = vshll.u32 %v15378_v0, 16  ;;  %v8716_v17 = vpop.f32.mrb[1].mxu1 }
 0x348   : > { %v5707_v20 = vsel %vm9518_vm9, %v8376_v43, %v5706_v36  ;;  %v5885_v25 = vshll.u32 %v5768_v2, 16  ;;  %v5891_v14 = vor.u32 %v15381_v33, %v15380_v24  ;;  %v5716_v48 = vsel %vm9518_vm9, %v5708_v1, %v5715_v38  ;;  %v8718_v43 = vpop.f32.mrb[2].mxu1 }
 0x349   : > { %v5869_v18 = vrot.slane %v5868_v32, 4  ;;  %v5879_v41 = vrot.slane %v15379_v4, 5  ;;  %v15383_v11 = vshll.u32 %v15382_v59, 16  ;;  %v5899_v56 = vshll.u32 %v5769_v60, 16  ;;  %v8719_v0 = vpop.f32.mrb[3].mxu1 }
 0x34a   : > { %v14105_v32 = vcombine.low %v5707_v20, %v5716_v48  ;;  %v5878_v2 = vrot.slane %v5877_v21, 4  ;;  %v14108_v31 = vadd.f32 %v8716_v17, %v8715_v29  ;;  %v5892_v36 = vrot.slane %v5891_v14, 4 }
 0x34b   : > { %v5874_v34 = vsel %vm9580_vm12, %v5869_v18, %v5873_v52  ;;  %v5893_v46 = vrot.slane %v15383_v11, 5  ;;  %v5882_v26 = vor.u32 %v15384_v28, %v5879_v41  ;;  %v5887_v52 = vrot.slane %v5885_v25, 5  ;;  %v15385_v18 = vld [vmem:[#allocation73_spill] sm:$0xff] }
 0x34c   : > { %v14103_v49 = vcombine.low %v5866_v22, %v5874_v34  ;;  %v5726_v38 = vshll.u32 %v14015_v8, 16  ;;  %v5901_v4 = vrot.slane %v5899_v56, 5  ;;  %v5718_v24 = vshrl.u32 %v5403_v45, 16  ;;  %v5771_v45 = vld [vmem:[#allocation3 + $0x100] sm:$0x1] }
 0x34d   : > { %v5896_v1 = vor.u32 %v15385_v18, %v5893_v46  ;;  %v5883_v60 = vrot.slane %v5882_v26, 4  ;;  %v14870_v22 = vshll.u32 %v13998_v16, 16  ;;  %v14113_v20 = vadd.f32 %v8719_v0, %v8718_v43  ;;  %v15389_v18 = vld [vmem:[#allocation19_spill] sm:$0xff] }
 0x34e   : > { %v5725_v33 = vrot.slane %v5723_v42, 7  ;;  %v5880_v25 = vsel %vm9580_vm12, %v5878_v2, %v5879_v41  ;;  %v8377_v29 = vrot.slane %v5718_v24, 11  ;;  %v5734_v34 = vrot.slane %v14871_v35, 7  ;;  %v3862_v35 = vld [vmem:[#allocation3 + $0x158] sm:$0x8] }
 0x34f   : > { %v5897_v21 = vrot.slane %v5896_v1, 4  ;;  %v5888_v14 = vsel %vm9580_vm12, %v5883_v60, %v5887_v52  ;;  %v5894_v59 = vsel %vm9580_vm12, %v5892_v36, %v5893_v46  ;;  %v15386_v41 = vshrl.u32 %v13667_v50, 16  ;;  %v15390_v1 = vld [vmem:[#allocation16_spill] sm:$0xff] }
 0x350   : > { %v14123_v48 = vcombine.low %v5880_v25, %v5888_v14  ;;  %v5728_v56 = vor.u32 %v5726_v38, %v5725_v33  ;;  %v5730_v28 = vrot.slane %v5725_v33, 4  ;;  %v5737_v26 = vor.u32 %v14870_v22, %v5734_v34 }
 0x351   : > { %v5902_v11 = vsel %vm9580_vm12, %v5897_v21, %v5901_v4  ;;  %v5945_v17 = vrot.slane %v15386_v41, 4  ;;  %v15387_v43 = vshll.u32 %v13667_v50, 16  ;;  %v15388_v46 = vshrl.u32 %v13739_v62, 16  ;;  %v5772_v50 = vld [vmem:[#allocation3 + $0x114] sm:$0x1] }
 0x352   : > { %v14133_v2 = vcombine.low %v5894_v59, %v5902_v11  ;;  %v5919_v0 = vor.u32 %v15390_v1, %v15389_v18  ;;  %v15391_v60 = vshll.u32 %v15335_v55, 16  ;;  %v5745_v24 = vshrl.u32 %v13556_v47, 16  ;;  %v15392_v11 = vld [vmem:[#allocation18_spill] sm:$0xff]  ;;  %v15393_v18 = vld [vmem:[#allocation27_spill] sm:$0xff] }
 0x353   : > { %v5946_v52 = vrot.slane %v15387_v43, 5  ;;  %v5951_v36 = vrot.slane %v15388_v46, 4  ;;  %v5729_v21 = vsel %vm9518_vm9, %v8377_v29, %v5728_v56  ;;  %v5738_v33 = vsel %vm9518_vm9, %v5730_v28, %v5737_v26  ;;  %v15394_v29 = vld [vmem:[#allocation30_spill] sm:$0xff] }
 0x354   : > { %v5921_v4 = vrot.slane %v15391_v60, 5  ;;  %v5927_v25 = vshll.u32 %v5771_v45, 16  ;;  %v14873_v14 = vshrl.u32 %v13558_v39, 16  ;;  %v14151_v34 = vcombine.low %v5729_v21, %v5738_v33  ;;  %v8721_v33 = vpop.f32.mrb[4].mxu1 }
 0x355   : > { %v5920_v59 = vrot.slane %v5919_v0, 4  ;;  %v5959_v55 = vrot.slane %v5701_v54, 4  ;;  %v5757_v43 = vshll.u32 %v13558_v39, 16  ;;  %v5933_v56 = vor.u32 %v15394_v29, %v15393_v18  ;;  %v5773_v0 = vld [vmem:[#allocation3 + $0x128] sm:$0x1] }
 0x356   : > { %v5924_v41 = vor.u32 %v15392_v11, %v5921_v4  ;;  %v5929_v46 = vrot.slane %v5927_v25, 5  ;;  %v15395_v26 = vshll.u32 %v13654_v27, 16  ;;  %v5941_v60 = vshll.u32 %v5772_v50, 16 }
 0x357   : > { %v5922_v45 = vsel %vm9580_vm12, %v5920_v59, %v5921_v4  ;;  %v5960_v21 = vrot.slane %v5704_v63, 5  ;;  %v5934_v54 = vrot.slane %v5933_v56, 4  ;;  %v5947_v11 = vor.u32 %v5946_v52, %v5945_v17  ;;  %v8722_v4 = vpop.f32.mrb[5].mxu1  ;;  %v15397_v59 = vld [vmem:[#allocation57_spill] sm:$0xff] }
 0x358   : > { %v5925_v28 = vrot.slane %v5924_v41, 4  ;;  %v5935_v1 = vrot.slane %v15395_v26, 5  ;;  %v15396_v25 = vshll.u32 %v13739_v62, 16  ;;  %v5965_v18 = vrot.slane %v5710_v44, 4  ;;  %v8724_v51 = vpop.f32.mrb[6].mxu1 }
 0x359   : > { %v5943_v41 = vrot.slane %v5941_v60, 5  ;;  %v14172_v29 = vadd.f32 %v8722_v4, %v8721_v33  ;;  %v5948_v17 = vrot.slane %v5947_v11, 4  ;;  %v8725_v52 = vpop.f32.mrb[7].mxu1  ;;  %v5955_v44 = vshll.u32 %v5773_v0, 16  ;;  %v9207_v11 = vld [vmem:[#allocation3 + $0x15c] sm:$0xf] }
 0x35a   : > { %v5949_v22 = vrot.slane %v15396_v25, 5  ;;  %v5930_v27 = vsel %vm9580_vm12, %v5925_v28, %v5929_v46  ;;  %v5938_v50 = vor.u32 %v15397_v59, %v5935_v1  ;;  %v5936_v62 = vsel %vm9580_vm12, %v5934_v54, %v5935_v1  ;;  %v6282_v59 = vpop.permute.xlu0 %6281 }
 0x35b   : > { %v14174_v63 = vcombine.low %v5922_v45, %v5930_v27  ;;  %v3863_v19 = vsel %vm11449_vm5, 0, %v3862_v35  ;;  %v14180_v46 = vadd.f32 %v8725_v52, %v8724_v51  ;;  %v5747_v45 = vrot.slane %v5745_v24, 7  ;;  %vm15425_vm5 = vmmov %vm15100_vm0 }
 0x35c   : > { %v5939_v56 = vrot.slane %v5938_v50, 4  ;;  %v5952_v26 = vor.u32 %v5951_v36, %v5949_v22  ;;  %v5950_v28 = vsel %vm9580_vm12, %v5948_v17, %v5949_v22  ;;  %3864 = vst [vmem:[#allocation3 + $0x158] sm:$0x8] %v3863_v19  ;;  %v5756_v1 = vrot.slane %v14873_v14, 7 }
 0x35d   : > { %v5973_v60 = vrot.slane %v5723_v42, 4  ;;  %v5957_v35 = vrot.slane %v5955_v44, 5  ;;  %v5974_v33 = vrot.slane %v5726_v38, 5  ;;  %v5752_v19 = vrot.slane %v5747_v45, 4  ;;  %v5774_v42 = vld [vmem:[#allocation3 + $0x13c] sm:$0x1] }
 0x35e   : > { %v5944_v36 = vsel %vm9580_vm12, %v5939_v56, %v5943_v41  ;;  %v5953_v0 = vrot.slane %v5952_v26, 4  ;;  %v5759_v22 = vor.u32 %v5757_v43, %v5756_v1  ;;  %v5748_v4 = vshll.u32 %v9207_v11, 16  ;;  %v15401_v56 = vld [vmem:[#allocation26_spill] sm:$0xff]  ;;  %v6154_v14 = vpop.permute.xlu0 %6153 }
 0x35f   : > { %v14194_v54 = vcombine.low %v5936_v62, %v5944_v36  ;;  %v5961_v8 = vor.u32 %v5960_v21, %v5959_v55  ;;  %v15399_v38 = vshll.u32 %v13944_v53, 16  ;;  %v5775_v62 = vld [vmem:[#allocation3 + $0x150] sm:$0x1]  ;;  %v15400_v17 = vshrl.u32 %v13998_v16, 16  ;;  %v15402_v36 = vld [vmem:[#allocation33_spill] sm:$0xff]  ;;  %v15405_v55 = vld [vmem:[#allocation34_spill] sm:$0xff] }
 0x360   : > { %v5958_v27 = vsel %vm9580_vm12, %v5953_v0, %v5957_v35  ;;  %v5760_v41 = vsel %vm9518_vm9, %v5752_v19, %v5759_v22  ;;  %v6772_v26 = vsel %vm6657_vm6, %v15401_v56, %v6282_v59  ;;  %v5969_v1 = vshll.u32 %v5774_v42, 16  ;;  %v15403_v0 = vld [vmem:[#allocation32_spill] sm:$0xff]  ;;  %v15406_v21 = vld [vmem:[#allocation35_spill] sm:$0xff] }
 0x361   : > { %v14200_v50 = vcombine.low %v5950_v28, %v5958_v27  ;;  %v5963_v51 = vrot.slane %v15399_v38, 5  ;;  %v5979_v52 = vrot.slane %v15400_v17, 4  ;;  %7378 = vmatprep.mubr.bf16.mxu1 %v6772_v26  ;;  %v5962_v44 = vrot.slane %v5961_v8, 4  ;;  %v15409_v8 = vld [vmem:[#allocation42_spill] sm:$0xff] }
 0x362   : > { %v5975_v28 = vor.u32 %v5974_v33, %v5973_v60  ;;  %v15404_v35 = vor.u32 %v15402_v36, %v15403_v0  ;;  %v15407_v53 = vor.u32 %v15405_v55, %v15406_v21  ;;  %v15408_v27 = vshll.u32 %v13998_v16, 16  ;;  %v5762_v33 = vld [vmem:[#allocation3 + $0x4c] sm:$0x1] }
 0x363   : > { %v5966_v25 = vor.u32 %v5965_v18, %v5963_v51  ;;  %v5406_v11 = vld [vmem:[#allocation3 + $0x158] sm:$0x8]  ;;  %v5983_v17 = vshll.u32 %v5775_v62, 16  ;;  %v5750_v56 = vor.u32 %v5748_v4, %v5747_v45  ;;  %v5964_v18 = vsel %vm9580_vm12, %v5962_v44, %v5963_v51 }
 0x364   : > { %v5794_v19 = vrot.slane %v15404_v35, 4  ;;  %v5799_v22 = vrot.slane %v15407_v53, 4  ;;  %v5977_v38 = vrot.slane %v15408_v27, 5  ;;  %v5740_v59 = vshrl.u32 %v5406_v11, 16  ;;  %v3806_v53 = vld [vmem:[#allocation3 + $0x164] sm:$0x1] }
 0x365   : > { %v5967_v60 = vrot.slane %v5966_v25, 4  ;;  %v5987_v42 = vrot.slane %v5745_v24, 4  ;;  %v6708_v26 = vsel %vm6657_vm6, %v15409_v8, %v6154_v14  ;;  %v5971_v36 = vrot.slane %v5969_v1, 5  ;;  %v6284_v14 = vpop.permute.xlu0 %6283  ;;  %v8727_v8 = vpop.f32.mrb[8].mxu1 }
 0x366   : > { %v5976_v0 = vrot.slane %v5975_v28, 4  ;;  %v5988_v35 = vrot.slane %v5748_v4, 5  ;;  %7379 = vmatmul.mubr.bf16.gmra.mrb[48].mxu1 %v6708_v26  ;;  %v8378_v16 = vrot.slane %v5740_v59, 11  ;;  %v5980_v62 = vor.u32 %v5979_v52, %v5977_v38  ;;  %v8728_v26 = vpop.f32.mrb[9].mxu1 }
 0x367   : > { %v5985_v55 = vrot.slane %v5983_v17, 5  ;;  %v5972_v45 = vsel %vm9580_vm12, %v5967_v60, %v5971_v36  ;;  %v5796_v47 = vsel %vm9580_vm12, %v5794_v19, %v15406_v21  ;;  %v5801_v24 = vshll.u32 %v5762_v33, 16 }
 0x368   : > { %v5978_v51 = vsel %vm9580_vm12, %v5976_v0, %v5977_v38  ;;  %v5751_v4 = vsel %vm9518_vm9, %v8378_v16, %v5750_v56  ;;  %v14233_v44 = vcombine.low %v5964_v18, %v5972_v45  ;;  %v5981_v52 = vrot.slane %v5980_v62, 4  ;;  %vm15423_vm9 = vmmov %vm15100_vm0 }
 0x369   : > { %v6776_v25 = vsel %vm6657_vm6, %v13886_v57, %v6284_v14  ;;  %v14237_v1 = vcombine.low %v5751_v4, %v5760_v41  ;;  %v5803_v28 = vrot.slane %v5801_v24, 5  ;;  %v3807_v27 = vsel %vm11489_vm7, 0, %v3806_v53  ;;  %v6156_v17 = vpop.permute.xlu0 %6155 }
 0x36a   : > { %7386 = vmatprep.mubr.bf16.mxu1 %v6776_v25  ;;  %v5986_v19 = vsel %vm9580_vm12, %v5981_v52, %v5985_v55  ;;  %3808 = vst [vmem:[#allocation3 + $0x164] sm:$0x1] %v3807_v27  ;;  %v5989_v21 = vor.u32 %v5988_v35, %v5987_v42  ;;  %v5991_v41 = vrot.slane %v5757_v43, 5  ;;  %v6712_v56 = vsel %vm6657_vm6, %v13903_v15, %v6156_v17  ;;  %v8730_v43 = vpop.f32.mrb[10].mxu1 }
 0x36b   : > { %v14243_v40 = vcombine.low %v5978_v51, %v5986_v19  ;;  %v5804_v38 = vsel %vm9580_vm12, %v5799_v22, %v5803_v28  ;;  %v15411_v22 = vshrl.u32 %v13558_v39, 16  ;;  %v14259_v36 = vadd.f32 %v8728_v26, %v8727_v8  ;;  %v8731_v35 = vpop.f32.mrb[11].mxu1  ;;  %v6438_v8 = vpop.permute.xlu1 %6437 }
 0x36c   : > { %v14247_v59 = vcombine.low %v5796_v47, %v5804_v38  ;;  %v5990_v57 = vrot.slane %v5989_v21, 4  ;;  %v14261_v15 = vadd.f32 %v8731_v35, %v8730_v43  ;;  %v8733_v53 = vpop.f32.mrb[12].mxu1  ;;  %v9209_v35 = vld [vmem:[#allocation3 + $0xe8] sm:$0xf] }
 0x36d   : > { %v5993_v42 = vrot.slane %v15411_v22, 4  ;;  %v8734_v51 = vpop.f32.mrb[13].mxu1 }
 0x36e   : > { %7387 = vmatmul.mubr.bf16.gmra.mrb[52].mxu1 %v6712_v56  ;;  %v5992_v18 = vsel %vm9580_vm12, %v5990_v57, %v5991_v41  ;;  %v14263_v47 = vadd.f32 %v8734_v51, %v8733_v53  ;;  %v8736_v39 = vpop.f32.mrb[14].mxu1 }
 0x36f   : > { %v5994_v0 = vor.u32 %v5993_v42, %v5991_v41  ;;  %v8737_v14 = vpop.f32.mrb[15].mxu1 }
 0x370   : > { %v14269_v52 = vadd.f32 %v8737_v14, %v8736_v39 }
 0x371   : > { %v3916_v60 = vld [vmem:[#allocation3 + $0x164] sm:$0x1]  ;;  %v5995_v62 = vrot.slane %v5994_v0, 4 }
 0x372   : > { %v3917_v33 = vsel %vm11489_vm7, 0, %v3916_v60  ;;  %v9208_v0 = vld [vmem:[#allocation3 + $0xe4] sm:$0xf]  ;;  %vm15426_vm7 = vmmov %vm15100_vm0 }
 0x373   : > { %3918 = vst [vmem:[#allocation3 + $0x164] sm:$0x1] %v3917_v33 }
 0x37a   : > { %v5776_v16 = vld [vmem:[#allocation3 + $0x164] sm:$0x1] }
 0x37b   : > { %v5997_v55 = vshll.u32 %v5776_v16, 16  ;;  %v8453_v16 = vcombine.low %v9208_v0, %v9209_v35  ;;  %v15414_v35 = vld [vmem:[#allocation76_spill] sm:$0xff] }
 0x37d   : > { %v5999_v45 = vrot.slane %v5997_v55, 5 }
 0x37f   : > { %v6000_v24 = vsel %vm9580_vm12, %v5995_v62, %v5999_v45  ;;  %v6828_v62 = vsel %vm6657_vm6, %v8453_v16, %v6438_v8  ;;  %v15415_v16 = vshrl.u32 %v15414_v35, 16 }
 0x380   : > { %v14267_v4 = vcombine.low %v5992_v18, %v6000_v24 }
 0x388   : > { %v6286_v25 = vpop.permute.xlu0 %6285 }
 0x389   : > { %v6780_v28 = vsel %vm6657_vm6, %v13924_v37, %v6286_v25 }
 0x38a   : > { %7394 = vmatprep.mubr.bf16.mxu1 %v6780_v28 }
 0x38b   : > { %v8739_v38 = vpop.f32.mrb[16].mxu1 }
 0x38c   : > { %v8827_v17 = vpop.f32.mrb[32].mxu0  ;;  %v8740_v57 = vpop.f32.mrb[17].mxu1 }
 0x38d   : > { %v14277_v56 = vadd.f32 %v8740_v57, %v8739_v38  ;;  %v8828_v18 = vpop.f32.mrb[33].mxu0  ;;  %v8742_v33 = vpop.f32.mrb[18].mxu1 }
 0x38e   : > { %v6158_v11 = vpop.permute.xlu0 %6157  ;;  %v14281_v60 = vadd.f32 %v8828_v18, %v8827_v17  ;;  %v8743_v22 = vpop.f32.mrb[19].mxu1  ;;  %v9211_v17 = vld [vmem:[#allocation3 + $0xfc] sm:$0xf] }
 0x38f   : > { %v6716_v27 = vsel %vm6657_vm6, %v13922_v12, %v6158_v11  ;;  %v8830_v12 = vpop.f32.mrb[34].mxu0 }
 0x390   : > { %7395 = vmatmul.mubr.bf16.gmra.mrb[56].mxu1 %v6716_v27  ;;  %v8831_v42 = vpop.f32.mrb[35].mxu0  ;;  %v6440_v27 = vpop.permute.xlu1 %6439 }
 0x391   : > { %v14287_v26 = vadd.f32 %v8831_v42, %v8830_v12  ;;  %v15413_v12 = vshll.u32 %v15310_v23, 16 }
 0x392   : > { %v6288_v19 = vpop.permute.xlu0 %6287 }
 0x393   : > { %v6784_v21 = vsel %vm6657_vm6, %v13962_v3, %v6288_v19  ;;  %v14285_v3 = vadd.f32 %v8743_v22, %v8742_v33  ;;  %v8745_v55 = vpop.f32.mrb[20].mxu1  ;;  %v15412_v33 = vshrl.u32 %v15310_v23, 16  ;;  %v5907_v22 = vrot.slane %v15413_v12, 5 }
 0x394   : > { %7402 = vmatprep.mubr.bf16.mxu1 %v6784_v21  ;;  %v8833_v53 = vpop.f32.mrb[36].mxu0  ;;  %v8746_v45 = vpop.f32.mrb[21].mxu1 }
 0x395   : > { %v8834_v39 = vpop.f32.mrb[37].mxu0  ;;  %v8748_v25 = vpop.f32.mrb[22].mxu1 }
 0x396   : > { %v6160_v41 = vpop.permute.xlu0 %6159  ;;  %v14296_v14 = vadd.f32 %v8834_v39, %v8833_v53  ;;  %v8836_v28 = vpop.f32.mrb[38].mxu0 }
 0x397   : > { %v6720_v37 = vsel %vm6657_vm6, %v13968_v61, %v6160_v41  ;;  %v8837_v11 = vpop.f32.mrb[39].mxu0 }
 0x398   : > { %7403 = vmatmul.mubr.bf16.gmra.mrb[60].mxu1 %v6720_v37  ;;  %v14304_v21 = vadd.f32 %v8837_v11, %v8836_v28 }
 0x399   : > { %8993 = vmatprep.mubr.msk.bf16.mxu1 %vm6657_vm6, %v13992_v13  ;;  %v14292_v13 = vadd.f32 %v8746_v45, %v8745_v55  ;;  %v6442_v55 = vpop.permute.xlu1 %6441  ;;  %v9212_v45 = vld [vmem:[#allocation3 + $0x10c] sm:$0xf] }
 0x39c   : > { %v6598_v43 = vpop.permute.xlu0 %6597 }
 0x39d   : > { %v6892_v61 = vsel %vm6657_vm6, %v14008_v7, %v6598_v43  ;;  %v8749_v7 = vpop.f32.mrb[23].mxu1  ;;  %v8839_v18 = vpop.f32.mrb[40].mxu0  ;;  %v5770_v43 = vld [vmem:[#allocation3 + $0xec] sm:$0x1] }
 0x39e   : > { %7523 = vmatprep.mubr.bf16.mxu0 %v6892_v61  ;;  %v14302_v19 = vadd.f32 %v8749_v7, %v8748_v25  ;;  %v8840_v37 = vpop.f32.mrb[41].mxu0  ;;  %v15416_v61 = vshll.u32 %v15414_v35, 16 }
 0x39f   : > { %7524 = vmatmul.mubr.bf16.gmra.mrb[72].mxu0 %v6828_v62  ;;  %v14313_v42 = vadd.f32 %v8840_v37, %v8839_v18  ;;  %v8842_v8 = vpop.f32.mrb[42].mxu0  ;;  %v9214_v37 = vld [vmem:[#allocation3 + $0x120] sm:$0xf] }
 0x3a0   : > { %8994 = vmatmul.mubr.msk.bf16.vlgmr.msra.gmra.mrb[64].mxu1 %vm6657_vm6, %v14041_v5  ;;  %v8843_v0 = vpop.f32.mrb[43].mxu0  ;;  %v5904_v62 = vrot.slane %v15416_v61, 5 }
 0x3a1   : > { %v6600_v51 = vpop.permute.xlu0 %6599  ;;  %8997 = vmatprep.mubr.msk.bf16.mxu1 %vm6657_vm6, %v14055_v6  ;;  %v5909_v6 = vrot.slane %v15412_v33, 4  ;;  %v14323_v23 = vadd.f32 %v8843_v0, %v8842_v8  ;;  %v9215_v33 = vld [vmem:[#allocation3 + $0x124] sm:$0xf] }
 0x3a2   : > { %v6896_v24 = vsel %vm6657_vm6, %v14025_v58, %v6600_v51  ;;  %v9210_v58 = vld [vmem:[#allocation3 + $0xf8] sm:$0xf]  ;;  %v9213_v51 = vld [vmem:[#allocation3 + $0x110] sm:$0xf] }
 0x3a3   : > { %7531 = vmatprep.mubr.bf16.mxu0 %v6896_v24  ;;  %v8454_v57 = vcombine.low %v9210_v58, %v9211_v17  ;;  %v8455_v39 = vcombine.low %v9212_v45, %v9213_v51  ;;  %v5910_v24 = vor.u32 %v5909_v6, %v5907_v22  ;;  %v8456_v6 = vcombine.low %v9214_v37, %v9215_v33 }
 0x3a5   : > { %v6832_v41 = vsel %vm6657_vm6, %v8454_v57, %v6440_v27  ;;  %v6836_v25 = vsel %vm6657_vm6, %v8455_v39, %v6442_v55  ;;  %v8845_v11 = vpop.f32.mrb[44].mxu0  ;;  %v15420_v55 = vld [vmem:[#allocation8_spill] sm:$0xff] }
 0x3a6   : > { %v6602_v38 = vpop.permute.xlu0 %6601  ;;  %v8846_v27 = vpop.f32.mrb[45].mxu0  ;;  %v15422_v51 = vshll.u32 %v15420_v55, 16 }
 0x3a7   : > { %7532 = vmatmul.mubr.bf16.gmra.mrb[76].mxu0 %v6832_v41  ;;  %v6900_v5 = vsel %vm6657_vm6, %v14065_v30, %v6602_v38  ;;  %v5903_v30 = vrot.slane %v15415_v16, 4  ;;  %v5911_v38 = vrot.slane %v5910_v24, 4  ;;  %v14328_v58 = vadd.f32 %v8846_v27, %v8845_v11  ;;  %v8848_v17 = vpop.f32.mrb[46].mxu0  ;;  %v6444_v41 = vpop.permute.xlu1 %6443 }
 0x3a8   : > { %7539 = vmatprep.mubr.bf16.mxu0 %v6900_v5  ;;  %8998 = vmatmul.mubr.msk.bf16.gmra.mrb[68].mxu1 %vm6657_vm6, %v14087_v10  ;;  %v5913_v10 = vshll.u32 %v5770_v43, 16  ;;  %v8849_v57 = vpop.f32.mrb[47].mxu0  ;;  %v6840_v8 = vsel %vm6657_vm6, %v8456_v6, %v6444_v41  ;;  %v15417_v43 = vld [vmem:[#allocation22_spill] sm:$0xff]  ;;  %v5778_v39 = vrot.slane %v15422_v51, 5 }
 0x3a9   : > { %9001 = vmatprep.mubr.msk.bf16.mxu1 %vm6657_vm6, %v14103_v49  ;;  %v5905_v7 = vor.u32 %v5904_v62, %v5903_v30  ;;  %v14334_v18 = vadd.f32 %v8849_v57, %v8848_v17  ;;  %v15418_v0 = vshrl.u32 %v15417_v43, 16  ;;  %v15419_v16 = vshll.u32 %v15417_v43, 16  ;;  %v5761_v62 = vld [vmem:[#allocation3 + $0x38] sm:$0x1] }
 0x3aa   : > { %v6604_v53 = vpop.permute.xlu0 %6603  ;;  %v5915_v49 = vrot.slane %v5913_v10, 5 }
 0x3ab   : > { %v6904_v28 = vsel %vm6657_vm6, %v14105_v32, %v6604_v53  ;;  %v5906_v5 = vrot.slane %v5905_v7, 4  ;;  %v5781_v30 = vrot.slane %v15419_v16, 5  ;;  %v15421_v53 = vshrl.u32 %v15420_v55, 16  ;;  %v6446_v10 = vpop.permute.xlu1 %6445 }
 0x3ac   : > { %v5916_v12 = vsel %vm9580_vm12, %v5911_v38, %v5915_v49 }
 0x3ad   : > { %v5777_v45 = vrot.slane %v15421_v53, 4 }
 0x3ae   : > { %v6606_v32 = vpop.permute.xlu0 %6605 }
 0x3af   : > { %7540 = vmatmul.mubr.bf16.gmra.mrb[80].mxu0 %v6836_v25  ;;  %v6908_v35 = vsel %vm6657_vm6, %v14151_v34, %v6606_v32  ;;  %v9216_v25 = vld [vmem:[#allocation3 + $0x134] sm:$0xf]  ;;  %v5779_v27 = vor.u32 %v5778_v39, %v5777_v45 }
 0x3b0   : > { %7547 = vmatprep.mubr.bf16.mxu0 %v6904_v28  ;;  %9002 = vmatmul.mubr.msk.bf16.gmra.mrb[72].mxu1 %vm6657_vm6, %v14123_v48  ;;  %v5783_v48 = vrot.slane %v15418_v0, 4  ;;  %v9217_v28 = vld [vmem:[#allocation3 + $0x138] sm:$0xf] }
 0x3b1   : > { %9005 = vmatprep.mubr.msk.bf16.mxu1 %vm6657_vm6, %v14133_v2  ;;  %v5908_v2 = vsel %vm9580_vm12, %v5906_v5, %v5907_v22  ;;  %v5787_v22 = vshll.u32 %v5761_v62, 16  ;;  %v8457_v7 = vcombine.low %v9216_v25, %v9217_v28  ;;  %v5780_v32 = vrot.slane %v5779_v27, 4 }
 0x3b2   : > { %v8516_v61 = vcombine.low %v5908_v2, %v5916_v12  ;;  %v5784_v34 = vor.u32 %v5783_v48, %v5781_v30  ;;  %v9218_v12 = vld [vmem:[#allocation3 + $0x148] sm:$0xf] }
 0x3b3   : > { %v6844_v38 = vsel %vm6657_vm6, %v8457_v7, %v6446_v10  ;;  %v5789_v57 = vrot.slane %v5787_v22, 5  ;;  %v5782_v0 = vsel %vm9580_vm12, %v5780_v32, %v5781_v30 }
 0x3b4   : > { %v5785_v17 = vrot.slane %v5784_v34, 4 }
 0x3b5   : > { %v6608_v24 = vpop.permute.xlu0 %6607 }
 0x3b6   : > { %v6912_v11 = vsel %vm6657_vm6, %v14237_v1, %v6608_v24  ;;  %v6448_v1 = vpop.permute.xlu1 %6447  ;;  %v5790_v6 = vsel %vm9580_vm12, %v5785_v17, %v5789_v57  ;;  %vm15424_vm12 = vmmov %vm15100_vm0 }
 0x3b7   : > { %7548 = vmatmul.mubr.bf16.gmra.mrb[84].mxu0 %v6840_v8  ;;  %v9219_v8 = vld [vmem:[#allocation3 + $0x14c] sm:$0xf]  ;;  %v8507_v2 = vcombine.low %v5782_v0, %v5790_v6 }
 0x3b8   : > { %7555 = vmatprep.mubr.bf16.mxu0 %v6908_v35  ;;  %9006 = vmatmul.mubr.msk.bf16.gmra.mrb[76].mxu1 %vm6657_vm6, %v8516_v61  ;;  %v8851_v49 = vpop.f32.mrb[48].mxu0  ;;  %v8458_v43 = vcombine.low %v9218_v12, %v9219_v8 }
 0x3b9   : > { %9009 = vmatprep.mubr.msk.bf16.mxu1 %vm6657_vm6, %v14174_v63  ;;  %v8852_v41 = vpop.f32.mrb[49].mxu0 }
 0x3ba   : > { %v14357_v5 = vadd.f32 %v8852_v41, %v8851_v49  ;;  %v8854_v63 = vpop.f32.mrb[50].mxu0  ;;  %v6848_v35 = vsel %vm6657_vm6, %v8458_v43, %v6448_v1 }
 0x3bb   : > { %v8855_v37 = vpop.f32.mrb[51].mxu0 }
 0x3bc   : > { %v14361_v33 = vadd.f32 %v8855_v37, %v8854_v63 }
 0x3bd   : > { %v8751_v48 = vpop.f32.mrb[24].mxu1 }
 0x3bf   : > { %7556 = vmatmul.mubr.bf16.gmra.mrb[88].mxu0 %v6844_v38 }
 0x3c0   : > { %7563 = vmatprep.mubr.bf16.mxu0 %v6912_v11  ;;  %9010 = vmatmul.mubr.msk.bf16.gmra.mrb[80].mxu1 %vm6657_vm6, %v14194_v54  ;;  %v8752_v54 = vpop.f32.mrb[25].mxu1  ;;  %v8857_v16 = vpop.f32.mrb[52].mxu0 }
 0x3c1   : > { %9013 = vmatprep.mubr.msk.bf16.mxu1 %vm6657_vm6, %v14200_v50  ;;  %v14370_v61 = vadd.f32 %v8752_v54, %v8751_v48  ;;  %v8754_v62 = vpop.f32.mrb[26].mxu1  ;;  %v8858_v50 = vpop.f32.mrb[53].mxu0 }
 0x3c2   : > { %v8755_v55 = vpop.f32.mrb[27].mxu1  ;;  %v8859_v53 = vadd.f32 %v8858_v50, %v8857_v16  ;;  %v8860_v45 = vpop.f32.mrb[54].mxu0 }
 0x3c3   : > { %v14373_v51 = vadd.f32 %v8755_v55, %v8754_v62  ;;  %v8861_v9 = vpop.f32.mrb[55].mxu0 }
 0x3c4   : > { %v8862_v30 = vadd.f32 %v8861_v9, %v8860_v45  ;;  %v14385_v45 = vadd.f32 %v14328_v58, %v14263_v47  ;;  %v14400_v47 = vadd.f32 %v8859_v53, %v14292_v13 }
 0x3c5   : > { %v8757_v39 = vpop.f32.mrb[28].mxu1 }
 0x3c6   : > { %v8758_v24 = vpop.f32.mrb[29].mxu1 }
 0x3c7   : > { %7564 = vmatmul.mubr.bf16.gmra.mrb[92].mxu0 %v6848_v35  ;;  %v8759_v34 = vadd.f32 %v8758_v24, %v8757_v39  ;;  %v8760_v22 = vpop.f32.mrb[30].mxu1 }
 0x3c8   : > { %8989 = vmatprep.mubr.msk.bf16.mxu0 %vm6657_vm6, %v8507_v2  ;;  %9014 = vmatmul.mubr.msk.bf16.gmra.mrb[84].mxu1 %vm6657_vm6, %v14233_v44  ;;  %v8863_v10 = vpop.f32.mrb[56].mxu0  ;;  %v8761_v28 = vpop.f32.mrb[31].mxu1 }
 0x3c9   : > { %9017 = vmatprep.mubr.msk.bf16.mxu1 %vm6657_vm6, %v14243_v40  ;;  %v8864_v25 = vpop.f32.mrb[57].mxu0  ;;  %v8762_v27 = vadd.f32 %v8761_v28, %v8760_v22  ;;  %v14389_v22 = vadd.f32 %v14313_v42, %v14259_v36  ;;  %v14393_v28 = vadd.f32 %v14334_v18, %v14269_v52  ;;  %v14404_v36 = vadd.f32 %v14357_v5, %v14277_v56 }
 0x3ca   : > { %v8865_v7 = vadd.f32 %v8864_v25, %v8863_v10  ;;  %v8866_v11 = vpop.f32.mrb[58].mxu0  ;;  %v14407_v52 = vadd.f32 %v8862_v30, %v14302_v19 }
 0x3cb   : > { %v8867_v38 = vpop.f32.mrb[59].mxu0 }
 0x3cc   : > { %v8868_v44 = vadd.f32 %v8867_v38, %v8866_v11  ;;  %v14397_v38 = vadd.f32 %v14323_v23, %v14261_v15  ;;  %v14411_v15 = vadd.f32 %v14361_v33, %v14285_v3 }
 0x3ce   : > { %v14425_v30 = vadd.f32 %v8868_v44, %v14373_v51  ;;  %v14445_v51 = vadd.f32 %v14304_v21, %v14180_v46 }
 0x3cf   : > { %8990 = vmatmul.mubr.msk.bf16.vlgmr.msra.gmra.mrb[96].mxu0 %vm6657_vm6, %v14247_v59 }
 0x3d0   : > { %9018 = vmatmul.mubr.msk.bf16.gmra.mrb[88].mxu1 %vm6657_vm6, %v14267_v4  ;;  %vm15427_vm6 = vmmov %vm15100_vm0 }
 0x3d5   : > { %v8869_v49 = vpop.f32.mrb[60].mxu0 }
 0x3d6   : > { %v8870_v40 = vpop.f32.mrb[61].mxu0 }
 0x3d7   : > { %v8871_v17 = vadd.f32 %v8870_v40, %v8869_v49  ;;  %v8872_v57 = vpop.f32.mrb[62].mxu0 }
 0x3d8   : > { %v8873_v41 = vpop.f32.mrb[63].mxu0 }
 0x3d9   : > { %v8874_v63 = vadd.f32 %v8873_v41, %v8872_v57  ;;  %v14413_v23 = vadd.f32 %v8871_v17, %v8759_v34 }
 0x3db   : > { %v14420_v5 = vadd.f32 %v8874_v63, %v8762_v27  ;;  %v14449_v27 = vadd.f32 %v14287_v26, %v14113_v20 }
 0x3dd   : > { %v8763_v32 = vpop.f32.mrb[32].mxu1 }
 0x3de   : > { %v8764_v37 = vpop.f32.mrb[33].mxu1 }
 0x3df   : > { %v8875_v59 = vpop.f32.mrb[64].mxu0  ;;  %v8765_v6 = vadd.f32 %v8764_v37, %v8763_v32  ;;  %v8766_v12 = vpop.f32.mrb[34].mxu1 }
 0x3e0   : > { %v8876_v1 = vpop.f32.mrb[65].mxu0  ;;  %v8767_v0 = vpop.f32.mrb[35].mxu1 }
 0x3e1   : > { %v8877_v8 = vadd.f32 %v8876_v1, %v8875_v59  ;;  %v8878_v43 = vpop.f32.mrb[66].mxu0  ;;  %v8768_v35 = vadd.f32 %v8767_v0, %v8766_v12  ;;  %v14418_v59 = vadd.f32 %v8865_v7, %v14370_v61  ;;  %v14437_v61 = vadd.f32 %v14296_v14, %v14172_v29 }
 0x3e2   : > { %v8879_v48 = vpop.f32.mrb[67].mxu0  ;;  %v14441_v7 = vadd.f32 %v14281_v60, %v14108_v31 }
 0x3e3   : > { %v8880_v2 = vadd.f32 %v8879_v48, %v8878_v43  ;;  %v14429_v33 = vadd.f32 %v8877_v8, %v8765_v6 }
 0x3e5   : > { %v14433_v17 = vadd.f32 %v8880_v2, %v8768_v35 }
 0x3ed   : > { %v8769_v4 = vpop.f32.mrb[36].mxu1 }
 0x3ee   : > { %v8770_v54 = vpop.f32.mrb[37].mxu1 }
 0x3ef   : > { %v8771_v16 = vadd.f32 %v8770_v54, %v8769_v4  ;;  %v8772_v62 = vpop.f32.mrb[38].mxu1 }
 0x3f0   : > { %v8773_v50 = vpop.f32.mrb[39].mxu1 }
 0x3f1   : > { %v8774_v55 = vadd.f32 %v8773_v50, %v8772_v62 }
 0x3ff   : > { %v8881_v9 = vpop.f32.mrb[68].mxu0 }
 0x400   : > { %v8882_v39 = vpop.f32.mrb[69].mxu0 }
 0x401   : > { %v8883_v24 = vadd.f32 %v8882_v39, %v8881_v9  ;;  %v8884_v10 = vpop.f32.mrb[70].mxu0 }
 0x402   : > { %v8885_v25 = vpop.f32.mrb[71].mxu0 }
 0x403   : > { %v8886_v11 = vadd.f32 %v8885_v25, %v8884_v10  ;;  %v14427_v3 = vadd.f32 %v8883_v24, %v8771_v16  ;;  %v14470_v25 = vld [vmem:[%s14730_s5] ss:$0 sm:$0xff] }
 0x405   : > { %v14431_v34 = vadd.f32 %v8886_v11, %v8774_v55 }
 0x406   : > { %v8775_v58 = vpop.f32.mrb[40].mxu1 }
 0x407   : > { %v8776_v49 = vpop.f32.mrb[41].mxu1 }
 0x408   : > { %v8777_v40 = vadd.f32 %v8776_v49, %v8775_v58  ;;  %v8778_v57 = vpop.f32.mrb[42].mxu1 }
 0x409   : > { %v8779_v42 = vpop.f32.mrb[43].mxu1 }
 0x40a   : > { %v8780_v18 = vadd.f32 %v8779_v42, %v8778_v57  ;;  %v14479_v42 = vld [vmem:[%s14731_s6] ss:$0 sm:$0xff] }
 0x410   : > { %v8781_v13 = vpop.f32.mrb[44].mxu1 }
 0x411   : > { %v8782_v53 = vpop.f32.mrb[45].mxu1 }
 0x412   : > { %v14415_v41 = vadd.f32 %v8782_v53, %v8781_v13  ;;  %v8784_v32 = vpop.f32.mrb[46].mxu1 }
 0x413   : > { %v8785_v56 = vpop.f32.mrb[47].mxu1 }
 0x414   : > { %v14422_v19 = vadd.f32 %v8785_v56, %v8784_v32 }
 0x439   : > { %v8787_v44 = vpop.f32.mrb[48].mxu1 }
 0x43a   : > { %v8788_v63 = vpop.f32.mrb[49].mxu1 }
 0x43b   : > { %v14451_v37 = vadd.f32 %v8788_v63, %v8787_v44  ;;  %v8790_v1 = vpop.f32.mrb[50].mxu1 }
 0x43c   : > { %v8791_v6 = vpop.f32.mrb[51].mxu1 }
 0x43d   : > { %v14453_v29 = vadd.f32 %v8791_v6, %v8790_v1 }
 0x441   : > { %v8793_v14 = vpop.f32.mrb[52].mxu1 }
 0x442   : > { %v8794_v12 = vpop.f32.mrb[53].mxu1 }
 0x443   : > { %v14455_v31 = vadd.f32 %v8794_v12, %v8793_v14  ;;  %v8796_v60 = vpop.f32.mrb[54].mxu1 }
 0x444   : > { %v8797_v8 = vpop.f32.mrb[55].mxu1 }
 0x445   : > { %v14457_v46 = vadd.f32 %v8797_v8, %v8796_v60 }
 0x463   : > { %v8799_v21 = vpop.f32.mrb[56].mxu1 }
 0x464   : > { %v8800_v43 = vpop.f32.mrb[57].mxu1 }
 0x465   : > { %v14459_v20 = vadd.f32 %v8800_v43, %v8799_v21  ;;  %v8802_v26 = vpop.f32.mrb[58].mxu1 }
 0x466   : > { %v8803_v0 = vpop.f32.mrb[59].mxu1 }
 0x467   : > { %v14461_v48 = vadd.f32 %v8803_v0, %v8802_v26 }
 0x46b   : > { %v8805_v35 = vpop.f32.mrb[60].mxu1 }
 0x46c   : > { %v8806_v2 = vpop.f32.mrb[61].mxu1 }
 0x46d   : > { %v14463_v4 = vadd.f32 %v8806_v2, %v8805_v35  ;;  %v8808_v54 = vpop.f32.mrb[62].mxu1 }
 0x46e   : > { %v8809_v16 = vpop.f32.mrb[63].mxu1 }
 0x46f   : > { %v14465_v62 = vadd.f32 %v8809_v16, %v8808_v54 }
 0x472   : > { %v8887_v50 = vpop.f32.mrb[72].mxu0 }
 0x473   : > { %v8888_v55 = vpop.f32.mrb[73].mxu0  ;;  %v8995_v10 = vpop.f32.mrb[64].mxu1 }
 0x474   : > { %v8889_v9 = vadd.f32 %v8888_v55, %v8887_v50  ;;  %v8890_v39 = vpop.f32.mrb[74].mxu0  ;;  %v7631_v58 = vadd.f32 %v8995_v10, %v14385_v45  ;;  %v7622_v49 = vpop.f32.mrb[65].mxu1 }
 0x475   : > { %v8891_v24 = vpop.f32.mrb[75].mxu0  ;;  %v7623_v13 = vadd.f32 %v7622_v49, %v14389_v22  ;;  %v8996_v53 = vpop.f32.mrb[66].mxu1 }
 0x476   : > { %v8892_v11 = vadd.f32 %v8891_v24, %v8890_v39  ;;  %v14473_v57 = vadd.f32 %v8889_v9, %v8777_v40  ;;  %v7746_v32 = vmul.f32 %v14470_v25, %v7631_v58  ;;  %v7634_v56 = vadd.f32 %v8996_v53, %v14393_v28  ;;  %v7625_v44 = vpop.f32.mrb[67].mxu1 }
 0x477   : > { %v7744_v45 = vmul.f32 %v14470_v25, %v7623_v13  ;;  %v7626_v40 = vadd.f32 %v7625_v44, %v14397_v38 }
 0x478   : > { %v14484_v63 = vadd.f32 %v8892_v11, %v8780_v18  ;;  %v7785_v1 = vadd.f32 %v14479_v42, %v7746_v32  ;;  %v7747_v6 = vmul.f32 %v14470_v25, %v7634_v56 }
 0x479   : > { %v7783_v22 = vadd.f32 %v14479_v42, %v7744_v45  ;;  %v7745_v12 = vmul.f32 %v14470_v25, %v7626_v40 }
 0x47a   : > { %v8893_v14 = vpop.f32.mrb[76].mxu0  ;;  %v7817_v28 = vmax.f32 %v7785_v1, 0.0  ;;  %v7786_v18 = vadd.f32 %v14479_v42, %v7747_v6 }
 0x47b   : > { %v8894_v60 = vpop.f32.mrb[77].mxu0  ;;  %v7815_v43 = vmax.f32 %v7783_v22, 0.0  ;;  %v7784_v38 = vadd.f32 %v14479_v42, %v7745_v12  ;;  %v8999_v0 = vpop.f32.mrb[68].mxu1 }
 0x47c   : > { %v8895_v8 = vadd.f32 %v8894_v60, %v8893_v14  ;;  %v8896_v21 = vpop.f32.mrb[78].mxu0  ;;  %v8653_v35 = vpack.c.bf16 %v7817_v28, %v7817_v28  ;;  %v7818_v2 = vmax.f32 %v7786_v18, 0.0  ;;  %v7647_v16 = vadd.f32 %v8999_v0, %v14400_v47  ;;  %v7638_v50 = vpop.f32.mrb[69].mxu1 }
 0x47d   : > { %v8897_v26 = vpop.f32.mrb[79].mxu0  ;;  %v8651_v55 = vpack.c.bf16 %v7815_v43, %v7815_v43  ;;  %v7816_v9 = vmax.f32 %v7784_v38, 0.0  ;;  %v7639_v39 = vadd.f32 %v7638_v50, %v14404_v36  ;;  %v9000_v24 = vpop.f32.mrb[70].mxu1 }
 0x47e   : > { %v8898_v54 = vadd.f32 %v8897_v26, %v8896_v21  ;;  %v14499_v10 = vadd.f32 %v8895_v8, %v14415_v41  ;;  %7977 = vst.msk [vmem:[%s14501_s8 + $0x18] sm:$0xf] %vm15423_vm9, %v8653_v35  ;;  %v8654_v11 = vpack.c.bf16 %v7818_v2, %v7818_v2  ;;  %v7750_v47 = vmul.f32 %v14470_v25, %v7647_v16  ;;  %v7641_v49 = vpop.f32.mrb[71].mxu1  ;;  %vm15438_vm9 = vmmov %vm15100_vm0 }
 0x47f   : > { %v7650_v58 = vadd.f32 %v9000_v24, %v14407_v52  ;;  %7975 = vst.msk [vmem:[%s14501_s8 + $0x10] sm:$0xf] %vm15424_vm12, %v8651_v55  ;;  %v8652_v41 = vpack.c.bf16 %v7816_v9, %v7816_v9  ;;  %v7748_v13 = vmul.f32 %v14470_v25, %v7639_v39  ;;  %v7642_v53 = vadd.f32 %v7641_v49, %v14411_v15  ;;  %vm15439_vm12 = vmmov %vm15100_vm0 }
 0x480   : > { %v14508_v36 = vadd.f32 %v8898_v54, %v14422_v19  ;;  %7978 = vst.msk [vmem:[%s14501_s8 + $0x1c] sm:$0xf] %vm15425_vm5, %v8654_v11  ;;  %v7789_v32 = vadd.f32 %v14479_v42, %v7750_v47  ;;  %vm15440_vm5 = vmmov %vm15100_vm0 }
 0x481   : > { %v7751_v56 = vmul.f32 %v14470_v25, %v7650_v58  ;;  %7976 = vst.msk [vmem:[%s14501_s8 + $0x14] sm:$0xf] %vm15426_vm7, %v8652_v41  ;;  %v7787_v52 = vadd.f32 %v14479_v42, %v7748_v13  ;;  %v7749_v19 = vmul.f32 %v14470_v25, %v7642_v53  ;;  %vm15441_vm7 = vmmov %vm15100_vm0 }
 0x482   : > { %v8899_v44 = vpop.f32.mrb[80].mxu0  ;;  %v7821_v40 = vmax.f32 %v7789_v32, 0.0 }
 0x483   : > { %v8900_v45 = vpop.f32.mrb[81].mxu0  ;;  %v7790_v1 = vadd.f32 %v14479_v42, %v7751_v56  ;;  %v7819_v14 = vmax.f32 %v7787_v52, 0.0  ;;  %v7788_v22 = vadd.f32 %v14479_v42, %v7749_v19  ;;  %v9003_v60 = vpop.f32.mrb[72].mxu1 }
 0x484   : > { %v8901_v6 = vadd.f32 %v8900_v45, %v8899_v44  ;;  %v8902_v15 = vpop.f32.mrb[82].mxu0  ;;  %v8657_v28 = vpack.c.bf16 %v7821_v40, %v7821_v40  ;;  %v7663_v21 = vadd.f32 %v9003_v60, %v14413_v23  ;;  %v7654_v43 = vpop.f32.mrb[73].mxu1 }
 0x485   : > { %v8903_v12 = vpop.f32.mrb[83].mxu0  ;;  %v7822_v18 = vmax.f32 %v7790_v1, 0.0  ;;  %v8655_v38 = vpack.c.bf16 %v7819_v14, %v7819_v14  ;;  %v7820_v26 = vmax.f32 %v7788_v22, 0.0  ;;  %v7655_v0 = vadd.f32 %v7654_v43, %v14418_v59  ;;  %v9004_v35 = vpop.f32.mrb[74].mxu1 }
 0x486   : > { %v8904_v8 = vadd.f32 %v8903_v12, %v8902_v15  ;;  %v14527_v2 = vadd.f32 %v8901_v6, %v14451_v37  ;;  %7981 = vst.msk [vmem:[%s14501_s8 + $0x28] sm:$0xf] %vm15427_vm6, %v8657_v28  ;;  %v7754_v16 = vmul.f32 %v14470_v25, %v7663_v21  ;;  %v7666_v50 = vadd.f32 %v9004_v35, %v14420_v5  ;;  %v7657_v55 = vpop.f32.mrb[75].mxu1  ;;  %vm15442_vm6 = vmmov %vm15100_vm0 }
 0x487   : > { %v8658_v54 = vpack.c.bf16 %v7822_v18, %v7822_v18  ;;  %7979 = vst.msk [vmem:[%s14501_s8 + $0x20] sm:$0xf] %vm15428_vm15, %v8655_v38  ;;  %v8656_v9 = vpack.c.bf16 %v7820_v26, %v7820_v26  ;;  %v7752_v59 = vmul.f32 %v14470_v25, %v7655_v0  ;;  %v7658_v39 = vadd.f32 %v7657_v55, %v14425_v30  ;;  %vm15443_vm15 = vmmov %vm15100_vm0 }
 0x488   : > { %v14534_v23 = vadd.f32 %v8904_v8, %v14453_v29  ;;  %v7793_v37 = vadd.f32 %v14479_v42, %v7754_v16  ;;  %v7755_v24 = vmul.f32 %v14470_v25, %v7666_v50 }
 0x489   : > { %7982 = vst.msk [vmem:[%s14501_s8 + $0x2c] sm:$0xf] %vm15429_vm2, %v8658_v54  ;;  %v7791_v5 = vadd.f32 %v14479_v42, %v7752_v59  ;;  %v7753_v29 = vmul.f32 %v14470_v25, %v7658_v39  ;;  %vm15444_vm2 = vmmov %vm15100_vm0 }
 0x48a   : > { %v8905_v11 = vpop.f32.mrb[84].mxu0  ;;  %7980 = vst.msk [vmem:[%s14501_s8 + $0x24] sm:$0xf] %vm15430_vm8, %v8656_v9  ;;  %v7825_v58 = vmax.f32 %v7793_v37, 0.0  ;;  %v7794_v49 = vadd.f32 %v14479_v42, %v7755_v24  ;;  %vm15445_vm8 = vmmov %vm15100_vm0 }
 0x48b   : > { %v8906_v47 = vpop.f32.mrb[85].mxu0  ;;  %v7823_v13 = vmax.f32 %v7791_v5, 0.0  ;;  %v7792_v53 = vadd.f32 %v14479_v42, %v7753_v29  ;;  %v9007_v56 = vpop.f32.mrb[76].mxu1 }
 0x48c   : > { %v8907_v41 = vadd.f32 %v8906_v47, %v8905_v11  ;;  %v8908_v30 = vpop.f32.mrb[86].mxu0  ;;  %v8661_v44 = vpack.c.bf16 %v7825_v58, %v7825_v58  ;;  %v7826_v52 = vmax.f32 %v7794_v49, 0.0  ;;  %v7679_v45 = vadd.f32 %v9007_v56, %v14427_v3  ;;  %v7670_v40 = vpop.f32.mrb[77].mxu1 }
 0x48d   : > { %v8909_v32 = vpop.f32.mrb[87].mxu0  ;;  %v8659_v1 = vpack.c.bf16 %v7823_v13, %v7823_v13  ;;  %v7824_v6 = vmax.f32 %v7792_v53, 0.0  ;;  %v7671_v15 = vadd.f32 %v7670_v40, %v14429_v33  ;;  %v9008_v14 = vpop.f32.mrb[78].mxu1 }
 0x48e   : > { %v8910_v19 = vadd.f32 %v8909_v32, %v8908_v30  ;;  %v14553_v22 = vadd.f32 %v8907_v41, %v14455_v31  ;;  %7985 = vst.msk [vmem:[%s14501_s8 + $0x38] sm:$0xf] %vm15431_vm10, %v8661_v44  ;;  %v8662_v12 = vpack.c.bf16 %v7826_v52, %v7826_v52  ;;  %v7758_v60 = vmul.f32 %v14470_v25, %v7679_v45  ;;  %v7673_v18 = vpop.f32.mrb[79].mxu1  ;;  %vm15446_vm10 = vmmov %vm15100_vm0 }
 0x48f   : > { %v7682_v28 = vadd.f32 %v9008_v14, %v14431_v34  ;;  %7983 = vst.msk [vmem:[%s14501_s8 + $0x30] sm:$0xf] %vm15432_vm11, %v8659_v1  ;;  %v8660_v8 = vpack.c.bf16 %v7824_v6, %v7824_v6  ;;  %v7756_v33 = vmul.f32 %v14470_v25, %v7671_v15  ;;  %v7674_v21 = vadd.f32 %v7673_v18, %v14433_v17  ;;  %vm15447_vm11 = vmmov %vm15100_vm0 }
 0x490   : > { %v14560_v3 = vadd.f32 %v8910_v19, %v14457_v46  ;;  %7986 = vst.msk [vmem:[%s14501_s8 + $0x3c] sm:$0xf] %vm15100_vm0, %v8662_v12  ;;  %v7797_v31 = vadd.f32 %v14479_v42, %v7758_v60 }
 0x491   : > { %v7759_v43 = vmul.f32 %v14470_v25, %v7682_v28  ;;  %7984 = vst.msk [vmem:[%s14501_s8 + $0x34] sm:$0xf] %vm15433_vm3, %v8660_v8  ;;  %v7795_v34 = vadd.f32 %v14479_v42, %v7756_v33  ;;  %v7757_v46 = vmul.f32 %v14470_v25, %v7674_v21  ;;  %vm15448_vm3 = vmmov %vm15100_vm0 }
 0x492   : > { %v8911_v38 = vpop.f32.mrb[88].mxu0  ;;  %v7829_v0 = vmax.f32 %v7797_v31, 0.0 }
 0x493   : > { %v8912_v26 = vpop.f32.mrb[89].mxu0  ;;  %v7798_v35 = vadd.f32 %v14479_v42, %v7759_v43  ;;  %v7827_v16 = vmax.f32 %v7795_v34, 0.0  ;;  %v7796_v50 = vadd.f32 %v14479_v42, %v7757_v46  ;;  %v9011_v9 = vpop.f32.mrb[80].mxu1 }
 0x494   : > { %v8913_v54 = vadd.f32 %v8912_v26, %v8911_v38  ;;  %v8914_v17 = vpop.f32.mrb[90].mxu0  ;;  %v8665_v59 = vpack.c.bf16 %v7829_v0, %v7829_v0  ;;  %v7695_v24 = vadd.f32 %v9011_v9, %v14499_v10  ;;  %v7686_v11 = vpop.f32.mrb[81].mxu1 }
 0x495   : > { %v8915_v55 = vpop.f32.mrb[91].mxu0  ;;  %v7830_v39 = vmax.f32 %v7798_v35, 0.0  ;;  %v8663_v5 = vpack.c.bf16 %v7827_v16, %v7827_v16  ;;  %v7828_v29 = vmax.f32 %v7796_v50, 0.0  ;;  %v7687_v47 = vadd.f32 %v7686_v11, %v14473_v57  ;;  %v9012_v58 = vpop.f32.mrb[82].mxu1 }
 0x496   : > { %v8916_v37 = vadd.f32 %v8915_v55, %v8914_v17  ;;  %v14579_v49 = vadd.f32 %v8913_v54, %v14459_v20  ;;  %7989 = vst.msk [vmem:[%s14501_s8 + $0x48] sm:$0xf] %vm15434_vm4, %v8665_v59  ;;  %v7762_v30 = vmul.f32 %v14470_v25, %v7695_v24  ;;  %v7698_v13 = vadd.f32 %v9012_v58, %v14508_v36  ;;  %v7689_v53 = vpop.f32.mrb[83].mxu1  ;;  %vm15449_vm4 = vmmov %vm15100_vm0 }
 0x497   : > { %v8666_v41 = vpack.c.bf16 %v7830_v39, %v7830_v39  ;;  %7987 = vst.msk [vmem:[%s14501_s8 + $0x40] sm:$0xf] %vm15435_vm1, %v8663_v5  ;;  %v8664_v32 = vpack.c.bf16 %v7828_v29, %v7828_v29  ;;  %v7760_v57 = vmul.f32 %v14470_v25, %v7687_v47  ;;  %v7690_v56 = vadd.f32 %v7689_v53, %v14484_v63  ;;  %vm15450_vm1 = vmmov %vm15100_vm0 }
 0x498   : > { %v14586_v10 = vadd.f32 %v8916_v37, %v14461_v48  ;;  %v7801_v20 = vadd.f32 %v14479_v42, %v7762_v30  ;;  %v7763_v44 = vmul.f32 %v14470_v25, %v7698_v13 }
 0x499   : > { %7990 = vst.msk [vmem:[%s14501_s8 + $0x4c] sm:$0xf] %vm15436_vm13, %v8666_v41  ;;  %v7799_v36 = vadd.f32 %v14479_v42, %v7760_v57  ;;  %v7761_v48 = vmul.f32 %v14470_v25, %v7690_v56  ;;  %vm15451_vm13 = vmmov %vm15100_vm0 }
 0x49a   : > { %v8917_v52 = vpop.f32.mrb[92].mxu0  ;;  %7988 = vst.msk [vmem:[%s14501_s8 + $0x44] sm:$0xf] %vm15437_vm14, %v8664_v32  ;;  %v7833_v45 = vmax.f32 %v7801_v20, 0.0  ;;  %v7802_v40 = vadd.f32 %v14479_v42, %v7763_v44  ;;  %vm15452_vm14 = vmmov %vm15100_vm0 }
 0x49b   : > { %v8918_v19 = vpop.f32.mrb[93].mxu0  ;;  %v7831_v6 = vmax.f32 %v7799_v36, 0.0  ;;  %v7800_v15 = vadd.f32 %v14479_v42, %v7761_v48  ;;  %v9015_v12 = vpop.f32.mrb[84].mxu1 }
 0x49c   : > { %v8919_v1 = vadd.f32 %v8918_v19, %v8917_v52  ;;  %v8920_v63 = vpop.f32.mrb[94].mxu0  ;;  %v8669_v60 = vpack.c.bf16 %v7833_v45, %v7833_v45  ;;  %v7834_v28 = vmax.f32 %v7802_v40, 0.0  ;;  %v7711_v8 = vadd.f32 %v9015_v12, %v14553_v22  ;;  %v7702_v33 = vpop.f32.mrb[85].mxu1 }
 0x49d   : > { %v8921_v14 = vpop.f32.mrb[95].mxu0  ;;  %v8667_v21 = vpack.c.bf16 %v7831_v6, %v7831_v6  ;;  %v7832_v31 = vmax.f32 %v7800_v15, 0.0  ;;  %v7703_v43 = vadd.f32 %v7702_v33, %v14527_v2  ;;  %v9016_v38 = vpop.f32.mrb[86].mxu1 }
 0x49e   : > { %v8922_v18 = vadd.f32 %v8921_v14, %v8920_v63  ;;  %v7566_v34 = vadd.f32 %v8919_v1, %v14463_v4  ;;  %7993 = vst.msk [vmem:[%s14501_s8 + $0x58] sm:$0xf] %vm15438_vm9, %v8669_v60  ;;  %v8670_v46 = vpack.c.bf16 %v7834_v28, %v7834_v28  ;;  %v7766_v26 = vmul.f32 %v14470_v25, %v7711_v8  ;;  %v7705_v35 = vpop.f32.mrb[87].mxu1 }
 0x49f   : > { %v7714_v0 = vadd.f32 %v9016_v38, %v14560_v3  ;;  %7991 = vst.msk [vmem:[%s14501_s8 + $0x50] sm:$0xf] %vm15439_vm12, %v8667_v21  ;;  %v8668_v54 = vpack.c.bf16 %v7832_v31, %v7832_v31  ;;  %v7764_v17 = vmul.f32 %v14470_v25, %v7703_v43  ;;  %v7706_v2 = vadd.f32 %v7705_v35, %v14534_v23 }
 0x4a0   : > { %v7569_v22 = vadd.f32 %v8922_v18, %v14465_v62  ;;  %7994 = vst.msk [vmem:[%s14501_s8 + $0x5c] sm:$0xf] %vm15440_vm5, %v8670_v46  ;;  %v7805_v4 = vadd.f32 %v14479_v42, %v7766_v26 }
 0x4a1   : > { %v7767_v16 = vmul.f32 %v14470_v25, %v7714_v0  ;;  %7992 = vst.msk [vmem:[%s14501_s8 + $0x54] sm:$0xf] %vm15441_vm7, %v8668_v54  ;;  %v7803_v3 = vadd.f32 %v14479_v42, %v7764_v17  ;;  %v7765_v62 = vmul.f32 %v14470_v25, %v7706_v2 }
 0x4a2   : > { %v8991_v50 = vpop.f32.mrb[96].mxu0  ;;  %v7837_v59 = vmax.f32 %v7805_v4, 0.0 }
 0x4a3   : > { %v7615_v55 = vadd.f32 %v8991_v50, %v14437_v61  ;;  %v7606_v9 = vpop.f32.mrb[97].mxu0  ;;  %v7806_v39 = vadd.f32 %v14479_v42, %v7767_v16  ;;  %v7835_v24 = vmax.f32 %v7803_v3, 0.0  ;;  %v7804_v11 = vadd.f32 %v14479_v42, %v7765_v62  ;;  %v9019_v58 = vpop.f32.mrb[88].mxu1 }
 0x4a4   : > { %v7607_v23 = vadd.f32 %v7606_v9, %v14441_v7  ;;  %v8992_v37 = vpop.f32.mrb[98].mxu0  ;;  %v8673_v41 = vpack.c.bf16 %v7837_v59, %v7837_v59  ;;  %v7718_v53 = vpop.f32.mrb[89].mxu1  ;;  %v7727_v36 = vadd.f32 %v9019_v58, %v7566_v34 }
 0x4a5   : > { %v7742_v5 = vmul.f32 %v14470_v25, %v7615_v55  ;;  %v7618_v29 = vadd.f32 %v8992_v37, %v14445_v51  ;;  %v7609_v47 = vpop.f32.mrb[99].mxu0  ;;  %v7838_v61 = vmax.f32 %v7806_v39, 0.0  ;;  %v8671_v7 = vpack.c.bf16 %v7835_v24, %v7835_v24  ;;  %v9020_v20 = vpop.f32.mrb[90].mxu1 }
 0x4a6   : > { %v7740_v30 = vmul.f32 %v14470_v25, %v7607_v23  ;;  %v7610_v13 = vadd.f32 %v7609_v47, %v14449_v27  ;;  %v7836_v32 = vmax.f32 %v7804_v11, 0.0  ;;  %7997 = vst.msk [vmem:[%s14501_s8 + $0x68] sm:$0xf] %vm15442_vm6, %v8673_v41  ;;  %v7721_v48 = vpop.f32.mrb[91].mxu1  ;;  %v7719_v40 = vadd.f32 %v7718_v53, %v14579_v49 }
 0x4a7   : > { %v7781_v57 = vadd.f32 %v14479_v42, %v7742_v5  ;;  %v7743_v56 = vmul.f32 %v14470_v25, %v7618_v29  ;;  %v8674_v51 = vpack.c.bf16 %v7838_v61, %v7838_v61  ;;  %7995 = vst.msk [vmem:[%s14501_s8 + $0x60] sm:$0xf] %vm15443_vm15, %v8671_v7  ;;  %v7770_v6 = vmul.f32 %v14470_v25, %v7727_v36 }
 0x4a8   : > { %v7779_v44 = vadd.f32 %v14479_v42, %v7740_v30  ;;  %v7741_v52 = vmul.f32 %v14470_v25, %v7610_v13  ;;  %v8672_v27 = vpack.c.bf16 %v7836_v32, %v7836_v32  ;;  %v7730_v15 = vadd.f32 %v9020_v20, %v7569_v22 }
 0x4a9   : > { %v7813_v19 = vmax.f32 %v7781_v57, 0.0  ;;  %v7782_v45 = vadd.f32 %v14479_v42, %v7743_v56  ;;  %7998 = vst.msk [vmem:[%s14501_s8 + $0x6c] sm:$0xf] %vm15444_vm2, %v8674_v51  ;;  %v7768_v60 = vmul.f32 %v14470_v25, %v7719_v40  ;;  %v7722_v28 = vadd.f32 %v7721_v48, %v14586_v10 }
 0x4aa   : > { %v7811_v1 = vmax.f32 %v7779_v44, 0.0  ;;  %v7780_v63 = vadd.f32 %v14479_v42, %v7741_v52  ;;  %7996 = vst.msk [vmem:[%s14501_s8 + $0x64] sm:$0xf] %vm15445_vm8, %v8672_v27  ;;  %v7809_v8 = vadd.f32 %v14479_v42, %v7770_v6  ;;  %v7771_v33 = vmul.f32 %v14470_v25, %v7730_v15 }
 0x4ab   : > { %v8649_v14 = vpack.c.bf16 %v7813_v19, %v7813_v19  ;;  %v7814_v12 = vmax.f32 %v7782_v45, 0.0  ;;  %v7807_v31 = vadd.f32 %v14479_v42, %v7768_v60  ;;  %v7769_v43 = vmul.f32 %v14470_v25, %v7722_v28 }
 0x4ac   : > { %v8647_v49 = vpack.c.bf16 %v7811_v1, %v7811_v1  ;;  %v7812_v18 = vmax.f32 %v7780_v63, 0.0  ;;  %v7841_v38 = vmax.f32 %v7809_v8, 0.0  ;;  %v7810_v34 = vadd.f32 %v14479_v42, %v7771_v33 }
 0x4ad   : > { %7973 = vst.msk [vmem:[%s14501_s8 + $0x8] sm:$0xf] %vm15446_vm10, %v8649_v14  ;;  %v8650_v21 = vpack.c.bf16 %v7814_v12, %v7814_v12  ;;  %v7839_v46 = vmax.f32 %v7807_v31, 0.0  ;;  %v7808_v26 = vadd.f32 %v14479_v42, %v7769_v43 }
 0x4ae   : > { %7971 = vst.msk [vmem:[%s14501_s8] sm:$0xf] %vm15447_vm11, %v8647_v49  ;;  %v8648_v10 = vpack.c.bf16 %v7812_v18, %v7812_v18  ;;  %v8677_v0 = vpack.c.bf16 %v7841_v38, %v7841_v38  ;;  %v7842_v35 = vmax.f32 %v7810_v34, 0.0 }
 0x4af   : > { %7974 = vst.msk [vmem:[%s14501_s8 + $0xc] sm:$0xf] %vm15100_vm0, %v8650_v21  ;;  %v8675_v25 = vpack.c.bf16 %v7839_v46, %v7839_v46  ;;  %v7840_v22 = vmax.f32 %v7808_v26, 0.0 }
 0x4b0   : > { %7972 = vst.msk [vmem:[%s14501_s8 + $0x4] sm:$0xf] %vm15448_vm3, %v8648_v10  ;;  %v8678_v54 = vpack.c.bf16 %v7842_v35, %v7842_v35 }
 0x4b1   : > { %8001 = vst.msk [vmem:[%s14501_s8 + $0x78] sm:$0xf] %vm15449_vm4, %v8677_v0  ;;  %v8676_v17 = vpack.c.bf16 %v7840_v22, %v7840_v22 }
 0x4b2   : > { %7999 = vst.msk [vmem:[%s14501_s8 + $0x70] sm:$0xf] %vm15450_vm1, %v8675_v25 }
 0x4b3   : > { %8002 = vst.msk [vmem:[%s14501_s8 + $0x7c] sm:$0xf] %vm15451_vm13, %v8678_v54 }
 0x4b4   : > { %8000 = vst.msk [vmem:[%s14501_s8 + $0x74] sm:$0xf] %vm15452_vm14, %v8676_v17 }
 0x4b5   : > { %9233 = shalt.err (!%p9230_p3)
}
 0x4b6   : > { %s9234_s21 = scalar_lea.hbm %s14671_s9, 2048  ;;  %s9238_s13 = scalar_lea.hbm %s14732_s7, 4096 }
 0x4b7   : > { %p9235_p4 = scmp.ne.s32.totalorder %s14671_s9, %s9234_s21  ;;  %p9239_p9 = scmp.lt.u32.totalorder %s14671_s9, %s14732_s7 }
 0x4b8   : > { %p9240_p10 = scmp.lt.u32.totalorder %s9238_s13, %s9234_s21  ;;  %p9242_p12 = scmp.lt.u32.totalorder %s9234_s21, %s14671_s9 }
 0x4b9   : > { %p9236_p7 = pnand %p9235_p4, %p9373_p5 }
 0x4ba   : > { %p9241_p11 = por %p9240_p10, %p9239_p9 }
 0x4bb   : > { %p9237_p8 = pneg %p9236_p7 }
 0x4bc   : > { %p9243_p13 = por %p9242_p12, %p9241_p11 }
 0x4be   : > { %p9244_p0 = pnand %p9243_p13, %p9237_p8 }
 0x4c0   : > { %9247 = shalt.err (!%p9244_p0)
}
 0x4c1   : > { %9030 = dma.vmem_to_hbm [thread:$0]  (%p9373_p5), %s14673_s14, 2048, %s14671_s9, %s14681_s28, %s9293_s17, %s9293_s17, %s9285_s18  }
 0x4c2 PF: > { %p9036_p1 = scmp.ge.s32.totalorder %s9282_s27, 2  ;;  %s8032_s19 = sand.u32 1, %s9270_s24  }
 0x4c3   : > { %s8033_s20 = scalar_lea.sflag [#allocation5], %s8032_s19 }
 0x4c4   : > { %p9033_p2 = pnand %p9036_p1, %p9377_p6 }
 0x4c6   : > { %9265 = dma.done.wait (!%p9033_p2), %s8033_s20, 2048  }
 0x4c7   : > { %9267 = vsyncadd (!%p9033_p2), %s8033_s20, 4294965248  ;;  %p17_p3 = scmp.ge.s32.totalorder %s9360_s30, 4   ;;  %s15453_s24 = smov %s9274_s25 }
 0x4c8   : > { %s15454_s25 = smov %s9278_s26  ;;  %s15455_s26 = smov %s9371_s10 }
 0x4c9   : > { %s15456_s27 = smov %s9360_s30  ;;  %19 = sbr.rel (!%p17_p3) target bundleno = 3 (0x3), region = 89 }
 0x4d0   :  { %8038 = vsyncpa [#allocation5], 1 }
 0x4d1   :  { %8040 = vsyncpa [#allocation5 + $0x1], 1 }

</bundles_post_ra>
